<compile_context>
chip_gen: v7x
topology: tpu7x:2x2x1
jax: 0.10.0
libtpu: 0.0.40
codegen_flags: <defaults>
</compile_context>

<pallas_src>
import functools

import jax
import jax.numpy as jnp
from jax.experimental import pallas as pl
from jax.experimental.pallas import tpu as pltpu


# ----------------------------------------------------------------------------
# Fused conv-as-matmul Pallas kernel
#   y  = x2d @ w2d + b               (plain conv / NiN)
#   y  = x2d @ w2d + b + add         (Residual: skip-add fused)
#   mu = x2d @ w2d + b ; z = mu+eps  (Sampler: eps-add fused, two outputs)
# x2d / w2d are bf16 (MXU fast path, half HBM traffic); accumulation happens
# in f32 directly in the K-grid-invariant output block (no scratch).
# ----------------------------------------------------------------------------
def _fused_matmul_kernel(x_ref, w_ref, b_ref, *rest, has_add, has_eps):
    idx = 0
    add_ref = rest[idx] if has_add else None
    idx += int(has_add)
    eps_ref = rest[idx] if has_eps else None
    idx += int(has_eps)
    o_ref = rest[idx]
    z_ref = rest[idx + 1] if has_eps else None

    k = pl.program_id(1)

    @pl.when(k == 0)
    def _init():
        o_ref[...] = jnp.zeros_like(o_ref)

    # bf16 x bf16 -> f32 on the MXU, accumulated into the f32 output block.
    o_ref[...] += jnp.dot(x_ref[...], w_ref[...],
                          preferred_element_type=jnp.float32)

    @pl.when(k == pl.num_programs(1) - 1)
    def _finalize():
        out = o_ref[...] + b_ref[...].astype(jnp.float32)
        if add_ref is not None:
            out = out + add_ref[...].astype(jnp.float32)
        o_ref[...] = out
        if z_ref is not None:
            z_ref[...] = out + eps_ref[...].astype(jnp.float32)


def _pick_tile(dim, candidates):
    for c in candidates:
        if dim >= c and dim % c == 0:
            return c
    return dim  # full extent (always a legal block dim)


# tm multiples of 8 (sublane); tk multiples of 128 (lane).  tk capped at 1152
# so the double-buffered bf16 weight block stays ~2.3 MiB: safely inside the
# default scoped VMEM on v5e (16 MiB) and v7x (32 MiB of 64 MiB physical).
_TM_CANDIDATES = (512, 384, 256, 128, 64, 32, 16, 8)
_TK_CANDIDATES = (1152, 1024, 896, 768, 640, 512, 384, 256, 128)


def fused_matmul(x2d, w2d, b, add2d=None, eps2d=None):
    """[z =] y = x2d @ w2d + b [+ add2d] [; z = y + eps2d]."""
    M, K = x2d.shape
    Kw, N = w2d.shape
    assert K == Kw
    tm = _pick_tile(M, _TM_CANDIDATES)
    tk = _pick_tile(K, _TK_CANDIDATES)
    grid = (M // tm, K // tk)

    in_specs = [
        pl.BlockSpec((tm, tk), lambda i, k: (i, k)),
        pl.BlockSpec((tk, N), lambda i, k: (k, 0)),
        pl.BlockSpec((1, N), lambda i, k: (0, 0)),
    ]
    args = [x2d, w2d, b.reshape(1, N)]
    if add2d is not None:
        in_specs.append(pl.BlockSpec((tm, N), lambda i, k: (i, 0)))
        args.append(add2d)
    if eps2d is not None:
        in_specs.append(pl.BlockSpec((tm, N), lambda i, k: (i, 0)))
        args.append(eps2d)

    if eps2d is not None:
        out_shape = (jax.ShapeDtypeStruct((M, N), jnp.float32),
                     jax.ShapeDtypeStruct((M, N), jnp.float32))
        out_specs = (pl.BlockSpec((tm, N), lambda i, k: (i, 0)),
                     pl.BlockSpec((tm, N), lambda i, k: (i, 0)))
    else:
        out_shape = jax.ShapeDtypeStruct((M, N), jnp.float32)
        out_specs = pl.BlockSpec((tm, N), lambda i, k: (i, 0))

    n_f32_slabs = 1 + int(add2d is not None) + 2 * int(eps2d is not None)
    cost = pl.CostEstimate(
        flops=2 * M * K * N,
        transcendentals=0,
        bytes_accessed=(M * K * x2d.dtype.itemsize
                        + K * N * w2d.dtype.itemsize
                        + N * 4
                        + M * N * 4 * n_f32_slabs),
    )

    kernel = functools.partial(_fused_matmul_kernel,
                               has_add=add2d is not None,
                               has_eps=eps2d is not None)
    return pl.pallas_call(
        kernel,
        out_shape=out_shape,
        grid=grid,
        in_specs=in_specs,
        out_specs=out_specs,
        compiler_params=pltpu.CompilerParams(
            dimension_semantics=("parallel", "arbitrary")),
        cost_estimate=cost,
    )(*args)


# ----------------------------------------------------------------------------
# Glue: ELU, im2col, space<->depth, sub-module wrappers (all NHWC)
# ----------------------------------------------------------------------------
def elu(x):
    # ELU(alpha=1); expm1 for precision near x ~= 0.
    return jnp.where(x > 0, x, jnp.expm1(x))


def im2col_3x3(x_nhwc):
    """(N,H,W,C) -> (N*H*W, 9*C), 3x3 neighborhood with zero 'same' padding.

    K ordering is (kh, kw, c) -- matches w.reshape(9*C, Cout) for HWIO weights.
    """
    # TODO(synk): stream the 9 (kh,kw) taps via the kernel's K grid instead of
    # materializing the 9x-inflated im2col slab in HBM (matters at large H*W).
    N, H, W, C = x_nhwc.shape
    xp = jnp.pad(x_nhwc, ((0, 0), (1, 1), (1, 1), (0, 0)))
    cols = [xp[:, kh:kh + H, kw:kw + W, :]
            for kh in range(3) for kw in range(3)]
    patches = jnp.concatenate(cols, axis=-1)          # (N, H, W, 9*C)
    return patches.reshape(N * H * W, 9 * C)


def conv3x3(x_nhwc, w_hwio, b, add_nhwc=None, eps_nhwc=None):
    N, H, W, C = x_nhwc.shape
    Cout = w_hwio.shape[-1]
    x2d = im2col_3x3(x_nhwc.astype(jnp.bfloat16))
    w2d = w_hwio.reshape(9 * C, Cout)
    add2d = None if add_nhwc is None else add_nhwc.reshape(N * H * W, Cout)
    eps2d = None if eps_nhwc is None else eps_nhwc.reshape(N * H * W, Cout)
    out = fused_matmul(x2d, w2d, b, add2d=add2d, eps2d=eps2d)
    if eps_nhwc is not None:
        mu2d, z2d = out
        return mu2d.reshape(N, H, W, Cout), z2d.reshape(N, H, W, Cout)
    return out.reshape(N, H, W, Cout)


def nin(x_nhwc, w_io, b):
    N, H, W, C = x_nhwc.shape
    Cout = w_io.shape[-1]
    y2d = fused_matmul(x_nhwc.reshape(N * H * W, C).astype(jnp.bfloat16),
                       w_io, b)
    return y2d.reshape(N, H, W, Cout)


def residual(x_nhwc, skip_nhwc, w, b):
    # out = x + conv3x3(elu(cat([x, skip], ch)));  drop_prob=0 -> no dropout.
    h = x_nhwc if skip_nhwc is None else jnp.concatenate(
        [x_nhwc, skip_nhwc], axis=-1)
    # ELU once per element BEFORE im2col (valid: ELU(0)=0 matches the zero
    # 'same' padding) and downcast to bf16 so the im2col slab and the MXU lhs
    # stream at half the HBM bytes.  The residual add (x, f32) is fused into
    # the kernel's finalize.
    h = elu(h).astype(jnp.bfloat16)
    return conv3x3(h, w, b, add_nhwc=x_nhwc)


def sampler(x_nhwc, w, b, eps_nhwc):
    # mu = conv3x3(x); z = mu + eps -- both emitted by ONE pallas_call.
    return conv3x3(x_nhwc, w, b, eps_nhwc=eps_nhwc)


def space_to_depth(x, bs=2):     # NHWC, TF-style channel ordering (bh, bw, c)
    N, H, W, C = x.shape
    x = x.reshape(N, H // bs, bs, W // bs, bs, C)
    x = x.transpose(0, 1, 3, 2, 4, 5)
    return x.reshape(N, H // bs, W // bs, bs * bs * C)


def depth_to_space(x, bs=2):     # inverse of space_to_depth
    N, H, W, C = x.shape
    c = C // (bs * bs)
    x = x.reshape(N, H, W, bs, bs, c)
    x = x.transpose(0, 1, 3, 2, 4, 5)
    return x.reshape(N, H * bs, W * bs, c)


# ----------------------------------------------------------------------------
# Parameters (deterministic synthetic init; shapes from the module __init__).
# Weights are stored in bf16 so the weight DMA itself is halved; biases f32.
# ----------------------------------------------------------------------------
def init_params(key):
    def conv_w(k, cin, cout):
        w = jax.random.normal(k, (3, 3, cin, cout), jnp.float32) \
            * (1.0 / jnp.sqrt(9.0 * cin))
        return w.astype(jnp.bfloat16)

    def nin_w(k, cin, cout):
        w = jax.random.normal(k, (cin, cout), jnp.float32) \
            * (1.0 / jnp.sqrt(float(cin)))
        return w.astype(jnp.bfloat16)

    keys = jax.random.split(key, 16)
    p = {}
    p["res_init_w"] = conv_w(keys[0], 256, 128)
    p["res_init_b"] = jnp.zeros((128,), jnp.float32)
    p["res_s2d_w"] = conv_w(keys[1], 128, 128)
    p["res_s2d_b"] = jnp.zeros((128,), jnp.float32)
    for i in range(3):
        p[f"res_{i}_w"] = conv_w(keys[2 + i], 1024, 512)
        p[f"res_{i}_b"] = jnp.zeros((512,), jnp.float32)
        p[f"nin_{i}_w"] = nin_w(keys[5 + i], 128, 512)
        p[f"nin_{i}_b"] = jnp.zeros((512,), jnp.float32)
    for i in range(4):
        p[f"samp_{i}_w"] = conv_w(keys[8 + i], 512, 128)
        p[f"samp_{i}_b"] = jnp.zeros((128,), jnp.float32)
    return p


# ----------------------------------------------------------------------------
# AutoRegressiveBlock.forward
# ----------------------------------------------------------------------------
def autoregressive_block(params, x_nchw, skip_a_nchw, eps_keys,
                         enc_down_mu_nchw=None):
    to_nhwc = lambda a: jnp.transpose(a, (0, 2, 3, 1))
    to_nchw = lambda a: jnp.transpose(a, (0, 3, 1, 2))

    x = to_nhwc(x_nchw)                 # (N, H, W, 128)
    skip_a = to_nhwc(skip_a_nchw)       # (N, H, W, 128)

    # x = residual_init(x, skip_in=skip_a)
    x = residual(x, skip_a, params["res_init_w"], params["res_init_b"])
    # x_ = s2d(residual_s2d(x, skip_in=None))
    t = residual(x, None, params["res_s2d_w"], params["res_s2d_b"])
    x_ = space_to_depth(t, 2)           # (N, H/2, W/2, 512)

    g = None
    if enc_down_mu_nchw is not None:
        gg = space_to_depth(to_nhwc(enc_down_mu_nchw), 2)
        g0, g1, g2, _ = jnp.split(gg, 4, axis=-1)
        g = (nin(g0, params["nin_0_w"], params["nin_0_b"]),
             nin(g1, params["nin_1_w"], params["nin_1_b"]),
             nin(g2, params["nin_2_w"], params["nin_2_b"]))

    Nb, h, w, _ = x_.shape
    mus, zs = [], []
    for i in range(4):
        eps = jax.random.normal(eps_keys[i], (Nb, h, w, 128), jnp.float32)
        mu_i, z_i = sampler(x_, params[f"samp_{i}_w"],
                            params[f"samp_{i}_b"], eps)
        mus.append(mu_i)
        zs.append(z_i)
        if i < 3:
            if g is not None:
                skip = g[i]
            else:
                skip = nin(z_i, params[f"nin_{i}_w"], params[f"nin_{i}_b"])
            x_ = residual(x_, skip, params[f"res_{i}_w"], params[f"res_{i}_b"])

    mu_0 = depth_to_space(jnp.concatenate(mus, axis=-1), 2)   # (N, H, W, 128)
    z_0 = depth_to_space(jnp.concatenate(zs, axis=-1), 2)     # (N, H, W, 128)

    return to_nchw(x), to_nchw(mu_0), to_nchw(z_0)


# ----------------------------------------------------------------------------
if __name__ == "__main__":
    key = jax.random.PRNGKey(0)
    k_param, k_x, k_skip, k_noise = jax.random.split(key, 4)

    params = init_params(k_param)

    # Channel counts are fixed by the module (128-ch inputs); small spatial.
    N, C, H, W = 2, 128, 8, 8
    x = jax.random.normal(k_x, (N, C, H, W), jnp.float32)
    skip_a = jax.random.normal(k_skip, (N, C, H, W), jnp.float32)
    eps_keys = jax.random.split(k_noise, 4)

    fwd = jax.jit(functools.partial(autoregressive_block, params))
    out_x, mu_0, z_0 = fwd(x, skip_a, eps_keys)   # enc_down_mu=None branch
    jax.block_until_ready((out_x, mu_0, z_0))

    assert out_x.shape == (N, 128, H, W)
    assert mu_0.shape == (N, 128, H, W)
    assert z_0.shape == (N, 128, H, W)
    assert jnp.all(jnp.isfinite(out_x)) and jnp.all(jnp.isfinite(mu_0))
    print("KERNEL_OK")
</pallas_src>

<mosaic_0001>
module attributes {stable_mosaic.version = 11 : i64} {
  func.func @_fused_matmul_kernel(%arg0: i32, %arg1: i32, %arg2: memref<128x1152xbf16, #tpu.memory_space<vmem>>, %arg3: memref<1152x128xbf16, #tpu.memory_space<vmem>>, %arg4: memref<1x128xf32, #tpu.memory_space<vmem>>, %arg5: memref<128x128xf32, #tpu.memory_space<vmem>>, %arg6: memref<128x128xf32, #tpu.memory_space<vmem>>) attributes {dimension_semantics = [#tpu.dimension_semantics<parallel>, #tpu.dimension_semantics<arbitrary>], iteration_bounds = array<i64: 1, 2>, scalar_prefetch = 0 : i64, scratch_operands = 0 : i64, tpu.core_type = #tpu.core_type<tc>, window_params = [{transform_indices = @transform_0, window_bounds = array<i64: 128, 1152>}, {transform_indices = @transform_1, window_bounds = array<i64: 1152, 128>}, {pipeline_mode = #tpu.pipeline_mode<synchronous>, transform_indices = @transform_2, window_bounds = array<i64: 1, 128>}, {transform_indices = @transform_3, window_bounds = array<i64: 128, 128>}, {transform_indices = @transform_4, window_bounds = array<i64: 128, 128>}]} {
    %c0_i32 = arith.constant 0 : i32
    %0 = arith.cmpi eq, %arg1, %c0_i32 : i32
    %1 = arith.extui %0 : i1 to i32
    %c0_i32_0 = arith.constant 0 : i32
    %2 = arith.cmpi ne, %1, %c0_i32_0 : i32
    scf.if %2 {
      %cst_9 = arith.constant 0.000000e+00 : f32
      %12 = vector.broadcast %cst_9 : f32 to vector<128x128xf32>
      %c0_10 = arith.constant 0 : index
      %c0_11 = arith.constant 0 : index
      %13 = vector.load %arg6[%c0_10, %c0_11] : memref<128x128xf32, #tpu.memory_space<vmem>>, vector<128x128xf32>
      tpu.vector_store %arg6[%c0_10, %c0_11], %12 {strides = array<i32>} : memref<128x128xf32, #tpu.memory_space<vmem>>, vector<128x128xf32>,
    } else {
    }
    %c0 = arith.constant 0 : index
    %c0_1 = arith.constant 0 : index
    %3 = vector.load %arg6[%c0, %c0_1] : memref<128x128xf32, #tpu.memory_space<vmem>>, vector<128x128xf32>
    %c0_2 = arith.constant 0 : index
    %c0_3 = arith.constant 0 : index
    %4 = vector.load %arg2[%c0_2, %c0_3] : memref<128x1152xbf16, #tpu.memory_space<vmem>>, vector<128x1152xbf16>
    %c0_4 = arith.constant 0 : index
    %c0_5 = arith.constant 0 : index
    %5 = vector.load %arg3[%c0_4, %c0_5] : memref<1152x128xbf16, #tpu.memory_space<vmem>>, vector<1152x128xbf16>
    %cst = arith.constant dense<0.000000e+00> : vector<128x128xf32>
    %6 = tpu.matmul %4, %5, %cst {dimension_numbers = #tpu.dot_dimension_numbers<[1], [0], [0], [1], [0, 0, 1, 1], [], []>} : vector<128x1152xbf16>, vector<1152x128xbf16>, vector<128x128xf32> -> vector<128x128xf32>
    %7 = arith.addf %3, %6 : vector<128x128xf32>
    %c0_6 = arith.constant 0 : index
    %c0_7 = arith.constant 0 : index
    %8 = vector.load %arg6[%c0_6, %c0_7] : memref<128x128xf32, #tpu.memory_space<vmem>>, vector<128x128xf32>
    tpu.vector_store %arg6[%c0_6, %c0_7], %7 {strides = array<i32>} : memref<128x128xf32, #tpu.memory_space<vmem>>, vector<128x128xf32>,
    %c1_i32 = arith.constant 1 : i32
    %9 = arith.cmpi eq, %arg1, %c1_i32 : i32
    %10 = arith.extui %9 : i1 to i32
    %c0_i32_8 = arith.constant 0 : i32
    %11 = arith.cmpi ne, %10, %c0_i32_8 : i32
    scf.if %11 {
      %c0_9 = arith.constant 0 : index
      %c0_10 = arith.constant 0 : index
      %12 = vector.load %arg6[%c0_9, %c0_10] : memref<128x128xf32, #tpu.memory_space<vmem>>, vector<128x128xf32>
      %c0_11 = arith.constant 0 : index
      %c0_12 = arith.constant 0 : index
      %13 = vector.load %arg4[%c0_11, %c0_12] : memref<1x128xf32, #tpu.memory_space<vmem>>, vector<1x128xf32>
      %14 = vector.broadcast %13 : vector<1x128xf32> to vector<128x128xf32>
      %15 = arith.addf %12, %14 : vector<128x128xf32>
      %c0_13 = arith.constant 0 : index
      %c0_14 = arith.constant 0 : index
      %16 = vector.load %arg5[%c0_13, %c0_14] : memref<128x128xf32, #tpu.memory_space<vmem>>, vector<128x128xf32>
      %17 = arith.addf %15, %16 : vector<128x128xf32>
      %c0_15 = arith.constant 0 : index
      %c0_16 = arith.constant 0 : index
      %18 = vector.load %arg6[%c0_15, %c0_16] : memref<128x128xf32, #tpu.memory_space<vmem>>, vector<128x128xf32>
      tpu.vector_store %arg6[%c0_15, %c0_16], %17 {strides = array<i32>} : memref<128x128xf32, #tpu.memory_space<vmem>>, vector<128x128xf32>,
    } else {
    }
    return
  }
  func.func @transform_0(%arg0: i32, %arg1: i32) -> (i32, i32) {
    %c0_i32 = arith.constant 0 : i32
    return %arg0, %arg1 : i32, i32
  }
  func.func @transform_1(%arg0: i32, %arg1: i32) -> (i32, i32) {
    %c0_i32 = arith.constant 0 : i32
    %c0_i32_0 = arith.constant 0 : i32
    return %arg1, %c0_i32 : i32, i32
  }
  func.func @transform_2(%arg0: i32, %arg1: i32) -> (i32, i32) {
    %c0_i32 = arith.constant 0 : i32
    %c0_i32_0 = arith.constant 0 : i32
    %c0_i32_1 = arith.constant 0 : i32
    return %c0_i32, %c0_i32_0 : i32, i32
  }
  func.func @transform_3(%arg0: i32, %arg1: i32) -> (i32, i32) {
    %c0_i32 = arith.constant 0 : i32
    %c0_i32_0 = arith.constant 0 : i32
    return %arg0, %c0_i32 : i32, i32
  }
  func.func @transform_4(%arg0: i32, %arg1: i32) -> (i32, i32) {
    %c0_i32 = arith.constant 0 : i32
    %c0_i32_0 = arith.constant 0 : i32
    return %arg0, %c0_i32 : i32, i32
  }
}

module attributes {stable_mosaic.version = 11 : i64} {
  func.func @_fused_matmul_kernel(%arg0: i32, %arg1: i32, %arg2: memref<128x1152xbf16, #tpu.memory_space<vmem>>, %arg3: memref<1152x128xbf16, #tpu.memory_space<vmem>>, %arg4: memref<1x128xf32, #tpu.memory_space<vmem>>, %arg5: memref<128x128xf32, #tpu.memory_space<vmem>>, %arg6: memref<128x128xf32, #tpu.memory_space<vmem>>) attributes {dimension_semantics = [#tpu.dimension_semantics<parallel>, #tpu.dimension_semantics<arbitrary>], iteration_bounds = array<i64: 1, 1>, scalar_prefetch = 0 : i64, scratch_operands = 0 : i64, tpu.core_type = #tpu.core_type<tc>, window_params = [{transform_indices = @transform_0, window_bounds = array<i64: 128, 1152>}, {transform_indices = @transform_1, window_bounds = array<i64: 1152, 128>}, {pipeline_mode = #tpu.pipeline_mode<synchronous>, transform_indices = @transform_2, window_bounds = array<i64: 1, 128>}, {transform_indices = @transform_3, window_bounds = array<i64: 128, 128>}, {transform_indices = @transform_4, window_bounds = array<i64: 128, 128>}]} {
    %c0_i32 = arith.constant 0 : i32
    %0 = arith.cmpi eq, %arg1, %c0_i32 : i32
    %1 = arith.extui %0 : i1 to i32
    %c0_i32_0 = arith.constant 0 : i32
    %2 = arith.cmpi ne, %1, %c0_i32_0 : i32
    scf.if %2 {
      %cst_10 = arith.constant 0.000000e+00 : f32
      %12 = vector.broadcast %cst_10 : f32 to vector<128x128xf32>
      %c0_11 = arith.constant 0 : index
      %c0_12 = arith.constant 0 : index
      %13 = vector.load %arg6[%c0_11, %c0_12] : memref<128x128xf32, #tpu.memory_space<vmem>>, vector<128x128xf32>
      tpu.vector_store %arg6[%c0_11, %c0_12], %12 {strides = array<i32>} : memref<128x128xf32, #tpu.memory_space<vmem>>, vector<128x128xf32>,
    } else {
    }
    %c0 = arith.constant 0 : index
    %c0_1 = arith.constant 0 : index
    %3 = vector.load %arg6[%c0, %c0_1] : memref<128x128xf32, #tpu.memory_space<vmem>>, vector<128x128xf32>
    %c0_2 = arith.constant 0 : index
    %c0_3 = arith.constant 0 : index
    %4 = vector.load %arg2[%c0_2, %c0_3] : memref<128x1152xbf16, #tpu.memory_space<vmem>>, vector<128x1152xbf16>
    %c0_4 = arith.constant 0 : index
    %c0_5 = arith.constant 0 : index
    %5 = vector.load %arg3[%c0_4, %c0_5] : memref<1152x128xbf16, #tpu.memory_space<vmem>>, vector<1152x128xbf16>
    %cst = arith.constant dense<0.000000e+00> : vector<128x128xf32>
    %6 = tpu.matmul %4, %5, %cst {dimension_numbers = #tpu.dot_dimension_numbers<[1], [0], [0], [1], [0, 0, 1, 1], [], []>} : vector<128x1152xbf16>, vector<1152x128xbf16>, vector<128x128xf32> -> vector<128x128xf32>
    %7 = arith.addf %3, %6 : vector<128x128xf32>
    %c0_6 = arith.constant 0 : index
    %c0_7 = arith.constant 0 : index
    %8 = vector.load %arg6[%c0_6, %c0_7] : memref<128x128xf32, #tpu.memory_space<vmem>>, vector<128x128xf32>
    tpu.vector_store %arg6[%c0_6, %c0_7], %7 {strides = array<i32>} : memref<128x128xf32, #tpu.memory_space<vmem>>, vector<128x128xf32>,
    %c0_i32_8 = arith.constant 0 : i32
    %9 = arith.cmpi eq, %arg1, %c0_i32_8 : i32
    %10 = arith.extui %9 : i1 to i32
    %c0_i32_9 = arith.constant 0 : i32
    %11 = arith.cmpi ne, %10, %c0_i32_9 : i32
    scf.if %11 {
      %c0_10 = arith.constant 0 : index
      %c0_11 = arith.constant 0 : index
      %12 = vector.load %arg6[%c0_10, %c0_11] : memref<128x128xf32, #tpu.memory_space<vmem>>, vector<128x128xf32>
      %c0_12 = arith.constant 0 : index
      %c0_13 = arith.constant 0 : index
      %13 = vector.load %arg4[%c0_12, %c0_13] : memref<1x128xf32, #tpu.memory_space<vmem>>, vector<1x128xf32>
      %14 = vector.broadcast %13 : vector<1x128xf32> to vector<128x128xf32>
      %15 = arith.addf %12, %14 : vector<128x128xf32>
      %c0_14 = arith.constant 0 : index
      %c0_15 = arith.constant 0 : index
      %16 = vector.load %arg5[%c0_14, %c0_15] : memref<128x128xf32, #tpu.memory_space<vmem>>, vector<128x128xf32>
      %17 = arith.addf %15, %16 : vector<128x128xf32>
      %c0_16 = arith.constant 0 : index
      %c0_17 = arith.constant 0 : index
      %18 = vector.load %arg6[%c0_16, %c0_17] : memref<128x128xf32, #tpu.memory_space<vmem>>, vector<128x128xf32>
      tpu.vector_store %arg6[%c0_16, %c0_17], %17 {strides = array<i32>} : memref<128x128xf32, #tpu.memory_space<vmem>>, vector<128x128xf32>,
    } else {
    }
    return
  }
  func.func @transform_0(%arg0: i32, %arg1: i32) -> (i32, i32) {
    %c0_i32 = arith.constant 0 : i32
    return %arg0, %arg1 : i32, i32
  }
  func.func @transform_1(%arg0: i32, %arg1: i32) -> (i32, i32) {
    %c0_i32 = arith.constant 0 : i32
    %c0_i32_0 = arith.constant 0 : i32
    return %arg1, %c0_i32 : i32, i32
  }
  func.func @transform_2(%arg0: i32, %arg1: i32) -> (i32, i32) {
    %c0_i32 = arith.constant 0 : i32
    %c0_i32_0 = arith.constant 0 : i32
    %c0_i32_1 = arith.constant 0 : i32
    return %c0_i32, %c0_i32_0 : i32, i32
  }
  func.func @transform_3(%arg0: i32, %arg1: i32) -> (i32, i32) {
    %c0_i32 = arith.constant 0 : i32
    %c0_i32_0 = arith.constant 0 : i32
    return %arg0, %c0_i32 : i32, i32
  }
  func.func @transform_4(%arg0: i32, %arg1: i32) -> (i32, i32) {
    %c0_i32 = arith.constant 0 : i32
    %c0_i32_0 = arith.constant 0 : i32
    return %arg0, %c0_i32 : i32, i32
  }
}

module attributes {stable_mosaic.version = 11 : i64} {
  func.func @_fused_matmul_kernel(%arg0: i32, %arg1: i32, %arg2: memref<32x1152xbf16, #tpu.memory_space<vmem>>, %arg3: memref<1152x128xbf16, #tpu.memory_space<vmem>>, %arg4: memref<1x128xf32, #tpu.memory_space<vmem>>, %arg5: memref<32x128xf32, #tpu.memory_space<vmem>>, %arg6: memref<32x128xf32, #tpu.memory_space<vmem>>, %arg7: memref<32x128xf32, #tpu.memory_space<vmem>>) attributes {dimension_semantics = [#tpu.dimension_semantics<parallel>, #tpu.dimension_semantics<arbitrary>], iteration_bounds = array<i64: 1, 4>, scalar_prefetch = 0 : i64, scratch_operands = 0 : i64, tpu.core_type = #tpu.core_type<tc>, window_params = [{transform_indices = @transform_0, window_bounds = array<i64: 32, 1152>}, {transform_indices = @transform_1, window_bounds = array<i64: 1152, 128>}, {pipeline_mode = #tpu.pipeline_mode<synchronous>, transform_indices = @transform_2, window_bounds = array<i64: 1, 128>}, {transform_indices = @transform_3, window_bounds = array<i64: 32, 128>}, {transform_indices = @transform_4, window_bounds = array<i64: 32, 128>}, {transform_indices = @transform_5, window_bounds = array<i64: 32, 128>}]} {
    %c0_i32 = arith.constant 0 : i32
    %0 = arith.cmpi eq, %arg1, %c0_i32 : i32
    %1 = arith.extui %0 : i1 to i32
    %c0_i32_0 = arith.constant 0 : i32
    %2 = arith.cmpi ne, %1, %c0_i32_0 : i32
    scf.if %2 {
      %cst_9 = arith.constant 0.000000e+00 : f32
      %12 = vector.broadcast %cst_9 : f32 to vector<32x128xf32>
      %c0_10 = arith.constant 0 : index
      %c0_11 = arith.constant 0 : index
      %13 = vector.load %arg6[%c0_10, %c0_11] : memref<32x128xf32, #tpu.memory_space<vmem>>, vector<32x128xf32>
      tpu.vector_store %arg6[%c0_10, %c0_11], %12 {strides = array<i32>} : memref<32x128xf32, #tpu.memory_space<vmem>>, vector<32x128xf32>,
    } else {
    }
    %c0 = arith.constant 0 : index
    %c0_1 = arith.constant 0 : index
    %3 = vector.load %arg6[%c0, %c0_1] : memref<32x128xf32, #tpu.memory_space<vmem>>, vector<32x128xf32>
    %c0_2 = arith.constant 0 : index
    %c0_3 = arith.constant 0 : index
    %4 = vector.load %arg2[%c0_2, %c0_3] : memref<32x1152xbf16, #tpu.memory_space<vmem>>, vector<32x1152xbf16>
    %c0_4 = arith.constant 0 : index
    %c0_5 = arith.constant 0 : index
    %5 = vector.load %arg3[%c0_4, %c0_5] : memref<1152x128xbf16, #tpu.memory_space<vmem>>, vector<1152x128xbf16>
    %cst = arith.constant dense<0.000000e+00> : vector<32x128xf32>
    %6 = tpu.matmul %4, %5, %cst {dimension_numbers = #tpu.dot_dimension_numbers<[1], [0], [0], [1], [0, 0, 1, 1], [], []>} : vector<32x1152xbf16>, vector<1152x128xbf16>, vector<32x128xf32> -> vector<32x128xf32>
    %7 = arith.addf %3, %6 : vector<32x128xf32>
    %c0_6 = arith.constant 0 : index
    %c0_7 = arith.constant 0 : index
    %8 = vector.load %arg6[%c0_6, %c0_7] : memref<32x128xf32, #tpu.memory_space<vmem>>, vector<32x128xf32>
    tpu.vector_store %arg6[%c0_6, %c0_7], %7 {strides = array<i32>} : memref<32x128xf32, #tpu.memory_space<vmem>>, vector<32x128xf32>,
    %c3_i32 = arith.constant 3 : i32
    %9 = arith.cmpi eq, %arg1, %c3_i32 : i32
    %10 = arith.extui %9 : i1 to i32
    %c0_i32_8 = arith.constant 0 : i32
    %11 = arith.cmpi ne, %10, %c0_i32_8 : i32
    scf.if %11 {
      %c0_9 = arith.constant 0 : index
      %c0_10 = arith.constant 0 : index
      %12 = vector.load %arg6[%c0_9, %c0_10] : memref<32x128xf32, #tpu.memory_space<vmem>>, vector<32x128xf32>
      %c0_11 = arith.constant 0 : index
      %c0_12 = arith.constant 0 : index
      %13 = vector.load %arg4[%c0_11, %c0_12] : memref<1x128xf32, #tpu.memory_space<vmem>>, vector<1x128xf32>
      %14 = vector.broadcast %13 : vector<1x128xf32> to vector<32x128xf32>
      %15 = arith.addf %12, %14 : vector<32x128xf32>
      %c0_13 = arith.constant 0 : index
      %c0_14 = arith.constant 0 : index
      %16 = vector.load %arg6[%c0_13, %c0_14] : memref<32x128xf32, #tpu.memory_space<vmem>>, vector<32x128xf32>
      tpu.vector_store %arg6[%c0_13, %c0_14], %15 {strides = array<i32>} : memref<32x128xf32, #tpu.memory_space<vmem>>, vector<32x128xf32>,
      %c0_15 = arith.constant 0 : index
      %c0_16 = arith.constant 0 : index
      %17 = vector.load %arg5[%c0_15, %c0_16] : memref<32x128xf32, #tpu.memory_space<vmem>>, vector<32x128xf32>
      %18 = arith.addf %15, %17 : vector<32x128xf32>
      %c0_17 = arith.constant 0 : index
      %c0_18 = arith.constant 0 : index
      %19 = vector.load %arg7[%c0_17, %c0_18] : memref<32x128xf32, #tpu.memory_space<vmem>>, vector<32x128xf32>
      tpu.vector_store %arg7[%c0_17, %c0_18], %18 {strides = array<i32>} : memref<32x128xf32, #tpu.memory_space<vmem>>, vector<32x128xf32>,
    } else {
    }
    return
  }
  func.func @transform_0(%arg0: i32, %arg1: i32) -> (i32, i32) {
    %c0_i32 = arith.constant 0 : i32
    return %arg0, %arg1 : i32, i32
  }
  func.func @transform_1(%arg0: i32, %arg1: i32) -> (i32, i32) {
    %c0_i32 = arith.constant 0 : i32
    %c0_i32_0 = arith.constant 0 : i32
    return %arg1, %c0_i32 : i32, i32
  }
  func.func @transform_2(%arg0: i32, %arg1: i32) -> (i32, i32) {
    %c0_i32 = arith.constant 0 : i32
    %c0_i32_0 = arith.constant 0 : i32
    %c0_i32_1 = arith.constant 0 : i32
    return %c0_i32, %c0_i32_0 : i32, i32
  }
  func.func @transform_3(%arg0: i32, %arg1: i32) -> (i32, i32) {
    %c0_i32 = arith.constant 0 : i32
    %c0_i32_0 = arith.constant 0 : i32
    return %arg0, %c0_i32 : i32, i32
  }
  func.func @transform_4(%arg0: i32, %arg1: i32) -> (i32, i32) {
    %c0_i32 = arith.constant 0 : i32
    %c0_i32_0 = arith.constant 0 : i32
    return %arg0, %c0_i32 : i32, i32
  }
  func.func @transform_5(%arg0: i32, %arg1: i32) -> (i32, i32) {
    %c0_i32 = arith.constant 0 : i32
    %c0_i32_0 = arith.constant 0 : i32
    return %arg0, %c0_i32 : i32, i32
  }
}

module attributes {stable_mosaic.version = 11 : i64} {
  func.func @_fused_matmul_kernel(%arg0: i32, %arg1: i32, %arg2: memref<32x128xbf16, #tpu.memory_space<vmem>>, %arg3: memref<128x512xbf16, #tpu.memory_space<vmem>>, %arg4: memref<1x512xf32, #tpu.memory_space<vmem>>, %arg5: memref<32x512xf32, #tpu.memory_space<vmem>>) attributes {dimension_semantics = [#tpu.dimension_semantics<parallel>, #tpu.dimension_semantics<arbitrary>], iteration_bounds = array<i64: 1, 1>, scalar_prefetch = 0 : i64, scratch_operands = 0 : i64, tpu.core_type = #tpu.core_type<tc>, window_params = [{transform_indices = @transform_0, window_bounds = array<i64: 32, 128>}, {transform_indices = @transform_1, window_bounds = array<i64: 128, 512>}, {pipeline_mode = #tpu.pipeline_mode<synchronous>, transform_indices = @transform_2, window_bounds = array<i64: 1, 512>}, {transform_indices = @transform_3, window_bounds = array<i64: 32, 512>}]} {
    %c0_i32 = arith.constant 0 : i32
    %0 = arith.cmpi eq, %arg1, %c0_i32 : i32
    %1 = arith.extui %0 : i1 to i32
    %c0_i32_0 = arith.constant 0 : i32
    %2 = arith.cmpi ne, %1, %c0_i32_0 : i32
    scf.if %2 {
      %cst_10 = arith.constant 0.000000e+00 : f32
      %12 = vector.broadcast %cst_10 : f32 to vector<32x512xf32>
      %c0_11 = arith.constant 0 : index
      %c0_12 = arith.constant 0 : index
      %13 = vector.load %arg5[%c0_11, %c0_12] : memref<32x512xf32, #tpu.memory_space<vmem>>, vector<32x512xf32>
      tpu.vector_store %arg5[%c0_11, %c0_12], %12 {strides = array<i32>} : memref<32x512xf32, #tpu.memory_space<vmem>>, vector<32x512xf32>,
    } else {
    }
    %c0 = arith.constant 0 : index
    %c0_1 = arith.constant 0 : index
    %3 = vector.load %arg5[%c0, %c0_1] : memref<32x512xf32, #tpu.memory_space<vmem>>, vector<32x512xf32>
    %c0_2 = arith.constant 0 : index
    %c0_3 = arith.constant 0 : index
    %4 = vector.load %arg2[%c0_2, %c0_3] : memref<32x128xbf16, #tpu.memory_space<vmem>>, vector<32x128xbf16>
    %c0_4 = arith.constant 0 : index
    %c0_5 = arith.constant 0 : index
    %5 = vector.load %arg3[%c0_4, %c0_5] : memref<128x512xbf16, #tpu.memory_space<vmem>>, vector<128x512xbf16>
    %cst = arith.constant dense<0.000000e+00> : vector<32x512xf32>
    %6 = tpu.matmul %4, %5, %cst {dimension_numbers = #tpu.dot_dimension_numbers<[1], [0], [0], [1], [0, 0, 1, 1], [], []>} : vector<32x128xbf16>, vector<128x512xbf16>, vector<32x512xf32> -> vector<32x512xf32>
    %7 = arith.addf %3, %6 : vector<32x512xf32>
    %c0_6 = arith.constant 0 : index
    %c0_7 = arith.constant 0 : index
    %8 = vector.load %arg5[%c0_6, %c0_7] : memref<32x512xf32, #tpu.memory_space<vmem>>, vector<32x512xf32>
    tpu.vector_store %arg5[%c0_6, %c0_7], %7 {strides = array<i32>} : memref<32x512xf32, #tpu.memory_space<vmem>>, vector<32x512xf32>,
    %c0_i32_8 = arith.constant 0 : i32
    %9 = arith.cmpi eq, %arg1, %c0_i32_8 : i32
    %10 = arith.extui %9 : i1 to i32
    %c0_i32_9 = arith.constant 0 : i32
    %11 = arith.cmpi ne, %10, %c0_i32_9 : i32
    scf.if %11 {
      %c0_10 = arith.constant 0 : index
      %c0_11 = arith.constant 0 : index
      %12 = vector.load %arg5[%c0_10, %c0_11] : memref<32x512xf32, #tpu.memory_space<vmem>>, vector<32x512xf32>
      %c0_12 = arith.constant 0 : index
      %c0_13 = arith.constant 0 : index
      %13 = vector.load %arg4[%c0_12, %c0_13] : memref<1x512xf32, #tpu.memory_space<vmem>>, vector<1x512xf32>
      %14 = vector.broadcast %13 : vector<1x512xf32> to vector<32x512xf32>
      %15 = arith.addf %12, %14 : vector<32x512xf32>
      %c0_14 = arith.constant 0 : index
      %c0_15 = arith.constant 0 : index
      %16 = vector.load %arg5[%c0_14, %c0_15] : memref<32x512xf32, #tpu.memory_space<vmem>>, vector<32x512xf32>
      tpu.vector_store %arg5[%c0_14, %c0_15], %15 {strides = array<i32>} : memref<32x512xf32, #tpu.memory_space<vmem>>, vector<32x512xf32>,
    } else {
    }
    return
  }
  func.func @transform_0(%arg0: i32, %arg1: i32) -> (i32, i32) {
    %c0_i32 = arith.constant 0 : i32
    return %arg0, %arg1 : i32, i32
  }
  func.func @transform_1(%arg0: i32, %arg1: i32) -> (i32, i32) {
    %c0_i32 = arith.constant 0 : i32
    %c0_i32_0 = arith.constant 0 : i32
    return %arg1, %c0_i32 : i32, i32
  }
  func.func @transform_2(%arg0: i32, %arg1: i32) -> (i32, i32) {
    %c0_i32 = arith.constant 0 : i32
    %c0_i32_0 = arith.constant 0 : i32
    %c0_i32_1 = arith.constant 0 : i32
    return %c0_i32, %c0_i32_0 : i32, i32
  }
  func.func @transform_3(%arg0: i32, %arg1: i32) -> (i32, i32) {
    %c0_i32 = arith.constant 0 : i32
    %c0_i32_0 = arith.constant 0 : i32
    return %arg0, %c0_i32 : i32, i32
  }
}

module attributes {stable_mosaic.version = 11 : i64} {
  func.func @_fused_matmul_kernel(%arg0: i32, %arg1: i32, %arg2: memref<32x1152xbf16, #tpu.memory_space<vmem>>, %arg3: memref<1152x512xbf16, #tpu.memory_space<vmem>>, %arg4: memref<1x512xf32, #tpu.memory_space<vmem>>, %arg5: memref<32x512xf32, #tpu.memory_space<vmem>>, %arg6: memref<32x512xf32, #tpu.memory_space<vmem>>) attributes {dimension_semantics = [#tpu.dimension_semantics<parallel>, #tpu.dimension_semantics<arbitrary>], iteration_bounds = array<i64: 1, 8>, scalar_prefetch = 0 : i64, scratch_operands = 0 : i64, tpu.core_type = #tpu.core_type<tc>, window_params = [{transform_indices = @transform_0, window_bounds = array<i64: 32, 1152>}, {transform_indices = @transform_1, window_bounds = array<i64: 1152, 512>}, {pipeline_mode = #tpu.pipeline_mode<synchronous>, transform_indices = @transform_2, window_bounds = array<i64: 1, 512>}, {transform_indices = @transform_3, window_bounds = array<i64: 32, 512>}, {transform_indices = @transform_4, window_bounds = array<i64: 32, 512>}]} {
    %c0_i32 = arith.constant 0 : i32
    %0 = arith.cmpi eq, %arg1, %c0_i32 : i32
    %1 = arith.extui %0 : i1 to i32
    %c0_i32_0 = arith.constant 0 : i32
    %2 = arith.cmpi ne, %1, %c0_i32_0 : i32
    scf.if %2 {
      %cst_9 = arith.constant 0.000000e+00 : f32
      %12 = vector.broadcast %cst_9 : f32 to vector<32x512xf32>
      %c0_10 = arith.constant 0 : index
      %c0_11 = arith.constant 0 : index
      %13 = vector.load %arg6[%c0_10, %c0_11] : memref<32x512xf32, #tpu.memory_space<vmem>>, vector<32x512xf32>
      tpu.vector_store %arg6[%c0_10, %c0_11], %12 {strides = array<i32>} : memref<32x512xf32, #tpu.memory_space<vmem>>, vector<32x512xf32>,
    } else {
    }
    %c0 = arith.constant 0 : index
    %c0_1 = arith.constant 0 : index
    %3 = vector.load %arg6[%c0, %c0_1] : memref<32x512xf32, #tpu.memory_space<vmem>>, vector<32x512xf32>
    %c0_2 = arith.constant 0 : index
    %c0_3 = arith.constant 0 : index
    %4 = vector.load %arg2[%c0_2, %c0_3] : memref<32x1152xbf16, #tpu.memory_space<vmem>>, vector<32x1152xbf16>
    %c0_4 = arith.constant 0 : index
    %c0_5 = arith.constant 0 : index
    %5 = vector.load %arg3[%c0_4, %c0_5] : memref<1152x512xbf16, #tpu.memory_space<vmem>>, vector<1152x512xbf16>
    %cst = arith.constant dense<0.000000e+00> : vector<32x512xf32>
    %6 = tpu.matmul %4, %5, %cst {dimension_numbers = #tpu.dot_dimension_numbers<[1], [0], [0], [1], [0, 0, 1, 1], [], []>} : vector<32x1152xbf16>, vector<1152x512xbf16>, vector<32x512xf32> -> vector<32x512xf32>
    %7 = arith.addf %3, %6 : vector<32x512xf32>
    %c0_6 = arith.constant 0 : index
    %c0_7 = arith.constant 0 : index
    %8 = vector.load %arg6[%c0_6, %c0_7] : memref<32x512xf32, #tpu.memory_space<vmem>>, vector<32x512xf32>
    tpu.vector_store %arg6[%c0_6, %c0_7], %7 {strides = array<i32>} : memref<32x512xf32, #tpu.memory_space<vmem>>, vector<32x512xf32>,
    %c7_i32 = arith.constant 7 : i32
    %9 = arith.cmpi eq, %arg1, %c7_i32 : i32
    %10 = arith.extui %9 : i1 to i32
    %c0_i32_8 = arith.constant 0 : i32
    %11 = arith.cmpi ne, %10, %c0_i32_8 : i32
    scf.if %11 {
      %c0_9 = arith.constant 0 : index
      %c0_10 = arith.constant 0 : index
      %12 = vector.load %arg6[%c0_9, %c0_10] : memref<32x512xf32, #tpu.memory_space<vmem>>, vector<32x512xf32>
      %c0_11 = arith.constant 0 : index
      %c0_12 = arith.constant 0 : index
      %13 = vector.load %arg4[%c0_11, %c0_12] : memref<1x512xf32, #tpu.memory_space<vmem>>, vector<1x512xf32>
      %14 = vector.broadcast %13 : vector<1x512xf32> to vector<32x512xf32>
      %15 = arith.addf %12, %14 : vector<32x512xf32>
      %c0_13 = arith.constant 0 : index
      %c0_14 = arith.constant 0 : index
      %16 = vector.load %arg5[%c0_13, %c0_14] : memref<32x512xf32, #tpu.memory_space<vmem>>, vector<32x512xf32>
      %17 = arith.addf %15, %16 : vector<32x512xf32>
      %c0_15 = arith.constant 0 : index
      %c0_16 = arith.constant 0 : index
      %18 = vector.load %arg6[%c0_15, %c0_16] : memref<32x512xf32, #tpu.memory_space<vmem>>, vector<32x512xf32>
      tpu.vector_store %arg6[%c0_15, %c0_16], %17 {strides = array<i32>} : memref<32x512xf32, #tpu.memory_space<vmem>>, vector<32x512xf32>,
    } else {
    }
    return
  }
  func.func @transform_0(%arg0: i32, %arg1: i32) -> (i32, i32) {
    %c0_i32 = arith.constant 0 : i32
    return %arg0, %arg1 : i32, i32
  }
  func.func @transform_1(%arg0: i32, %arg1: i32) -> (i32, i32) {
    %c0_i32 = arith.constant 0 : i32
    %c0_i32_0 = arith.constant 0 : i32
    return %arg1, %c0_i32 : i32, i32
  }
  func.func @transform_2(%arg0: i32, %arg1: i32) -> (i32, i32) {
    %c0_i32 = arith.constant 0 : i32
    %c0_i32_0 = arith.constant 0 : i32
    %c0_i32_1 = arith.constant 0 : i32
    return %c0_i32, %c0_i32_0 : i32, i32
  }
  func.func @transform_3(%arg0: i32, %arg1: i32) -> (i32, i32) {
    %c0_i32 = arith.constant 0 : i32
    %c0_i32_0 = arith.constant 0 : i32
    return %arg0, %c0_i32 : i32, i32
  }
  func.func @transform_4(%arg0: i32, %arg1: i32) -> (i32, i32) {
    %c0_i32 = arith.constant 0 : i32
    %c0_i32_0 = arith.constant 0 : i32
    return %arg0, %c0_i32 : i32, i32
  }
}

module attributes {stable_mosaic.version = 11 : i64} {
  func.func @_fused_matmul_kernel(%arg0: i32, %arg1: i32, %arg2: memref<32x1152xbf16, #tpu.memory_space<vmem>>, %arg3: memref<1152x128xbf16, #tpu.memory_space<vmem>>, %arg4: memref<1x128xf32, #tpu.memory_space<vmem>>, %arg5: memref<32x128xf32, #tpu.memory_space<vmem>>, %arg6: memref<32x128xf32, #tpu.memory_space<vmem>>, %arg7: memref<32x128xf32, #tpu.memory_space<vmem>>) attributes {dimension_semantics = [#tpu.dimension_semantics<parallel>, #tpu.dimension_semantics<arbitrary>], iteration_bounds = array<i64: 1, 4>, scalar_prefetch = 0 : i64, scratch_operands = 0 : i64, tpu.core_type = #tpu.core_type<tc>, window_params = [{transform_indices = @transform_0, window_bounds = array<i64: 32, 1152>}, {transform_indices = @transform_1, window_bounds = array<i64: 1152, 128>}, {pipeline_mode = #tpu.pipeline_mode<synchronous>, transform_indices = @transform_2, window_bounds = array<i64: 1, 128>}, {transform_indices = @transform_3, window_bounds = array<i64: 32, 128>}, {transform_indices = @transform_4, window_bounds = array<i64: 32, 128>}, {transform_indices = @transform_5, window_bounds = array<i64: 32, 128>}]} {
    %c0_i32 = arith.constant 0 : i32
    %0 = arith.cmpi eq, %arg1, %c0_i32 : i32
    %1 = arith.extui %0 : i1 to i32
    %c0_i32_0 = arith.constant 0 : i32
    %2 = arith.cmpi ne, %1, %c0_i32_0 : i32
    scf.if %2 {
      %cst_9 = arith.constant 0.000000e+00 : f32
      %12 = vector.broadcast %cst_9 : f32 to vector<32x128xf32>
      %c0_10 = arith.constant 0 : index
      %c0_11 = arith.constant 0 : index
      %13 = vector.load %arg6[%c0_10, %c0_11] : memref<32x128xf32, #tpu.memory_space<vmem>>, vector<32x128xf32>
      tpu.vector_store %arg6[%c0_10, %c0_11], %12 {strides = array<i32>} : memref<32x128xf32, #tpu.memory_space<vmem>>, vector<32x128xf32>,
    } else {
    }
    %c0 = arith.constant 0 : index
    %c0_1 = arith.constant 0 : index
    %3 = vector.load %arg6[%c0, %c0_1] : memref<32x128xf32, #tpu.memory_space<vmem>>, vector<32x128xf32>
    %c0_2 = arith.constant 0 : index
    %c0_3 = arith.constant 0 : index
    %4 = vector.load %arg2[%c0_2, %c0_3] : memref<32x1152xbf16, #tpu.memory_space<vmem>>, vector<32x1152xbf16>
    %c0_4 = arith.constant 0 : index
    %c0_5 = arith.constant 0 : index
    %5 = vector.load %arg3[%c0_4, %c0_5] : memref<1152x128xbf16, #tpu.memory_space<vmem>>, vector<1152x128xbf16>
    %cst = arith.constant dense<0.000000e+00> : vector<32x128xf32>
    %6 = tpu.matmul %4, %5, %cst {dimension_numbers = #tpu.dot_dimension_numbers<[1], [0], [0], [1], [0, 0, 1, 1], [], []>} : vector<32x1152xbf16>, vector<1152x128xbf16>, vector<32x128xf32> -> vector<32x128xf32>
    %7 = arith.addf %3, %6 : vector<32x128xf32>
    %c0_6 = arith.constant 0 : index
    %c0_7 = arith.constant 0 : index
    %8 = vector.load %arg6[%c0_6, %c0_7] : memref<32x128xf32, #tpu.memory_space<vmem>>, vector<32x128xf32>
    tpu.vector_store %arg6[%c0_6, %c0_7], %7 {strides = array<i32>} : memref<32x128xf32, #tpu.memory_space<vmem>>, vector<32x128xf32>,
    %c3_i32 = arith.constant 3 : i32
    %9 = arith.cmpi eq, %arg1, %c3_i32 : i32
    %10 = arith.extui %9 : i1 to i32
    %c0_i32_8 = arith.constant 0 : i32
    %11 = arith.cmpi ne, %10, %c0_i32_8 : i32
    scf.if %11 {
      %c0_9 = arith.constant 0 : index
      %c0_10 = arith.constant 0 : index
      %12 = vector.load %arg6[%c0_9, %c0_10] : memref<32x128xf32, #tpu.memory_space<vmem>>, vector<32x128xf32>
      %c0_11 = arith.constant 0 : index
      %c0_12 = arith.constant 0 : index
      %13 = vector.load %arg4[%c0_11, %c0_12] : memref<1x128xf32, #tpu.memory_space<vmem>>, vector<1x128xf32>
      %14 = vector.broadcast %13 : vector<1x128xf32> to vector<32x128xf32>
      %15 = arith.addf %12, %14 : vector<32x128xf32>
      %c0_13 = arith.constant 0 : index
      %c0_14 = arith.constant 0 : index
      %16 = vector.load %arg6[%c0_13, %c0_14] : memref<32x128xf32, #tpu.memory_space<vmem>>, vector<32x128xf32>
      tpu.vector_store %arg6[%c0_13, %c0_14], %15 {strides = array<i32>} : memref<32x128xf32, #tpu.memory_space<vmem>>, vector<32x128xf32>,
      %c0_15 = arith.constant 0 : index
      %c0_16 = arith.constant 0 : index
      %17 = vector.load %arg5[%c0_15, %c0_16] : memref<32x128xf32, #tpu.memory_space<vmem>>, vector<32x128xf32>
      %18 = arith.addf %15, %17 : vector<32x128xf32>
      %c0_17 = arith.constant 0 : index
      %c0_18 = arith.constant 0 : index
      %19 = vector.load %arg7[%c0_17, %c0_18] : memref<32x128xf32, #tpu.memory_space<vmem>>, vector<32x128xf32>
      tpu.vector_store %arg7[%c0_17, %c0_18], %18 {strides = array<i32>} : memref<32x128xf32, #tpu.memory_space<vmem>>, vector<32x128xf32>,
    } else {
    }
    return
  }
  func.func @transform_0(%arg0: i32, %arg1: i32) -> (i32, i32) {
    %c0_i32 = arith.constant 0 : i32
    return %arg0, %arg1 : i32, i32
  }
  func.func @transform_1(%arg0: i32, %arg1: i32) -> (i32, i32) {
    %c0_i32 = arith.constant 0 : i32
    %c0_i32_0 = arith.constant 0 : i32
    return %arg1, %c0_i32 : i32, i32
  }
  func.func @transform_2(%arg0: i32, %arg1: i32) -> (i32, i32) {
    %c0_i32 = arith.constant 0 : i32
    %c0_i32_0 = arith.constant 0 : i32
    %c0_i32_1 = arith.constant 0 : i32
    return %c0_i32, %c0_i32_0 : i32, i32
  }
  func.func @transform_3(%arg0: i32, %arg1: i32) -> (i32, i32) {
    %c0_i32 = arith.constant 0 : i32
    %c0_i32_0 = arith.constant 0 : i32
    return %arg0, %c0_i32 : i32, i32
  }
  func.func @transform_4(%arg0: i32, %arg1: i32) -> (i32, i32) {
    %c0_i32 = arith.constant 0 : i32
    %c0_i32_0 = arith.constant 0 : i32
    return %arg0, %c0_i32 : i32, i32
  }
  func.func @transform_5(%arg0: i32, %arg1: i32) -> (i32, i32) {
    %c0_i32 = arith.constant 0 : i32
    %c0_i32_0 = arith.constant 0 : i32
    return %arg0, %c0_i32 : i32, i32
  }
}

</mosaic_0001>

<bundles_post_ra>
// kernel: autoregressive_block.12
= control target key start
LH: loop header
LB: loop body
LE: loop exit
PB: predicated region body
PF: predicated region fallthrough
CT: control target
= control target key end

     0   :  { %9 = vsyncpa [#allocation4], 0  ;;  %s3966_s0 = inlined_call_operand.vmem [shape: bf16[128,2304], index: 0, kind: input, shape index: {}]   ;;  %s3967_s1 = inlined_call_operand.hbm [shape: bf16[2304,128], index: 1, kind: input, shape index: {}]   ;;  %s3968_s2 = inlined_call_operand.vmem [shape: f32[1,128], index: 2, kind: input, shape index: {}]   ;;  %s3969_s3 = inlined_call_operand.hbm [shape: f32[128,128], index: 3, kind: input, shape index: {}]   ;;  %s3970_s4 = inlined_call_operand.vmem [shape: f32[128,128], index: 4, kind: output, shape index: {}]  }
   0x1   :  { %11 = vsyncpa [#allocation4 + $0x1], 0 }
   0x2   :  { %12 = vsyncpa [#allocation6], 0  ;;  %s3151_s15 = smov 0   ;;  %s3153_s16 = smov 0  }
   0x3   :  { %s3155_s17 = smov 0   ;;  %s3157_s18 = smov 0  }
   0x4   :  { %s3159_s19 = smov 0   ;;  %s3161_s20 = smov 0  }
   0x5 LB: > { %s2249_s21 = sadd.s32 4294967295, %s3117_s20   ;;  %s27_s22 = sadd.s32 1, %s3113_s19  ;;  %s3117_s20 = sphi %s3161_s20, %s18_s20   ;;  %s3113_s19 = sphi %s3159_s19, %s3990_s19   ;;  %s3109_s18 = sphi %s3157_s18, %s3989_s18   ;;  %s3105_s17 = sphi %s3155_s17, %s3988_s17   ;;  %s3101_s16 = sphi %s3153_s16, %s3987_s16   ;;  %s3097_s15 = sphi %s3151_s15, %s3986_s15  }
   0x6   : > { %p28_p0 = scmp.ge.s32.totalorder %s27_s22, 2  ;;  %s39_s23 = sadd.s32 1, %s3105_s17 }
   0x7   : > { %p46_p1 = scmp.ne.s32.totalorder %s3105_s17, %s3101_s16  ;;  %p47_p2 = scmp.eq.s32.totalorder %s3117_s20, 0 }
   0x8   : > { %s3992_s22 = smov (%p28_p0, %s27_s22), 0  ;;  %p78_p4 = scmp.ne.s32.totalorder %s3101_s16, %s3097_s15 }
   0x9   : > { %p3187_p3 = por %p47_p2, %p46_p1  ;;  %s35_s25 = ssub.s32 %s3113_s19, %s3992_s22 }
   0xa   : > { %p3194_p5 = scmp.eq.s32.totalorder %s2249_s21, 0  ;;  %p37_p6 = scmp.eq.s32.totalorder %s35_s25, 0 }
   0xb   : > { %s3976_s24 = scalar_select %p3187_p3, 1, 0 }
   0xc   : > { %s3977_s26 = scalar_select %p3194_p5, 1, 0 }
   0xd   : > { %p2250_p7 = scmp.ge.s32.totalorder %s3117_s20, 1  ;;  %p3201_p8 = por %p3194_p5, %p78_p4 }
   0xe   : > { %p162_p9 = scmp.lt.s32.totalorder %s3117_s20, 3  ;;  %s3119_s30 = smov [#allocation5]  }
   0xf   : > { %s3978_s27 = scalar_select %p3201_p8, 1, 0 }
  0x10   : > { %s3207_s28 = scalar_select %p37_p6, %s3105_s17, %s39_s23  }
  0x11   : > { %p3209_p10 = pnand %p2250_p7, %p162_p9  ;;  %s180_s5 = sshll.u32 %s3119_s30, 4  ;;  %s181_s5 = int_to_ptr.vmem [resolvable:$true] %s180_s5 }
  0x12   : > { %s3007_s9 = scalar_lea.hbm %s3969_s3, 2048 }
  0x13   : > { %s3979_s29 = scalar_select %p3209_p10, 1, 0 }
  0x14   : > { %p2771_p11 = pneg %p3209_p10  ;;  %p3008_p13 = scmp.ne.s32.totalorder %s3969_s3, %s3007_s9 }
  0x15   : > { %p3014_p4 = scmp.lt.u32.totalorder %s3007_s9, %s3969_s3 }
  0x16   : > { %p3217_p12 = pnand %p2771_p11, %p3194_p5 }
  0x18   : > { %p3009_p0 = pneg %p3217_p12 }
  0x1a   : > { %p3010_p1 = pnand %p3009_p0, %p3008_p13 }
  0x1c   : > { %p3011_p2 = pneg %p3010_p1 }
  0x1e   : > { %p3016_p6 = pnand %p3014_p4, %p3011_p2 }
  0x20   : > { %3019 = shalt.err (!%p3016_p6)
}
  0x21   : > { %s3020_s14 = scalar_lea.vmem %s181_s5, 2048  ;;  %p3028_p5 = scmp.lt.s32.totalorder %s181_s5, %s181_s5 }
  0x22   : > { %p3021_p7 = scmp.ne.s32.totalorder %s181_s5, %s3020_s14  ;;  %p3029_p8 = scmp.lt.s32.totalorder %s3020_s14, %s3020_s14 }
  0x24   : > { %p3023_p9 = pnand %p3021_p7, %p3009_p0  ;;  %p3030_p10 = por %p3029_p8, %p3028_p5 }
  0x26   : > { %p3024_p11 = pneg %p3023_p9 }
  0x28   : > { %p3031_p3 = pnand %p3030_p10, %p3024_p11 }
  0x2a   : > { %3034 = shalt.err (!%p3031_p3)
}
  0x2b   : > { %s3120_s15 = smov 128   ;;  %s3121_s21 = smov 8  }
  0x2c   : > { %2774 = dma.hbm_to_vmem [thread:$0]  (!%p3217_p12), %s3969_s3, 2048, %s181_s5, [#allocation6], %s3120_s15, %s3120_s15, %s3121_s21  }
  0x2d   : > { %p2252_p13 = scmp.ge.s32.totalorder %s3117_s20, 2 }
  0x2e   : > { %p3981_p1 = scmp.ne.s32.totalorder (!%p2252_p13), %s3976_s24, 0 }
  0x2f   : > { %190 = sbr.rel (%p2252_p13) target bundleno = 128 (0x80), region = 24 }
  0x36   : > { %193 = sbr.rel (!%p3981_p1) target bundleno = 101 (0x65), region = 28  ;;  %s195_s30 = sand.u32 (%p3981_p1), 1, %s3105_s17  }
  0x37   : > { %s2440_s7 = smul.u32 (%p3981_p1), 36, %s3113_s19 }
  0x38   : > { %s2762_s8 = smul.u32 (%p3981_p1), 576, %s195_s30 }
  0x39   : > { %s3245_s11 = scalar_lea.vmem (%p3981_p1), %s3966_s0, %s2440_s7 }
  0x3a   : > { %v218_v0 = vld [vmem:[%s3245_s11] sm:$0xff] (%p3981_p1)  ;;  %v220_v1 = vld [vmem:[%s3245_s11 + $0x8] sm:$0xff] (%p3981_p1)  ;;  %v222_v2 = vld [vmem:[%s3245_s11 + $0x10] sm:$0xff] (%p3981_p1)  ;;  %s3250_s5 = scalar_lea.vmem (%p3981_p1), [#allocation2], %s2762_s8 }
  0x3b   : > { %219 = vst [vmem:[%s3250_s5] sm:$0xff] (%p3981_p1), %v218_v0  ;;  %221 = vst [vmem:[%s3250_s5 + $0x8] sm:$0xff] (%p3981_p1), %v220_v1  ;;  %v224_v3 = vld [vmem:[%s3245_s11 + $0x18] sm:$0xff] (%p3981_p1)  ;;  %v226_v4 = vld [vmem:[%s3245_s11 + $0x48] sm:$0xff] (%p3981_p1) }
  0x3c   : > { %223 = vst [vmem:[%s3250_s5 + $0x10] sm:$0xff] (%p3981_p1), %v222_v2  ;;  %v228_v5 = vld [vmem:[%s3245_s11 + $0x50] sm:$0xff] (%p3981_p1)  ;;  %225 = vst [vmem:[%s3250_s5 + $0x18] sm:$0xff] (%p3981_p1), %v224_v3  ;;  %v230_v6 = vld [vmem:[%s3245_s11 + $0x58] sm:$0xff] (%p3981_p1) }
  0x3d   : > { %227 = vst [vmem:[%s3250_s5 + $0x24] sm:$0xff] %v226_v4  ;;  %229 = vst [vmem:[%s3250_s5 + $0x2c] sm:$0xff] %v228_v5  ;;  %v232_v7 = vld [vmem:[%s3245_s11 + $0x60] sm:$0xff]  ;;  %v234_v8 = vld [vmem:[%s3245_s11 + $0x90] sm:$0xff] }
  0x3e   : > { %231 = vst [vmem:[%s3250_s5 + $0x34] sm:$0xff] %v230_v6  ;;  %233 = vst [vmem:[%s3250_s5 + $0x3c] sm:$0xff] %v232_v7  ;;  %v236_v9 = vld [vmem:[%s3245_s11 + $0x98] sm:$0xff]  ;;  %v238_v10 = vld [vmem:[%s3245_s11 + $0xa0] sm:$0xff] }
  0x3f   : > { %235 = vst [vmem:[%s3250_s5 + $0x48] sm:$0xff] %v234_v8  ;;  %v240_v11 = vld [vmem:[%s3245_s11 + $0xa8] sm:$0xff]  ;;  %237 = vst [vmem:[%s3250_s5 + $0x50] sm:$0xff] %v236_v9  ;;  %v242_v12 = vld [vmem:[%s3245_s11 + $0xd8] sm:$0xff] }
  0x40   : > { %239 = vst [vmem:[%s3250_s5 + $0x58] sm:$0xff] %v238_v10  ;;  %241 = vst [vmem:[%s3250_s5 + $0x60] sm:$0xff] %v240_v11  ;;  %v244_v13 = vld [vmem:[%s3245_s11 + $0xe0] sm:$0xff]  ;;  %v246_v14 = vld [vmem:[%s3245_s11 + $0xe8] sm:$0xff] }
  0x41   : > { %243 = vst [vmem:[%s3250_s5 + $0x6c] sm:$0xff] %v242_v12  ;;  %245 = vst [vmem:[%s3250_s5 + $0x74] sm:$0xff] %v244_v13  ;;  %v248_v15 = vld [vmem:[%s3245_s11 + $0xf0] sm:$0xff]  ;;  %v250_v16 = vld [vmem:[%s3245_s11 + $0x120] sm:$0xff] }
  0x42   : > { %247 = vst [vmem:[%s3250_s5 + $0x7c] sm:$0xff] %v246_v14  ;;  %v252_v17 = vld [vmem:[%s3245_s11 + $0x128] sm:$0xff]  ;;  %249 = vst [vmem:[%s3250_s5 + $0x84] sm:$0xff] %v248_v15  ;;  %v254_v18 = vld [vmem:[%s3245_s11 + $0x130] sm:$0xff] }
  0x43   : > { %251 = vst [vmem:[%s3250_s5 + $0x90] sm:$0xff] %v250_v16  ;;  %253 = vst [vmem:[%s3250_s5 + $0x98] sm:$0xff] %v252_v17  ;;  %v256_v19 = vld [vmem:[%s3245_s11 + $0x138] sm:$0xff]  ;;  %v258_v20 = vld [vmem:[%s3245_s11 + $0x168] sm:$0xff] }
  0x44   : > { %255 = vst [vmem:[%s3250_s5 + $0xa0] sm:$0xff] %v254_v18  ;;  %257 = vst [vmem:[%s3250_s5 + $0xa8] sm:$0xff] %v256_v19  ;;  %v260_v21 = vld [vmem:[%s3245_s11 + $0x170] sm:$0xff]  ;;  %v262_v22 = vld [vmem:[%s3245_s11 + $0x178] sm:$0xff] }
  0x45   : > { %259 = vst [vmem:[%s3250_s5 + $0xb4] sm:$0xff] %v258_v20  ;;  %v264_v23 = vld [vmem:[%s3245_s11 + $0x180] sm:$0xff]  ;;  %261 = vst [vmem:[%s3250_s5 + $0xbc] sm:$0xff] %v260_v21  ;;  %v266_v24 = vld [vmem:[%s3245_s11 + $0x1b0] sm:$0xff] }
  0x46   : > { %263 = vst [vmem:[%s3250_s5 + $0xc4] sm:$0xff] %v262_v22  ;;  %265 = vst [vmem:[%s3250_s5 + $0xcc] sm:$0xff] %v264_v23  ;;  %v268_v25 = vld [vmem:[%s3245_s11 + $0x1b8] sm:$0xff]  ;;  %v270_v26 = vld [vmem:[%s3245_s11 + $0x1c0] sm:$0xff] }
  0x47   : > { %267 = vst [vmem:[%s3250_s5 + $0xd8] sm:$0xff] %v266_v24  ;;  %269 = vst [vmem:[%s3250_s5 + $0xe0] sm:$0xff] %v268_v25  ;;  %v272_v27 = vld [vmem:[%s3245_s11 + $0x1c8] sm:$0xff]  ;;  %v274_v28 = vld [vmem:[%s3245_s11 + $0x1f8] sm:$0xff] }
  0x48   : > { %271 = vst [vmem:[%s3250_s5 + $0xe8] sm:$0xff] %v270_v26  ;;  %v276_v29 = vld [vmem:[%s3245_s11 + $0x200] sm:$0xff]  ;;  %273 = vst [vmem:[%s3250_s5 + $0xf0] sm:$0xff] %v272_v27  ;;  %v278_v30 = vld [vmem:[%s3245_s11 + $0x208] sm:$0xff] }
  0x49   : > { %275 = vst [vmem:[%s3250_s5 + $0xfc] sm:$0xff] %v274_v28  ;;  %277 = vst [vmem:[%s3250_s5 + $0x104] sm:$0xff] %v276_v29  ;;  %v280_v31 = vld [vmem:[%s3245_s11 + $0x210] sm:$0xff]  ;;  %v282_v32 = vld [vmem:[%s3245_s11 + $0x240] sm:$0xff] }
  0x4a   : > { %279 = vst [vmem:[%s3250_s5 + $0x10c] sm:$0xff] %v278_v30  ;;  %281 = vst [vmem:[%s3250_s5 + $0x114] sm:$0xff] %v280_v31  ;;  %v284_v33 = vld [vmem:[%s3245_s11 + $0x248] sm:$0xff]  ;;  %v286_v34 = vld [vmem:[%s3245_s11 + $0x250] sm:$0xff] }
  0x4b   : > { %283 = vst [vmem:[%s3250_s5 + $0x120] sm:$0xff] %v282_v32  ;;  %v288_v35 = vld [vmem:[%s3245_s11 + $0x258] sm:$0xff]  ;;  %285 = vst [vmem:[%s3250_s5 + $0x128] sm:$0xff] %v284_v33  ;;  %v290_v36 = vld [vmem:[%s3245_s11 + $0x288] sm:$0xff] }
  0x4c   : > { %287 = vst [vmem:[%s3250_s5 + $0x130] sm:$0xff] %v286_v34  ;;  %289 = vst [vmem:[%s3250_s5 + $0x138] sm:$0xff] %v288_v35  ;;  %v292_v37 = vld [vmem:[%s3245_s11 + $0x290] sm:$0xff]  ;;  %v294_v38 = vld [vmem:[%s3245_s11 + $0x298] sm:$0xff] }
  0x4d   : > { %291 = vst [vmem:[%s3250_s5 + $0x144] sm:$0xff] %v290_v36  ;;  %293 = vst [vmem:[%s3250_s5 + $0x14c] sm:$0xff] %v292_v37  ;;  %v296_v39 = vld [vmem:[%s3245_s11 + $0x2a0] sm:$0xff]  ;;  %v298_v40 = vld [vmem:[%s3245_s11 + $0x2d0] sm:$0xff] }
  0x4e   : > { %295 = vst [vmem:[%s3250_s5 + $0x154] sm:$0xff] %v294_v38  ;;  %v300_v41 = vld [vmem:[%s3245_s11 + $0x2d8] sm:$0xff]  ;;  %297 = vst [vmem:[%s3250_s5 + $0x15c] sm:$0xff] %v296_v39  ;;  %v302_v42 = vld [vmem:[%s3245_s11 + $0x2e0] sm:$0xff] }
  0x4f   : > { %299 = vst [vmem:[%s3250_s5 + $0x168] sm:$0xff] %v298_v40  ;;  %301 = vst [vmem:[%s3250_s5 + $0x170] sm:$0xff] %v300_v41  ;;  %v304_v43 = vld [vmem:[%s3245_s11 + $0x2e8] sm:$0xff]  ;;  %v306_v44 = vld [vmem:[%s3245_s11 + $0x318] sm:$0xff] }
  0x50   : > { %303 = vst [vmem:[%s3250_s5 + $0x178] sm:$0xff] %v302_v42  ;;  %305 = vst [vmem:[%s3250_s5 + $0x180] sm:$0xff] %v304_v43  ;;  %v308_v45 = vld [vmem:[%s3245_s11 + $0x320] sm:$0xff]  ;;  %v310_v46 = vld [vmem:[%s3245_s11 + $0x328] sm:$0xff] }
  0x51   : > { %307 = vst [vmem:[%s3250_s5 + $0x18c] sm:$0xff] %v306_v44  ;;  %v312_v47 = vld [vmem:[%s3245_s11 + $0x330] sm:$0xff]  ;;  %309 = vst [vmem:[%s3250_s5 + $0x194] sm:$0xff] %v308_v45  ;;  %v314_v48 = vld [vmem:[%s3245_s11 + $0x360] sm:$0xff] }
  0x52   : > { %311 = vst [vmem:[%s3250_s5 + $0x19c] sm:$0xff] %v310_v46  ;;  %313 = vst [vmem:[%s3250_s5 + $0x1a4] sm:$0xff] %v312_v47  ;;  %v316_v49 = vld [vmem:[%s3245_s11 + $0x368] sm:$0xff]  ;;  %v318_v50 = vld [vmem:[%s3245_s11 + $0x370] sm:$0xff] }
  0x53   : > { %315 = vst [vmem:[%s3250_s5 + $0x1b0] sm:$0xff] %v314_v48  ;;  %317 = vst [vmem:[%s3250_s5 + $0x1b8] sm:$0xff] %v316_v49  ;;  %v320_v51 = vld [vmem:[%s3245_s11 + $0x378] sm:$0xff]  ;;  %v322_v52 = vld [vmem:[%s3245_s11 + $0x3a8] sm:$0xff] }
  0x54   : > { %319 = vst [vmem:[%s3250_s5 + $0x1c0] sm:$0xff] %v318_v50  ;;  %v324_v53 = vld [vmem:[%s3245_s11 + $0x3b0] sm:$0xff]  ;;  %321 = vst [vmem:[%s3250_s5 + $0x1c8] sm:$0xff] %v320_v51  ;;  %v326_v54 = vld [vmem:[%s3245_s11 + $0x3b8] sm:$0xff] }
  0x55   : > { %323 = vst [vmem:[%s3250_s5 + $0x1d4] sm:$0xff] %v322_v52  ;;  %325 = vst [vmem:[%s3250_s5 + $0x1dc] sm:$0xff] %v324_v53  ;;  %v328_v55 = vld [vmem:[%s3245_s11 + $0x3c0] sm:$0xff]  ;;  %v330_v56 = vld [vmem:[%s3245_s11 + $0x3f0] sm:$0xff] }
  0x56   : > { %327 = vst [vmem:[%s3250_s5 + $0x1e4] sm:$0xff] %v326_v54  ;;  %329 = vst [vmem:[%s3250_s5 + $0x1ec] sm:$0xff] %v328_v55  ;;  %v332_v57 = vld [vmem:[%s3245_s11 + $0x3f8] sm:$0xff]  ;;  %v334_v58 = vld [vmem:[%s3245_s11 + $0x400] sm:$0xff] }
  0x57   : > { %331 = vst [vmem:[%s3250_s5 + $0x1f8] sm:$0xff] %v330_v56  ;;  %v336_v59 = vld [vmem:[%s3245_s11 + $0x408] sm:$0xff]  ;;  %333 = vst [vmem:[%s3250_s5 + $0x200] sm:$0xff] %v332_v57  ;;  %v338_v60 = vld [vmem:[%s3245_s11 + $0x438] sm:$0xff] }
  0x58   : > { %335 = vst [vmem:[%s3250_s5 + $0x208] sm:$0xff] %v334_v58  ;;  %337 = vst [vmem:[%s3250_s5 + $0x210] sm:$0xff] %v336_v59  ;;  %v340_v61 = vld [vmem:[%s3245_s11 + $0x440] sm:$0xff]  ;;  %v342_v62 = vld [vmem:[%s3245_s11 + $0x448] sm:$0xff] }
  0x59   : > { %339 = vst [vmem:[%s3250_s5 + $0x21c] sm:$0xff] %v338_v60  ;;  %341 = vst [vmem:[%s3250_s5 + $0x224] sm:$0xff] %v340_v61  ;;  %v344_v63 = vld [vmem:[%s3245_s11 + $0x450] sm:$0xff]  ;;  %v2254_v0 = vld [vmem:[%s3245_s11 + $0x20] sm:$0xf] }
  0x5a   : > { %343 = vst [vmem:[%s3250_s5 + $0x22c] sm:$0xff] %v342_v62  ;;  %v2256_v1 = vld [vmem:[%s3245_s11 + $0x68] sm:$0xf]  ;;  %345 = vst [vmem:[%s3250_s5 + $0x234] sm:$0xff] %v344_v63  ;;  %v2258_v2 = vld [vmem:[%s3245_s11 + $0xb0] sm:$0xf] }
  0x5b   : > { %2255 = vst [vmem:[%s3250_s5 + $0x20] sm:$0xf] %v2254_v0  ;;  %2257 = vst [vmem:[%s3250_s5 + $0x44] sm:$0xf] %v2256_v1  ;;  %v2260_v3 = vld [vmem:[%s3245_s11 + $0xf8] sm:$0xf] }
  0x5c   : > { %v2262_v4 = vld [vmem:[%s3245_s11 + $0x140] sm:$0xf]  ;;  %2259 = vst [vmem:[%s3250_s5 + $0x68] sm:$0xf] %v2258_v2  ;;  %2261 = vst [vmem:[%s3250_s5 + $0x8c] sm:$0xf] %v2260_v3 }
  0x5d   : > { %2263 = vst [vmem:[%s3250_s5 + $0xb0] sm:$0xf] %v2262_v4  ;;  %v2264_v5 = vld [vmem:[%s3245_s11 + $0x188] sm:$0xf]  ;;  %v2266_v6 = vld [vmem:[%s3245_s11 + $0x1d0] sm:$0xf] }
  0x5e   : > { %v2268_v7 = vld [vmem:[%s3245_s11 + $0x218] sm:$0xf]  ;;  %2265 = vst [vmem:[%s3250_s5 + $0xd4] sm:$0xf] %v2264_v5  ;;  %2267 = vst [vmem:[%s3250_s5 + $0xf8] sm:$0xf] %v2266_v6 }
  0x5f   : > { %2269 = vst [vmem:[%s3250_s5 + $0x11c] sm:$0xf] %v2268_v7  ;;  %v2270_v8 = vld [vmem:[%s3245_s11 + $0x260] sm:$0xf]  ;;  %v2272_v9 = vld [vmem:[%s3245_s11 + $0x2a8] sm:$0xf] }
  0x60   : > { %v2274_v10 = vld [vmem:[%s3245_s11 + $0x2f0] sm:$0xf]  ;;  %2271 = vst [vmem:[%s3250_s5 + $0x140] sm:$0xf] %v2270_v8  ;;  %2273 = vst [vmem:[%s3250_s5 + $0x164] sm:$0xf] %v2272_v9 }
  0x61   : > { %2275 = vst [vmem:[%s3250_s5 + $0x188] sm:$0xf] %v2274_v10  ;;  %v2276_v11 = vld [vmem:[%s3245_s11 + $0x338] sm:$0xf]  ;;  %v2278_v12 = vld [vmem:[%s3245_s11 + $0x380] sm:$0xf] }
  0x62   : > { %v2280_v13 = vld [vmem:[%s3245_s11 + $0x3c8] sm:$0xf]  ;;  %2277 = vst [vmem:[%s3250_s5 + $0x1ac] sm:$0xf] %v2276_v11  ;;  %2279 = vst [vmem:[%s3250_s5 + $0x1d0] sm:$0xf] %v2278_v12 }
  0x63   : > { %2281 = vst [vmem:[%s3250_s5 + $0x1f4] sm:$0xf] %v2280_v13  ;;  %v2282_v14 = vld [vmem:[%s3245_s11 + $0x410] sm:$0xf]  ;;  %v2284_v15 = vld [vmem:[%s3245_s11 + $0x458] sm:$0xf] }
  0x64   : > { %2283 = vst [vmem:[%s3250_s5 + $0x218] sm:$0xf] %v2282_v14  ;;  %2285 = vst [vmem:[%s3250_s5 + $0x23c] sm:$0xf] %v2284_v15 }
  0x65 PF: > { %s391_s6 = sand.u32 1, %s3105_s17   ;;  %s2441_s12 = smul.u32 9216, %s3113_s19 }
  0x66   : > { %s2763_s13 = smul.u32 576, %s391_s6  ;;  %s3418_s30 = scalar_lea.sflag [#allocation4], %s391_s6 }
  0x67   : > { %s3414_s21 = scalar_lea.hbm %s3967_s1, %s2441_s12  ;;  %p3982_p5 = scmp.ne.s32.totalorder %s3976_s24, 0 }
  0x68   : > { %s395_s23 = scalar_lea.vmem [#allocation3], %s2763_s13  ;;  %s3035_s7 = scalar_lea.hbm %s3414_s21, 9216 }
  0x69   : > { %s402_s25 = sshll.u32 %s395_s23, 4  ;;  %p3036_p3 = scmp.ne.s32.totalorder %s3414_s21, %s3035_s7  ;;  %s3416_s25 = int_to_ptr.vmem [resolvable:$true] %s402_s25 }
  0x6a   : > { %s3039_s10 = scalar_lea.hbm %s3967_s1, 18432  ;;  %p3040_p12 = scmp.lt.u32.totalorder %s3414_s21, %s3967_s1 }
  0x6b   : > { %p3037_p8 = pnand %p3036_p3, %p3982_p5  ;;  %p3041_p0 = scmp.lt.u32.totalorder %s3039_s10, %s3035_s7 }
  0x6c   : > { %p3043_p4 = scmp.lt.u32.totalorder %s3035_s7, %s3414_s21 }
  0x6d   : > { %p3038_p10 = pneg %p3037_p8  ;;  %p3042_p2 = por %p3041_p0, %p3040_p12 }
  0x6f   : > { %p3044_p6 = por %p3043_p4, %p3042_p2 }
  0x71   : > { %p3045_p7 = pnand %p3044_p6, %p3038_p10 }
  0x73   : > { %3048 = shalt.err (!%p3045_p7)
}
  0x74   : > { %s3049_s6 = scalar_lea.vmem %s3416_s25, 9216  ;;  %s3122_s12 = smov [#allocation3]  }
  0x75   : > { %p3050_p9 = scmp.ne.s32.totalorder %s3416_s25, %s3049_s6  ;;  %s3053_s13 = sshll.u32 %s3122_s12, 4  ;;  %s3054_s13 = int_to_ptr.vmem [resolvable:$false] %s3053_s13 }
  0x76   : > { %s3055_s14 = scalar_lea.vmem %s3054_s13, 18432  ;;  %p3056_p1 = scmp.lt.s32.totalorder %s3416_s25, %s3054_s13 }
  0x77   : > { %p3051_p11 = pnand %p3050_p9, %p3982_p5  ;;  %p3057_p3 = scmp.lt.s32.totalorder %s3055_s14, %s3049_s6 }
  0x79   : > { %p3052_p13 = pneg %p3051_p11  ;;  %p3058_p8 = por %p3057_p3, %p3056_p1 }
  0x7b   : > { %p3059_p12 = pnand %p3058_p8, %p3052_p13 }
  0x7d   : > { %3062 = shalt.err (!%p3059_p12)
}
  0x7e   : > { %s3123_s15 = smov 64   ;;  %s3124_s23 = smov 4  }
  0x7f   : > { %2767 = dma.hbm_to_vmem [thread:$0]  (%p3982_p5), %s3414_s21, 9216, %s3416_s25, %s3418_s30, %s3123_s15, %s3123_s15, %s3124_s23  }
  0x80 PF: > { %p3983_p10 = scmp.ne.s32.totalorder %s3979_s29, 0 }
  0x81   : > { %s417_s7 = sand.u32 (!%p3983_p10), 1, %s3101_s16   ;;  %p3984_p0 = scmp.ne.s32.totalorder (!%p3983_p10), %s3978_s27, 0 }
  0x82   : > { %414 = sbr.rel (%p3983_p10) target bundleno = 554 (0x22a), region = 58  ;;  %s424_s10 = scalar_lea.sflag (!%p3983_p10), [#allocation4], %s417_s7 }
  0x83   : > { %s2764_s8 = smul.u32 (!%p3983_p10), 576, %s417_s7 }
  0x85   : > { %s3445_s9 = scalar_lea.vmem (!%p3983_p10), [#allocation2], %s2764_s8  ;;  %s3447_s11 = scalar_lea.vmem (!%p3983_p10), [#allocation3], %s2764_s8 }
  0x89   : > { %3088 = dma.done.wait (%p3984_p0), %s424_s10, 9216  }
  0x8a   : > { %3090 = vsyncadd (%p3984_p0), %s424_s10, 4294958080  ;;  %p3985_p5 = scmp.ne.s32.totalorder %s3977_s26, 0 }
  0x8c   : > { %3092 = dma.done.wait (%p3985_p5), [#allocation6], 2048  }
  0x8d   : > { %3094 = vsyncadd (%p3985_p5), [#allocation6], 4294965248  ;;  %p2289_p2 = scmp.ne.s32.totalorder %s3109_s18, 0 }
  0x8e   : > { %v3125_v16 = vmov (!%p2289_p2), 0.0  }
  0x8f   : > { %474 = sbr.rel (%p2289_p2) target bundleno = 151 (0x97), region = 74  ;;  %475 = vst [vmem:[%s3970_s4] sm:$0xff] (!%p2289_p2), %v3125_v16  ;;  %476 = vst [vmem:[%s3970_s4 + $0x8] sm:$0xff] (!%p2289_p2), %v3125_v16 }
  0x90   : > { %477 = vst [vmem:[%s3970_s4 + $0x10] sm:$0xff] (!%p2289_p2), %v3125_v16  ;;  %478 = vst [vmem:[%s3970_s4 + $0x18] sm:$0xff] (!%p2289_p2), %v3125_v16 }
  0x91   : > { %479 = vst [vmem:[%s3970_s4 + $0x20] sm:$0xff] (!%p2289_p2), %v3125_v16  ;;  %480 = vst [vmem:[%s3970_s4 + $0x28] sm:$0xff] (!%p2289_p2), %v3125_v16 }
  0x92   : > { %481 = vst [vmem:[%s3970_s4 + $0x30] sm:$0xff] (!%p2289_p2), %v3125_v16  ;;  %482 = vst [vmem:[%s3970_s4 + $0x38] sm:$0xff] (!%p2289_p2), %v3125_v16 }
  0x93   : > { %483 = vst [vmem:[%s3970_s4 + $0x40] sm:$0xff] (!%p2289_p2), %v3125_v16  ;;  %484 = vst [vmem:[%s3970_s4 + $0x48] sm:$0xff] (!%p2289_p2), %v3125_v16 }
  0x94   : > { %485 = vst [vmem:[%s3970_s4 + $0x50] sm:$0xff] (!%p2289_p2), %v3125_v16  ;;  %486 = vst [vmem:[%s3970_s4 + $0x58] sm:$0xff] (!%p2289_p2), %v3125_v16 }
  0x95   : > { %487 = vst [vmem:[%s3970_s4 + $0x60] sm:$0xff] (!%p2289_p2), %v3125_v16  ;;  %488 = vst [vmem:[%s3970_s4 + $0x68] sm:$0xff] (!%p2289_p2), %v3125_v16 }
  0x96   : > { %489 = vst [vmem:[%s3970_s4 + $0x70] sm:$0xff] %v3125_v16  ;;  %490 = vst [vmem:[%s3970_s4 + $0x78] sm:$0xff] %v3125_v16 }
  0x97 PF: > { %v2831_v17 = vld [vmem:[%s3447_s11 + $0x40] sm:$0xff]   ;;  %v2835_v21 = vld [vmem:[%s3447_s11 + $0x48] sm:$0xff]   ;;  %v2839_v25 = vld [vmem:[%s3447_s11 + $0x50] sm:$0xff]   ;;  %p2434_p4 = scmp.ne.s32.totalorder %s3109_s18, 1 }
  0x98   : > { %v2832_v18 = vld [vmem:[%s3447_s11 + $0xc0] sm:$0xff]   ;;  %2442 = vmatprep.subr.bf16.mxu0 %v2831_v17  ;;  %v2836_v22 = vld [vmem:[%s3447_s11 + $0xc8] sm:$0xff]   ;;  %v2840_v26 = vld [vmem:[%s3447_s11 + $0xd0] sm:$0xff]  }
  0x99   : > { %v2833_v19 = vld [vmem:[%s3447_s11] sm:$0xff]   ;;  %2506 = vmatprep.subr.bf16.mxu1 %v2832_v18  ;;  %v2837_v23 = vld [vmem:[%s3447_s11 + $0x8] sm:$0xff]   ;;  %v2841_v27 = vld [vmem:[%s3447_s11 + $0x10] sm:$0xff]  }
  0x9a   : > { %v2834_v20 = vld [vmem:[%s3447_s11 + $0x80] sm:$0xff]   ;;  %2443 = vmatpush3.bf16.msra.mxu0 %v2833_v19  ;;  %v2838_v24 = vld [vmem:[%s3447_s11 + $0x88] sm:$0xff]   ;;  %v2842_v28 = vld [vmem:[%s3447_s11 + $0x90] sm:$0xff]  }
  0x9b   : > { %2507 = vmatpush3.bf16.msra.mxu1 %v2834_v20  ;;  %2444 = vmatprep.subr.bf16.mxu0 %v2835_v21  ;;  %v2843_v29 = vld [vmem:[%s3447_s11 + $0x58] sm:$0xff]   ;;  %v2847_v33 = vld [vmem:[%s3447_s11 + $0x60] sm:$0xff]   ;;  %v2851_v37 = vld [vmem:[%s3447_s11 + $0x68] sm:$0xff]  }
  0x9c   : > { %2508 = vmatprep.subr.bf16.mxu1 %v2836_v22  ;;  %v2844_v30 = vld [vmem:[%s3447_s11 + $0xd8] sm:$0xff]   ;;  %v2848_v34 = vld [vmem:[%s3447_s11 + $0xe0] sm:$0xff]   ;;  %v2852_v38 = vld [vmem:[%s3447_s11 + $0xe8] sm:$0xff]  }
  0x9d   : > { %v2845_v31 = vld [vmem:[%s3447_s11 + $0x18] sm:$0xff]   ;;  %v2849_v35 = vld [vmem:[%s3447_s11 + $0x20] sm:$0xff]   ;;  %v2853_v39 = vld [vmem:[%s3447_s11 + $0x28] sm:$0xff]  }
  0x9e   : > { %2445 = vmatpush3.bf16.msra.mxu0 %v2837_v23  ;;  %v2846_v32 = vld [vmem:[%s3447_s11 + $0x98] sm:$0xff]   ;;  %v2850_v36 = vld [vmem:[%s3447_s11 + $0xa0] sm:$0xff]   ;;  %v2854_v40 = vld [vmem:[%s3447_s11 + $0xa8] sm:$0xff]  }
  0x9f   : > { %2509 = vmatpush3.bf16.msra.mxu1 %v2838_v24  ;;  %2446 = vmatprep.subr.bf16.mxu0 %v2839_v25  ;;  %v2855_v41 = vld [vmem:[%s3447_s11 + $0x70] sm:$0xff]   ;;  %v2859_v45 = vld [vmem:[%s3447_s11 + $0x78] sm:$0xff]   ;;  %v2863_v49 = vld [vmem:[%s3445_s9] ss:$36 sps:$4 sm:$0xff]  }
  0xa0   : > { %2510 = vmatprep.subr.bf16.mxu1 %v2840_v26  ;;  %v2856_v42 = vld [vmem:[%s3447_s11 + $0xf0] sm:$0xff]   ;;  %v2860_v46 = vld [vmem:[%s3447_s11 + $0xf8] sm:$0xff]   ;;  %v2865_v50 = vld [vmem:[%s3445_s9 + $0x4] ss:$36 sps:$4 sm:$0xff]  }
  0xa1   : > { %v2857_v43 = vld [vmem:[%s3447_s11 + $0x30] sm:$0xff]   ;;  %v2861_v47 = vld [vmem:[%s3447_s11 + $0x38] sm:$0xff]   ;;  %v2866_v51 = vld [vmem:[%s3445_s9 + $0x8] ss:$36 sps:$4 sm:$0xff]   ;;  %1563 = vmatprep.mubr.bf16.mxu0 %v2865_v50 }
  0xa2   : > { %2447 = vmatpush3.bf16.msra.mxu0 %v2841_v27  ;;  %v2858_v44 = vld [vmem:[%s3447_s11 + $0xb0] sm:$0xff]   ;;  %v2862_v48 = vld [vmem:[%s3447_s11 + $0xb8] sm:$0xff]   ;;  %v2869_v53 = vld [vmem:[%s3447_s11 + $0x140] sm:$0xff]  }
  0xa3   : > { %2511 = vmatpush3.bf16.msra.mxu1 %v2842_v28  ;;  %2448 = vmatprep.subr.bf16.mxu0 %v2843_v29  ;;  %v2868_v52 = vld [vmem:[%s3445_s9 + $0xc] ss:$36 sps:$4 sm:$0xff]   ;;  %v2870_v54 = vld [vmem:[%s3447_s11 + $0x1c0] sm:$0xff]   ;;  %v2875_v58 = vld [vmem:[%s3445_s9 + $0x54] ss:$36 sps:$4 sm:$0xff]  }
  0xa4   : > { %2512 = vmatprep.subr.bf16.mxu1 %v2844_v30  ;;  %1660 = vmatprep.mubr.bf16.mxu1 %v2868_v52  ;;  %v2871_v55 = vld [vmem:[%s3447_s11 + $0x100] sm:$0xff]   ;;  %v2873_v57 = vld [vmem:[%s3445_s9 + $0x4c] ss:$36 sps:$4 sm:$0xff]   ;;  %v2883_v1 = vld [vmem:[%s3445_s9 + $0x94] ss:$36 sps:$4 sm:$0xff]  }
  0xa5   : > { %v2872_v56 = vld [vmem:[%s3447_s11 + $0x180] sm:$0xff]   ;;  %v2877_v59 = vld [vmem:[%s3445_s9 + $0x48] ss:$36 sps:$4 sm:$0xff]   ;;  %v2878_v60 = vld [vmem:[%s3445_s9 + $0x50] ss:$36 sps:$4 sm:$0xff]  }
  0xa6   : > { %2449 = vmatpush3.bf16.msra.mxu0 %v2845_v31  ;;  %v2879_v61 = vld [vmem:[%s3447_s11 + $0x148] sm:$0xff]   ;;  %v2885_v2 = vld [vmem:[%s3445_s9 + $0x9c] ss:$36 sps:$4 sm:$0xff]   ;;  %v2887_v3 = vld [vmem:[%s3445_s9 + $0x90] ss:$36 sps:$4 sm:$0xff]  }
  0xa7   : > { %2513 = vmatpush3.bf16.msra.mxu1 %v2846_v32  ;;  %2450 = vmatprep.subr.bf16.mxu0 %v2847_v33  ;;  %v2880_v62 = vld [vmem:[%s3447_s11 + $0x1c8] sm:$0xff]   ;;  %v2888_v4 = vld [vmem:[%s3445_s9 + $0x98] ss:$36 sps:$4 sm:$0xff]   ;;  %v2889_v5 = vld [vmem:[%s3447_s11 + $0x150] sm:$0xff]  }
  0xa8   : > { %2514 = vmatprep.subr.bf16.mxu1 %v2848_v34  ;;  %v2881_v63 = vld [vmem:[%s3447_s11 + $0x108] sm:$0xff]   ;;  %v2890_v6 = vld [vmem:[%s3447_s11 + $0x1d0] sm:$0xff]   ;;  %v2893_v9 = vld [vmem:[%s3445_s9 + $0xdc] ss:$36 sps:$4 sm:$0xff]  }
  0xa9   : > { %v2882_v0 = vld [vmem:[%s3447_s11 + $0x188] sm:$0xff]   ;;  %v2891_v7 = vld [vmem:[%s3447_s11 + $0x110] sm:$0xff]   ;;  %v2897_v11 = vld [vmem:[%s3445_s9 + $0xd8] ss:$36 sps:$4 sm:$0xff]  }
  0xaa   : > { %2451 = vmatpush3.bf16.msra.mxu0 %v2849_v35  ;;  %v2892_v8 = vld [vmem:[%s3447_s11 + $0x190] sm:$0xff]   ;;  %v2895_v10 = vld [vmem:[%s3445_s9 + $0xe4] ss:$36 sps:$4 sm:$0xff]   ;;  %v2899_v13 = vld [vmem:[%s3447_s11 + $0x158] sm:$0xff]  }
  0xab   : > { %2515 = vmatpush3.bf16.msra.mxu1 %v2850_v36  ;;  %2452 = vmatprep.subr.bf16.mxu0 %v2851_v37  ;;  %v2898_v12 = vld [vmem:[%s3445_s9 + $0xe0] ss:$36 sps:$4 sm:$0xff]   ;;  %v2900_v14 = vld [vmem:[%s3447_s11 + $0x1d8] sm:$0xff]   ;;  %v2905_v18 = vld [vmem:[%s3445_s9 + $0x12c] ss:$36 sps:$4 sm:$0xff]  }
  0xac   : > { %2516 = vmatprep.subr.bf16.mxu1 %v2852_v38  ;;  %v2901_v15 = vld [vmem:[%s3447_s11 + $0x118] sm:$0xff]   ;;  %v2903_v17 = vld [vmem:[%s3445_s9 + $0x124] ss:$36 sps:$4 sm:$0xff]   ;;  %v2913_v25 = vld [vmem:[%s3445_s9 + $0x16c] ss:$36 sps:$4 sm:$0xff]  }
  0xad   : > { %v2902_v16 = vld [vmem:[%s3447_s11 + $0x198] sm:$0xff]   ;;  %v2907_v19 = vld [vmem:[%s3445_s9 + $0x120] ss:$36 sps:$4 sm:$0xff]   ;;  %v2908_v21 = vld [vmem:[%s3445_s9 + $0x128] ss:$36 sps:$4 sm:$0xff]  }
  0xae   : > { %2453 = vmatpush3.bf16.msra.mxu0 %v2853_v39  ;;  %v2909_v20 = vld [vmem:[%s3447_s11 + $0x160] sm:$0xff]   ;;  %v2915_v26 = vld [vmem:[%s3445_s9 + $0x174] ss:$36 sps:$4 sm:$0xff]   ;;  %v2919_v27 = vld [vmem:[%s3447_s11 + $0x168] sm:$0xff]  }
  0xaf   : > { %2517 = vmatpush3.bf16.msra.mxu1 %v2854_v40  ;;  %2454 = vmatprep.subr.bf16.mxu0 %v2855_v41  ;;  %v2910_v22 = vld [vmem:[%s3447_s11 + $0x1e0] sm:$0xff]   ;;  %v2920_v28 = vld [vmem:[%s3447_s11 + $0x1e8] sm:$0xff]   ;;  %v2918_v32 = vld [vmem:[%s3445_s9 + $0x170] ss:$36 sps:$4 sm:$0xff]  }
  0xb0   : > { %2518 = vmatprep.subr.bf16.mxu1 %v2856_v42  ;;  %v2911_v23 = vld [vmem:[%s3447_s11 + $0x120] sm:$0xff]   ;;  %v2917_v29 = vld [vmem:[%s3445_s9 + $0x168] ss:$36 sps:$4 sm:$0xff]   ;;  %v2923_v33 = vld [vmem:[%s3445_s9 + $0x1b4] ss:$36 sps:$4 sm:$0xff]  }
  0xb1   : > { %v2912_v24 = vld [vmem:[%s3447_s11 + $0x1a0] sm:$0xff]   ;;  %v2921_v30 = vld [vmem:[%s3447_s11 + $0x128] sm:$0xff]   ;;  %v2929_v35 = vld [vmem:[%s3447_s11 + $0x170] sm:$0xff]  }
  0xb2   : > { %2455 = vmatpush3.bf16.msra.mxu0 %v2857_v43  ;;  %v2922_v31 = vld [vmem:[%s3447_s11 + $0x1a8] sm:$0xff]   ;;  %v2925_v34 = vld [vmem:[%s3445_s9 + $0x1bc] ss:$36 sps:$4 sm:$0xff]   ;;  %v2930_v36 = vld [vmem:[%s3447_s11 + $0x1f0] sm:$0xff]  }
  0xb3   : > { %2519 = vmatpush3.bf16.msra.mxu1 %v2858_v44  ;;  %2456 = vmatprep.subr.bf16.mxu0 %v2859_v45  ;;  %v2931_v37 = vld [vmem:[%s3447_s11 + $0x130] sm:$0xff]   ;;  %v2928_v40 = vld [vmem:[%s3445_s9 + $0x1b8] ss:$36 sps:$4 sm:$0xff]   ;;  %v2935_v42 = vld [vmem:[%s3445_s9 + $0x204] ss:$36 sps:$4 sm:$0xff]  }
  0xb4   : > { %2520 = vmatprep.subr.bf16.mxu1 %v2860_v46  ;;  %v2932_v38 = vld [vmem:[%s3447_s11 + $0x1b0] sm:$0xff]   ;;  %v2933_v41 = vld [vmem:[%s3445_s9 + $0x1fc] ss:$36 sps:$4 sm:$0xff]  }
  0xb5   : > { %v2927_v39 = vld [vmem:[%s3445_s9 + $0x1b0] ss:$36 sps:$4 sm:$0xff]   ;;  %v2939_v43 = vld [vmem:[%s3447_s11 + $0x178] sm:$0xff]  }
  0xb6   : > { %2457 = vmatpush3.bf16.msra.mxu0 %v2861_v47  ;;  %v2940_v44 = vld [vmem:[%s3447_s11 + $0x1f8] sm:$0xff]   ;;  %v2943_v52 = vld [vmem:[%s3445_s9 + $0x10] ss:$36 sps:$4 sm:$0xff]  }
  0xb7   : > { %2521 = vmatpush3.bf16.msra.mxu1 %v2862_v48  ;;  %2570 = vmatprep.subr.bf16.mxu0 %v2869_v53  ;;  %v2941_v45 = vld [vmem:[%s3447_s11 + $0x138] sm:$0xff]   ;;  %v2938_v48 = vld [vmem:[%s3445_s9 + $0x200] ss:$36 sps:$4 sm:$0xff]  }
  0xb8   : > { %2634 = vmatprep.subr.bf16.mxu1 %v2870_v54  ;;  %v2942_v46 = vld [vmem:[%s3447_s11 + $0x1b8] sm:$0xff]  }
  0xb9   : > { %1564 = vmatmul.mubr.bf16.vlgmr.msra.gmra.mrb[0].mxu0 %v2863_v49  ;;  %v2937_v47 = vld [vmem:[%s3445_s9 + $0x1f8] ss:$36 sps:$4 sm:$0xff]   ;;  %v2949_v49 = vld [vmem:[%s3447_s11 + $0x200] sm:$0xff]  }
  0xba   : > { %1661 = vmatmul.mubr.bf16.vlgmr.msra.gmra.mrb[0].mxu1 %v2866_v51  ;;  %2571 = vmatpush3.bf16.msra.mxu0 %v2871_v55  ;;  %v2945_v50 = vld [vmem:[%s3445_s9 + $0x14] ss:$36 sps:$4 sm:$0xff]   ;;  %v2948_v51 = vld [vmem:[%s3445_s9 + $0x1c] ss:$36 sps:$4 sm:$0xff]   ;;  %v2952_v55 = vld [vmem:[%s3445_s9 + $0x64] ss:$36 sps:$4 sm:$0xff]  }
  0xbb   : > { %2635 = vmatpush3.bf16.msra.mxu1 %v2872_v56  ;;  %1571 = vmatprep.mubr.bf16.mxu0 %v2873_v57  ;;  %v2946_v53 = vld [vmem:[%s3445_s9 + $0x18] ss:$36 sps:$4 sm:$0xff]   ;;  %v2956_v56 = vld [vmem:[%s3447_s11 + $0x208] sm:$0xff]   ;;  %v2963_v57 = vld [vmem:[%s3447_s11 + $0x210] sm:$0xff]  }
  0xbc   : > { %1668 = vmatprep.mubr.bf16.mxu1 %v2875_v58  ;;  %2572 = vmatprep.subr.bf16.mxu0 %v2879_v61  ;;  %v2950_v54 = vld [vmem:[%s3445_s9 + $0x5c] ss:$36 sps:$4 sm:$0xff]   ;;  %v2959_v61 = vld [vmem:[%s3445_s9 + $0xac] ss:$36 sps:$4 sm:$0xff]  }
  0xbd   : > { %2636 = vmatprep.subr.bf16.mxu1 %v2880_v62  ;;  %v2954_v58 = vld [vmem:[%s3445_s9 + $0x58] ss:$36 sps:$4 sm:$0xff]  }
  0xbe   : > { %2573 = vmatpush3.bf16.msra.mxu0 %v2881_v63  ;;  %v2970_v62 = vld [vmem:[%s3447_s11 + $0x218] sm:$0xff]   ;;  %v2977_v63 = vld [vmem:[%s3447_s11 + $0x220] sm:$0xff]  }
  0xbf   : > { %2637 = vmatpush3.bf16.msra.mxu1 %v2882_v0  ;;  %2574 = vmatprep.subr.bf16.mxu0 %v2889_v5  ;;  %v2961_v0 = vld [vmem:[%s3445_s9 + $0xa0] ss:$36 sps:$4 sm:$0xff]   ;;  %v2968_v5 = vld [vmem:[%s3445_s9 + $0xe8] ss:$36 sps:$4 sm:$0xff]  }
  0xc0   : > { %2638 = vmatprep.subr.bf16.mxu1 %v2890_v6  ;;  %v2991_v6 = vld [vmem:[%s3447_s11 + $0x230] sm:$0xff]  }
  0xc1   : > { %1572 = vmatmul.mubr.bf16.gmra.mrb[4].mxu0 %v2877_v59  ;;  %v2955_v59 = vld [vmem:[%s3445_s9 + $0x60] ss:$36 sps:$4 sm:$0xff]  }
  0xc2   : > { %1669 = vmatmul.mubr.bf16.gmra.mrb[4].mxu1 %v2878_v60  ;;  %1579 = vmatprep.mubr.bf16.mxu0 %v2883_v1  ;;  %v2957_v60 = vld [vmem:[%s3445_s9 + $0xa4] ss:$36 sps:$4 sm:$0xff]  }
  0xc3   : > { %1676 = vmatprep.mubr.bf16.mxu1 %v2885_v2  ;;  %2575 = vmatpush3.bf16.msra.mxu0 %v2891_v7  ;;  %v2962_v1 = vld [vmem:[%s3445_s9 + $0xa8] ss:$36 sps:$4 sm:$0xff]   ;;  %v2969_v7 = vld [vmem:[%s3445_s9 + $0xf0] ss:$36 sps:$4 sm:$0xff]  }
  0xc4   : > { %2639 = vmatpush3.bf16.msra.mxu1 %v2892_v8  ;;  %2576 = vmatprep.subr.bf16.mxu0 %v2899_v13  ;;  %v2964_v2 = vld [vmem:[%s3445_s9 + $0xec] ss:$36 sps:$4 sm:$0xff]   ;;  %v2971_v8 = vld [vmem:[%s3445_s9 + $0x134] ss:$36 sps:$4 sm:$0xff]   ;;  %v2978_v13 = vld [vmem:[%s3445_s9 + $0x17c] ss:$36 sps:$4 sm:$0xff]  }
  0xc5   : > { %2640 = vmatprep.subr.bf16.mxu1 %v2900_v14  ;;  %v2980_v14 = vld [vmem:[%s3445_s9 + $0x184] ss:$36 sps:$4 sm:$0xff]  }
  0xc7   : > { %2577 = vmatpush3.bf16.msra.mxu0 %v2901_v15  ;;  %v2982_v15 = vld [vmem:[%s3445_s9 + $0x178] ss:$36 sps:$4 sm:$0xff]  }
  0xc8   : > { %2641 = vmatpush3.bf16.msra.mxu1 %v2902_v16  ;;  %2578 = vmatprep.subr.bf16.mxu0 %v2909_v20  ;;  %v2983_v16 = vld [vmem:[%s3445_s9 + $0x180] ss:$36 sps:$4 sm:$0xff]   ;;  %v2990_v20 = vld [vmem:[%s3445_s9 + $0x1c8] ss:$36 sps:$4 sm:$0xff]  }
  0xc9   : > { %1580 = vmatmul.mubr.bf16.gmra.mrb[8].mxu0 %v2887_v3  ;;  %2642 = vmatprep.subr.bf16.mxu1 %v2910_v22  ;;  %v2966_v3 = vld [vmem:[%s3445_s9 + $0xf4] ss:$36 sps:$4 sm:$0xff]  }
  0xca   : > { %1677 = vmatmul.mubr.bf16.gmra.mrb[8].mxu1 %v2888_v4  ;;  %1587 = vmatprep.mubr.bf16.mxu0 %v2893_v9  ;;  %v2984_v4 = vld [vmem:[%s3447_s11 + $0x228] sm:$0xff]   ;;  %v2973_v9 = vld [vmem:[%s3445_s9 + $0x13c] ss:$36 sps:$4 sm:$0xff]   ;;  %v2994_v22 = vld [vmem:[%s3445_s9 + $0x214] ss:$36 sps:$4 sm:$0xff]  }
  0xcb   : > { %1684 = vmatprep.mubr.bf16.mxu1 %v2895_v10  ;;  %2579 = vmatpush3.bf16.msra.mxu0 %v2911_v23  ;;  %v2998_v10 = vld [vmem:[%s3447_s11 + $0x238] sm:$0xff]   ;;  %v2996_v23 = vld [vmem:[%s3445_s9 + $0x208] ss:$36 sps:$4 sm:$0xff]  }
  0xcc   : > { %2643 = vmatpush3.bf16.msra.mxu1 %v2912_v24  ;;  %2580 = vmatprep.subr.bf16.mxu0 %v2919_v27  ;;  %v2997_v24 = vld [vmem:[%s3445_s9 + $0x210] ss:$36 sps:$4 sm:$0xff]   ;;  %v3001_v27 = vld [vmem:[%s3445_s9 + $0x68] ss:$36 sps:$4 sm:$0xff]  }
  0xcd   : > { %2644 = vmatprep.subr.bf16.mxu1 %v2920_v28  ;;  %v3002_v28 = vld [vmem:[%s3445_s9 + $0x188] ss:$36 sps:$4 sm:$0xff]  }
  0xcf   : > { %2581 = vmatpush3.bf16.msra.mxu0 %v2921_v30  ;;  %v3004_v30 = vld [vmem:[%s3445_s9 + $0x1d0] ss:$36 sps:$4 sm:$0xff]  }
  0xd0   : > { %2645 = vmatpush3.bf16.msra.mxu1 %v2922_v31  ;;  %2582 = vmatprep.subr.bf16.mxu0 %v2929_v35  ;;  %v3005_v31 = vld [vmem:[%s3445_s9 + $0xf8] ss:$36 sps:$4 sm:$0xff]  }
  0xd1   : > { %1588 = vmatmul.mubr.bf16.gmra.mrb[12].mxu0 %v2897_v11  ;;  %2646 = vmatprep.subr.bf16.mxu1 %v2930_v36  ;;  %v2975_v11 = vld [vmem:[%s3445_s9 + $0x130] ss:$36 sps:$4 sm:$0xff]  }
  0xd2   : > { %1685 = vmatmul.mubr.bf16.gmra.mrb[12].mxu1 %v2898_v12  ;;  %1595 = vmatprep.mubr.bf16.mxu0 %v2903_v17  ;;  %v2976_v12 = vld [vmem:[%s3445_s9 + $0x138] ss:$36 sps:$4 sm:$0xff]   ;;  %v2985_v17 = vld [vmem:[%s3445_s9 + $0x1c4] ss:$36 sps:$4 sm:$0xff]  }
  0xd3   : > { %1692 = vmatprep.mubr.bf16.mxu1 %v2905_v18  ;;  %2583 = vmatpush3.bf16.msra.mxu0 %v2931_v37  ;;  %v2987_v18 = vld [vmem:[%s3445_s9 + $0x1cc] ss:$36 sps:$4 sm:$0xff]  }
  0xd4   : > { %2647 = vmatpush3.bf16.msra.mxu1 %v2932_v38  ;;  %2584 = vmatprep.subr.bf16.mxu0 %v2939_v43 }
  0xd5   : > { %2648 = vmatprep.subr.bf16.mxu1 %v2940_v44 }
  0xd7   : > { %2585 = vmatpush3.bf16.msra.mxu0 %v2941_v45 }
  0xd8   : > { %2649 = vmatpush3.bf16.msra.mxu1 %v2942_v46  ;;  %2714 = vmatprep.subr.bf16.mxu0 %v2949_v49 }
  0xd9   : > { %1596 = vmatmul.mubr.bf16.gmra.mrb[16].mxu0 %v2907_v19  ;;  %2746 = vmatprep.subr.bf16.mxu1 %v2949_v49  ;;  %v2989_v19 = vld [vmem:[%s3445_s9 + $0x1c0] ss:$36 sps:$4 sm:$0xff]  }
  0xda   : > { %1693 = vmatmul.mubr.bf16.gmra.mrb[16].mxu1 %v2908_v21  ;;  %1603 = vmatprep.mubr.bf16.mxu0 %v2913_v25  ;;  %v2992_v21 = vld [vmem:[%s3445_s9 + $0x20c] ss:$36 sps:$4 sm:$0xff]   ;;  %v2999_v25 = vld [vmem:[%s3445_s9 + $0x20] ss:$36 sps:$4 sm:$0xff]  }
  0xdb   : > { %1700 = vmatprep.mubr.bf16.mxu1 %v2915_v26  ;;  %v3000_v26 = vld [vmem:[%s3445_s9 + $0x140] ss:$36 sps:$4 sm:$0xff]  }
  0xe1   : > { %1604 = vmatmul.mubr.bf16.gmra.mrb[20].mxu0 %v2917_v29  ;;  %v3003_v29 = vld [vmem:[%s3445_s9 + $0xb0] ss:$36 sps:$4 sm:$0xff]  }
  0xe2   : > { %1701 = vmatmul.mubr.bf16.gmra.mrb[20].mxu1 %v2918_v32  ;;  %1611 = vmatprep.mubr.bf16.mxu0 %v2923_v33  ;;  %v3006_v32 = vld [vmem:[%s3445_s9 + $0x218] ss:$36 sps:$4 sm:$0xff]  }
  0xe3   : > { %1708 = vmatprep.mubr.bf16.mxu1 %v2925_v34 }
  0xe9   : > { %1612 = vmatmul.mubr.bf16.gmra.mrb[24].mxu0 %v2927_v39 }
  0xea   : > { %1709 = vmatmul.mubr.bf16.gmra.mrb[24].mxu1 %v2928_v40  ;;  %1619 = vmatprep.mubr.bf16.mxu0 %v2933_v41 }
  0xeb   : > { %1716 = vmatprep.mubr.bf16.mxu1 %v2935_v42 }
  0xf1   : > { %1620 = vmatmul.mubr.bf16.gmra.mrb[28].mxu0 %v2937_v47 }
  0xf2   : > { %1717 = vmatmul.mubr.bf16.gmra.mrb[28].mxu1 %v2938_v48  ;;  %1757 = vmatprep.mubr.bf16.mxu0 %v2945_v50 }
  0xf3   : > { %1854 = vmatprep.mubr.bf16.mxu1 %v2948_v51 }
  0xf9   : > { %1758 = vmatmul.mubr.bf16.vlgmr.msra.gmra.mrb[32].mxu0 %v2943_v52 }
  0xfa   : > { %1855 = vmatmul.mubr.bf16.vlgmr.msra.gmra.mrb[32].mxu1 %v2946_v53  ;;  %2715 = vmatpush3.bf16.msra.mxu0 %v2949_v49 }
  0xfb   : > { %2754 = vmatpush3.bf16.msra.mxu1 %v2949_v49  ;;  %1765 = vmatprep.mubr.bf16.mxu0 %v2950_v54 }
  0xfc   : > { %1862 = vmatprep.mubr.bf16.mxu1 %v2952_v55  ;;  %2716 = vmatprep.subr.bf16.mxu0 %v2956_v56 }
  0xfd   : > { %2747 = vmatprep.subr.bf16.mxu1 %v2956_v56 }
  0xfe   : > { %2717 = vmatpush3.bf16.msra.mxu0 %v2956_v56 }
  0xff   : > { %2755 = vmatpush3.bf16.msra.mxu1 %v2956_v56  ;;  %2718 = vmatprep.subr.bf16.mxu0 %v2963_v57 }
 0x100   : > { %2748 = vmatprep.subr.bf16.mxu1 %v2963_v57 }
 0x101   : > { %1766 = vmatmul.mubr.bf16.gmra.mrb[36].mxu0 %v2954_v58 }
 0x102   : > { %1863 = vmatmul.mubr.bf16.gmra.mrb[36].mxu1 %v2955_v59  ;;  %1773 = vmatprep.mubr.bf16.mxu0 %v2957_v60 }
 0x103   : > { %1870 = vmatprep.mubr.bf16.mxu1 %v2959_v61  ;;  %2719 = vmatpush3.bf16.msra.mxu0 %v2963_v57 }
 0x104   : > { %2756 = vmatpush3.bf16.msra.mxu1 %v2963_v57  ;;  %2720 = vmatprep.subr.bf16.mxu0 %v2970_v62 }
 0x105   : > { %2749 = vmatprep.subr.bf16.mxu1 %v2970_v62 }
 0x107   : > { %2721 = vmatpush3.bf16.msra.mxu0 %v2970_v62 }
 0x108   : > { %2757 = vmatpush3.bf16.msra.mxu1 %v2970_v62  ;;  %2722 = vmatprep.subr.bf16.mxu0 %v2977_v63 }
 0x109   : > { %1774 = vmatmul.mubr.bf16.gmra.mrb[40].mxu0 %v2961_v0  ;;  %2750 = vmatprep.subr.bf16.mxu1 %v2977_v63 }
 0x10a   : > { %1871 = vmatmul.mubr.bf16.gmra.mrb[40].mxu1 %v2962_v1  ;;  %1781 = vmatprep.mubr.bf16.mxu0 %v2964_v2 }
 0x10b   : > { %1878 = vmatprep.mubr.bf16.mxu1 %v2966_v3  ;;  %2723 = vmatpush3.bf16.msra.mxu0 %v2977_v63 }
 0x10c   : > { %2758 = vmatpush3.bf16.msra.mxu1 %v2977_v63  ;;  %2724 = vmatprep.subr.bf16.mxu0 %v2984_v4 }
 0x10d   : > { %2751 = vmatprep.subr.bf16.mxu1 %v2984_v4 }
 0x10f   : > { %2725 = vmatpush3.bf16.msra.mxu0 %v2984_v4 }
 0x110   : > { %2759 = vmatpush3.bf16.msra.mxu1 %v2984_v4  ;;  %2726 = vmatprep.subr.bf16.mxu0 %v2991_v6 }
 0x111   : > { %1782 = vmatmul.mubr.bf16.gmra.mrb[44].mxu0 %v2968_v5  ;;  %2752 = vmatprep.subr.bf16.mxu1 %v2991_v6 }
 0x112   : > { %1879 = vmatmul.mubr.bf16.gmra.mrb[44].mxu1 %v2969_v7  ;;  %1789 = vmatprep.mubr.bf16.mxu0 %v2971_v8 }
 0x113   : > { %1886 = vmatprep.mubr.bf16.mxu1 %v2973_v9  ;;  %2727 = vmatpush3.bf16.msra.mxu0 %v2991_v6 }
 0x114   : > { %2760 = vmatpush3.bf16.msra.mxu1 %v2991_v6  ;;  %2728 = vmatprep.subr.bf16.mxu0 %v2998_v10 }
 0x115   : > { %2753 = vmatprep.subr.bf16.mxu1 %v2998_v10 }
 0x117   : > { %2729 = vmatpush3.bf16.msra.mxu0 %v2998_v10 }
 0x118   : > { %2761 = vmatpush3.bf16.msra.mxu1 %v2998_v10 }
 0x119   : > { %1790 = vmatmul.mubr.bf16.gmra.mrb[48].mxu0 %v2975_v11 }
 0x11a   : > { %1887 = vmatmul.mubr.bf16.gmra.mrb[48].mxu1 %v2976_v12  ;;  %1797 = vmatprep.mubr.bf16.mxu0 %v2978_v13 }
 0x11b   : > { %1894 = vmatprep.mubr.bf16.mxu1 %v2980_v14 }
 0x121   : > { %1798 = vmatmul.mubr.bf16.gmra.mrb[52].mxu0 %v2982_v15 }
 0x122   : > { %1895 = vmatmul.mubr.bf16.gmra.mrb[52].mxu1 %v2983_v16  ;;  %1805 = vmatprep.mubr.bf16.mxu0 %v2985_v17 }
 0x123   : > { %1902 = vmatprep.mubr.bf16.mxu1 %v2987_v18 }
 0x129   : > { %1806 = vmatmul.mubr.bf16.gmra.mrb[56].mxu0 %v2989_v19 }
 0x12a   : > { %1903 = vmatmul.mubr.bf16.gmra.mrb[56].mxu1 %v2990_v20  ;;  %1813 = vmatprep.mubr.bf16.mxu0 %v2992_v21 }
 0x12b   : > { %1910 = vmatprep.mubr.bf16.mxu1 %v2994_v22 }
 0x131   : > { %1814 = vmatmul.mubr.bf16.gmra.mrb[60].mxu0 %v2996_v23 }
 0x132   : > { %1911 = vmatmul.mubr.bf16.gmra.mrb[60].mxu1 %v2997_v24  ;;  %2730 = vmatprep.mubr.bf16.mxu0 %v2999_v25 }
 0x133   : > { %2738 = vmatprep.mubr.bf16.mxu1 %v3000_v26 }
 0x139   : > { %2731 = vmatmul.mubr.bf16.vlgmr.msra.gmra.mrb[64].mxu0 %v3001_v27 }
 0x13a   : > { %2739 = vmatmul.mubr.bf16.vlgmr.msra.gmra.mrb[64].mxu1 %v3002_v28  ;;  %2734 = vmatprep.mubr.bf16.mxu0 %v3003_v29 }
 0x13b   : > { %2742 = vmatprep.mubr.bf16.mxu1 %v3004_v30 }
 0x141   : > { %2735 = vmatmul.mubr.bf16.gmra.mrb[68].mxu0 %v3005_v31 }
 0x142   : > { %2743 = vmatmul.mubr.bf16.gmra.mrb[68].mxu1 %v3006_v32 }
 0x18c   : > { %v2458_v33 = vpop.f32.mrb[0].mxu0 }
 0x18d   : > { %v2522_v34 = vpop.f32.mrb[0].mxu1  ;;  %v2459_v35 = vpop.f32.mrb[1].mxu0 }
 0x18e   : > { %v2460_v36 = vadd.f32 %v2459_v35, %v2458_v33  ;;  %v2523_v37 = vpop.f32.mrb[1].mxu1  ;;  %v2461_v38 = vpop.f32.mrb[2].mxu0 }
 0x18f   : > { %v2524_v39 = vadd.f32 %v2523_v37, %v2522_v34  ;;  %v2525_v40 = vpop.f32.mrb[2].mxu1  ;;  %v2462_v41 = vpop.f32.mrb[3].mxu0 }
 0x190   : > { %v2463_v42 = vadd.f32 %v2462_v41, %v2461_v38  ;;  %v2526_v43 = vpop.f32.mrb[3].mxu1 }
 0x191   : > { %v3650_v44 = vadd.f32 %v2524_v39, %v2460_v36  ;;  %v2527_v45 = vadd.f32 %v2526_v43, %v2525_v40 }
 0x193   : > { %v3652_v46 = vadd.f32 %v2527_v45, %v2463_v42 }
 0x194   : > { %v2464_v47 = vpop.f32.mrb[4].mxu0 }
 0x195   : > { %v2528_v48 = vpop.f32.mrb[4].mxu1  ;;  %v2465_v49 = vpop.f32.mrb[5].mxu0 }
 0x196   : > { %v2466_v50 = vadd.f32 %v2465_v49, %v2464_v47  ;;  %v2529_v51 = vpop.f32.mrb[5].mxu1  ;;  %v2467_v52 = vpop.f32.mrb[6].mxu0 }
 0x197   : > { %v2530_v53 = vadd.f32 %v2529_v51, %v2528_v48  ;;  %v2531_v54 = vpop.f32.mrb[6].mxu1  ;;  %v2468_v55 = vpop.f32.mrb[7].mxu0 }
 0x198   : > { %v2469_v56 = vadd.f32 %v2468_v55, %v2467_v52  ;;  %v2532_v57 = vpop.f32.mrb[7].mxu1 }
 0x199   : > { %v3654_v58 = vadd.f32 %v2530_v53, %v2466_v50  ;;  %v2533_v59 = vadd.f32 %v2532_v57, %v2531_v54 }
 0x19b   : > { %v3656_v60 = vadd.f32 %v2533_v59, %v2469_v56 }
 0x19c   : > { %v2470_v61 = vpop.f32.mrb[8].mxu0 }
 0x19d   : > { %v2534_v62 = vpop.f32.mrb[8].mxu1  ;;  %v2471_v63 = vpop.f32.mrb[9].mxu0 }
 0x19e   : > { %v2472_v0 = vadd.f32 %v2471_v63, %v2470_v61  ;;  %v2535_v1 = vpop.f32.mrb[9].mxu1  ;;  %v2473_v2 = vpop.f32.mrb[10].mxu0 }
 0x19f   : > { %v2536_v3 = vadd.f32 %v2535_v1, %v2534_v62  ;;  %v2537_v4 = vpop.f32.mrb[10].mxu1  ;;  %v2474_v5 = vpop.f32.mrb[11].mxu0 }
 0x1a0   : > { %v2475_v6 = vadd.f32 %v2474_v5, %v2473_v2  ;;  %v2538_v7 = vpop.f32.mrb[11].mxu1 }
 0x1a1   : > { %v3658_v8 = vadd.f32 %v2536_v3, %v2472_v0  ;;  %v2539_v9 = vadd.f32 %v2538_v7, %v2537_v4 }
 0x1a3   : > { %v3660_v10 = vadd.f32 %v2539_v9, %v2475_v6 }
 0x1a4   : > { %v2476_v11 = vpop.f32.mrb[12].mxu0 }
 0x1a5   : > { %v2540_v12 = vpop.f32.mrb[12].mxu1  ;;  %v2477_v13 = vpop.f32.mrb[13].mxu0 }
 0x1a6   : > { %v2478_v14 = vadd.f32 %v2477_v13, %v2476_v11  ;;  %v2541_v15 = vpop.f32.mrb[13].mxu1  ;;  %v2479_v16 = vpop.f32.mrb[14].mxu0 }
 0x1a7   : > { %v2542_v17 = vadd.f32 %v2541_v15, %v2540_v12  ;;  %v2543_v18 = vpop.f32.mrb[14].mxu1  ;;  %v2480_v19 = vpop.f32.mrb[15].mxu0 }
 0x1a8   : > { %v2481_v20 = vadd.f32 %v2480_v19, %v2479_v16  ;;  %v2544_v21 = vpop.f32.mrb[15].mxu1 }
 0x1a9   : > { %v3662_v22 = vadd.f32 %v2542_v17, %v2478_v14  ;;  %v2545_v23 = vadd.f32 %v2544_v21, %v2543_v18 }
 0x1ab   : > { %v3664_v24 = vadd.f32 %v2545_v23, %v2481_v20 }
 0x1ac   : > { %v2482_v25 = vpop.f32.mrb[16].mxu0 }
 0x1ad   : > { %v2546_v26 = vpop.f32.mrb[16].mxu1  ;;  %v2483_v27 = vpop.f32.mrb[17].mxu0 }
 0x1ae   : > { %v2484_v28 = vadd.f32 %v2483_v27, %v2482_v25  ;;  %v2547_v29 = vpop.f32.mrb[17].mxu1  ;;  %v2485_v30 = vpop.f32.mrb[18].mxu0 }
 0x1af   : > { %v2548_v31 = vadd.f32 %v2547_v29, %v2546_v26  ;;  %v2549_v32 = vpop.f32.mrb[18].mxu1  ;;  %v2486_v33 = vpop.f32.mrb[19].mxu0 }
 0x1b0   : > { %v2487_v34 = vadd.f32 %v2486_v33, %v2485_v30  ;;  %v2550_v35 = vpop.f32.mrb[19].mxu1 }
 0x1b1   : > { %v3666_v36 = vadd.f32 %v2548_v31, %v2484_v28  ;;  %v2551_v37 = vadd.f32 %v2550_v35, %v2549_v32 }
 0x1b3   : > { %v3668_v38 = vadd.f32 %v2551_v37, %v2487_v34 }
 0x1b4   : > { %v2488_v39 = vpop.f32.mrb[20].mxu0 }
 0x1b5   : > { %v2552_v40 = vpop.f32.mrb[20].mxu1  ;;  %v2489_v41 = vpop.f32.mrb[21].mxu0 }
 0x1b6   : > { %v2490_v42 = vadd.f32 %v2489_v41, %v2488_v39  ;;  %v2553_v43 = vpop.f32.mrb[21].mxu1  ;;  %v2491_v45 = vpop.f32.mrb[22].mxu0 }
 0x1b7   : > { %v2554_v47 = vadd.f32 %v2553_v43, %v2552_v40  ;;  %v2555_v48 = vpop.f32.mrb[22].mxu1  ;;  %v2492_v49 = vpop.f32.mrb[23].mxu0 }
 0x1b8   : > { %v2493_v50 = vadd.f32 %v2492_v49, %v2491_v45  ;;  %v2556_v51 = vpop.f32.mrb[23].mxu1 }
 0x1b9   : > { %v3670_v52 = vadd.f32 %v2554_v47, %v2490_v42  ;;  %v2557_v53 = vadd.f32 %v2556_v51, %v2555_v48 }
 0x1bb   : > { %v3672_v54 = vadd.f32 %v2557_v53, %v2493_v50 }
 0x1bc   : > { %v2494_v55 = vpop.f32.mrb[24].mxu0 }
 0x1bd   : > { %v2558_v56 = vpop.f32.mrb[24].mxu1  ;;  %v2495_v57 = vpop.f32.mrb[25].mxu0 }
 0x1be   : > { %v2496_v59 = vadd.f32 %v2495_v57, %v2494_v55  ;;  %v2559_v61 = vpop.f32.mrb[25].mxu1  ;;  %v2497_v62 = vpop.f32.mrb[26].mxu0 }
 0x1bf   : > { %v2560_v63 = vadd.f32 %v2559_v61, %v2558_v56  ;;  %v2561_v0 = vpop.f32.mrb[26].mxu1  ;;  %v2498_v1 = vpop.f32.mrb[27].mxu0 }
 0x1c0   : > { %v2499_v2 = vadd.f32 %v2498_v1, %v2497_v62  ;;  %v2562_v3 = vpop.f32.mrb[27].mxu1 }
 0x1c1   : > { %v3674_v4 = vadd.f32 %v2560_v63, %v2496_v59  ;;  %v2563_v5 = vadd.f32 %v2562_v3, %v2561_v0 }
 0x1c3   : > { %v3676_v6 = vadd.f32 %v2563_v5, %v2499_v2 }
 0x1c4   : > { %v2500_v7 = vpop.f32.mrb[28].mxu0 }
 0x1c5   : > { %v2564_v9 = vpop.f32.mrb[28].mxu1  ;;  %v2501_v11 = vpop.f32.mrb[29].mxu0 }
 0x1c6   : > { %v2502_v12 = vadd.f32 %v2501_v11, %v2500_v7  ;;  %v2565_v13 = vpop.f32.mrb[29].mxu1  ;;  %v2503_v14 = vpop.f32.mrb[30].mxu0 }
 0x1c7   : > { %v2566_v15 = vadd.f32 %v2565_v13, %v2564_v9  ;;  %v2567_v16 = vpop.f32.mrb[30].mxu1  ;;  %v2504_v17 = vpop.f32.mrb[31].mxu0 }
 0x1c8   : > { %v2505_v18 = vadd.f32 %v2504_v17, %v2503_v14  ;;  %v2568_v19 = vpop.f32.mrb[31].mxu1 }
 0x1c9   : > { %v3678_v20 = vadd.f32 %v2566_v15, %v2502_v12  ;;  %v2569_v21 = vadd.f32 %v2568_v19, %v2567_v16 }
 0x1cb   : > { %v3680_v23 = vadd.f32 %v2569_v21, %v2505_v18 }
 0x1cc   : > { %v2586_v25 = vpop.f32.mrb[32].mxu0 }
 0x1cd   : > { %v2650_v26 = vpop.f32.mrb[32].mxu1  ;;  %v2587_v27 = vpop.f32.mrb[33].mxu0 }
 0x1ce   : > { %v2588_v28 = vadd.f32 %v2587_v27, %v2586_v25  ;;  %v2651_v29 = vpop.f32.mrb[33].mxu1  ;;  %v2589_v30 = vpop.f32.mrb[34].mxu0 }
 0x1cf   : > { %v2652_v31 = vadd.f32 %v2651_v29, %v2650_v26  ;;  %v2653_v32 = vpop.f32.mrb[34].mxu1  ;;  %v2590_v33 = vpop.f32.mrb[35].mxu0 }
 0x1d0   : > { %v1760_v34 = vadd.f32 %v2588_v28, %v3650_v44  ;;  %v2591_v35 = vadd.f32 %v2590_v33, %v2589_v30  ;;  %v2654_v37 = vpop.f32.mrb[35].mxu1 }
 0x1d1   : > { %v2655_v39 = vadd.f32 %v2654_v37, %v2653_v32 }
 0x1d2   : > { %v1763_v40 = vadd.f32 %v2591_v35, %v3652_v46  ;;  %v3684_v41 = vadd.f32 %v2652_v31, %v1760_v34 }
 0x1d4   : > { %v2592_v42 = vpop.f32.mrb[36].mxu0  ;;  %v3686_v43 = vadd.f32 %v2655_v39, %v1763_v40 }
 0x1d5   : > { %v2656_v45 = vpop.f32.mrb[36].mxu1  ;;  %v2593_v47 = vpop.f32.mrb[37].mxu0 }
 0x1d6   : > { %v2594_v48 = vadd.f32 %v2593_v47, %v2592_v42  ;;  %v2657_v49 = vpop.f32.mrb[37].mxu1  ;;  %v2595_v50 = vpop.f32.mrb[38].mxu0 }
 0x1d7   : > { %v2658_v51 = vadd.f32 %v2657_v49, %v2656_v45  ;;  %v2659_v53 = vpop.f32.mrb[38].mxu1  ;;  %v2596_v55 = vpop.f32.mrb[39].mxu0 }
 0x1d8   : > { %v1768_v44 = vadd.f32 %v2594_v48, %v3654_v58  ;;  %v2597_v56 = vadd.f32 %v2596_v55, %v2595_v50  ;;  %v2660_v57 = vpop.f32.mrb[39].mxu1 }
 0x1d9   : > { %v2661_v59 = vadd.f32 %v2660_v57, %v2659_v53 }
 0x1da   : > { %v1771_v46 = vadd.f32 %v2597_v56, %v3656_v60  ;;  %v3690_v61 = vadd.f32 %v2658_v51, %v1768_v44 }
 0x1dc   : > { %v2598_v62 = vpop.f32.mrb[40].mxu0  ;;  %v3692_v63 = vadd.f32 %v2661_v59, %v1771_v46 }
 0x1dd   : > { %v2662_v0 = vpop.f32.mrb[40].mxu1  ;;  %v2599_v1 = vpop.f32.mrb[41].mxu0 }
 0x1de   : > { %v2600_v2 = vadd.f32 %v2599_v1, %v2598_v62  ;;  %v2663_v3 = vpop.f32.mrb[41].mxu1  ;;  %v2601_v5 = vpop.f32.mrb[42].mxu0 }
 0x1df   : > { %v2664_v7 = vadd.f32 %v2663_v3, %v2662_v0  ;;  %v2665_v9 = vpop.f32.mrb[42].mxu1  ;;  %v2602_v11 = vpop.f32.mrb[43].mxu0 }
 0x1e0   : > { %v1776_v58 = vadd.f32 %v2600_v2, %v3658_v8  ;;  %v2603_v12 = vadd.f32 %v2602_v11, %v2601_v5  ;;  %v2666_v13 = vpop.f32.mrb[43].mxu1 }
 0x1e1   : > { %v2667_v14 = vadd.f32 %v2666_v13, %v2665_v9 }
 0x1e2   : > { %v1779_v60 = vadd.f32 %v2603_v12, %v3660_v10  ;;  %v3696_v15 = vadd.f32 %v2664_v7, %v1776_v58 }
 0x1e4   : > { %v2604_v16 = vpop.f32.mrb[44].mxu0  ;;  %v3698_v17 = vadd.f32 %v2667_v14, %v1779_v60 }
 0x1e5   : > { %v2668_v18 = vpop.f32.mrb[44].mxu1  ;;  %v2605_v19 = vpop.f32.mrb[45].mxu0 }
 0x1e6   : > { %v2606_v21 = vadd.f32 %v2605_v19, %v2604_v16  ;;  %v2669_v25 = vpop.f32.mrb[45].mxu1  ;;  %v2607_v26 = vpop.f32.mrb[46].mxu0 }
 0x1e7   : > { %v2670_v27 = vadd.f32 %v2669_v25, %v2668_v18  ;;  %v2671_v28 = vpop.f32.mrb[46].mxu1  ;;  %v2608_v29 = vpop.f32.mrb[47].mxu0 }
 0x1e8   : > { %v1784_v8 = vadd.f32 %v2606_v21, %v3662_v22  ;;  %v2609_v30 = vadd.f32 %v2608_v29, %v2607_v26  ;;  %v2672_v31 = vpop.f32.mrb[47].mxu1 }
 0x1e9   : > { %v2673_v32 = vadd.f32 %v2672_v31, %v2671_v28 }
 0x1ea   : > { %v1787_v10 = vadd.f32 %v2609_v30, %v3664_v24  ;;  %v3702_v33 = vadd.f32 %v2670_v27, %v1784_v8 }
 0x1ec   : > { %v2610_v34 = vpop.f32.mrb[48].mxu0  ;;  %v3704_v35 = vadd.f32 %v2673_v32, %v1787_v10 }
 0x1ed   : > { %v2674_v37 = vpop.f32.mrb[48].mxu1  ;;  %v2611_v39 = vpop.f32.mrb[49].mxu0 }
 0x1ee   : > { %v2612_v40 = vadd.f32 %v2611_v39, %v2610_v34  ;;  %v2675_v42 = vpop.f32.mrb[49].mxu1  ;;  %v2613_v45 = vpop.f32.mrb[50].mxu0 }
 0x1ef   : > { %v2676_v47 = vadd.f32 %v2675_v42, %v2674_v37  ;;  %v2677_v48 = vpop.f32.mrb[50].mxu1  ;;  %v2614_v49 = vpop.f32.mrb[51].mxu0 }
 0x1f0   : > { %v1792_v22 = vadd.f32 %v2612_v40, %v3666_v36  ;;  %v2615_v50 = vadd.f32 %v2614_v49, %v2613_v45  ;;  %v2678_v51 = vpop.f32.mrb[51].mxu1 }
 0x1f1   : > { %v2679_v53 = vadd.f32 %v2678_v51, %v2677_v48 }
 0x1f2   : > { %v1795_v24 = vadd.f32 %v2615_v50, %v3668_v38  ;;  %v3708_v55 = vadd.f32 %v2676_v47, %v1792_v22  ;;  %v493_v22 = vld [vmem:[%s3970_s4 + $0x10] sm:$0xff] }
 0x1f4   : > { %v2616_v44 = vpop.f32.mrb[52].mxu0  ;;  %v3710_v56 = vadd.f32 %v2679_v53, %v1795_v24  ;;  %v501_v24 = vld [vmem:[%s3970_s4 + $0x50] sm:$0xff] }
 0x1f5   : > { %v2680_v57 = vpop.f32.mrb[52].mxu1  ;;  %v2617_v59 = vpop.f32.mrb[53].mxu0 }
 0x1f6   : > { %v2618_v46 = vadd.f32 %v2617_v59, %v2616_v44  ;;  %v2681_v62 = vpop.f32.mrb[53].mxu1  ;;  %v2619_v0 = vpop.f32.mrb[54].mxu0 }
 0x1f7   : > { %v2682_v1 = vadd.f32 %v2681_v62, %v2680_v57  ;;  %v2683_v2 = vpop.f32.mrb[54].mxu1  ;;  %v2620_v3 = vpop.f32.mrb[55].mxu0 }
 0x1f8   : > { %v1800_v36 = vadd.f32 %v2618_v46, %v3670_v52  ;;  %v2621_v5 = vadd.f32 %v2620_v3, %v2619_v0  ;;  %v2684_v7 = vpop.f32.mrb[55].mxu1  ;;  %v499_v46 = vld [vmem:[%s3970_s4 + $0x40] sm:$0xff] }
 0x1f9   : > { %v2685_v9 = vadd.f32 %v2684_v7, %v2683_v2 }
 0x1fa   : > { %v1803_v38 = vadd.f32 %v2621_v5, %v3672_v54  ;;  %v1897_v11 = vadd.f32 %v2682_v1, %v1800_v36  ;;  %v502_v36 = vld [vmem:[%s3970_s4 + $0x58] sm:$0xff]  ;;  %v492_v5 = vld [vmem:[%s3970_s4 + $0x8] sm:$0xff] }
 0x1fc   : > { %v2622_v58 = vpop.f32.mrb[56].mxu0  ;;  %v1900_v12 = vadd.f32 %v2685_v9, %v1803_v38 }
 0x1fd   : > { %v2686_v13 = vpop.f32.mrb[56].mxu1  ;;  %v2623_v14 = vpop.f32.mrb[57].mxu0 }
 0x1fe   : > { %v2624_v60 = vadd.f32 %v2623_v14, %v2622_v58  ;;  %v2687_v16 = vpop.f32.mrb[57].mxu1  ;;  %v2625_v18 = vpop.f32.mrb[58].mxu0 }
 0x1ff   : > { %v2688_v19 = vadd.f32 %v2687_v16, %v2686_v13  ;;  %v2689_v21 = vpop.f32.mrb[58].mxu1  ;;  %v2626_v25 = vpop.f32.mrb[59].mxu0 }
 0x200   : > { %v1808_v26 = vadd.f32 %v2624_v60, %v3674_v4  ;;  %v2627_v27 = vadd.f32 %v2626_v25, %v2625_v18  ;;  %v2690_v52 = vpop.f32.mrb[59].mxu1 }
 0x201   : > { %v2691_v28 = vadd.f32 %v2690_v52, %v2689_v21  ;;  %v505_v21 = vld [vmem:[%s3970_s4 + $0x70] sm:$0xff] }
 0x202   : > { %v1811_v29 = vadd.f32 %v2627_v27, %v3676_v6  ;;  %v3716_v8 = vadd.f32 %v2688_v19, %v1808_v26  ;;  %v495_v26 = vld [vmem:[%s3970_s4 + $0x20] sm:$0xff] }
 0x204   : > { %v2628_v54 = vpop.f32.mrb[60].mxu0  ;;  %v3718_v30 = vadd.f32 %v2691_v28, %v1811_v29  ;;  %v503_v29 = vld [vmem:[%s3970_s4 + $0x60] sm:$0xff] }
 0x205   : > { %v2692_v31 = vpop.f32.mrb[60].mxu1  ;;  %v2629_v32 = vpop.f32.mrb[61].mxu0 }
 0x206   : > { %v2630_v10 = vadd.f32 %v2629_v32, %v2628_v54  ;;  %v2693_v34 = vpop.f32.mrb[61].mxu1  ;;  %v2631_v37 = vpop.f32.mrb[62].mxu0 }
 0x207   : > { %v2694_v39 = vadd.f32 %v2693_v34, %v2692_v31  ;;  %v2695_v40 = vpop.f32.mrb[62].mxu1  ;;  %v2632_v42 = vpop.f32.mrb[63].mxu0 }
 0x208   : > { %v1816_v4 = vadd.f32 %v2630_v10, %v3678_v20  ;;  %v2633_v45 = vadd.f32 %v2632_v42, %v2631_v37  ;;  %v2696_v47 = vpop.f32.mrb[63].mxu1  ;;  %v491_v20 = vld [vmem:[%s3970_s4] sm:$0xff]  ;;  %v506_v37 = vld [vmem:[%s3970_s4 + $0x78] sm:$0xff] }
 0x209   : > { %v2697_v48 = vadd.f32 %v2696_v47, %v2695_v40 }
 0x20a   : > { %v1819_v6 = vadd.f32 %v2633_v45, %v3680_v23  ;;  %v1913_v49 = vadd.f32 %v2694_v39, %v1816_v4  ;;  %v496_v39 = vld [vmem:[%s3970_s4 + $0x28] sm:$0xff] }
 0x20c   : > { %v2732_v50 = vpop.f32.mrb[64].mxu0  ;;  %v1916_v51 = vadd.f32 %v2697_v48, %v1819_v6 }
 0x20d   : > { %v1962_v53 = vadd.f32 %v2732_v50, %v3690_v61  ;;  %v2740_v44 = vpop.f32.mrb[64].mxu1  ;;  %v1953_v57 = vpop.f32.mrb[65].mxu0  ;;  %v494_v61 = vld [vmem:[%s3970_s4 + $0x18] sm:$0xff] }
 0x20e   : > { %v1994_v23 = vadd.f32 %v2740_v44, %v1897_v11  ;;  %v1954_v59 = vadd.f32 %v1953_v57, %v3684_v41  ;;  %v1985_v62 = vpop.f32.mrb[65].mxu1  ;;  %v2733_v0 = vpop.f32.mrb[66].mxu0 }
 0x20f   : > { %v2018_v1 = vadd.f32 %v1962_v53, %v493_v22  ;;  %v1986_v2 = vadd.f32 %v1985_v62, %v3708_v55  ;;  %v1965_v3 = vadd.f32 %v2733_v0, %v3692_v63  ;;  %v2741_v41 = vpop.f32.mrb[66].mxu1  ;;  %v1956_v7 = vpop.f32.mrb[67].mxu0  ;;  %v500_v55 = vld [vmem:[%s3970_s4 + $0x48] sm:$0xff]  ;;  %v2091_v53 = vld [vmem:[#allocation5] sm:$0xff] (!%p2434_p4) }
 0x210   : > { %v2026_v9 = vadd.f32 %v1994_v23, %v501_v24  ;;  %v2016_v38 = vadd.f32 %v1954_v59, %v491_v20  ;;  %v1997_v11 = vadd.f32 %v2741_v41, %v1900_v12  ;;  %v1957_v58 = vadd.f32 %v1956_v7, %v3686_v43  ;;  %v1988_v63 = vpop.f32.mrb[67].mxu1  ;;  %v2092_v20 = vld [vmem:[#allocation5 + $0x8] sm:$0xff] (!%p2434_p4) }
 0x211   : > { %2034 = vst [vmem:[%s3970_s4 + $0x10] sm:$0xff] %v2018_v1  ;;  %v2024_v13 = vadd.f32 %v1986_v2, %v499_v46  ;;  %v2019_v14 = vadd.f32 %v1965_v3, %v494_v61  ;;  %v1989_v60 = vadd.f32 %v1988_v63, %v3710_v56  ;;  %v497_v56 = vld [vmem:[%s3970_s4 + $0x30] sm:$0xff]  ;;  %v2094_v61 = vld [vmem:[#allocation5 + $0x18] sm:$0xff] (!%p2434_p4)  ;;  %v2095_v3 = vld [vmem:[#allocation5 + $0x20] sm:$0xff] (!%p2434_p4) }
 0x212   : > { %2042 = vst [vmem:[%s3970_s4 + $0x50] sm:$0xff] %v2026_v9  ;;  %2032 = vst [vmem:[%s3970_s4] sm:$0xff] %v2016_v38  ;;  %v2027_v43 = vadd.f32 %v1997_v11, %v502_v36  ;;  %v2017_v12 = vadd.f32 %v1957_v58, %v492_v5  ;;  %v2093_v46 = vld [vmem:[#allocation5 + $0x10] sm:$0xff] (!%p2434_p4)  ;;  %v2096_v38 = vld [vmem:[#allocation5 + $0x28] sm:$0xff] (!%p2434_p4) }
 0x213   : > { %2040 = vst [vmem:[%s3970_s4 + $0x40] sm:$0xff] %v2024_v13  ;;  %2035 = vst [vmem:[%s3970_s4 + $0x18] sm:$0xff] %v2019_v14  ;;  %v2025_v16 = vadd.f32 %v1989_v60, %v500_v55  ;;  %v2097_v58 = vld [vmem:[#allocation5 + $0x30] sm:$0xff] (!%p2434_p4)  ;;  %v2098_v14 = vld [vmem:[#allocation5 + $0x38] sm:$0xff] (!%p2434_p4) }
 0x214   : > { %2043 = vst [vmem:[%s3970_s4 + $0x58] sm:$0xff] %v2027_v43  ;;  %2033 = vst [vmem:[%s3970_s4 + $0x8] sm:$0xff] %v2017_v12  ;;  %v2736_v18 = vpop.f32.mrb[68].mxu0 }
 0x215   : > { %2041 = vst [vmem:[%s3970_s4 + $0x48] sm:$0xff] %v2025_v16  ;;  %v1978_v19 = vadd.f32 %v2736_v18, %v3702_v33  ;;  %v2744_v25 = vpop.f32.mrb[68].mxu1  ;;  %v1969_v27 = vpop.f32.mrb[69].mxu0  ;;  %v498_v33 = vld [vmem:[%s3970_s4 + $0x38] sm:$0xff]  ;;  %v2099_v18 = vld [vmem:[#allocation5 + $0x40] sm:$0xff] (!%p2434_p4) }
 0x216   : > { %v2010_v52 = vadd.f32 %v2744_v25, %v1913_v49  ;;  %v1970_v28 = vadd.f32 %v1969_v27, %v3696_v15  ;;  %v2001_v54 = vpop.f32.mrb[69].mxu1  ;;  %v2737_v31 = vpop.f32.mrb[70].mxu0 }
 0x217   : > { %v2022_v32 = vadd.f32 %v1978_v19, %v497_v56  ;;  %v2002_v10 = vadd.f32 %v2001_v54, %v3716_v8  ;;  %v1981_v34 = vadd.f32 %v2737_v31, %v3704_v35  ;;  %v2745_v15 = vpop.f32.mrb[70].mxu1  ;;  %v1972_v40 = vpop.f32.mrb[71].mxu0  ;;  %v504_v8 = vld [vmem:[%s3970_s4 + $0x68] sm:$0xff]  ;;  %2051 = sbr.rel (%p2434_p4) target bundleno = 554 (0x22a), region = 78 }
 0x218   : > { %v2030_v42 = vadd.f32 %v2010_v52, %v505_v21  ;;  %v2020_v4 = vadd.f32 %v1970_v28, %v495_v26  ;;  %v2013_v45 = vadd.f32 %v2745_v15, %v1916_v51  ;;  %v1973_v47 = vadd.f32 %v1972_v40, %v3698_v17  ;;  %v2004_v35 = vpop.f32.mrb[71].mxu1  ;;  %v3837_v51 = vld [vmem:[%s3968_s2] ss:$0 sm:$0xff] (!%p2434_p4)  ;;  %v2054_v57 = vld [vmem:[%s3970_s4 + $0x10] sm:$0xff] (!%p2434_p4)  ;;  %v2100_v21 = vld [vmem:[#allocation5 + $0x48] sm:$0xff] (!%p2434_p4) }
 0x219   : > { %2038 = vst [vmem:[%s3970_s4 + $0x30] sm:$0xff] %v2022_v32  ;;  %v2028_v48 = vadd.f32 %v2002_v10, %v503_v29  ;;  %v2023_v6 = vadd.f32 %v1981_v34, %v498_v33  ;;  %v2005_v49 = vadd.f32 %v2004_v35, %v3718_v30  ;;  %v2052_v30 = vld [vmem:[%s3970_s4] sm:$0xff] (!%p2434_p4)  ;;  %v2077_v59 = vadd.f32 (!%p2434_p4), %v3837_v51, %v2054_v57  ;;  %v2062_v27 = vld [vmem:[%s3970_s4 + $0x50] sm:$0xff] (!%p2434_p4)  ;;  %v2102_v32 = vld [vmem:[#allocation5 + $0x58] sm:$0xff] (!%p2434_p4) }
 0x21a   : > { %2046 = vst [vmem:[%s3970_s4 + $0x70] sm:$0xff] %v2030_v42  ;;  %2036 = vst [vmem:[%s3970_s4 + $0x20] sm:$0xff] %v2020_v4  ;;  %v2031_v17 = vadd.f32 %v2013_v45, %v506_v37  ;;  %v2021_v22 = vadd.f32 %v1973_v47, %v496_v39  ;;  %v2075_v24 = vadd.f32 (!%p2434_p4), %v3837_v51, %v2052_v30  ;;  %v2055_v62 = vld [vmem:[%s3970_s4 + $0x18] sm:$0xff] (!%p2434_p4)  ;;  %v2060_v60 = vld [vmem:[%s3970_s4 + $0x40] sm:$0xff] (!%p2434_p4) }
 0x21b   : > { %2044 = vst [vmem:[%s3970_s4 + $0x60] sm:$0xff] %v2028_v48  ;;  %2039 = vst [vmem:[%s3970_s4 + $0x38] sm:$0xff] %v2023_v6  ;;  %v2029_v50 = vadd.f32 %v2005_v49, %v504_v8  ;;  %v2053_v44 = vld [vmem:[%s3970_s4 + $0x8] sm:$0xff] (!%p2434_p4)  ;;  %v2078_v1 = vadd.f32 (!%p2434_p4), %v3837_v51, %v2055_v62  ;;  %v2109_v5 = vadd.f32 (!%p2434_p4), %v2093_v46, %v2077_v59  ;;  %v2101_v52 = vld [vmem:[#allocation5 + $0x50] sm:$0xff] (!%p2434_p4) }
 0x21c   : > { %2047 = vst [vmem:[%s3970_s4 + $0x78] sm:$0xff] %v2031_v17  ;;  %2037 = vst [vmem:[%s3970_s4 + $0x28] sm:$0xff] %v2021_v22  ;;  %v2076_v23 = vadd.f32 (!%p2434_p4), %v3837_v51, %v2053_v44  ;;  %v2107_v0 = vadd.f32 (!%p2434_p4), %v2091_v53, %v2075_v24  ;;  %v2083_v56 = vadd.f32 (!%p2434_p4), %v3837_v51, %v2060_v60  ;;  %v2061_v19 = vld [vmem:[%s3970_s4 + $0x48] sm:$0xff] (!%p2434_p4)  ;;  %v2063_v28 = vld [vmem:[%s3970_s4 + $0x58] sm:$0xff] (!%p2434_p4) }
 0x21d   : > { %2045 = vst [vmem:[%s3970_s4 + $0x68] sm:$0xff] %v2029_v50  ;;  %v2110_v55 = vadd.f32 (!%p2434_p4), %v2094_v61, %v2078_v1  ;;  %2125 = vst [vmem:[%s3970_s4 + $0x10] sm:$0xff] (!%p2434_p4), %v2109_v5  ;;  %v2084_v26 = vadd.f32 (!%p2434_p4), %v3837_v51, %v2061_v19  ;;  %v2085_v33 = vadd.f32 (!%p2434_p4), %v3837_v51, %v2062_v27  ;;  %v2103_v34 = vld [vmem:[#allocation5 + $0x60] sm:$0xff] (!%p2434_p4)  ;;  %v2104_v40 = vld [vmem:[#allocation5 + $0x68] sm:$0xff] (!%p2434_p4) }
 0x21e   : > { %v2108_v41 = vadd.f32 %v2092_v20, %v2076_v23  ;;  %2123 = vst [vmem:[%s3970_s4] sm:$0xff] %v2107_v0  ;;  %v2115_v54 = vadd.f32 %v2099_v18, %v2083_v56  ;;  %v2086_v31 = vadd.f32 %v3837_v51, %v2063_v28  ;;  %v2105_v35 = vld [vmem:[#allocation5 + $0x70] sm:$0xff]  ;;  %v2106_v6 = vld [vmem:[#allocation5 + $0x78] sm:$0xff] }
 0x21f   : > { %2126 = vst [vmem:[%s3970_s4 + $0x18] sm:$0xff] %v2110_v55  ;;  %v2116_v37 = vadd.f32 %v2100_v21, %v2084_v26  ;;  %v2117_v4 = vadd.f32 %v2101_v52, %v2085_v33 }
 0x220   : > { %v2058_v11 = vld [vmem:[%s3970_s4 + $0x30] sm:$0xff]  ;;  %2124 = vst [vmem:[%s3970_s4 + $0x8] sm:$0xff] %v2108_v41  ;;  %2131 = vst [vmem:[%s3970_s4 + $0x40] sm:$0xff] %v2115_v54  ;;  %v2118_v45 = vadd.f32 %v2102_v32, %v2086_v31 }
 0x221   : > { %v2056_v2 = vld [vmem:[%s3970_s4 + $0x20] sm:$0xff]  ;;  %v2081_v63 = vadd.f32 %v3837_v51, %v2058_v11  ;;  %v2066_v42 = vld [vmem:[%s3970_s4 + $0x70] sm:$0xff]  ;;  %2132 = vst [vmem:[%s3970_s4 + $0x48] sm:$0xff] %v2116_v37  ;;  %2133 = vst [vmem:[%s3970_s4 + $0x50] sm:$0xff] %v2117_v4 }
 0x222   : > { %v2079_v7 = vadd.f32 %v3837_v51, %v2056_v2  ;;  %v2059_v13 = vld [vmem:[%s3970_s4 + $0x38] sm:$0xff]  ;;  %v2064_v10 = vld [vmem:[%s3970_s4 + $0x60] sm:$0xff]  ;;  %v2089_v8 = vadd.f32 %v3837_v51, %v2066_v42  ;;  %2134 = vst [vmem:[%s3970_s4 + $0x58] sm:$0xff] %v2118_v45 }
 0x223   : > { %v2057_v36 = vld [vmem:[%s3970_s4 + $0x28] sm:$0xff]  ;;  %v2082_v16 = vadd.f32 %v3837_v51, %v2059_v13  ;;  %v2113_v25 = vadd.f32 %v2097_v58, %v2081_v63  ;;  %v2087_v15 = vadd.f32 %v3837_v51, %v2064_v10  ;;  %v2067_v48 = vld [vmem:[%s3970_s4 + $0x78] sm:$0xff] }
 0x224   : > { %v2080_v9 = vadd.f32 %v3837_v51, %v2057_v36  ;;  %v2111_v43 = vadd.f32 %v2095_v3, %v2079_v7  ;;  %v2065_v39 = vld [vmem:[%s3970_s4 + $0x68] sm:$0xff]  ;;  %v2090_v17 = vadd.f32 %v3837_v51, %v2067_v48  ;;  %v2121_v50 = vadd.f32 %v2105_v35, %v2089_v8 }
 0x225   : > { %v2114_v29 = vadd.f32 %v2098_v14, %v2082_v16  ;;  %2129 = vst [vmem:[%s3970_s4 + $0x30] sm:$0xff] %v2113_v25  ;;  %v2088_v47 = vadd.f32 %v3837_v51, %v2065_v39  ;;  %v2119_v49 = vadd.f32 %v2103_v34, %v2087_v15 }
 0x226   : > { %v2112_v12 = vadd.f32 %v2096_v38, %v2080_v9  ;;  %2127 = vst [vmem:[%s3970_s4 + $0x20] sm:$0xff] %v2111_v43  ;;  %v2122_v30 = vadd.f32 %v2106_v6, %v2090_v17  ;;  %2137 = vst [vmem:[%s3970_s4 + $0x70] sm:$0xff] %v2121_v50 }
 0x227   : > { %2130 = vst [vmem:[%s3970_s4 + $0x38] sm:$0xff] %v2114_v29  ;;  %v2120_v22 = vadd.f32 %v2104_v40, %v2088_v47  ;;  %2135 = vst [vmem:[%s3970_s4 + $0x60] sm:$0xff] %v2119_v49 }
 0x228   : > { %2128 = vst [vmem:[%s3970_s4 + $0x28] sm:$0xff] %v2112_v12  ;;  %2138 = vst [vmem:[%s3970_s4 + $0x78] sm:$0xff] %v2122_v30 }
 0x229   : > { %2136 = vst [vmem:[%s3970_s4 + $0x68] sm:$0xff] %v2120_v22 }
 0x22a PF: > { %s18_s20 = sadd.s32 1, %s3117_s20   ;;  %s3986_s15 = smov %s3101_s16 }
 0x22b   : > { %p15_p6 = scmp.ge.s32.totalorder %s18_s20, 4   ;;  %s3987_s16 = smov %s3105_s17 }
 0x22c   : > { %s3988_s17 = smov %s3207_s28  ;;  %s3989_s18 = smov %s3113_s19 }
 0x22d   : > { %s3990_s19 = smov %s3992_s22  ;;  %17 = sbr.rel (!%p15_p6) target bundleno = 5 (0x5), region = 129 }
 0x234   :  { %2161 = vsyncpa [#allocation4], 1 }
 0x235   :  { %2163 = vsyncpa [#allocation4 + $0x1], 1 }
 0x236   :  { %2164 = vsyncpa [#allocation6], 1 }

// kernel: autoregressive_block.13
= control target key start
LH: loop header
LB: loop body
LE: loop exit
PB: predicated region body
PF: predicated region fallthrough
CT: control target
= control target key end

     0   :  { %9 = vsyncpa [#allocation3], 0  ;;  %s2373_s15 = smov [#allocation2]   ;;  %s2827_s0 = inlined_call_operand.vmem [shape: bf16[128,1152], index: 0, kind: input, shape index: {}]   ;;  %s2828_s1 = inlined_call_operand.hbm [shape: bf16[1152,128], index: 1, kind: input, shape index: {}]   ;;  %s2829_s2 = inlined_call_operand.vmem [shape: f32[1,128], index: 2, kind: input, shape index: {}]   ;;  %s2830_s3 = inlined_call_operand.vmem [shape: f32[128,128], index: 3, kind: input, shape index: {}]   ;;  %s2831_s4 = inlined_call_operand.vmem [shape: f32[128,128], index: 4, kind: output, shape index: {}]  }
   0x1   :  { %s17_s16 = sshll.u32 %s2373_s15, 4  ;;  %s2349_s19 = scalar_lea.hbm %s2828_s1, 9216  ;;  %s18_s16 = int_to_ptr.vmem [resolvable:$true] %s17_s16 }
   0x2   :  { %p2350_p0 = scmp.ne.s32.totalorder %s2828_s1, %s2349_s19  ;;  %p2353_p1 = scmp.lt.u32.totalorder %s2349_s19, %s2828_s1 }
   0x4   :  { %p2355_p2 = pnand %p2353_p1, %p2350_p0 }
   0x6   :  { %2358 = shalt.err (!%p2355_p2)
}
   0x7   :  { %s2359_s24 = scalar_lea.vmem %s18_s16, 9216  ;;  %p2364_p4 = scmp.lt.s32.totalorder %s18_s16, %s18_s16 }
   0x8   :  { %p2360_p3 = scmp.ne.s32.totalorder %s18_s16, %s2359_s24  ;;  %p2365_p5 = scmp.lt.s32.totalorder %s2359_s24, %s2359_s24 }
   0xa   :  { %p2366_p6 = por %p2365_p5, %p2364_p4 }
   0xc   :  { %p2367_p7 = pnand %p2366_p6, %p2360_p3 }
   0xe   :  { %2370 = shalt.err (!%p2367_p7)
}
   0xf   :  { %s2374_s25 = smov 64   ;;  %s2375_s26 = smov 4  }
  0x10   :  { %23 = dma.hbm_to_vmem [thread:$0]  %s2828_s1, 9216, %s18_s16, [#allocation3], %s2374_s25, %s2374_s25, %s2375_s26  }
  0x11   :  { %2371 = dma.done.wait [#allocation3], 9216  }
  0x12   :  { %2372 = vsyncadd [#allocation3], 4294958080  ;;  %v2173_v0 = vld [vmem:[#allocation2 + $0x40] sm:$0xff]   ;;  %v2177_v4 = vld [vmem:[#allocation2 + $0x48] sm:$0xff]  }
  0x13   :  { %v2174_v1 = vld [vmem:[#allocation2 + $0xc0] sm:$0xff]   ;;  %1849 = vmatprep.subr.bf16.mxu0 %v2173_v0  ;;  %v2178_v5 = vld [vmem:[#allocation2 + $0xc8] sm:$0xff]   ;;  %v2181_v8 = vld [vmem:[#allocation2 + $0x50] sm:$0xff]  }
  0x14   :  { %v2175_v2 = vld [vmem:[#allocation2] sm:$0xff]   ;;  %1913 = vmatprep.subr.bf16.mxu1 %v2174_v1  ;;  %v2179_v6 = vld [vmem:[#allocation2 + $0x8] sm:$0xff]   ;;  %v2182_v9 = vld [vmem:[#allocation2 + $0xd0] sm:$0xff]  }
  0x15   :  { %v2176_v3 = vld [vmem:[#allocation2 + $0x80] sm:$0xff]   ;;  %1850 = vmatpush3.bf16.msra.mxu0 %v2175_v2  ;;  %v2180_v7 = vld [vmem:[#allocation2 + $0x88] sm:$0xff]   ;;  %v2183_v10 = vld [vmem:[#allocation2 + $0x10] sm:$0xff]  }
  0x16   :  { %1914 = vmatpush3.bf16.msra.mxu1 %v2176_v3  ;;  %1851 = vmatprep.subr.bf16.mxu0 %v2177_v4  ;;  %v2184_v11 = vld [vmem:[#allocation2 + $0x90] sm:$0xff]   ;;  %v2185_v12 = vld [vmem:[#allocation2 + $0x58] sm:$0xff]   ;;  %v2189_v16 = vld [vmem:[#allocation2 + $0x60] sm:$0xff]  }
  0x17   :  { %1915 = vmatprep.subr.bf16.mxu1 %v2178_v5  ;;  %v2186_v13 = vld [vmem:[#allocation2 + $0xd8] sm:$0xff]   ;;  %v2190_v17 = vld [vmem:[#allocation2 + $0xe0] sm:$0xff]   ;;  %v2193_v20 = vld [vmem:[#allocation2 + $0x68] sm:$0xff]  }
  0x18   :  { %v2187_v14 = vld [vmem:[#allocation2 + $0x18] sm:$0xff]   ;;  %v2191_v18 = vld [vmem:[#allocation2 + $0x20] sm:$0xff]   ;;  %v2194_v21 = vld [vmem:[#allocation2 + $0xe8] sm:$0xff]  }
  0x19   :  { %1852 = vmatpush3.bf16.msra.mxu0 %v2179_v6  ;;  %v2188_v15 = vld [vmem:[#allocation2 + $0x98] sm:$0xff]   ;;  %v2192_v19 = vld [vmem:[#allocation2 + $0xa0] sm:$0xff]   ;;  %v2195_v22 = vld [vmem:[#allocation2 + $0x28] sm:$0xff]  }
  0x1a   :  { %1916 = vmatpush3.bf16.msra.mxu1 %v2180_v7  ;;  %1853 = vmatprep.subr.bf16.mxu0 %v2181_v8  ;;  %v2196_v23 = vld [vmem:[#allocation2 + $0xa8] sm:$0xff]   ;;  %v2197_v24 = vld [vmem:[#allocation2 + $0x70] sm:$0xff]   ;;  %v2201_v28 = vld [vmem:[#allocation2 + $0x78] sm:$0xff]  }
  0x1b   :  { %1917 = vmatprep.subr.bf16.mxu1 %v2182_v9  ;;  %v2198_v25 = vld [vmem:[#allocation2 + $0xf0] sm:$0xff]   ;;  %v2202_v29 = vld [vmem:[#allocation2 + $0xf8] sm:$0xff]   ;;  %v2205_v32 = vld [vmem:[%s2827_s0] ss:$36 sps:$4 sm:$0xff]  }
  0x1c   :  { %v2199_v26 = vld [vmem:[#allocation2 + $0x30] sm:$0xff]   ;;  %v2203_v30 = vld [vmem:[#allocation2 + $0x38] sm:$0xff]   ;;  %v2207_v33 = vld [vmem:[%s2827_s0 + $0x4] ss:$36 sps:$4 sm:$0xff]  }
  0x1d   :  { %1854 = vmatpush3.bf16.msra.mxu0 %v2183_v10  ;;  %v2200_v27 = vld [vmem:[#allocation2 + $0xb0] sm:$0xff]   ;;  %v2204_v31 = vld [vmem:[#allocation2 + $0xb8] sm:$0xff]   ;;  %v2208_v34 = vld [vmem:[%s2827_s0 + $0x8] ss:$36 sps:$4 sm:$0xff]   ;;  %1124 = vmatprep.mubr.bf16.mxu0 %v2207_v33 }
  0x1e   :  { %1918 = vmatpush3.bf16.msra.mxu1 %v2184_v11  ;;  %1855 = vmatprep.subr.bf16.mxu0 %v2185_v12  ;;  %v2210_v35 = vld [vmem:[%s2827_s0 + $0xc] ss:$36 sps:$4 sm:$0xff]   ;;  %v2211_v36 = vld [vmem:[#allocation2 + $0x140] sm:$0xff]   ;;  %v2217_v41 = vld [vmem:[%s2827_s0 + $0x54] ss:$36 sps:$4 sm:$0xff]  }
  0x1f   :  { %1919 = vmatprep.subr.bf16.mxu1 %v2186_v13  ;;  %1221 = vmatprep.mubr.bf16.mxu1 %v2210_v35  ;;  %v2212_v37 = vld [vmem:[#allocation2 + $0x1c0] sm:$0xff]   ;;  %v2215_v40 = vld [vmem:[%s2827_s0 + $0x4c] ss:$36 sps:$4 sm:$0xff]   ;;  %v2225_v48 = vld [vmem:[%s2827_s0 + $0x94] ss:$36 sps:$4 sm:$0xff]  }
  0x20   :  { %v2213_v38 = vld [vmem:[#allocation2 + $0x100] sm:$0xff]   ;;  %v2219_v42 = vld [vmem:[%s2827_s0 + $0x48] ss:$36 sps:$4 sm:$0xff]   ;;  %v2220_v43 = vld [vmem:[%s2827_s0 + $0x50] ss:$36 sps:$4 sm:$0xff]  }
  0x21   :  { %1856 = vmatpush3.bf16.msra.mxu0 %v2187_v14  ;;  %v2214_v39 = vld [vmem:[#allocation2 + $0x180] sm:$0xff]   ;;  %v2221_v44 = vld [vmem:[#allocation2 + $0x148] sm:$0xff]   ;;  %v2229_v50 = vld [vmem:[%s2827_s0 + $0x90] ss:$36 sps:$4 sm:$0xff]  }
  0x22   :  { %1920 = vmatpush3.bf16.msra.mxu1 %v2188_v15  ;;  %1857 = vmatprep.subr.bf16.mxu0 %v2189_v16  ;;  %v2222_v45 = vld [vmem:[#allocation2 + $0x1c8] sm:$0xff]   ;;  %v2227_v49 = vld [vmem:[%s2827_s0 + $0x9c] ss:$36 sps:$4 sm:$0xff]   ;;  %v2231_v52 = vld [vmem:[#allocation2 + $0x150] sm:$0xff]  }
  0x23   :  { %1921 = vmatprep.subr.bf16.mxu1 %v2190_v17  ;;  %v2223_v46 = vld [vmem:[#allocation2 + $0x108] sm:$0xff]   ;;  %v2230_v51 = vld [vmem:[%s2827_s0 + $0x98] ss:$36 sps:$4 sm:$0xff]   ;;  %v2232_v53 = vld [vmem:[#allocation2 + $0x1d0] sm:$0xff]  }
  0x24   :  { %v2224_v47 = vld [vmem:[#allocation2 + $0x188] sm:$0xff]   ;;  %v2233_v54 = vld [vmem:[#allocation2 + $0x110] sm:$0xff]   ;;  %v2235_v56 = vld [vmem:[%s2827_s0 + $0xdc] ss:$36 sps:$4 sm:$0xff]  }
  0x25   :  { %1858 = vmatpush3.bf16.msra.mxu0 %v2191_v18  ;;  %v2234_v55 = vld [vmem:[#allocation2 + $0x190] sm:$0xff]   ;;  %v2237_v57 = vld [vmem:[%s2827_s0 + $0xe4] ss:$36 sps:$4 sm:$0xff]   ;;  %v2239_v58 = vld [vmem:[%s2827_s0 + $0xd8] ss:$36 sps:$4 sm:$0xff]  }
  0x26   :  { %1922 = vmatpush3.bf16.msra.mxu1 %v2192_v19  ;;  %1859 = vmatprep.subr.bf16.mxu0 %v2193_v20  ;;  %v2240_v59 = vld [vmem:[%s2827_s0 + $0xe0] ss:$36 sps:$4 sm:$0xff]   ;;  %v2241_v60 = vld [vmem:[#allocation2 + $0x158] sm:$0xff]   ;;  %v2247_v1 = vld [vmem:[%s2827_s0 + $0x12c] ss:$36 sps:$4 sm:$0xff]  }
  0x27   :  { %1923 = vmatprep.subr.bf16.mxu1 %v2194_v21  ;;  %v2242_v61 = vld [vmem:[#allocation2 + $0x1d8] sm:$0xff]   ;;  %v2245_v0 = vld [vmem:[%s2827_s0 + $0x124] ss:$36 sps:$4 sm:$0xff]   ;;  %v2255_v8 = vld [vmem:[%s2827_s0 + $0x16c] ss:$36 sps:$4 sm:$0xff]  }
  0x28   :  { %v2243_v62 = vld [vmem:[#allocation2 + $0x118] sm:$0xff]   ;;  %v2249_v2 = vld [vmem:[%s2827_s0 + $0x120] ss:$36 sps:$4 sm:$0xff]   ;;  %v2250_v4 = vld [vmem:[%s2827_s0 + $0x128] ss:$36 sps:$4 sm:$0xff]  }
  0x29   :  { %1860 = vmatpush3.bf16.msra.mxu0 %v2195_v22  ;;  %v2244_v63 = vld [vmem:[#allocation2 + $0x198] sm:$0xff]   ;;  %v2251_v3 = vld [vmem:[#allocation2 + $0x160] sm:$0xff]   ;;  %v2261_v10 = vld [vmem:[#allocation2 + $0x168] sm:$0xff]  }
  0x2a   :  { %1924 = vmatpush3.bf16.msra.mxu1 %v2196_v23  ;;  %1861 = vmatprep.subr.bf16.mxu0 %v2197_v24  ;;  %v2252_v5 = vld [vmem:[#allocation2 + $0x1e0] sm:$0xff]   ;;  %v2257_v9 = vld [vmem:[%s2827_s0 + $0x174] ss:$36 sps:$4 sm:$0xff]   ;;  %v2262_v11 = vld [vmem:[#allocation2 + $0x1e8] sm:$0xff]  }
  0x2b   :  { %1925 = vmatprep.subr.bf16.mxu1 %v2198_v25  ;;  %v2253_v6 = vld [vmem:[#allocation2 + $0x120] sm:$0xff]   ;;  %v2259_v12 = vld [vmem:[%s2827_s0 + $0x168] ss:$36 sps:$4 sm:$0xff]   ;;  %v2260_v15 = vld [vmem:[%s2827_s0 + $0x170] ss:$36 sps:$4 sm:$0xff]  }
  0x2c   :  { %v2254_v7 = vld [vmem:[#allocation2 + $0x1a0] sm:$0xff]   ;;  %v2263_v13 = vld [vmem:[#allocation2 + $0x128] sm:$0xff]   ;;  %v2265_v16 = vld [vmem:[%s2827_s0 + $0x1b4] ss:$36 sps:$4 sm:$0xff]  }
  0x2d   :  { %1862 = vmatpush3.bf16.msra.mxu0 %v2199_v26  ;;  %v2264_v14 = vld [vmem:[#allocation2 + $0x1a8] sm:$0xff]   ;;  %v2267_v17 = vld [vmem:[%s2827_s0 + $0x1bc] ss:$36 sps:$4 sm:$0xff]   ;;  %v2271_v18 = vld [vmem:[#allocation2 + $0x170] sm:$0xff]  }
  0x2e   :  { %1926 = vmatpush3.bf16.msra.mxu1 %v2200_v27  ;;  %1863 = vmatprep.subr.bf16.mxu0 %v2201_v28  ;;  %v2272_v19 = vld [vmem:[#allocation2 + $0x1f0] sm:$0xff]   ;;  %v2270_v23 = vld [vmem:[%s2827_s0 + $0x1b8] ss:$36 sps:$4 sm:$0xff]   ;;  %v2277_v25 = vld [vmem:[%s2827_s0 + $0x204] ss:$36 sps:$4 sm:$0xff]  }
  0x2f   :  { %1927 = vmatprep.subr.bf16.mxu1 %v2202_v29  ;;  %v2273_v20 = vld [vmem:[#allocation2 + $0x130] sm:$0xff]   ;;  %v2275_v24 = vld [vmem:[%s2827_s0 + $0x1fc] ss:$36 sps:$4 sm:$0xff]  }
  0x30   :  { %v2274_v21 = vld [vmem:[#allocation2 + $0x1b0] sm:$0xff]   ;;  %v2281_v26 = vld [vmem:[#allocation2 + $0x178] sm:$0xff]  }
  0x31   :  { %1864 = vmatpush3.bf16.msra.mxu0 %v2203_v30  ;;  %v2269_v22 = vld [vmem:[%s2827_s0 + $0x1b0] ss:$36 sps:$4 sm:$0xff]   ;;  %v2282_v27 = vld [vmem:[#allocation2 + $0x1f8] sm:$0xff]  }
  0x32   :  { %1928 = vmatpush3.bf16.msra.mxu1 %v2204_v31  ;;  %1977 = vmatprep.subr.bf16.mxu0 %v2211_v36  ;;  %v2283_v28 = vld [vmem:[#allocation2 + $0x138] sm:$0xff]   ;;  %v2280_v31 = vld [vmem:[%s2827_s0 + $0x200] ss:$36 sps:$4 sm:$0xff]   ;;  %v2285_v35 = vld [vmem:[%s2827_s0 + $0x10] ss:$36 sps:$4 sm:$0xff]  }
  0x33   :  { %2041 = vmatprep.subr.bf16.mxu1 %v2212_v37  ;;  %v2284_v29 = vld [vmem:[#allocation2 + $0x1b8] sm:$0xff]  }
  0x34   :  { %1125 = vmatmul.mubr.bf16.vlgmr.msra.gmra.mrb[0].mxu0 %v2205_v32  ;;  %v2279_v30 = vld [vmem:[%s2827_s0 + $0x1f8] ss:$36 sps:$4 sm:$0xff]   ;;  %v2291_v32 = vld [vmem:[#allocation2 + $0x200] sm:$0xff]  }
  0x35   :  { %1222 = vmatmul.mubr.bf16.vlgmr.msra.gmra.mrb[0].mxu1 %v2208_v34  ;;  %1978 = vmatpush3.bf16.msra.mxu0 %v2213_v38  ;;  %v2287_v33 = vld [vmem:[%s2827_s0 + $0x14] ss:$36 sps:$4 sm:$0xff]   ;;  %v2290_v34 = vld [vmem:[%s2827_s0 + $0x1c] ss:$36 sps:$4 sm:$0xff]   ;;  %v2294_v38 = vld [vmem:[%s2827_s0 + $0x64] ss:$36 sps:$4 sm:$0xff]  }
  0x36   :  { %2042 = vmatpush3.bf16.msra.mxu1 %v2214_v39  ;;  %1132 = vmatprep.mubr.bf16.mxu0 %v2215_v40  ;;  %v2288_v36 = vld [vmem:[%s2827_s0 + $0x18] ss:$36 sps:$4 sm:$0xff]   ;;  %v2298_v39 = vld [vmem:[#allocation2 + $0x208] sm:$0xff]   ;;  %v2305_v40 = vld [vmem:[#allocation2 + $0x210] sm:$0xff]  }
  0x37   :  { %1229 = vmatprep.mubr.bf16.mxu1 %v2217_v41  ;;  %1979 = vmatprep.subr.bf16.mxu0 %v2221_v44  ;;  %v2292_v37 = vld [vmem:[%s2827_s0 + $0x5c] ss:$36 sps:$4 sm:$0xff]   ;;  %v2301_v44 = vld [vmem:[%s2827_s0 + $0xac] ss:$36 sps:$4 sm:$0xff]  }
  0x38   :  { %2043 = vmatprep.subr.bf16.mxu1 %v2222_v45  ;;  %v2296_v41 = vld [vmem:[%s2827_s0 + $0x58] ss:$36 sps:$4 sm:$0xff]  }
  0x39   :  { %1980 = vmatpush3.bf16.msra.mxu0 %v2223_v46  ;;  %v2312_v45 = vld [vmem:[#allocation2 + $0x218] sm:$0xff]   ;;  %v2319_v46 = vld [vmem:[#allocation2 + $0x220] sm:$0xff]  }
  0x3a   :  { %2044 = vmatpush3.bf16.msra.mxu1 %v2224_v47  ;;  %1981 = vmatprep.subr.bf16.mxu0 %v2231_v52  ;;  %v2303_v47 = vld [vmem:[%s2827_s0 + $0xa0] ss:$36 sps:$4 sm:$0xff]   ;;  %v2310_v52 = vld [vmem:[%s2827_s0 + $0xe8] ss:$36 sps:$4 sm:$0xff]  }
  0x3b   :  { %2045 = vmatprep.subr.bf16.mxu1 %v2232_v53  ;;  %v2333_v53 = vld [vmem:[#allocation2 + $0x230] sm:$0xff]  }
  0x3c   :  { %1133 = vmatmul.mubr.bf16.gmra.mrb[4].mxu0 %v2219_v42  ;;  %v2297_v42 = vld [vmem:[%s2827_s0 + $0x60] ss:$36 sps:$4 sm:$0xff]  }
  0x3d   :  { %1230 = vmatmul.mubr.bf16.gmra.mrb[4].mxu1 %v2220_v43  ;;  %1140 = vmatprep.mubr.bf16.mxu0 %v2225_v48  ;;  %v2299_v43 = vld [vmem:[%s2827_s0 + $0xa4] ss:$36 sps:$4 sm:$0xff]  }
  0x3e   :  { %1237 = vmatprep.mubr.bf16.mxu1 %v2227_v49  ;;  %1982 = vmatpush3.bf16.msra.mxu0 %v2233_v54  ;;  %v2304_v48 = vld [vmem:[%s2827_s0 + $0xa8] ss:$36 sps:$4 sm:$0xff]   ;;  %v2311_v54 = vld [vmem:[%s2827_s0 + $0xf0] ss:$36 sps:$4 sm:$0xff]  }
  0x3f   :  { %2046 = vmatpush3.bf16.msra.mxu1 %v2234_v55  ;;  %1983 = vmatprep.subr.bf16.mxu0 %v2241_v60  ;;  %v2306_v49 = vld [vmem:[%s2827_s0 + $0xec] ss:$36 sps:$4 sm:$0xff]   ;;  %v2313_v55 = vld [vmem:[%s2827_s0 + $0x134] ss:$36 sps:$4 sm:$0xff]   ;;  %v2320_v60 = vld [vmem:[%s2827_s0 + $0x17c] ss:$36 sps:$4 sm:$0xff]  }
  0x40   :  { %2047 = vmatprep.subr.bf16.mxu1 %v2242_v61  ;;  %v2322_v61 = vld [vmem:[%s2827_s0 + $0x184] ss:$36 sps:$4 sm:$0xff]  }
  0x42   :  { %1984 = vmatpush3.bf16.msra.mxu0 %v2243_v62  ;;  %v2324_v62 = vld [vmem:[%s2827_s0 + $0x178] ss:$36 sps:$4 sm:$0xff]  }
  0x43   :  { %2048 = vmatpush3.bf16.msra.mxu1 %v2244_v63  ;;  %1985 = vmatprep.subr.bf16.mxu0 %v2251_v3  ;;  %v2325_v63 = vld [vmem:[%s2827_s0 + $0x180] ss:$36 sps:$4 sm:$0xff]   ;;  %v2332_v3 = vld [vmem:[%s2827_s0 + $0x1c8] ss:$36 sps:$4 sm:$0xff]  }
  0x44   :  { %1141 = vmatmul.mubr.bf16.gmra.mrb[8].mxu0 %v2229_v50  ;;  %2049 = vmatprep.subr.bf16.mxu1 %v2252_v5  ;;  %v2308_v50 = vld [vmem:[%s2827_s0 + $0xf4] ss:$36 sps:$4 sm:$0xff]  }
  0x45   :  { %1238 = vmatmul.mubr.bf16.gmra.mrb[8].mxu1 %v2230_v51  ;;  %1148 = vmatprep.mubr.bf16.mxu0 %v2235_v56  ;;  %v2326_v51 = vld [vmem:[#allocation2 + $0x228] sm:$0xff]   ;;  %v2315_v56 = vld [vmem:[%s2827_s0 + $0x13c] ss:$36 sps:$4 sm:$0xff]   ;;  %v2336_v5 = vld [vmem:[%s2827_s0 + $0x214] ss:$36 sps:$4 sm:$0xff]  }
  0x46   :  { %1245 = vmatprep.mubr.bf16.mxu1 %v2237_v57  ;;  %1986 = vmatpush3.bf16.msra.mxu0 %v2253_v6  ;;  %v2340_v57 = vld [vmem:[#allocation2 + $0x238] sm:$0xff]   ;;  %v2338_v6 = vld [vmem:[%s2827_s0 + $0x208] ss:$36 sps:$4 sm:$0xff]  }
  0x47   :  { %2050 = vmatpush3.bf16.msra.mxu1 %v2254_v7  ;;  %1987 = vmatprep.subr.bf16.mxu0 %v2261_v10  ;;  %v2339_v7 = vld [vmem:[%s2827_s0 + $0x210] ss:$36 sps:$4 sm:$0xff]   ;;  %v2343_v10 = vld [vmem:[%s2827_s0 + $0x68] ss:$36 sps:$4 sm:$0xff]  }
  0x48   :  { %2051 = vmatprep.subr.bf16.mxu1 %v2262_v11  ;;  %v2344_v11 = vld [vmem:[%s2827_s0 + $0x188] ss:$36 sps:$4 sm:$0xff]  }
  0x4a   :  { %1988 = vmatpush3.bf16.msra.mxu0 %v2263_v13  ;;  %v2346_v13 = vld [vmem:[%s2827_s0 + $0x1d0] ss:$36 sps:$4 sm:$0xff]  }
  0x4b   :  { %2052 = vmatpush3.bf16.msra.mxu1 %v2264_v14  ;;  %1989 = vmatprep.subr.bf16.mxu0 %v2271_v18  ;;  %v2347_v14 = vld [vmem:[%s2827_s0 + $0xf8] ss:$36 sps:$4 sm:$0xff]  }
  0x4c   :  { %1149 = vmatmul.mubr.bf16.gmra.mrb[12].mxu0 %v2239_v58  ;;  %2053 = vmatprep.subr.bf16.mxu1 %v2272_v19  ;;  %v2317_v58 = vld [vmem:[%s2827_s0 + $0x130] ss:$36 sps:$4 sm:$0xff]  }
  0x4d   :  { %1246 = vmatmul.mubr.bf16.gmra.mrb[12].mxu1 %v2240_v59  ;;  %1156 = vmatprep.mubr.bf16.mxu0 %v2245_v0  ;;  %v2318_v59 = vld [vmem:[%s2827_s0 + $0x138] ss:$36 sps:$4 sm:$0xff]   ;;  %v2327_v0 = vld [vmem:[%s2827_s0 + $0x1c4] ss:$36 sps:$4 sm:$0xff]  }
  0x4e   :  { %1253 = vmatprep.mubr.bf16.mxu1 %v2247_v1  ;;  %1990 = vmatpush3.bf16.msra.mxu0 %v2273_v20  ;;  %v2329_v1 = vld [vmem:[%s2827_s0 + $0x1cc] ss:$36 sps:$4 sm:$0xff]  }
  0x4f   :  { %2054 = vmatpush3.bf16.msra.mxu1 %v2274_v21  ;;  %1991 = vmatprep.subr.bf16.mxu0 %v2281_v26 }
  0x50   :  { %2055 = vmatprep.subr.bf16.mxu1 %v2282_v27 }
  0x52   :  { %1992 = vmatpush3.bf16.msra.mxu0 %v2283_v28 }
  0x53   :  { %2056 = vmatpush3.bf16.msra.mxu1 %v2284_v29  ;;  %2121 = vmatprep.subr.bf16.mxu0 %v2291_v32 }
  0x54   :  { %1157 = vmatmul.mubr.bf16.gmra.mrb[16].mxu0 %v2249_v2  ;;  %2153 = vmatprep.subr.bf16.mxu1 %v2291_v32  ;;  %v2331_v2 = vld [vmem:[%s2827_s0 + $0x1c0] ss:$36 sps:$4 sm:$0xff]  }
  0x55   :  { %1254 = vmatmul.mubr.bf16.gmra.mrb[16].mxu1 %v2250_v4  ;;  %1164 = vmatprep.mubr.bf16.mxu0 %v2255_v8  ;;  %v2334_v4 = vld [vmem:[%s2827_s0 + $0x20c] ss:$36 sps:$4 sm:$0xff]   ;;  %v2341_v8 = vld [vmem:[%s2827_s0 + $0x20] ss:$36 sps:$4 sm:$0xff]  }
  0x56   :  { %1261 = vmatprep.mubr.bf16.mxu1 %v2257_v9  ;;  %v2342_v9 = vld [vmem:[%s2827_s0 + $0x140] ss:$36 sps:$4 sm:$0xff]  }
  0x5c   :  { %1165 = vmatmul.mubr.bf16.gmra.mrb[20].mxu0 %v2259_v12  ;;  %v2345_v12 = vld [vmem:[%s2827_s0 + $0xb0] ss:$36 sps:$4 sm:$0xff]  }
  0x5d   :  { %1262 = vmatmul.mubr.bf16.gmra.mrb[20].mxu1 %v2260_v15  ;;  %1172 = vmatprep.mubr.bf16.mxu0 %v2265_v16  ;;  %v2348_v15 = vld [vmem:[%s2827_s0 + $0x218] ss:$36 sps:$4 sm:$0xff]  }
  0x5e   :  { %1269 = vmatprep.mubr.bf16.mxu1 %v2267_v17 }
  0x64   :  { %1173 = vmatmul.mubr.bf16.gmra.mrb[24].mxu0 %v2269_v22 }
  0x65   :  { %1270 = vmatmul.mubr.bf16.gmra.mrb[24].mxu1 %v2270_v23  ;;  %1180 = vmatprep.mubr.bf16.mxu0 %v2275_v24 }
  0x66   :  { %1277 = vmatprep.mubr.bf16.mxu1 %v2277_v25 }
  0x6c   :  { %1181 = vmatmul.mubr.bf16.gmra.mrb[28].mxu0 %v2279_v30 }
  0x6d   :  { %1278 = vmatmul.mubr.bf16.gmra.mrb[28].mxu1 %v2280_v31  ;;  %1318 = vmatprep.mubr.bf16.mxu0 %v2287_v33 }
  0x6e   :  { %1415 = vmatprep.mubr.bf16.mxu1 %v2290_v34 }
  0x74   :  { %1319 = vmatmul.mubr.bf16.vlgmr.msra.gmra.mrb[32].mxu0 %v2285_v35 }
  0x75   :  { %1416 = vmatmul.mubr.bf16.vlgmr.msra.gmra.mrb[32].mxu1 %v2288_v36  ;;  %2122 = vmatpush3.bf16.msra.mxu0 %v2291_v32 }
  0x76   :  { %2161 = vmatpush3.bf16.msra.mxu1 %v2291_v32  ;;  %1326 = vmatprep.mubr.bf16.mxu0 %v2292_v37 }
  0x77   :  { %1423 = vmatprep.mubr.bf16.mxu1 %v2294_v38  ;;  %2123 = vmatprep.subr.bf16.mxu0 %v2298_v39 }
  0x78   :  { %2154 = vmatprep.subr.bf16.mxu1 %v2298_v39 }
  0x79   :  { %2124 = vmatpush3.bf16.msra.mxu0 %v2298_v39 }
  0x7a   :  { %2162 = vmatpush3.bf16.msra.mxu1 %v2298_v39  ;;  %2125 = vmatprep.subr.bf16.mxu0 %v2305_v40 }
  0x7b   :  { %2155 = vmatprep.subr.bf16.mxu1 %v2305_v40 }
  0x7c   :  { %1327 = vmatmul.mubr.bf16.gmra.mrb[36].mxu0 %v2296_v41 }
  0x7d   :  { %1424 = vmatmul.mubr.bf16.gmra.mrb[36].mxu1 %v2297_v42  ;;  %1334 = vmatprep.mubr.bf16.mxu0 %v2299_v43 }
  0x7e   :  { %1431 = vmatprep.mubr.bf16.mxu1 %v2301_v44  ;;  %2126 = vmatpush3.bf16.msra.mxu0 %v2305_v40 }
  0x7f   :  { %2163 = vmatpush3.bf16.msra.mxu1 %v2305_v40  ;;  %2127 = vmatprep.subr.bf16.mxu0 %v2312_v45 }
  0x80   :  { %2156 = vmatprep.subr.bf16.mxu1 %v2312_v45 }
  0x82   :  { %2128 = vmatpush3.bf16.msra.mxu0 %v2312_v45 }
  0x83   :  { %2164 = vmatpush3.bf16.msra.mxu1 %v2312_v45  ;;  %2129 = vmatprep.subr.bf16.mxu0 %v2319_v46 }
  0x84   :  { %1335 = vmatmul.mubr.bf16.gmra.mrb[40].mxu0 %v2303_v47  ;;  %2157 = vmatprep.subr.bf16.mxu1 %v2319_v46 }
  0x85   :  { %1432 = vmatmul.mubr.bf16.gmra.mrb[40].mxu1 %v2304_v48  ;;  %1342 = vmatprep.mubr.bf16.mxu0 %v2306_v49 }
  0x86   :  { %1439 = vmatprep.mubr.bf16.mxu1 %v2308_v50  ;;  %2130 = vmatpush3.bf16.msra.mxu0 %v2319_v46 }
  0x87   :  { %2165 = vmatpush3.bf16.msra.mxu1 %v2319_v46  ;;  %2131 = vmatprep.subr.bf16.mxu0 %v2326_v51 }
  0x88   :  { %2158 = vmatprep.subr.bf16.mxu1 %v2326_v51 }
  0x8a   :  { %2132 = vmatpush3.bf16.msra.mxu0 %v2326_v51 }
  0x8b   :  { %2166 = vmatpush3.bf16.msra.mxu1 %v2326_v51  ;;  %2133 = vmatprep.subr.bf16.mxu0 %v2333_v53 }
  0x8c   :  { %1343 = vmatmul.mubr.bf16.gmra.mrb[44].mxu0 %v2310_v52  ;;  %2159 = vmatprep.subr.bf16.mxu1 %v2333_v53 }
  0x8d   :  { %1440 = vmatmul.mubr.bf16.gmra.mrb[44].mxu1 %v2311_v54  ;;  %1350 = vmatprep.mubr.bf16.mxu0 %v2313_v55 }
  0x8e   :  { %1447 = vmatprep.mubr.bf16.mxu1 %v2315_v56  ;;  %2134 = vmatpush3.bf16.msra.mxu0 %v2333_v53 }
  0x8f   :  { %2167 = vmatpush3.bf16.msra.mxu1 %v2333_v53  ;;  %2135 = vmatprep.subr.bf16.mxu0 %v2340_v57 }
  0x90   :  { %2160 = vmatprep.subr.bf16.mxu1 %v2340_v57 }
  0x92   :  { %2136 = vmatpush3.bf16.msra.mxu0 %v2340_v57 }
  0x93   :  { %2168 = vmatpush3.bf16.msra.mxu1 %v2340_v57 }
  0x94   :  { %1351 = vmatmul.mubr.bf16.gmra.mrb[48].mxu0 %v2317_v58 }
  0x95   :  { %1448 = vmatmul.mubr.bf16.gmra.mrb[48].mxu1 %v2318_v59  ;;  %1358 = vmatprep.mubr.bf16.mxu0 %v2320_v60 }
  0x96   :  { %1455 = vmatprep.mubr.bf16.mxu1 %v2322_v61 }
  0x9c   :  { %1359 = vmatmul.mubr.bf16.gmra.mrb[52].mxu0 %v2324_v62 }
  0x9d   :  { %1456 = vmatmul.mubr.bf16.gmra.mrb[52].mxu1 %v2325_v63  ;;  %1366 = vmatprep.mubr.bf16.mxu0 %v2327_v0 }
  0x9e   :  { %1463 = vmatprep.mubr.bf16.mxu1 %v2329_v1 }
  0xa4   :  { %1367 = vmatmul.mubr.bf16.gmra.mrb[56].mxu0 %v2331_v2 }
  0xa5   :  { %1464 = vmatmul.mubr.bf16.gmra.mrb[56].mxu1 %v2332_v3  ;;  %1374 = vmatprep.mubr.bf16.mxu0 %v2334_v4 }
  0xa6   :  { %1471 = vmatprep.mubr.bf16.mxu1 %v2336_v5 }
  0xac   :  { %1375 = vmatmul.mubr.bf16.gmra.mrb[60].mxu0 %v2338_v6 }
  0xad   :  { %1472 = vmatmul.mubr.bf16.gmra.mrb[60].mxu1 %v2339_v7  ;;  %2137 = vmatprep.mubr.bf16.mxu0 %v2341_v8 }
  0xae   :  { %2145 = vmatprep.mubr.bf16.mxu1 %v2342_v9 }
  0xb4   :  { %2138 = vmatmul.mubr.bf16.vlgmr.msra.gmra.mrb[64].mxu0 %v2343_v10 }
  0xb5   :  { %2146 = vmatmul.mubr.bf16.vlgmr.msra.gmra.mrb[64].mxu1 %v2344_v11  ;;  %2141 = vmatprep.mubr.bf16.mxu0 %v2345_v12 }
  0xb6   :  { %2149 = vmatprep.mubr.bf16.mxu1 %v2346_v13 }
  0xbc   :  { %2142 = vmatmul.mubr.bf16.gmra.mrb[68].mxu0 %v2347_v14 }
  0xbd   :  { %2150 = vmatmul.mubr.bf16.gmra.mrb[68].mxu1 %v2348_v15 }
 0x107   :  { %v1865_v16 = vpop.f32.mrb[0].mxu0 }
 0x108   :  { %v1929_v17 = vpop.f32.mrb[0].mxu1  ;;  %v1866_v18 = vpop.f32.mrb[1].mxu0 }
 0x109   :  { %v1867_v19 = vadd.f32 %v1866_v18, %v1865_v16  ;;  %v1930_v20 = vpop.f32.mrb[1].mxu1  ;;  %v1868_v21 = vpop.f32.mrb[2].mxu0 }
 0x10a   :  { %v1931_v22 = vadd.f32 %v1930_v20, %v1929_v17  ;;  %v1932_v23 = vpop.f32.mrb[2].mxu1  ;;  %v1869_v24 = vpop.f32.mrb[3].mxu0 }
 0x10b   :  { %v1870_v25 = vadd.f32 %v1869_v24, %v1868_v21  ;;  %v1933_v26 = vpop.f32.mrb[3].mxu1 }
 0x10c   :  { %v2629_v27 = vadd.f32 %v1931_v22, %v1867_v19  ;;  %v1934_v28 = vadd.f32 %v1933_v26, %v1932_v23 }
 0x10e   :  { %v2631_v29 = vadd.f32 %v1934_v28, %v1870_v25 }
 0x10f   :  { %v1871_v30 = vpop.f32.mrb[4].mxu0 }
 0x110   :  { %v1935_v31 = vpop.f32.mrb[4].mxu1  ;;  %v1872_v32 = vpop.f32.mrb[5].mxu0 }
 0x111   :  { %v1873_v33 = vadd.f32 %v1872_v32, %v1871_v30  ;;  %v1936_v34 = vpop.f32.mrb[5].mxu1  ;;  %v1874_v35 = vpop.f32.mrb[6].mxu0 }
 0x112   :  { %v1937_v36 = vadd.f32 %v1936_v34, %v1935_v31  ;;  %v1938_v37 = vpop.f32.mrb[6].mxu1  ;;  %v1875_v38 = vpop.f32.mrb[7].mxu0 }
 0x113   :  { %v1876_v39 = vadd.f32 %v1875_v38, %v1874_v35  ;;  %v1939_v40 = vpop.f32.mrb[7].mxu1 }
 0x114   :  { %v2633_v41 = vadd.f32 %v1937_v36, %v1873_v33  ;;  %v1940_v42 = vadd.f32 %v1939_v40, %v1938_v37 }
 0x116   :  { %v2635_v43 = vadd.f32 %v1940_v42, %v1876_v39 }
 0x117   :  { %v1877_v44 = vpop.f32.mrb[8].mxu0 }
 0x118   :  { %v1941_v45 = vpop.f32.mrb[8].mxu1  ;;  %v1878_v46 = vpop.f32.mrb[9].mxu0 }
 0x119   :  { %v1879_v47 = vadd.f32 %v1878_v46, %v1877_v44  ;;  %v1942_v48 = vpop.f32.mrb[9].mxu1  ;;  %v1880_v49 = vpop.f32.mrb[10].mxu0 }
 0x11a   :  { %v1943_v50 = vadd.f32 %v1942_v48, %v1941_v45  ;;  %v1944_v51 = vpop.f32.mrb[10].mxu1  ;;  %v1881_v52 = vpop.f32.mrb[11].mxu0 }
 0x11b   :  { %v1882_v53 = vadd.f32 %v1881_v52, %v1880_v49  ;;  %v1945_v54 = vpop.f32.mrb[11].mxu1 }
 0x11c   :  { %v2637_v55 = vadd.f32 %v1943_v50, %v1879_v47  ;;  %v1946_v56 = vadd.f32 %v1945_v54, %v1944_v51 }
 0x11e   :  { %v2639_v57 = vadd.f32 %v1946_v56, %v1882_v53 }
 0x11f   :  { %v1883_v58 = vpop.f32.mrb[12].mxu0 }
 0x120   :  { %v1947_v59 = vpop.f32.mrb[12].mxu1  ;;  %v1884_v60 = vpop.f32.mrb[13].mxu0 }
 0x121   :  { %v1885_v61 = vadd.f32 %v1884_v60, %v1883_v58  ;;  %v1948_v62 = vpop.f32.mrb[13].mxu1  ;;  %v1886_v63 = vpop.f32.mrb[14].mxu0 }
 0x122   :  { %v1949_v0 = vadd.f32 %v1948_v62, %v1947_v59  ;;  %v1950_v1 = vpop.f32.mrb[14].mxu1  ;;  %v1887_v2 = vpop.f32.mrb[15].mxu0 }
 0x123   :  { %v1888_v3 = vadd.f32 %v1887_v2, %v1886_v63  ;;  %v1951_v4 = vpop.f32.mrb[15].mxu1 }
 0x124   :  { %v2641_v5 = vadd.f32 %v1949_v0, %v1885_v61  ;;  %v1952_v6 = vadd.f32 %v1951_v4, %v1950_v1 }
 0x126   :  { %v2643_v7 = vadd.f32 %v1952_v6, %v1888_v3 }
 0x127   :  { %v1889_v8 = vpop.f32.mrb[16].mxu0 }
 0x128   :  { %v1953_v9 = vpop.f32.mrb[16].mxu1  ;;  %v1890_v10 = vpop.f32.mrb[17].mxu0 }
 0x129   :  { %v1891_v11 = vadd.f32 %v1890_v10, %v1889_v8  ;;  %v1954_v12 = vpop.f32.mrb[17].mxu1  ;;  %v1892_v13 = vpop.f32.mrb[18].mxu0 }
 0x12a   :  { %v1955_v14 = vadd.f32 %v1954_v12, %v1953_v9  ;;  %v1956_v15 = vpop.f32.mrb[18].mxu1  ;;  %v1893_v16 = vpop.f32.mrb[19].mxu0 }
 0x12b   :  { %v1894_v17 = vadd.f32 %v1893_v16, %v1892_v13  ;;  %v1957_v18 = vpop.f32.mrb[19].mxu1 }
 0x12c   :  { %v2645_v19 = vadd.f32 %v1955_v14, %v1891_v11  ;;  %v1958_v20 = vadd.f32 %v1957_v18, %v1956_v15 }
 0x12e   :  { %v2647_v21 = vadd.f32 %v1958_v20, %v1894_v17 }
 0x12f   :  { %v1895_v22 = vpop.f32.mrb[20].mxu0 }
 0x130   :  { %v1959_v23 = vpop.f32.mrb[20].mxu1  ;;  %v1896_v24 = vpop.f32.mrb[21].mxu0 }
 0x131   :  { %v1897_v25 = vadd.f32 %v1896_v24, %v1895_v22  ;;  %v1960_v26 = vpop.f32.mrb[21].mxu1  ;;  %v1898_v28 = vpop.f32.mrb[22].mxu0 }
 0x132   :  { %v1961_v30 = vadd.f32 %v1960_v26, %v1959_v23  ;;  %v1962_v31 = vpop.f32.mrb[22].mxu1  ;;  %v1899_v32 = vpop.f32.mrb[23].mxu0 }
 0x133   :  { %v1900_v33 = vadd.f32 %v1899_v32, %v1898_v28  ;;  %v1963_v34 = vpop.f32.mrb[23].mxu1 }
 0x134   :  { %v2649_v35 = vadd.f32 %v1961_v30, %v1897_v25  ;;  %v1964_v36 = vadd.f32 %v1963_v34, %v1962_v31 }
 0x136   :  { %v2651_v37 = vadd.f32 %v1964_v36, %v1900_v33 }
 0x137   :  { %v1901_v38 = vpop.f32.mrb[24].mxu0 }
 0x138   :  { %v1965_v39 = vpop.f32.mrb[24].mxu1  ;;  %v1902_v40 = vpop.f32.mrb[25].mxu0 }
 0x139   :  { %v1903_v42 = vadd.f32 %v1902_v40, %v1901_v38  ;;  %v1966_v44 = vpop.f32.mrb[25].mxu1  ;;  %v1904_v45 = vpop.f32.mrb[26].mxu0 }
 0x13a   :  { %v1967_v46 = vadd.f32 %v1966_v44, %v1965_v39  ;;  %v1968_v47 = vpop.f32.mrb[26].mxu1  ;;  %v1905_v48 = vpop.f32.mrb[27].mxu0 }
 0x13b   :  { %v1906_v49 = vadd.f32 %v1905_v48, %v1904_v45  ;;  %v1969_v50 = vpop.f32.mrb[27].mxu1 }
 0x13c   :  { %v2653_v51 = vadd.f32 %v1967_v46, %v1903_v42  ;;  %v1970_v52 = vadd.f32 %v1969_v50, %v1968_v47 }
 0x13e   :  { %v2655_v53 = vadd.f32 %v1970_v52, %v1906_v49 }
 0x13f   :  { %v1907_v54 = vpop.f32.mrb[28].mxu0 }
 0x140   :  { %v1971_v56 = vpop.f32.mrb[28].mxu1  ;;  %v1908_v58 = vpop.f32.mrb[29].mxu0 }
 0x141   :  { %v1909_v59 = vadd.f32 %v1908_v58, %v1907_v54  ;;  %v1972_v60 = vpop.f32.mrb[29].mxu1  ;;  %v1910_v61 = vpop.f32.mrb[30].mxu0 }
 0x142   :  { %v1973_v62 = vadd.f32 %v1972_v60, %v1971_v56  ;;  %v1974_v63 = vpop.f32.mrb[30].mxu1  ;;  %v1911_v0 = vpop.f32.mrb[31].mxu0 }
 0x143   :  { %v1912_v1 = vadd.f32 %v1911_v0, %v1910_v61  ;;  %v1975_v2 = vpop.f32.mrb[31].mxu1 }
 0x144   :  { %v2657_v3 = vadd.f32 %v1973_v62, %v1909_v59  ;;  %v1976_v4 = vadd.f32 %v1975_v2, %v1974_v63 }
 0x146   :  { %v2659_v6 = vadd.f32 %v1976_v4, %v1912_v1 }
 0x147   :  { %v1993_v8 = vpop.f32.mrb[32].mxu0 }
 0x148   :  { %v2057_v9 = vpop.f32.mrb[32].mxu1  ;;  %v1994_v10 = vpop.f32.mrb[33].mxu0 }
 0x149   :  { %v1995_v11 = vadd.f32 %v1994_v10, %v1993_v8  ;;  %v2058_v12 = vpop.f32.mrb[33].mxu1  ;;  %v1996_v13 = vpop.f32.mrb[34].mxu0 }
 0x14a   :  { %v2059_v14 = vadd.f32 %v2058_v12, %v2057_v9  ;;  %v2060_v15 = vpop.f32.mrb[34].mxu1  ;;  %v1997_v16 = vpop.f32.mrb[35].mxu0 }
 0x14b   :  { %v1321_v17 = vadd.f32 %v1995_v11, %v2629_v27  ;;  %v1998_v18 = vadd.f32 %v1997_v16, %v1996_v13  ;;  %v2061_v20 = vpop.f32.mrb[35].mxu1 }
 0x14c   :  { %v2062_v22 = vadd.f32 %v2061_v20, %v2060_v15 }
 0x14d   :  { %v1324_v23 = vadd.f32 %v1998_v18, %v2631_v29  ;;  %v2663_v24 = vadd.f32 %v2059_v14, %v1321_v17 }
 0x14f   :  { %v1999_v25 = vpop.f32.mrb[36].mxu0  ;;  %v2665_v26 = vadd.f32 %v2062_v22, %v1324_v23 }
 0x150   :  { %v2063_v28 = vpop.f32.mrb[36].mxu1  ;;  %v2000_v30 = vpop.f32.mrb[37].mxu0 }
 0x151   :  { %v2001_v31 = vadd.f32 %v2000_v30, %v1999_v25  ;;  %v2064_v32 = vpop.f32.mrb[37].mxu1  ;;  %v2002_v33 = vpop.f32.mrb[38].mxu0 }
 0x152   :  { %v2065_v34 = vadd.f32 %v2064_v32, %v2063_v28  ;;  %v2066_v36 = vpop.f32.mrb[38].mxu1  ;;  %v2003_v38 = vpop.f32.mrb[39].mxu0 }
 0x153   :  { %v1329_v27 = vadd.f32 %v2001_v31, %v2633_v41  ;;  %v2004_v39 = vadd.f32 %v2003_v38, %v2002_v33  ;;  %v2067_v40 = vpop.f32.mrb[39].mxu1 }
 0x154   :  { %v2068_v42 = vadd.f32 %v2067_v40, %v2066_v36 }
 0x155   :  { %v1332_v29 = vadd.f32 %v2004_v39, %v2635_v43  ;;  %v2669_v44 = vadd.f32 %v2065_v34, %v1329_v27 }
 0x157   :  { %v2005_v45 = vpop.f32.mrb[40].mxu0  ;;  %v2671_v46 = vadd.f32 %v2068_v42, %v1332_v29 }
 0x158   :  { %v2069_v47 = vpop.f32.mrb[40].mxu1  ;;  %v2006_v48 = vpop.f32.mrb[41].mxu0 }
 0x159   :  { %v2007_v49 = vadd.f32 %v2006_v48, %v2005_v45  ;;  %v2070_v50 = vpop.f32.mrb[41].mxu1  ;;  %v2008_v52 = vpop.f32.mrb[42].mxu0 }
 0x15a   :  { %v2071_v54 = vadd.f32 %v2070_v50, %v2069_v47  ;;  %v2072_v56 = vpop.f32.mrb[42].mxu1  ;;  %v2009_v58 = vpop.f32.mrb[43].mxu0 }
 0x15b   :  { %v1337_v41 = vadd.f32 %v2007_v49, %v2637_v55  ;;  %v2010_v59 = vadd.f32 %v2009_v58, %v2008_v52  ;;  %v2073_v60 = vpop.f32.mrb[43].mxu1 }
 0x15c   :  { %v2074_v61 = vadd.f32 %v2073_v60, %v2072_v56 }
 0x15d   :  { %v1340_v43 = vadd.f32 %v2010_v59, %v2639_v57  ;;  %v2675_v62 = vadd.f32 %v2071_v54, %v1337_v41 }
 0x15f   :  { %v2011_v63 = vpop.f32.mrb[44].mxu0  ;;  %v2677_v0 = vadd.f32 %v2074_v61, %v1340_v43 }
 0x160   :  { %v2075_v1 = vpop.f32.mrb[44].mxu1  ;;  %v2012_v2 = vpop.f32.mrb[45].mxu0 }
 0x161   :  { %v2013_v4 = vadd.f32 %v2012_v2, %v2011_v63  ;;  %v2076_v8 = vpop.f32.mrb[45].mxu1  ;;  %v2014_v9 = vpop.f32.mrb[46].mxu0 }
 0x162   :  { %v2077_v10 = vadd.f32 %v2076_v8, %v2075_v1  ;;  %v2078_v11 = vpop.f32.mrb[46].mxu1  ;;  %v2015_v12 = vpop.f32.mrb[47].mxu0 }
 0x163   :  { %v1345_v55 = vadd.f32 %v2013_v4, %v2641_v5  ;;  %v2016_v13 = vadd.f32 %v2015_v12, %v2014_v9  ;;  %v2079_v14 = vpop.f32.mrb[47].mxu1 }
 0x164   :  { %v2080_v15 = vadd.f32 %v2079_v14, %v2078_v11 }
 0x165   :  { %v1348_v57 = vadd.f32 %v2016_v13, %v2643_v7  ;;  %v2681_v16 = vadd.f32 %v2077_v10, %v1345_v55 }
 0x167   :  { %v2017_v17 = vpop.f32.mrb[48].mxu0  ;;  %v2683_v18 = vadd.f32 %v2080_v15, %v1348_v57 }
 0x168   :  { %v2081_v20 = vpop.f32.mrb[48].mxu1  ;;  %v2018_v22 = vpop.f32.mrb[49].mxu0 }
 0x169   :  { %v2019_v23 = vadd.f32 %v2018_v22, %v2017_v17  ;;  %v2082_v25 = vpop.f32.mrb[49].mxu1  ;;  %v2020_v28 = vpop.f32.mrb[50].mxu0 }
 0x16a   :  { %v2083_v30 = vadd.f32 %v2082_v25, %v2081_v20  ;;  %v2084_v31 = vpop.f32.mrb[50].mxu1  ;;  %v2021_v32 = vpop.f32.mrb[51].mxu0 }
 0x16b   :  { %v1353_v5 = vadd.f32 %v2019_v23, %v2645_v19  ;;  %v2022_v33 = vadd.f32 %v2021_v32, %v2020_v28  ;;  %v2085_v34 = vpop.f32.mrb[51].mxu1 }
 0x16c   :  { %v2086_v36 = vadd.f32 %v2085_v34, %v2084_v31 }
 0x16d   :  { %v1356_v7 = vadd.f32 %v2022_v33, %v2647_v21  ;;  %v1450_v38 = vadd.f32 %v2083_v30, %v1353_v5 }
 0x16f   :  { %v2023_v27 = vpop.f32.mrb[52].mxu0  ;;  %v2687_v39 = vadd.f32 %v2086_v36, %v1356_v7 }
 0x170   :  { %v2087_v40 = vpop.f32.mrb[52].mxu1  ;;  %v2024_v42 = vpop.f32.mrb[53].mxu0 }
 0x171   :  { %v2025_v29 = vadd.f32 %v2024_v42, %v2023_v27  ;;  %v2088_v45 = vpop.f32.mrb[53].mxu1  ;;  %v2026_v47 = vpop.f32.mrb[54].mxu0  ;;  %v2703_v27 = vld [vmem:[%s2829_s2] ss:$0 sm:$0xff] }
 0x172   :  { %v2089_v48 = vadd.f32 %v2088_v45, %v2087_v40  ;;  %v2090_v49 = vpop.f32.mrb[54].mxu1  ;;  %v2027_v50 = vpop.f32.mrb[55].mxu0 }
 0x173   :  { %v1361_v52 = vadd.f32 %v2025_v29, %v2649_v35  ;;  %v2028_v19 = vadd.f32 %v2027_v50, %v2026_v47  ;;  %v2091_v54 = vpop.f32.mrb[55].mxu1 }
 0x174   :  { %v2092_v56 = vadd.f32 %v2091_v54, %v2090_v49 }
 0x175   :  { %v1364_v58 = vadd.f32 %v2028_v19, %v2651_v37  ;;  %v1458_v21 = vadd.f32 %v2089_v48, %v1361_v52 }
 0x177   :  { %v2029_v41 = vpop.f32.mrb[56].mxu0  ;;  %v1461_v59 = vadd.f32 %v2092_v56, %v1364_v58  ;;  %v1654_v58 = vld [vmem:[%s2830_s3 + $0x18] sm:$0xff] }
 0x178   :  { %v2093_v60 = vpop.f32.mrb[56].mxu1  ;;  %v2030_v61 = vpop.f32.mrb[57].mxu0 }
 0x179   :  { %v2031_v43 = vadd.f32 %v2030_v61, %v2029_v41  ;;  %v2094_v63 = vpop.f32.mrb[57].mxu1  ;;  %v2032_v1 = vpop.f32.mrb[58].mxu0 }
 0x17a   :  { %v2095_v2 = vadd.f32 %v2094_v63, %v2093_v60  ;;  %v2096_v4 = vpop.f32.mrb[58].mxu1  ;;  %v2033_v8 = vpop.f32.mrb[59].mxu0  ;;  %v1652_v60 = vld [vmem:[%s2830_s3 + $0x8] sm:$0xff] }
 0x17b   :  { %v1369_v9 = vadd.f32 %v2031_v43, %v2653_v51  ;;  %v2034_v10 = vadd.f32 %v2033_v8, %v2032_v1  ;;  %v2097_v35 = vpop.f32.mrb[59].mxu1 }
 0x17c   :  { %v2098_v11 = vadd.f32 %v2097_v35, %v2096_v4 }
 0x17d   :  { %v1372_v12 = vadd.f32 %v2034_v10, %v2655_v53  ;;  %v2693_v55 = vadd.f32 %v2095_v2, %v1369_v9  ;;  %v1660_v2 = vld [vmem:[%s2830_s3 + $0x48] sm:$0xff] }
 0x17f   :  { %v2035_v37 = vpop.f32.mrb[60].mxu0  ;;  %v2695_v13 = vadd.f32 %v2098_v11, %v1372_v12 }
 0x180   :  { %v2099_v14 = vpop.f32.mrb[60].mxu1  ;;  %v2036_v15 = vpop.f32.mrb[61].mxu0 }
 0x181   :  { %v2037_v57 = vadd.f32 %v2036_v15, %v2035_v37  ;;  %v2100_v17 = vpop.f32.mrb[61].mxu1  ;;  %v2038_v20 = vpop.f32.mrb[62].mxu0 }
 0x182   :  { %v2101_v22 = vadd.f32 %v2100_v17, %v2099_v14  ;;  %v2102_v23 = vpop.f32.mrb[62].mxu1  ;;  %v2039_v25 = vpop.f32.mrb[63].mxu0 }
 0x183   :  { %v1377_v51 = vadd.f32 %v2037_v57, %v2657_v3  ;;  %v2040_v28 = vadd.f32 %v2039_v25, %v2038_v20  ;;  %v2103_v30 = vpop.f32.mrb[63].mxu1 }
 0x184   :  { %v2104_v31 = vadd.f32 %v2103_v30, %v2102_v23 }
 0x185   :  { %v1380_v53 = vadd.f32 %v2040_v28, %v2659_v6  ;;  %v1474_v32 = vadd.f32 %v2101_v22, %v1377_v51 }
 0x187   :  { %v2139_v5 = vpop.f32.mrb[64].mxu0  ;;  %v1477_v33 = vadd.f32 %v2104_v31, %v1380_v53  ;;  %v1665_v31 = vld [vmem:[%s2830_s3 + $0x70] sm:$0xff]  ;;  %v1655_v53 = vld [vmem:[%s2830_s3 + $0x20] sm:$0xff] }
 0x188   :  { %v1523_v34 = vadd.f32 %v2139_v5, %v2669_v44  ;;  %v2147_v36 = vpop.f32.mrb[64].mxu1  ;;  %v1514_v7 = vpop.f32.mrb[65].mxu0  ;;  %v1653_v44 = vld [vmem:[%s2830_s3 + $0x10] sm:$0xff] }
 0x189   :  { %v1555_v40 = vadd.f32 %v2147_v36, %v1458_v21  ;;  %v1515_v3 = vadd.f32 %v1514_v7, %v2663_v24  ;;  %v1546_v42 = vpop.f32.mrb[65].mxu1  ;;  %v2140_v29 = vpop.f32.mrb[66].mxu0  ;;  %v1661_v24 = vld [vmem:[%s2830_s3 + $0x50] sm:$0xff] }
 0x18a   :  { %v1547_v45 = vadd.f32 %v1546_v42, %v1450_v38  ;;  %v1526_v6 = vadd.f32 %v2140_v29, %v2671_v46  ;;  %v2148_v47 = vpop.f32.mrb[66].mxu1  ;;  %v1517_v48 = vpop.f32.mrb[67].mxu0  ;;  %v1637_v19 = vadd.f32 %v2703_v27, %v1523_v34  ;;  %v1651_v46 = vld [vmem:[%s2830_s3] sm:$0xff]  ;;  %v1658_v34 = vld [vmem:[%s2830_s3 + $0x38] sm:$0xff] }
 0x18b   :  { %v1558_v49 = vadd.f32 %v2148_v47, %v1461_v59  ;;  %v1518_v50 = vadd.f32 %v1517_v48, %v2665_v26  ;;  %v1549_v52 = vpop.f32.mrb[67].mxu1  ;;  %v1645_v54 = vadd.f32 %v2703_v27, %v1555_v40  ;;  %v1635_v56 = vadd.f32 %v2703_v27, %v1515_v3  ;;  %v1659_v26 = vld [vmem:[%s2830_s3 + $0x40] sm:$0xff]  ;;  %v1656_v3 = vld [vmem:[%s2830_s3 + $0x28] sm:$0xff] }
 0x18c   :  { %v1550_v38 = vadd.f32 %v1549_v52, %v2687_v39  ;;  %v1669_v21 = vadd.f32 %v1653_v44, %v1637_v19  ;;  %v1643_v41 = vadd.f32 %v2703_v27, %v1547_v45  ;;  %v1638_v59 = vadd.f32 %v2703_v27, %v1526_v6  ;;  %v1662_v39 = vld [vmem:[%s2830_s3 + $0x58] sm:$0xff]  ;;  %v1664_v47 = vld [vmem:[%s2830_s3 + $0x68] sm:$0xff] }
 0x18d   :  { %v1677_v61 = vadd.f32 %v1661_v24, %v1645_v54  ;;  %v1667_v43 = vadd.f32 %v1651_v46, %v1635_v56  ;;  %v1646_v63 = vadd.f32 %v2703_v27, %v1558_v49  ;;  %v1636_v1 = vadd.f32 %v2703_v27, %v1518_v50 }
 0x18e   :  { %1685 = vst [vmem:[%s2831_s4 + $0x10] sm:$0xff] %v1669_v21  ;;  %v1675_v8 = vadd.f32 %v1659_v26, %v1643_v41  ;;  %v1670_v9 = vadd.f32 %v1654_v58, %v1638_v59  ;;  %v1644_v10 = vadd.f32 %v2703_v27, %v1550_v38 }
 0x18f   :  { %v2143_v4 = vpop.f32.mrb[68].mxu0  ;;  %1693 = vst [vmem:[%s2831_s4 + $0x50] sm:$0xff] %v1677_v61  ;;  %1683 = vst [vmem:[%s2831_s4] sm:$0xff] %v1667_v43  ;;  %v1678_v37 = vadd.f32 %v1662_v39, %v1646_v63  ;;  %v1668_v14 = vadd.f32 %v1652_v60, %v1636_v1 }
 0x190   :  { %v1539_v35 = vadd.f32 %v2143_v4, %v2681_v16  ;;  %v2151_v11 = vpop.f32.mrb[68].mxu1  ;;  %v1530_v12 = vpop.f32.mrb[69].mxu0  ;;  %1691 = vst [vmem:[%s2831_s4 + $0x40] sm:$0xff] %v1675_v8  ;;  %1686 = vst [vmem:[%s2831_s4 + $0x18] sm:$0xff] %v1670_v9  ;;  %v1676_v16 = vadd.f32 %v1660_v2, %v1644_v10 }
 0x191   :  { %v1571_v15 = vadd.f32 %v2151_v11, %v1474_v32  ;;  %v1531_v57 = vadd.f32 %v1530_v12, %v2675_v62  ;;  %v1562_v17 = vpop.f32.mrb[69].mxu1  ;;  %v2144_v20 = vpop.f32.mrb[70].mxu0  ;;  %1694 = vst [vmem:[%s2831_s4 + $0x58] sm:$0xff] %v1678_v37  ;;  %1684 = vst [vmem:[%s2831_s4 + $0x8] sm:$0xff] %v1668_v14  ;;  %v1657_v62 = vld [vmem:[%s2830_s3 + $0x30] sm:$0xff] }
 0x192   :  { %v1563_v22 = vadd.f32 %v1562_v17, %v2693_v55  ;;  %v1542_v23 = vadd.f32 %v2144_v20, %v2683_v18  ;;  %v2152_v25 = vpop.f32.mrb[70].mxu1  ;;  %v1533_v51 = vpop.f32.mrb[71].mxu0  ;;  %1692 = vst [vmem:[%s2831_s4 + $0x48] sm:$0xff] %v1676_v16  ;;  %v1641_v18 = vadd.f32 %v2703_v27, %v1539_v35 }
 0x193   :  { %v1574_v28 = vadd.f32 %v2152_v25, %v1477_v33  ;;  %v1534_v30 = vadd.f32 %v1533_v51, %v2677_v0  ;;  %v1565_v55 = vpop.f32.mrb[71].mxu1  ;;  %v1649_v5 = vadd.f32 %v2703_v27, %v1571_v15  ;;  %v1639_v0 = vadd.f32 %v2703_v27, %v1531_v57  ;;  %v1663_v33 = vld [vmem:[%s2830_s3 + $0x60] sm:$0xff] }
 0x194   :  { %v1566_v32 = vadd.f32 %v1565_v55, %v2695_v13  ;;  %v1673_v36 = vadd.f32 %v1657_v62, %v1641_v18  ;;  %v1647_v7 = vadd.f32 %v2703_v27, %v1563_v22  ;;  %v1642_v40 = vadd.f32 %v2703_v27, %v1542_v23  ;;  %v1666_v13 = vld [vmem:[%s2830_s3 + $0x78] sm:$0xff] }
 0x195   :  { %v1681_v42 = vadd.f32 %v1665_v31, %v1649_v5  ;;  %v1671_v29 = vadd.f32 %v1655_v53, %v1639_v0  ;;  %v1650_v45 = vadd.f32 %v2703_v27, %v1574_v28  ;;  %v1640_v6 = vadd.f32 %v2703_v27, %v1534_v30 }
 0x196   :  { %1689 = vst [vmem:[%s2831_s4 + $0x30] sm:$0xff] %v1673_v36  ;;  %v1679_v48 = vadd.f32 %v1663_v33, %v1647_v7  ;;  %v1674_v44 = vadd.f32 %v1658_v34, %v1642_v40  ;;  %v1648_v49 = vadd.f32 %v2703_v27, %v1566_v32 }
 0x197   :  { %1697 = vst [vmem:[%s2831_s4 + $0x70] sm:$0xff] %v1681_v42  ;;  %1687 = vst [vmem:[%s2831_s4 + $0x20] sm:$0xff] %v1671_v29  ;;  %v1682_v50 = vadd.f32 %v1666_v13, %v1650_v45  ;;  %v1672_v52 = vadd.f32 %v1656_v3, %v1640_v6 }
 0x198   :  { %1695 = vst [vmem:[%s2831_s4 + $0x60] sm:$0xff] %v1679_v48  ;;  %1690 = vst [vmem:[%s2831_s4 + $0x38] sm:$0xff] %v1674_v44  ;;  %v1680_v19 = vadd.f32 %v1664_v47, %v1648_v49 }
 0x199   :  { %1698 = vst [vmem:[%s2831_s4 + $0x78] sm:$0xff] %v1682_v50  ;;  %1688 = vst [vmem:[%s2831_s4 + $0x28] sm:$0xff] %v1672_v52 }
 0x19a   :  { %1696 = vst [vmem:[%s2831_s4 + $0x68] sm:$0xff] %v1680_v19 }
 0x19b   :  { %1703 = vsyncpa [#allocation3], 1 }

// kernel: autoregressive_block.14
= control target key start
LH: loop header
LB: loop body
LE: loop exit
PB: predicated region body
PF: predicated region fallthrough
CT: control target
= control target key end

     0   :  { %11 = vsyncpa [#allocation4], 0  ;;  %s2392_s0 = inlined_call_operand.vmem [shape: bf16[32,4608], index: 0, kind: input, shape index: {}]   ;;  %s2393_s1 = inlined_call_operand.hbm [shape: bf16[4608,128], index: 1, kind: input, shape index: {}]   ;;  %s2394_s2 = inlined_call_operand.vmem [shape: f32[1,128], index: 2, kind: input, shape index: {}]   ;;  %s2395_s3 = inlined_call_operand.vmem [shape: f32[32,128], index: 3, kind: input, shape index: {}]   ;;  %s2396_s4 = inlined_call_operand.vmem [shape: f32[32,128], index: 4, kind: output, shape index: {0}]   ;;  %s2397_s5 = inlined_call_operand.vmem [shape: f32[32,128], index: 5, kind: output, shape index: {1}]  }
   0x1   :  { %13 = vsyncpa [#allocation4 + $0x1], 0  ;;  %s2049_s18 = smov 0   ;;  %s2051_s19 = smov 0  }
   0x2   :  { %s2053_s20 = smov 0   ;;  %s2055_s21 = smov 0  }
   0x3   :  { %s2057_s22 = smov 0   ;;  %s2059_s23 = smov 0  }
   0x4 LB: > { %s1522_s24 = sadd.s32 4294967295, %s2013_s23   ;;  %s28_s25 = sadd.s32 1, %s2009_s22  ;;  %s2013_s23 = sphi %s2059_s23, %s19_s23   ;;  %s2009_s22 = sphi %s2057_s22, %s2404_s22   ;;  %s2005_s21 = sphi %s2055_s21, %s2403_s21   ;;  %s2001_s20 = sphi %s2053_s20, %s2402_s20   ;;  %s1997_s19 = sphi %s2051_s19, %s2401_s19   ;;  %s1993_s18 = sphi %s2049_s18, %s2400_s18  }
   0x5   : > { %p29_p0 = scmp.ge.s32.totalorder %s28_s25, 4  ;;  %s40_s26 = sadd.s32 1, %s2001_s20 }
   0x6   : > { %p47_p1 = scmp.ne.s32.totalorder %s2001_s20, %s1997_s19  ;;  %p48_p2 = scmp.eq.s32.totalorder %s2013_s23, 0 }
   0x7   : > { %s2406_s25 = smov (%p29_p0, %s28_s25), 0  ;;  %p79_p4 = scmp.ne.s32.totalorder %s1997_s19, %s1993_s18 }
   0x8   : > { %p2085_p3 = por %p48_p2, %p47_p1  ;;  %s36_s28 = ssub.s32 %s2009_s22, %s2406_s25 }
   0x9   : > { %p80_p5 = scmp.eq.s32.totalorder %s1522_s24, 0  ;;  %p38_p6 = scmp.eq.s32.totalorder %s36_s28, 0 }
   0xa   : > { %p1525_p8 = scmp.ge.s32.totalorder %s2013_s23, 4 }
   0xb   : > { %p2092_p7 = por %p80_p5, %p79_p4 }
   0xc   : > { %s2097_s30 = scalar_select %p38_p6, %s2001_s20, %s40_s26  }
   0xd   : > { %210 = sbr.rel (%p1525_p8) target bundleno = 61 (0x3d), region = 24 }
  0x14   : > { %213 = sbr.rel (!%p2085_p3) target bundleno = 35 (0x23), region = 28  ;;  %s215_s6 = sand.u32 (%p2085_p3), 1, %s2001_s20  }
  0x15   : > { %s1636_s7 = smul.u32 (%p2085_p3), 36, %s2009_s22 }
  0x16   : > { %s1780_s8 = smul.u32 (%p2085_p3), 144, %s215_s6 }
  0x17   : > { %s2107_s11 = scalar_lea.vmem (%p2085_p3), %s2392_s0, %s1636_s7 }
  0x18   : > { %v238_v0 = vld [vmem:[%s2107_s11] sm:$0xff] (%p2085_p3)  ;;  %v240_v1 = vld [vmem:[%s2107_s11 + $0x8] sm:$0xff] (%p2085_p3)  ;;  %v242_v2 = vld [vmem:[%s2107_s11 + $0x10] sm:$0xff] (%p2085_p3)  ;;  %s2112_s12 = scalar_lea.vmem (%p2085_p3), [#allocation2], %s1780_s8 }
  0x19   : > { %239 = vst [vmem:[%s2112_s12] sm:$0xff] (%p2085_p3), %v238_v0  ;;  %241 = vst [vmem:[%s2112_s12 + $0x8] sm:$0xff] (%p2085_p3), %v240_v1  ;;  %v244_v3 = vld [vmem:[%s2107_s11 + $0x18] sm:$0xff] (%p2085_p3)  ;;  %v246_v4 = vld [vmem:[%s2107_s11 + $0x90] sm:$0xff] (%p2085_p3) }
  0x1a   : > { %243 = vst [vmem:[%s2112_s12 + $0x10] sm:$0xff] (%p2085_p3), %v242_v2  ;;  %v248_v5 = vld [vmem:[%s2107_s11 + $0x98] sm:$0xff] (%p2085_p3)  ;;  %245 = vst [vmem:[%s2112_s12 + $0x18] sm:$0xff] (%p2085_p3), %v244_v3  ;;  %v250_v6 = vld [vmem:[%s2107_s11 + $0xa0] sm:$0xff] (%p2085_p3) }
  0x1b   : > { %247 = vst [vmem:[%s2112_s12 + $0x24] sm:$0xff] %v246_v4  ;;  %249 = vst [vmem:[%s2112_s12 + $0x2c] sm:$0xff] %v248_v5  ;;  %v252_v7 = vld [vmem:[%s2107_s11 + $0xa8] sm:$0xff]  ;;  %v254_v8 = vld [vmem:[%s2107_s11 + $0x120] sm:$0xff] }
  0x1c   : > { %251 = vst [vmem:[%s2112_s12 + $0x34] sm:$0xff] %v250_v6  ;;  %253 = vst [vmem:[%s2112_s12 + $0x3c] sm:$0xff] %v252_v7  ;;  %v256_v9 = vld [vmem:[%s2107_s11 + $0x128] sm:$0xff]  ;;  %v258_v10 = vld [vmem:[%s2107_s11 + $0x130] sm:$0xff] }
  0x1d   : > { %255 = vst [vmem:[%s2112_s12 + $0x48] sm:$0xff] %v254_v8  ;;  %v260_v11 = vld [vmem:[%s2107_s11 + $0x138] sm:$0xff]  ;;  %257 = vst [vmem:[%s2112_s12 + $0x50] sm:$0xff] %v256_v9  ;;  %v262_v12 = vld [vmem:[%s2107_s11 + $0x1b0] sm:$0xff] }
  0x1e   : > { %259 = vst [vmem:[%s2112_s12 + $0x58] sm:$0xff] %v258_v10  ;;  %261 = vst [vmem:[%s2112_s12 + $0x60] sm:$0xff] %v260_v11  ;;  %v264_v13 = vld [vmem:[%s2107_s11 + $0x1b8] sm:$0xff]  ;;  %v266_v14 = vld [vmem:[%s2107_s11 + $0x1c0] sm:$0xff] }
  0x1f   : > { %263 = vst [vmem:[%s2112_s12 + $0x6c] sm:$0xff] %v262_v12  ;;  %265 = vst [vmem:[%s2112_s12 + $0x74] sm:$0xff] %v264_v13  ;;  %v268_v15 = vld [vmem:[%s2107_s11 + $0x1c8] sm:$0xff]  ;;  %v1527_v16 = vld [vmem:[%s2107_s11 + $0x20] sm:$0xf] }
  0x20   : > { %267 = vst [vmem:[%s2112_s12 + $0x7c] sm:$0xff] %v266_v14  ;;  %v1529_v17 = vld [vmem:[%s2107_s11 + $0xb0] sm:$0xf]  ;;  %269 = vst [vmem:[%s2112_s12 + $0x84] sm:$0xff] %v268_v15  ;;  %v1531_v18 = vld [vmem:[%s2107_s11 + $0x140] sm:$0xf] }
  0x21   : > { %1528 = vst [vmem:[%s2112_s12 + $0x20] sm:$0xf] %v1527_v16  ;;  %1530 = vst [vmem:[%s2112_s12 + $0x44] sm:$0xf] %v1529_v17  ;;  %v1533_v19 = vld [vmem:[%s2107_s11 + $0x1d0] sm:$0xf] }
  0x22   : > { %1532 = vst [vmem:[%s2112_s12 + $0x68] sm:$0xf] %v1531_v18  ;;  %1534 = vst [vmem:[%s2112_s12 + $0x8c] sm:$0xf] %v1533_v19 }
  0x23 PF: > { %s291_s13 = sand.u32 1, %s2001_s20   ;;  %s1637_s14 = smul.u32 9216, %s2009_s22 }
  0x24   : > { %s1781_s15 = smul.u32 576, %s291_s13  ;;  %s2160_s28 = scalar_lea.sflag [#allocation4], %s291_s13 }
  0x25   : > { %s2156_s18 = scalar_lea.hbm %s2393_s1, %s1637_s14  ;;  %s1939_s9 = scalar_lea.hbm %s2393_s1, 36864 }
  0x26   : > { %s295_s24 = scalar_lea.vmem [#allocation3], %s1781_s15  ;;  %s1935_s6 = scalar_lea.hbm %s2156_s18, 9216 }
  0x27   : > { %s302_s26 = sshll.u32 %s295_s24, 4  ;;  %p1936_p9 = scmp.ne.s32.totalorder %s2156_s18, %s1935_s6  ;;  %s2158_s26 = int_to_ptr.vmem [resolvable:$true] %s302_s26 }
  0x28   : > { %p1940_p12 = scmp.lt.u32.totalorder %s2156_s18, %s2393_s1  ;;  %p1941_p13 = scmp.lt.u32.totalorder %s1939_s9, %s1935_s6 }
  0x29   : > { %p1937_p10 = pnand %p1936_p9, %p2085_p3  ;;  %p1943_p1 = scmp.lt.u32.totalorder %s1935_s6, %s2156_s18 }
  0x2a   : > { %p1942_p0 = por %p1941_p13, %p1940_p12 }
  0x2b   : > { %p1938_p11 = pneg %p1937_p10 }
  0x2c   : > { %p1944_p2 = por %p1943_p1, %p1942_p0 }
  0x2e   : > { %p1945_p4 = pnand %p1944_p2, %p1938_p11 }
  0x30   : > { %1948 = shalt.err (!%p1945_p4)
}
  0x31   : > { %s1949_s12 = scalar_lea.vmem %s2158_s26, 9216  ;;  %s2015_s13 = smov [#allocation3]  }
  0x32   : > { %p1950_p5 = scmp.ne.s32.totalorder %s2158_s26, %s1949_s12  ;;  %s1953_s14 = sshll.u32 %s2015_s13, 4  ;;  %s1954_s14 = int_to_ptr.vmem [resolvable:$false] %s1953_s14 }
  0x33   : > { %s1955_s15 = scalar_lea.vmem %s1954_s14, 18432  ;;  %p1956_p9 = scmp.lt.s32.totalorder %s2158_s26, %s1954_s14 }
  0x34   : > { %p1951_p6 = pnand %p1950_p5, %p2085_p3  ;;  %p1957_p10 = scmp.lt.s32.totalorder %s1955_s15, %s1949_s12 }
  0x36   : > { %p1952_p8 = pneg %p1951_p6  ;;  %p1958_p12 = por %p1957_p10, %p1956_p9 }
  0x38   : > { %p1959_p13 = pnand %p1958_p12, %p1952_p8 }
  0x3a   : > { %1962 = shalt.err (!%p1959_p13)
}
  0x3b   : > { %s2016_s16 = smov 64   ;;  %s2017_s17 = smov 4  }
  0x3c   : > { %1784 = dma.hbm_to_vmem [thread:$0]  (%p2085_p3), %s2156_s18, 9216, %s2158_s26, %s2160_s28, %s2016_s16, %s2016_s16, %s2017_s17  }
  0x3d PF: > { %p1536_p11 = scmp.ge.s32.totalorder %s2013_s23, 1  ;;  %p310_p0 = scmp.lt.s32.totalorder %s2013_s23, 5 }
  0x3f   : > { %p311_p1 = pnand %p1536_p11, %p310_p0 }
  0x40   : > { %s317_s24 = sand.u32 (!%p311_p1), 1, %s1997_s19  }
  0x41   : > { %314 = sbr.rel (%p311_p1) target bundleno = 412 (0x19c), region = 58  ;;  %s324_s9 = scalar_lea.sflag (!%p311_p1), [#allocation4], %s317_s24 }
  0x42   : > { %s1782_s6 = smul.u32 (!%p311_p1), 144, %s317_s24 }
  0x43   : > { %s1783_s7 = smul.u32 (!%p311_p1), 576, %s317_s24 }
  0x44   : > { %s2187_s8 = scalar_lea.vmem (!%p311_p1), [#allocation2], %s1782_s6 }
  0x45   : > { %s2189_s10 = scalar_lea.vmem (!%p311_p1), [#allocation3], %s1783_s7 }
  0x48   : > { %1988 = dma.done.wait (%p2092_p7), %s324_s9, 9216  }
  0x49   : > { %1990 = vsyncadd (%p2092_p7), %s324_s9, 4294958080  ;;  %p1537_p3 = scmp.ne.s32.totalorder %s2005_s21, 0 }
  0x4a   : > { %v2018_v20 = vmov (!%p1537_p3), 0.0  }
  0x4b   : > { %393 = sbr.rel (%p1537_p3) target bundleno = 82 (0x52), region = 70  ;;  %394 = vst [vmem:[%s2396_s4] sm:$0xff] (!%p1537_p3), %v2018_v20  ;;  %395 = vst [vmem:[%s2396_s4 + $0x8] sm:$0xff] (!%p1537_p3), %v2018_v20 }
  0x4c   : > { %396 = vst [vmem:[%s2396_s4 + $0x10] sm:$0xff] (!%p1537_p3), %v2018_v20  ;;  %397 = vst [vmem:[%s2396_s4 + $0x18] sm:$0xff] (!%p1537_p3), %v2018_v20 }
  0x52 PF: > { %v1837_v21 = vld [vmem:[%s2189_s10 + $0x40] sm:$0xff]   ;;  %v1841_v25 = vld [vmem:[%s2189_s10 + $0x48] sm:$0xff]   ;;  %v1845_v29 = vld [vmem:[%s2189_s10 + $0x50] sm:$0xff]   ;;  %p1628_p7 = scmp.ne.s32.totalorder %s2005_s21, 3 }
  0x53   : > { %v1838_v22 = vld [vmem:[%s2189_s10 + $0xc0] sm:$0xff]   ;;  %1638 = vmatprep.subr.bf16.mxu0 %v1837_v21  ;;  %v1842_v26 = vld [vmem:[%s2189_s10 + $0xc8] sm:$0xff]   ;;  %v1846_v30 = vld [vmem:[%s2189_s10 + $0xd0] sm:$0xff]  }
  0x54   : > { %v1839_v23 = vld [vmem:[%s2189_s10] sm:$0xff]   ;;  %1666 = vmatprep.subr.bf16.mxu1 %v1838_v22  ;;  %v1843_v27 = vld [vmem:[%s2189_s10 + $0x8] sm:$0xff]   ;;  %v1847_v31 = vld [vmem:[%s2189_s10 + $0x10] sm:$0xff]  }
  0x55   : > { %v1840_v24 = vld [vmem:[%s2189_s10 + $0x80] sm:$0xff]   ;;  %1639 = vmatpush3.bf16.msra.mxu0 %v1839_v23  ;;  %v1844_v28 = vld [vmem:[%s2189_s10 + $0x88] sm:$0xff]   ;;  %v1848_v32 = vld [vmem:[%s2189_s10 + $0x90] sm:$0xff]  }
  0x56   : > { %1667 = vmatpush3.bf16.msra.mxu1 %v1840_v24  ;;  %1640 = vmatprep.subr.bf16.mxu0 %v1841_v25  ;;  %v1849_v33 = vld [vmem:[%s2189_s10 + $0x58] sm:$0xff]   ;;  %v1853_v37 = vld [vmem:[%s2189_s10 + $0x60] sm:$0xff]   ;;  %v1857_v41 = vld [vmem:[%s2189_s10 + $0x68] sm:$0xff]  }
  0x57   : > { %1668 = vmatprep.subr.bf16.mxu1 %v1842_v26  ;;  %v1850_v34 = vld [vmem:[%s2189_s10 + $0xd8] sm:$0xff]   ;;  %v1854_v38 = vld [vmem:[%s2189_s10 + $0xe0] sm:$0xff]   ;;  %v1858_v42 = vld [vmem:[%s2189_s10 + $0xe8] sm:$0xff]  }
  0x58   : > { %v1851_v35 = vld [vmem:[%s2189_s10 + $0x18] sm:$0xff]   ;;  %v1855_v39 = vld [vmem:[%s2189_s10 + $0x20] sm:$0xff]   ;;  %v1859_v43 = vld [vmem:[%s2189_s10 + $0x28] sm:$0xff]  }
  0x59   : > { %1641 = vmatpush3.bf16.msra.mxu0 %v1843_v27  ;;  %v1852_v36 = vld [vmem:[%s2189_s10 + $0x98] sm:$0xff]   ;;  %v1856_v40 = vld [vmem:[%s2189_s10 + $0xa0] sm:$0xff]   ;;  %v1860_v44 = vld [vmem:[%s2189_s10 + $0xa8] sm:$0xff]  }
  0x5a   : > { %1669 = vmatpush3.bf16.msra.mxu1 %v1844_v28  ;;  %1642 = vmatprep.subr.bf16.mxu0 %v1845_v29  ;;  %v1861_v45 = vld [vmem:[%s2189_s10 + $0x70] sm:$0xff]   ;;  %v1865_v49 = vld [vmem:[%s2189_s10 + $0x78] sm:$0xff]   ;;  %v1875_v57 = vld [vmem:[%s2189_s10 + $0x140] sm:$0xff]  }
  0x5b   : > { %1670 = vmatprep.subr.bf16.mxu1 %v1846_v30  ;;  %v1862_v46 = vld [vmem:[%s2189_s10 + $0xf0] sm:$0xff]   ;;  %v1866_v50 = vld [vmem:[%s2189_s10 + $0xf8] sm:$0xff]   ;;  %v1876_v58 = vld [vmem:[%s2189_s10 + $0x100] sm:$0xff]  }
  0x5c   : > { %v1863_v47 = vld [vmem:[%s2189_s10 + $0x30] sm:$0xff]   ;;  %v1867_v51 = vld [vmem:[%s2189_s10 + $0x38] sm:$0xff]   ;;  %v1877_v59 = vld [vmem:[%s2189_s10 + $0x1c0] sm:$0xff]  }
  0x5d   : > { %1643 = vmatpush3.bf16.msra.mxu0 %v1847_v31  ;;  %v1864_v48 = vld [vmem:[%s2189_s10 + $0xb0] sm:$0xff]   ;;  %v1868_v52 = vld [vmem:[%s2189_s10 + $0xb8] sm:$0xff]   ;;  %v1878_v60 = vld [vmem:[%s2189_s10 + $0x180] sm:$0xff]  }
  0x5e   : > { %1671 = vmatpush3.bf16.msra.mxu1 %v1848_v32  ;;  %1644 = vmatprep.subr.bf16.mxu0 %v1849_v33  ;;  %v1869_v53 = vld [vmem:[%s2187_s8] ss:$36 sps:$4 sm:$0xff]   ;;  %v1872_v55 = vld [vmem:[%s2187_s8 + $0x8] ss:$36 sps:$4 sm:$0xff]   ;;  %v1898_v15 = vld [vmem:[%s2187_s8 + $0x54] ss:$36 sps:$4 sm:$0xff]  }
  0x5f   : > { %1672 = vmatprep.subr.bf16.mxu1 %v1850_v34  ;;  %v1871_v54 = vld [vmem:[%s2187_s8 + $0x4] ss:$36 sps:$4 sm:$0xff]   ;;  %v1874_v56 = vld [vmem:[%s2187_s8 + $0xc] ss:$36 sps:$4 sm:$0xff]   ;;  %v1914_v29 = vld [vmem:[%s2187_s8 + $0x14] ss:$36 sps:$4 sm:$0xff]  }
  0x60   : > { %1122 = vmatprep.mubr.bf16.mxu0 %v1871_v54  ;;  %1171 = vmatprep.mubr.bf16.mxu1 %v1874_v56  ;;  %v1879_v61 = vld [vmem:[%s2189_s10 + $0x148] sm:$0xff]   ;;  %v1883_v1 = vld [vmem:[%s2189_s10 + $0x150] sm:$0xff]   ;;  %v1887_v5 = vld [vmem:[%s2189_s10 + $0x158] sm:$0xff]  }
  0x61   : > { %1645 = vmatpush3.bf16.msra.mxu0 %v1851_v35  ;;  %v1880_v62 = vld [vmem:[%s2189_s10 + $0x108] sm:$0xff]   ;;  %v1884_v2 = vld [vmem:[%s2189_s10 + $0x110] sm:$0xff]   ;;  %v1888_v6 = vld [vmem:[%s2189_s10 + $0x118] sm:$0xff]  }
  0x62   : > { %1673 = vmatpush3.bf16.msra.mxu1 %v1852_v36  ;;  %1646 = vmatprep.subr.bf16.mxu0 %v1853_v37  ;;  %v1881_v63 = vld [vmem:[%s2189_s10 + $0x1c8] sm:$0xff]   ;;  %v1885_v3 = vld [vmem:[%s2189_s10 + $0x1d0] sm:$0xff]   ;;  %v1889_v7 = vld [vmem:[%s2189_s10 + $0x1d8] sm:$0xff]  }
  0x63   : > { %1674 = vmatprep.subr.bf16.mxu1 %v1854_v38  ;;  %v1882_v0 = vld [vmem:[%s2189_s10 + $0x188] sm:$0xff]   ;;  %v1886_v4 = vld [vmem:[%s2189_s10 + $0x190] sm:$0xff]   ;;  %v1890_v8 = vld [vmem:[%s2189_s10 + $0x198] sm:$0xff]  }
  0x64   : > { %v1891_v9 = vld [vmem:[%s2189_s10 + $0x160] sm:$0xff]   ;;  %v1895_v13 = vld [vmem:[%s2189_s10 + $0x168] sm:$0xff]   ;;  %v1905_v21 = vld [vmem:[%s2189_s10 + $0x170] sm:$0xff]  }
  0x65   : > { %1647 = vmatpush3.bf16.msra.mxu0 %v1855_v39  ;;  %v1892_v10 = vld [vmem:[%s2189_s10 + $0x120] sm:$0xff]   ;;  %v1900_v16 = vld [vmem:[%s2189_s10 + $0x128] sm:$0xff]   ;;  %v1906_v22 = vld [vmem:[%s2189_s10 + $0x130] sm:$0xff]  }
  0x66   : > { %1675 = vmatpush3.bf16.msra.mxu1 %v1856_v40  ;;  %1648 = vmatprep.subr.bf16.mxu0 %v1857_v41  ;;  %v1893_v11 = vld [vmem:[%s2189_s10 + $0x1e0] sm:$0xff]   ;;  %v1901_v17 = vld [vmem:[%s2187_s8 + $0x48] ss:$36 sps:$4 sm:$0xff]   ;;  %v1907_v23 = vld [vmem:[%s2189_s10 + $0x1f0] sm:$0xff]  }
  0x67   : > { %1676 = vmatprep.subr.bf16.mxu1 %v1858_v42  ;;  %v1894_v12 = vld [vmem:[%s2189_s10 + $0x1a0] sm:$0xff]   ;;  %v1903_v19 = vld [vmem:[%s2189_s10 + $0x1e8] sm:$0xff]   ;;  %v1908_v24 = vld [vmem:[%s2189_s10 + $0x1b0] sm:$0xff]  }
  0x68   : > { %v1896_v14 = vld [vmem:[%s2187_s8 + $0x4c] ss:$36 sps:$4 sm:$0xff]   ;;  %v1917_v32 = vld [vmem:[%s2187_s8 + $0x18] ss:$36 sps:$4 sm:$0xff]   ;;  %v1925_v38 = vld [vmem:[%s2187_s8 + $0x64] ss:$36 sps:$4 sm:$0xff]  }
  0x69   : > { %1649 = vmatpush3.bf16.msra.mxu0 %v1859_v43  ;;  %v1902_v18 = vld [vmem:[%s2187_s8 + $0x50] ss:$36 sps:$4 sm:$0xff]   ;;  %v1904_v20 = vld [vmem:[%s2189_s10 + $0x1a8] sm:$0xff]   ;;  %v1909_v25 = vld [vmem:[%s2189_s10 + $0x178] sm:$0xff]  }
  0x6a   : > { %1677 = vmatpush3.bf16.msra.mxu1 %v1860_v44  ;;  %1650 = vmatprep.subr.bf16.mxu0 %v1861_v45  ;;  %v1910_v26 = vld [vmem:[%s2189_s10 + $0x138] sm:$0xff]   ;;  %v1912_v28 = vld [vmem:[%s2187_s8 + $0x10] ss:$36 sps:$4 sm:$0xff]   ;;  %v1920_v34 = vld [vmem:[%s2189_s10 + $0x208] sm:$0xff]  }
  0x6b   : > { %1678 = vmatprep.subr.bf16.mxu1 %v1862_v46  ;;  %v1911_v27 = vld [vmem:[%s2189_s10 + $0x1f8] sm:$0xff]   ;;  %v1916_v31 = vld [vmem:[%s2189_s10 + $0x200] sm:$0xff]   ;;  %v1924_v37 = vld [vmem:[%s2189_s10 + $0x210] sm:$0xff]  }
  0x6c   : > { %v1915_v30 = vld [vmem:[%s2189_s10 + $0x1b8] sm:$0xff]   ;;  %v1927_v39 = vld [vmem:[%s2187_s8 + $0x60] ss:$36 sps:$4 sm:$0xff]   ;;  %v1930_v43 = vld [vmem:[%s2189_s10 + $0x228] sm:$0xff]  }
  0x6d   : > { %1651 = vmatpush3.bf16.msra.mxu0 %v1863_v47  ;;  %v1919_v33 = vld [vmem:[%s2187_s8 + $0x1c] ss:$36 sps:$4 sm:$0xff]   ;;  %v1934_v46 = vld [vmem:[%s2187_s8 + $0x68] ss:$36 sps:$4 sm:$0xff]  }
  0x6e   : > { %1679 = vmatpush3.bf16.msra.mxu1 %v1864_v48  ;;  %1652 = vmatprep.subr.bf16.mxu0 %v1865_v49  ;;  %v1921_v35 = vld [vmem:[%s2187_s8 + $0x5c] ss:$36 sps:$4 sm:$0xff]  }
  0x6f   : > { %1680 = vmatprep.subr.bf16.mxu1 %v1866_v50  ;;  %v1923_v36 = vld [vmem:[%s2187_s8 + $0x58] ss:$36 sps:$4 sm:$0xff]   ;;  %v1929_v41 = vld [vmem:[%s2189_s10 + $0x220] sm:$0xff]   ;;  %v1931_v44 = vld [vmem:[%s2189_s10 + $0x230] sm:$0xff]  }
  0x70   : > { %v1928_v40 = vld [vmem:[%s2189_s10 + $0x218] sm:$0xff]   ;;  %v1933_v42 = vld [vmem:[%s2187_s8 + $0x20] ss:$36 sps:$4 sm:$0xff]  }
  0x71   : > { %1653 = vmatpush3.bf16.msra.mxu0 %v1867_v51  ;;  %v1932_v45 = vld [vmem:[%s2189_s10 + $0x238] sm:$0xff]  }
  0x72   : > { %1681 = vmatpush3.bf16.msra.mxu1 %v1868_v52  ;;  %1694 = vmatprep.subr.bf16.mxu0 %v1875_v57 }
  0x73   : > { %1722 = vmatprep.subr.bf16.mxu1 %v1877_v59 }
  0x74   : > { %1123 = vmatmul.mubr.bf16.vlgmr.msra.gmra.mrb[0].mxu0 %v1869_v53 }
  0x75   : > { %1172 = vmatmul.mubr.bf16.vlgmr.msra.gmra.mrb[0].mxu1 %v1872_v55  ;;  %1695 = vmatpush3.bf16.msra.mxu0 %v1876_v58 }
  0x76   : > { %1723 = vmatpush3.bf16.msra.mxu1 %v1878_v60  ;;  %1696 = vmatprep.subr.bf16.mxu0 %v1879_v61 }
  0x77   : > { %1724 = vmatprep.subr.bf16.mxu1 %v1881_v63  ;;  %1130 = vmatprep.mubr.bf16.mxu0 %v1896_v14 }
  0x78   : > { %1179 = vmatprep.mubr.bf16.mxu1 %v1898_v15 }
  0x79   : > { %1697 = vmatpush3.bf16.msra.mxu0 %v1880_v62 }
  0x7a   : > { %1725 = vmatpush3.bf16.msra.mxu1 %v1882_v0  ;;  %1698 = vmatprep.subr.bf16.mxu0 %v1883_v1 }
  0x7b   : > { %1726 = vmatprep.subr.bf16.mxu1 %v1885_v3 }
  0x7c   : > { %1131 = vmatmul.mubr.bf16.gmra.mrb[4].mxu0 %v1901_v17 }
  0x7d   : > { %1699 = vmatpush3.bf16.msra.mxu0 %v1884_v2  ;;  %1180 = vmatmul.mubr.bf16.gmra.mrb[4].mxu1 %v1902_v18 }
  0x7e   : > { %1727 = vmatpush3.bf16.msra.mxu1 %v1886_v4  ;;  %1700 = vmatprep.subr.bf16.mxu0 %v1887_v5 }
  0x7f   : > { %1728 = vmatprep.subr.bf16.mxu1 %v1889_v7  ;;  %1220 = vmatprep.mubr.bf16.mxu0 %v1914_v29 }
  0x80   : > { %1269 = vmatprep.mubr.bf16.mxu1 %v1919_v33 }
  0x81   : > { %1701 = vmatpush3.bf16.msra.mxu0 %v1888_v6 }
  0x82   : > { %1729 = vmatpush3.bf16.msra.mxu1 %v1890_v8  ;;  %1702 = vmatprep.subr.bf16.mxu0 %v1891_v9 }
  0x83   : > { %1730 = vmatprep.subr.bf16.mxu1 %v1893_v11 }
  0x85   : > { %1703 = vmatpush3.bf16.msra.mxu0 %v1892_v10 }
  0x86   : > { %1731 = vmatpush3.bf16.msra.mxu1 %v1894_v12  ;;  %1704 = vmatprep.subr.bf16.mxu0 %v1895_v13 }
  0x87   : > { %1732 = vmatprep.subr.bf16.mxu1 %v1903_v19 }
  0x89   : > { %1705 = vmatpush3.bf16.msra.mxu0 %v1900_v16 }
  0x8a   : > { %1733 = vmatpush3.bf16.msra.mxu1 %v1904_v20  ;;  %1706 = vmatprep.subr.bf16.mxu0 %v1905_v21 }
  0x8b   : > { %1734 = vmatprep.subr.bf16.mxu1 %v1907_v23 }
  0x8d   : > { %1707 = vmatpush3.bf16.msra.mxu0 %v1906_v22 }
  0x8e   : > { %1735 = vmatpush3.bf16.msra.mxu1 %v1908_v24  ;;  %1708 = vmatprep.subr.bf16.mxu0 %v1909_v25 }
  0x8f   : > { %1736 = vmatprep.subr.bf16.mxu1 %v1911_v27 }
  0x91   : > { %1709 = vmatpush3.bf16.msra.mxu0 %v1910_v26 }
  0x92   : > { %1737 = vmatpush3.bf16.msra.mxu1 %v1915_v30  ;;  %1760 = vmatprep.subr.bf16.mxu0 %v1916_v31 }
  0x94   : > { %1221 = vmatmul.mubr.bf16.vlgmr.msra.gmra.mrb[8].mxu0 %v1912_v28 }
  0x95   : > { %1761 = vmatpush3.bf16.msra.mxu0 %v1916_v31  ;;  %1270 = vmatmul.mubr.bf16.vlgmr.msra.gmra.mrb[8].mxu1 %v1917_v32 }
  0x96   : > { %1762 = vmatprep.subr.bf16.mxu0 %v1920_v34  ;;  %1228 = vmatprep.mubr.bf16.mxu0 %v1921_v35 }
  0x97   : > { %1277 = vmatprep.mubr.bf16.mxu1 %v1925_v38 }
  0x99   : > { %1763 = vmatpush3.bf16.msra.mxu0 %v1920_v34 }
  0x9a   : > { %1764 = vmatprep.subr.bf16.mxu0 %v1924_v37 }
  0x9c   : > { %1229 = vmatmul.mubr.bf16.gmra.mrb[12].mxu0 %v1923_v36 }
  0x9d   : > { %1765 = vmatpush3.bf16.msra.mxu0 %v1924_v37  ;;  %1278 = vmatmul.mubr.bf16.gmra.mrb[12].mxu1 %v1927_v39 }
  0x9e   : > { %1766 = vmatprep.subr.bf16.mxu0 %v1928_v40  ;;  %1776 = vmatprep.mubr.bf16.mxu0 %v1933_v42 }
  0xa1   : > { %1767 = vmatpush3.bf16.msra.mxu0 %v1928_v40 }
  0xa2   : > { %1768 = vmatprep.subr.bf16.mxu0 %v1929_v41 }
  0xa5   : > { %1769 = vmatpush3.bf16.msra.mxu0 %v1929_v41 }
  0xa6   : > { %1770 = vmatprep.subr.bf16.mxu0 %v1930_v43 }
  0xa9   : > { %1771 = vmatpush3.bf16.msra.mxu0 %v1930_v43  ;;  %v400_v43 = vld [vmem:[%s2396_s4 + $0x10] sm:$0xff] }
  0xaa   : > { %1772 = vmatprep.subr.bf16.mxu0 %v1931_v44 }
  0xad   : > { %1773 = vmatpush3.bf16.msra.mxu0 %v1931_v44 }
  0xae   : > { %1774 = vmatprep.subr.bf16.mxu0 %v1932_v45 }
  0xb1   : > { %1775 = vmatpush3.bf16.msra.mxu0 %v1932_v45 }
  0xb4   : > { %1777 = vmatmul.mubr.bf16.vlgmr.msra.gmra.mrb[16].mxu0 %v1934_v46  ;;  %v398_v46 = vld [vmem:[%s2396_s4] sm:$0xff] }
 0x147   : > { %v1654_v47 = vpop.f32.mrb[0].mxu0 }
 0x148   : > { %v1682_v48 = vpop.f32.mrb[0].mxu1  ;;  %v1655_v49 = vpop.f32.mrb[1].mxu0 }
 0x149   : > { %v1656_v50 = vadd.f32 %v1655_v49, %v1654_v47  ;;  %v1683_v51 = vpop.f32.mrb[1].mxu1  ;;  %v1657_v52 = vpop.f32.mrb[2].mxu0  ;;  %v401_v49 = vld [vmem:[%s2396_s4 + $0x18] sm:$0xff] }
 0x14a   : > { %v1684_v53 = vadd.f32 %v1683_v51, %v1682_v48  ;;  %v1685_v54 = vpop.f32.mrb[2].mxu1  ;;  %v1658_v55 = vpop.f32.mrb[3].mxu0 }
 0x14b   : > { %v1659_v56 = vadd.f32 %v1658_v55, %v1657_v52  ;;  %v1686_v57 = vpop.f32.mrb[3].mxu1 }
 0x14c   : > { %v1174_v58 = vadd.f32 %v1684_v53, %v1656_v50  ;;  %v1687_v59 = vadd.f32 %v1686_v57, %v1685_v54  ;;  %v399_v53 = vld [vmem:[%s2396_s4 + $0x8] sm:$0xff] }
 0x14e   : > { %v1177_v60 = vadd.f32 %v1687_v59, %v1659_v56 }
 0x14f   : > { %v1660_v61 = vpop.f32.mrb[4].mxu0 }
 0x150   : > { %v1688_v62 = vpop.f32.mrb[4].mxu1  ;;  %v1661_v63 = vpop.f32.mrb[5].mxu0 }
 0x151   : > { %v1689_v0 = vpop.f32.mrb[5].mxu1  ;;  %v1662_v1 = vadd.f32 %v1661_v63, %v1660_v61  ;;  %v1663_v3 = vpop.f32.mrb[6].mxu0 }
 0x152   : > { %v1690_v2 = vadd.f32 %v1689_v0, %v1688_v62  ;;  %v1691_v4 = vpop.f32.mrb[6].mxu1  ;;  %v1664_v5 = vpop.f32.mrb[7].mxu0 }
 0x153   : > { %v1692_v6 = vpop.f32.mrb[7].mxu1  ;;  %v1665_v8 = vadd.f32 %v1664_v5, %v1663_v3  ;;  %v1367_v5 = vld [vmem:[%s2395_s3 + $0x8] sm:$0xff] (!%p1628_p7) }
 0x154   : > { %v1182_v7 = vadd.f32 %v1690_v2, %v1662_v1  ;;  %v1693_v9 = vadd.f32 %v1692_v6, %v1691_v4  ;;  %v1366_v2 = vld [vmem:[%s2395_s3] sm:$0xff] (!%p1628_p7)  ;;  %v1368_v6 = vld [vmem:[%s2395_s3 + $0x10] sm:$0xff] (!%p1628_p7) }
 0x156   : > { %v1185_v10 = vadd.f32 %v1693_v9, %v1665_v8 }
 0x167   : > { %v1710_v11 = vpop.f32.mrb[8].mxu0 }
 0x168   : > { %v1711_v12 = vpop.f32.mrb[9].mxu0  ;;  %v1738_v15 = vpop.f32.mrb[8].mxu1 }
 0x169   : > { %v1712_v13 = vadd.f32 %v1711_v12, %v1710_v11  ;;  %v1713_v14 = vpop.f32.mrb[10].mxu0  ;;  %v1739_v19 = vpop.f32.mrb[9].mxu1 }
 0x16a   : > { %v1714_v16 = vpop.f32.mrb[11].mxu0  ;;  %v1740_v20 = vadd.f32 %v1739_v19, %v1738_v15  ;;  %v1741_v21 = vpop.f32.mrb[10].mxu1 }
 0x16b   : > { %v1223_v17 = vadd.f32 %v1712_v13, %v1174_v58  ;;  %v1715_v18 = vadd.f32 %v1714_v16, %v1713_v14  ;;  %v1742_v23 = vpop.f32.mrb[11].mxu1 }
 0x16c   : > { %v1743_v24 = vadd.f32 %v1742_v23, %v1741_v21 }
 0x16d   : > { %v1226_v22 = vadd.f32 %v1715_v18, %v1177_v60  ;;  %v1272_v25 = vadd.f32 %v1740_v20, %v1223_v17  ;;  %v1629_v60 = vld [vmem:[%s2394_s2] ss:$0 sm:$0xff] (!%p1628_p7) }
 0x16f   : > { %v1716_v26 = vpop.f32.mrb[12].mxu0  ;;  %v1275_v28 = vadd.f32 %v1743_v24, %v1226_v22 }
 0x170   : > { %v1717_v27 = vpop.f32.mrb[13].mxu0  ;;  %v1744_v31 = vpop.f32.mrb[12].mxu1 }
 0x171   : > { %v1718_v29 = vadd.f32 %v1717_v27, %v1716_v26  ;;  %v1719_v30 = vpop.f32.mrb[14].mxu0  ;;  %v1745_v35 = vpop.f32.mrb[13].mxu1 }
 0x172   : > { %v1720_v32 = vpop.f32.mrb[15].mxu0  ;;  %v1746_v36 = vadd.f32 %v1745_v35, %v1744_v31  ;;  %v1747_v37 = vpop.f32.mrb[14].mxu1 }
 0x173   : > { %v1231_v33 = vadd.f32 %v1718_v29, %v1182_v7  ;;  %v1721_v34 = vadd.f32 %v1720_v32, %v1719_v30  ;;  %v1748_v39 = vpop.f32.mrb[15].mxu1  ;;  %v1369_v7 = vld [vmem:[%s2395_s3 + $0x18] sm:$0xff] (!%p1628_p7) }
 0x174   : > { %v1749_v40 = vadd.f32 %v1748_v39, %v1747_v37 }
 0x175   : > { %v1234_v38 = vadd.f32 %v1721_v34, %v1185_v10  ;;  %v1280_v41 = vadd.f32 %v1746_v36, %v1231_v33 }
 0x177   : > { %v1283_v42 = vadd.f32 %v1749_v40, %v1234_v38 }
 0x187   : > { %v1778_v44 = vpop.f32.mrb[16].mxu0 }
 0x188   : > { %v1329_v45 = vadd.f32 %v1778_v44, %v1280_v41  ;;  %v1320_v47 = vpop.f32.mrb[17].mxu0 }
 0x189   : > { %v1321_v48 = vadd.f32 %v1320_v47, %v1272_v25  ;;  %v1779_v50 = vpop.f32.mrb[18].mxu0  ;;  %1346 = sbr.rel (%p1628_p7) target bundleno = 412 (0x19c), region = 74 }
 0x18a   : > { %v1337_v51 = vadd.f32 %v1329_v45, %v400_v43  ;;  %v1332_v52 = vadd.f32 %v1779_v50, %v1283_v42  ;;  %v1323_v54 = vpop.f32.mrb[19].mxu0 }
 0x18b   : > { %v1335_v55 = vadd.f32 %v1321_v48, %v398_v46  ;;  %v1324_v56 = vadd.f32 %v1323_v54, %v1275_v28 }
 0x18c   : > { %1341 = vst [vmem:[%s2396_s4 + $0x10] sm:$0xff] %v1337_v51  ;;  %v1338_v57 = vadd.f32 %v1332_v52, %v401_v49 }
 0x18d   : > { %1339 = vst [vmem:[%s2396_s4] sm:$0xff] %v1335_v55  ;;  %v1336_v58 = vadd.f32 %v1324_v56, %v399_v53 }
 0x18e   : > { %1342 = vst [vmem:[%s2396_s4 + $0x18] sm:$0xff] %v1338_v57 }
 0x18f   : > { %1340 = vst [vmem:[%s2396_s4 + $0x8] sm:$0xff] %v1336_v58 }
 0x193   : > { %v1349_v0 = vld [vmem:[%s2396_s4 + $0x10] sm:$0xff] }
 0x194   : > { %v1347_v59 = vld [vmem:[%s2396_s4] sm:$0xff]  ;;  %v1360_v3 = vadd.f32 %v1629_v60, %v1349_v0 }
 0x195   : > { %v1358_v62 = vadd.f32 %v1629_v60, %v1347_v59  ;;  %v1350_v1 = vld [vmem:[%s2396_s4 + $0x18] sm:$0xff] }
 0x196   : > { %v1348_v61 = vld [vmem:[%s2396_s4 + $0x8] sm:$0xff]  ;;  %v1361_v4 = vadd.f32 %v1629_v60, %v1350_v1  ;;  %1364 = vst [vmem:[%s2396_s4 + $0x10] sm:$0xff] %v1360_v3  ;;  %v1372_v10 = vadd.f32 %v1368_v6, %v1360_v3 }
 0x197   : > { %v1359_v63 = vadd.f32 %v1629_v60, %v1348_v61  ;;  %1362 = vst [vmem:[%s2396_s4] sm:$0xff] %v1358_v62  ;;  %v1370_v8 = vadd.f32 %v1366_v2, %v1358_v62 }
 0x198   : > { %1365 = vst [vmem:[%s2396_s4 + $0x18] sm:$0xff] %v1361_v4  ;;  %v1373_v11 = vadd.f32 %v1369_v7, %v1361_v4  ;;  %1376 = vst [vmem:[%s2397_s5 + $0x10] sm:$0xff] %v1372_v10 }
 0x199   : > { %1363 = vst [vmem:[%s2396_s4 + $0x8] sm:$0xff] %v1359_v63  ;;  %v1371_v9 = vadd.f32 %v1367_v5, %v1359_v63  ;;  %1374 = vst [vmem:[%s2397_s5] sm:$0xff] %v1370_v8 }
 0x19a   : > { %1377 = vst [vmem:[%s2397_s5 + $0x18] sm:$0xff] %v1373_v11 }
 0x19b   : > { %1375 = vst [vmem:[%s2397_s5 + $0x8] sm:$0xff] %v1371_v9 }
 0x19c PF: > { %s19_s23 = sadd.s32 1, %s2013_s23   ;;  %s2400_s18 = smov %s1997_s19 }
 0x19d   : > { %p16_p2 = scmp.ge.s32.totalorder %s19_s23, 6   ;;  %s2401_s19 = smov %s2001_s20 }
 0x19e   : > { %s2402_s20 = smov %s2097_s30  ;;  %s2403_s21 = smov %s2009_s22 }
 0x19f   : > { %s2404_s22 = smov %s2406_s25  ;;  %18 = sbr.rel (!%p16_p2) target bundleno = 4 (0x4), region = 139 }
 0x1a6   :  { %1417 = vsyncpa [#allocation4], 1 }
 0x1a7   :  { %1419 = vsyncpa [#allocation4 + $0x1], 1 }

// kernel: autoregressive_block.15
= control target key start
LH: loop header
LB: loop body
LE: loop exit
PB: predicated region body
PF: predicated region fallthrough
CT: control target
= control target key end

     0   :  { %v560_v1 = vmov 0   ;;  %v418_v35 = vlaneseq  ;;  %s738_s1 = inlined_call_operand.vmem [shape: bf16[128,512], index: 1, kind: input, shape index: {}]   ;;  %s739_s0 = inlined_call_operand.vmem [shape: bf16[32,128], index: 0, kind: input, shape index: {}]   ;;  %s740_s2 = inlined_call_operand.vmem [shape: f32[1,512], index: 2, kind: input, shape index: {}]   ;;  %s741_s3 = inlined_call_operand.vmem [shape: f32[32,512], index: 3, kind: output, shape index: {}]  }
   0x1   :  { %v510_v0 = vld [vmem:[%s738_s1 + $0x4] ss:$16 sps:$4 sm:$0xff]   ;;  %291 = vmatprep.mubr.bf16.mxu0 %v560_v1  ;;  %344 = vmatprep.mubr.bf16.mxu1 %v560_v1  ;;  %v512_v2 = vld [vmem:[%s738_s1 + $0xc] ss:$16 sps:$4 sm:$0xff]   ;;  %v514_v3 = vld [vmem:[%s738_s1] ss:$16 sps:$4 sm:$0xff]  }
   0x2   :  { %259 = vmatprep.subr.bf16.mxu0 %v510_v0  ;;  %v515_v4 = vld [vmem:[%s738_s1 + $0x8] ss:$16 sps:$4 sm:$0xff]   ;;  %312 = vmatprep.subr.bf16.mxu1 %v512_v2  ;;  %v516_v5 = vld [vmem:[%s738_s1 + $0x24] ss:$16 sps:$4 sm:$0xff]   ;;  %v518_v6 = vld [vmem:[%s738_s1 + $0x2c] ss:$16 sps:$4 sm:$0xff]  }
   0x3   :  { %260 = vmatpush1.bf16.msra.mxu0 %v514_v3  ;;  %313 = vmatpush1.bf16.msra.mxu1 %v515_v4  ;;  %v520_v7 = vld [vmem:[%s738_s1 + $0x20] ss:$16 sps:$4 sm:$0xff]   ;;  %v521_v8 = vld [vmem:[%s738_s1 + $0x28] ss:$16 sps:$4 sm:$0xff]   ;;  %v522_v9 = vld [vmem:[%s738_s1 + $0x44] ss:$16 sps:$4 sm:$0xff]  }
   0x4   :  { %261 = vmatprep.subr.bf16.mxu0 %v516_v5  ;;  %314 = vmatprep.subr.bf16.mxu1 %v518_v6  ;;  %v524_v10 = vld [vmem:[%s738_s1 + $0x4c] ss:$16 sps:$4 sm:$0xff]   ;;  %v526_v11 = vld [vmem:[%s738_s1 + $0x40] ss:$16 sps:$4 sm:$0xff]   ;;  %v527_v12 = vld [vmem:[%s738_s1 + $0x48] ss:$16 sps:$4 sm:$0xff]  }
   0x5   :  { %v528_v13 = vld [vmem:[%s738_s1 + $0x64] ss:$16 sps:$4 sm:$0xff]   ;;  %v530_v14 = vld [vmem:[%s738_s1 + $0x6c] ss:$16 sps:$4 sm:$0xff]   ;;  %v532_v15 = vld [vmem:[%s738_s1 + $0x60] ss:$16 sps:$4 sm:$0xff]  }
   0x6   :  { %v533_v16 = vld [vmem:[%s738_s1 + $0x68] ss:$16 sps:$4 sm:$0xff]   ;;  %v534_v17 = vld [vmem:[%s738_s1 + $0x84] ss:$16 sps:$4 sm:$0xff]   ;;  %v536_v18 = vld [vmem:[%s738_s1 + $0x8c] ss:$16 sps:$4 sm:$0xff]  }
   0x7   :  { %262 = vmatpush1.bf16.msra.mxu0 %v520_v7  ;;  %315 = vmatpush1.bf16.msra.mxu1 %v521_v8  ;;  %v538_v19 = vld [vmem:[%s738_s1 + $0x80] ss:$16 sps:$4 sm:$0xff]   ;;  %v539_v20 = vld [vmem:[%s738_s1 + $0x88] ss:$16 sps:$4 sm:$0xff]   ;;  %v540_v21 = vld [vmem:[%s738_s1 + $0xa4] ss:$16 sps:$4 sm:$0xff]  }
   0x8   :  { %263 = vmatprep.subr.bf16.mxu0 %v522_v9  ;;  %316 = vmatprep.subr.bf16.mxu1 %v524_v10  ;;  %v542_v22 = vld [vmem:[%s738_s1 + $0xac] ss:$16 sps:$4 sm:$0xff]   ;;  %v544_v23 = vld [vmem:[%s738_s1 + $0xa0] ss:$16 sps:$4 sm:$0xff]   ;;  %v545_v24 = vld [vmem:[%s738_s1 + $0xa8] ss:$16 sps:$4 sm:$0xff]  }
   0x9   :  { %v546_v25 = vld [vmem:[%s738_s1 + $0xc4] ss:$16 sps:$4 sm:$0xff]   ;;  %v548_v26 = vld [vmem:[%s738_s1 + $0xcc] ss:$16 sps:$4 sm:$0xff]   ;;  %v550_v27 = vld [vmem:[%s738_s1 + $0xc0] ss:$16 sps:$4 sm:$0xff]  }
   0xa   :  { %v551_v28 = vld [vmem:[%s738_s1 + $0xc8] ss:$16 sps:$4 sm:$0xff]   ;;  %v552_v29 = vld [vmem:[%s738_s1 + $0xe4] ss:$16 sps:$4 sm:$0xff]   ;;  %v554_v30 = vld [vmem:[%s738_s1 + $0xec] ss:$16 sps:$4 sm:$0xff]  }
   0xb   :  { %264 = vmatpush1.bf16.msra.mxu0 %v526_v11  ;;  %317 = vmatpush1.bf16.msra.mxu1 %v527_v12  ;;  %v556_v31 = vld [vmem:[%s738_s1 + $0xe0] ss:$16 sps:$4 sm:$0xff]   ;;  %v557_v32 = vld [vmem:[%s738_s1 + $0xe8] ss:$16 sps:$4 sm:$0xff]   ;;  %v419_v36 = vshrl.u32 %v418_v35, 7 }
   0xc   :  { %265 = vmatprep.subr.bf16.mxu0 %v528_v13  ;;  %318 = vmatprep.subr.bf16.mxu1 %v530_v14  ;;  %v558_v33 = vld [vmem:[%s739_s0] sm:$0xff]   ;;  %v559_v34 = vld [vmem:[%s739_s0 + $0x8] sm:$0xff]  }
   0xd   :  { %v420_v37 = vsub.s32 0, %v419_v36  ;;  %v428_v38 = vsub.s32 2, %v419_v36  ;;  %v416_v39 = vld [vmem:[%s740_s2] sm:$0xf]  ;;  %v424_v40 = vsub.s32 1, %v419_v36  ;;  %v432_v41 = vsub.s32 3, %v419_v36 }
   0xf   :  { %266 = vmatpush1.bf16.msra.mxu0 %v532_v15  ;;  %319 = vmatpush1.bf16.msra.mxu1 %v533_v16  ;;  %v421_v42 = vrot.slane %v416_v39, %v420_v37  ;;  %v429_v43 = vrot.slane %v416_v39, %v428_v38  ;;  %v425_v46 = vrot.slane %v416_v39, %v424_v40 }
  0x10   :  { %267 = vmatprep.subr.bf16.mxu0 %v534_v17  ;;  %320 = vmatprep.subr.bf16.mxu1 %v536_v18  ;;  %v433_v47 = vrot.slane %v416_v39, %v432_v41 }
  0x13   :  { %268 = vmatpush1.bf16.msra.mxu0 %v538_v19  ;;  %321 = vmatpush1.bf16.msra.mxu1 %v539_v20 }
  0x14   :  { %269 = vmatprep.subr.bf16.mxu0 %v540_v21  ;;  %322 = vmatprep.subr.bf16.mxu1 %v542_v22 }
  0x17   :  { %270 = vmatpush1.bf16.msra.mxu0 %v544_v23  ;;  %323 = vmatpush1.bf16.msra.mxu1 %v545_v24 }
  0x18   :  { %271 = vmatprep.subr.bf16.mxu0 %v546_v25  ;;  %324 = vmatprep.subr.bf16.mxu1 %v548_v26 }
  0x1b   :  { %272 = vmatpush1.bf16.msra.mxu0 %v550_v27  ;;  %325 = vmatpush1.bf16.msra.mxu1 %v551_v28 }
  0x1c   :  { %273 = vmatprep.subr.bf16.mxu0 %v552_v29  ;;  %326 = vmatprep.subr.bf16.mxu1 %v554_v30 }
  0x1f   :  { %274 = vmatpush1.bf16.msra.mxu0 %v556_v31  ;;  %327 = vmatpush1.bf16.msra.mxu1 %v557_v32 }
  0x22   :  { %292 = vmatmul.mubr.bf16.vlgmr.msra.gmra.mrb[0].mxu0 %v558_v33  ;;  %345 = vmatmul.mubr.bf16.vlgmr.msra.gmra.mrb[0].mxu1 %v558_v33 }
  0x23   :  { %301 = vmatprep.mubr.bf16.mxu0 %v560_v1  ;;  %354 = vmatprep.mubr.bf16.mxu1 %v560_v1 }
  0x2a   :  { %302 = vmatmul.mubr.bf16.gmra.mrb[4].mxu0 %v559_v34  ;;  %355 = vmatmul.mubr.bf16.gmra.mrb[4].mxu1 %v559_v34 }
  0xf5   :  { %v293_v44 = vpop.f32.mrb[0].mxu0  ;;  %v346_v45 = vpop.f32.mrb[0].mxu1 }
  0xf6   :  { %v295_v48 = vpop.f32.mrb[1].mxu0  ;;  %v348_v49 = vpop.f32.mrb[1].mxu1  ;;  %v438_v52 = vadd.f32 %v421_v42, %v293_v44  ;;  %v440_v53 = vadd.f32 %v429_v43, %v346_v45 }
  0xf7   :  { %v297_v50 = vpop.f32.mrb[2].mxu0  ;;  %v350_v51 = vpop.f32.mrb[2].mxu1  ;;  %v439_v56 = vadd.f32 %v425_v46, %v295_v48  ;;  %v441_v57 = vadd.f32 %v433_v47, %v348_v49 }
  0xf8   :  { %v299_v54 = vpop.f32.mrb[3].mxu0  ;;  %v352_v55 = vpop.f32.mrb[3].mxu1  ;;  %454 = vst [vmem:[%s741_s3] sm:$0xff] %v438_v52  ;;  %456 = vst [vmem:[%s741_s3 + $0x10] sm:$0xff] %v440_v53  ;;  %v442_v58 = vadd.f32 %v421_v42, %v297_v50  ;;  %v444_v59 = vadd.f32 %v429_v43, %v350_v51 }
  0xf9   :  { %455 = vst [vmem:[%s741_s3 + $0x8] sm:$0xff] %v439_v56  ;;  %457 = vst [vmem:[%s741_s3 + $0x18] sm:$0xff] %v441_v57  ;;  %v443_v60 = vadd.f32 %v425_v46, %v299_v54  ;;  %v445_v61 = vadd.f32 %v433_v47, %v352_v55 }
  0xfa   :  { %458 = vst [vmem:[%s741_s3 + $0x20] sm:$0xff] %v442_v58  ;;  %460 = vst [vmem:[%s741_s3 + $0x30] sm:$0xff] %v444_v59 }
  0xfb   :  { %459 = vst [vmem:[%s741_s3 + $0x28] sm:$0xff] %v443_v60  ;;  %461 = vst [vmem:[%s741_s3 + $0x38] sm:$0xff] %v445_v61 }
  0xfd   :  { %v303_v62 = vpop.f32.mrb[4].mxu0  ;;  %v356_v63 = vpop.f32.mrb[4].mxu1 }
  0xfe   :  { %v305_v0 = vpop.f32.mrb[5].mxu0  ;;  %v358_v1 = vpop.f32.mrb[5].mxu1  ;;  %v446_v4 = vadd.f32 %v421_v42, %v303_v62  ;;  %v448_v5 = vadd.f32 %v429_v43, %v356_v63 }
  0xff   :  { %v307_v2 = vpop.f32.mrb[6].mxu0  ;;  %v360_v3 = vpop.f32.mrb[6].mxu1  ;;  %v447_v8 = vadd.f32 %v425_v46, %v305_v0  ;;  %v449_v9 = vadd.f32 %v433_v47, %v358_v1 }
 0x100   :  { %v309_v6 = vpop.f32.mrb[7].mxu0  ;;  %v362_v7 = vpop.f32.mrb[7].mxu1  ;;  %462 = vst [vmem:[%s741_s3 + $0x40] sm:$0xff] %v446_v4  ;;  %464 = vst [vmem:[%s741_s3 + $0x50] sm:$0xff] %v448_v5  ;;  %v450_v10 = vadd.f32 %v421_v42, %v307_v2  ;;  %v452_v11 = vadd.f32 %v429_v43, %v360_v3 }
 0x101   :  { %463 = vst [vmem:[%s741_s3 + $0x48] sm:$0xff] %v447_v8  ;;  %465 = vst [vmem:[%s741_s3 + $0x58] sm:$0xff] %v449_v9  ;;  %v451_v12 = vadd.f32 %v425_v46, %v309_v6  ;;  %v453_v13 = vadd.f32 %v433_v47, %v362_v7 }
 0x102   :  { %466 = vst [vmem:[%s741_s3 + $0x60] sm:$0xff] %v450_v10  ;;  %468 = vst [vmem:[%s741_s3 + $0x70] sm:$0xff] %v452_v11 }
 0x103   :  { %467 = vst [vmem:[%s741_s3 + $0x68] sm:$0xff] %v451_v12  ;;  %469 = vst [vmem:[%s741_s3 + $0x78] sm:$0xff] %v453_v13 }

// kernel: autoregressive_block.17
= control target key start
LH: loop header
LB: loop body
LE: loop exit
PB: predicated region body
PF: predicated region fallthrough
CT: control target
= control target key end

     0   :  { %s1961_s18 = smov 0   ;;  %s1963_s19 = smov 0   ;;  %s2253_s0 = inlined_call_operand.vmem [shape: bf16[32,4608], index: 0, kind: input, shape index: {}]   ;;  %s2254_s1 = inlined_call_operand.vmem [shape: bf16[4608,128], index: 1, kind: input, shape index: {}]   ;;  %s2255_s2 = inlined_call_operand.vmem [shape: f32[1,128], index: 2, kind: input, shape index: {}]   ;;  %s2256_s3 = inlined_call_operand.vmem [shape: f32[32,128], index: 3, kind: input, shape index: {}]   ;;  %s2257_s4 = inlined_call_operand.vmem [shape: f32[32,128], index: 4, kind: output, shape index: {0}]   ;;  %s2258_s5 = inlined_call_operand.vmem [shape: f32[32,128], index: 5, kind: output, shape index: {1}]  }
   0x1   :  { %s1965_s20 = smov 0   ;;  %s1967_s21 = smov 0  }
   0x2   :  { %s1969_s22 = smov 0  }
   0x3 LB: > { %s25_s23 = sadd.s32 1, %s1924_s21  ;;  %p44_p1 = scmp.ne.s32.totalorder %s1916_s19, %s1912_s18  ;;  %s1928_s22 = sphi %s1969_s22, %s16_s22   ;;  %s1924_s21 = sphi %s1967_s21, %s2262_s21   ;;  %s1920_s20 = sphi %s1965_s20, %s2261_s20   ;;  %s1916_s19 = sphi %s1963_s19, %s2260_s19   ;;  %s1912_s18 = sphi %s1961_s18, %s2259_s18  }
   0x4   : > { %p26_p0 = scmp.ge.s32.totalorder %s25_s23, 4  ;;  %p45_p2 = scmp.eq.s32.totalorder %s1928_s22, 0 }
   0x5   : > { %s37_s25 = sadd.s32 1, %s1916_s19  ;;  %p1495_p5 = scmp.ge.s32.totalorder %s1928_s22, 4 }
   0x6   : > { %s2264_s23 = smov (%p26_p0, %s25_s23), 0  ;;  %p46_p3 = por %p45_p2, %p44_p1 }
   0x7   : > { %s33_s24 = ssub.s32 %s1924_s21, %s2264_s23  ;;  %207 = sbr.rel (%p1495_p5) target bundleno = 29 (0x1d), region = 24 }
   0x8   : > { %p35_p4 = scmp.eq.s32.totalorder %s33_s24, 0 }
   0xa   : > { %s1996_s26 = scalar_select %p35_p4, %s1916_s19, %s37_s25  }
   0xe   : > { %210 = sbr.rel (!%p46_p3) target bundleno = 29 (0x1d), region = 28  ;;  %s212_s27 = sand.u32 (%p46_p3), 1, %s1916_s19  }
   0xf   : > { %s1606_s28 = smul.u32 (%p46_p3), 36, %s1924_s21 }
  0x10   : > { %s1749_s29 = smul.u32 (%p46_p3), 144, %s212_s27 }
  0x11   : > { %s2004_s7 = scalar_lea.vmem (%p46_p3), %s2253_s0, %s1606_s28 }
  0x12   : > { %v235_v0 = vld [vmem:[%s2004_s7] sm:$0xff] (%p46_p3)  ;;  %v237_v1 = vld [vmem:[%s2004_s7 + $0x8] sm:$0xff] (%p46_p3)  ;;  %v239_v2 = vld [vmem:[%s2004_s7 + $0x10] sm:$0xff] (%p46_p3)  ;;  %s2009_s8 = scalar_lea.vmem (%p46_p3), [#allocation2], %s1749_s29 }
  0x13   : > { %236 = vst [vmem:[%s2009_s8] sm:$0xff] (%p46_p3), %v235_v0  ;;  %238 = vst [vmem:[%s2009_s8 + $0x8] sm:$0xff] (%p46_p3), %v237_v1  ;;  %v241_v3 = vld [vmem:[%s2004_s7 + $0x18] sm:$0xff] (%p46_p3)  ;;  %v243_v4 = vld [vmem:[%s2004_s7 + $0x90] sm:$0xff] (%p46_p3) }
  0x14   : > { %240 = vst [vmem:[%s2009_s8 + $0x10] sm:$0xff] (%p46_p3), %v239_v2  ;;  %v245_v5 = vld [vmem:[%s2004_s7 + $0x98] sm:$0xff] (%p46_p3)  ;;  %242 = vst [vmem:[%s2009_s8 + $0x18] sm:$0xff] (%p46_p3), %v241_v3  ;;  %v247_v6 = vld [vmem:[%s2004_s7 + $0xa0] sm:$0xff] (%p46_p3) }
  0x15   : > { %244 = vst [vmem:[%s2009_s8 + $0x24] sm:$0xff] %v243_v4  ;;  %246 = vst [vmem:[%s2009_s8 + $0x2c] sm:$0xff] %v245_v5  ;;  %v249_v7 = vld [vmem:[%s2004_s7 + $0xa8] sm:$0xff]  ;;  %v251_v8 = vld [vmem:[%s2004_s7 + $0x120] sm:$0xff] }
  0x16   : > { %248 = vst [vmem:[%s2009_s8 + $0x34] sm:$0xff] %v247_v6  ;;  %250 = vst [vmem:[%s2009_s8 + $0x3c] sm:$0xff] %v249_v7  ;;  %v253_v9 = vld [vmem:[%s2004_s7 + $0x128] sm:$0xff]  ;;  %v255_v10 = vld [vmem:[%s2004_s7 + $0x130] sm:$0xff] }
  0x17   : > { %252 = vst [vmem:[%s2009_s8 + $0x48] sm:$0xff] %v251_v8  ;;  %v257_v11 = vld [vmem:[%s2004_s7 + $0x138] sm:$0xff]  ;;  %254 = vst [vmem:[%s2009_s8 + $0x50] sm:$0xff] %v253_v9  ;;  %v259_v12 = vld [vmem:[%s2004_s7 + $0x1b0] sm:$0xff] }
  0x18   : > { %256 = vst [vmem:[%s2009_s8 + $0x58] sm:$0xff] %v255_v10  ;;  %258 = vst [vmem:[%s2009_s8 + $0x60] sm:$0xff] %v257_v11  ;;  %v261_v13 = vld [vmem:[%s2004_s7 + $0x1b8] sm:$0xff]  ;;  %v263_v14 = vld [vmem:[%s2004_s7 + $0x1c0] sm:$0xff] }
  0x19   : > { %260 = vst [vmem:[%s2009_s8 + $0x6c] sm:$0xff] %v259_v12  ;;  %262 = vst [vmem:[%s2009_s8 + $0x74] sm:$0xff] %v261_v13  ;;  %v265_v15 = vld [vmem:[%s2004_s7 + $0x1c8] sm:$0xff]  ;;  %v1497_v16 = vld [vmem:[%s2004_s7 + $0x20] sm:$0xf] }
  0x1a   : > { %264 = vst [vmem:[%s2009_s8 + $0x7c] sm:$0xff] %v263_v14  ;;  %v1499_v17 = vld [vmem:[%s2004_s7 + $0xb0] sm:$0xf]  ;;  %266 = vst [vmem:[%s2009_s8 + $0x84] sm:$0xff] %v265_v15  ;;  %v1501_v18 = vld [vmem:[%s2004_s7 + $0x140] sm:$0xf] }
  0x1b   : > { %1498 = vst [vmem:[%s2009_s8 + $0x20] sm:$0xf] %v1497_v16  ;;  %1500 = vst [vmem:[%s2009_s8 + $0x44] sm:$0xf] %v1499_v17  ;;  %v1503_v19 = vld [vmem:[%s2004_s7 + $0x1d0] sm:$0xf] }
  0x1c   : > { %1502 = vst [vmem:[%s2009_s8 + $0x68] sm:$0xf] %v1501_v18  ;;  %1504 = vst [vmem:[%s2009_s8 + $0x8c] sm:$0xf] %v1503_v19 }
  0x1d PF: > { %p1505_p6 = scmp.ge.s32.totalorder %s1928_s22, 1  ;;  %p295_p7 = scmp.lt.s32.totalorder %s1928_s22, 5 }
  0x1f   : > { %p296_p8 = pnand %p1505_p6, %p295_p7 }
  0x20   : > { %s302_s9 = sand.u32 (!%p296_p8), 1, %s1912_s18   ;;  %s346_s10 = smul.u32 (!%p296_p8), 144, %s1920_s20 }
  0x21   : > { %299 = sbr.rel (%p296_p8) target bundleno = 377 (0x179), region = 58  ;;  %p1507_p10 = scmp.ne.s32.totalorder (!%p296_p8), %s1920_s20, 0 }
  0x22   : > { %s1750_s11 = smul.u32 (!%p296_p8), 144, %s302_s9  ;;  %p347_p9 = scmp.lt.s32.totalorder (!%p296_p8), %s346_s10, 575 }
  0x24   : > { %s2057_s16 = scalar_lea.vmem (!%p296_p8), [#allocation2], %s1750_s11 }
  0x28   : > { %s2266_s10 = smov (!%p347_p9, %s346_s10), 575  ;;  %374 = sbr.rel (%p1507_p10) target bundleno = 47 (0x2f), region = 66 }
  0x29   : > { %s1506_s12 = sshll.u32 %s2266_s10, 2  ;;  %v1930_v20 = vmov (!%p1507_p10), 0.0  }
  0x2a   : > { %s2055_s15 = scalar_lea.vmem %s2254_s1, %s1506_s12  ;;  %375 = vst [vmem:[%s2257_s4] sm:$0xff] (!%p1507_p10), %v1930_v20  ;;  %376 = vst [vmem:[%s2257_s4 + $0x8] sm:$0xff] (!%p1507_p10), %v1930_v20 }
  0x2b   : > { %377 = vst [vmem:[%s2257_s4 + $0x10] sm:$0xff] (!%p1507_p10), %v1930_v20  ;;  %378 = vst [vmem:[%s2257_s4 + $0x18] sm:$0xff] (!%p1507_p10), %v1930_v20 }
  0x2f PF: > { %v1792_v21 = vld [vmem:[%s2055_s15 + $0x40] sm:$0xff]   ;;  %v1796_v25 = vld [vmem:[%s2055_s15 + $0x48] sm:$0xff]   ;;  %v1800_v29 = vld [vmem:[%s2055_s15 + $0x50] sm:$0xff]   ;;  %p1598_p11 = scmp.ne.s32.totalorder %s1920_s20, 3 }
  0x30   : > { %v1793_v22 = vld [vmem:[%s2055_s15 + $0xc0] sm:$0xff]   ;;  %1607 = vmatprep.subr.bf16.mxu0 %v1792_v21  ;;  %v1797_v26 = vld [vmem:[%s2055_s15 + $0xc8] sm:$0xff]   ;;  %v1801_v30 = vld [vmem:[%s2055_s15 + $0xd0] sm:$0xff]  }
  0x31   : > { %v1794_v23 = vld [vmem:[%s2055_s15] sm:$0xff]   ;;  %1635 = vmatprep.subr.bf16.mxu1 %v1793_v22  ;;  %v1798_v27 = vld [vmem:[%s2055_s15 + $0x8] sm:$0xff]   ;;  %v1802_v31 = vld [vmem:[%s2055_s15 + $0x10] sm:$0xff]  }
  0x32   : > { %v1795_v24 = vld [vmem:[%s2055_s15 + $0x80] sm:$0xff]   ;;  %1608 = vmatpush3.bf16.msra.mxu0 %v1794_v23  ;;  %v1799_v28 = vld [vmem:[%s2055_s15 + $0x88] sm:$0xff]   ;;  %v1803_v32 = vld [vmem:[%s2055_s15 + $0x90] sm:$0xff]  }
  0x33   : > { %1636 = vmatpush3.bf16.msra.mxu1 %v1795_v24  ;;  %1609 = vmatprep.subr.bf16.mxu0 %v1796_v25  ;;  %v1804_v33 = vld [vmem:[%s2055_s15 + $0x58] sm:$0xff]   ;;  %v1808_v37 = vld [vmem:[%s2055_s15 + $0x60] sm:$0xff]   ;;  %v1812_v41 = vld [vmem:[%s2055_s15 + $0x68] sm:$0xff]  }
  0x34   : > { %1637 = vmatprep.subr.bf16.mxu1 %v1797_v26  ;;  %v1805_v34 = vld [vmem:[%s2055_s15 + $0xd8] sm:$0xff]   ;;  %v1809_v38 = vld [vmem:[%s2055_s15 + $0xe0] sm:$0xff]   ;;  %v1813_v42 = vld [vmem:[%s2055_s15 + $0xe8] sm:$0xff]  }
  0x35   : > { %v1806_v35 = vld [vmem:[%s2055_s15 + $0x18] sm:$0xff]   ;;  %v1810_v39 = vld [vmem:[%s2055_s15 + $0x20] sm:$0xff]   ;;  %v1814_v43 = vld [vmem:[%s2055_s15 + $0x28] sm:$0xff]  }
  0x36   : > { %1610 = vmatpush3.bf16.msra.mxu0 %v1798_v27  ;;  %v1807_v36 = vld [vmem:[%s2055_s15 + $0x98] sm:$0xff]   ;;  %v1811_v40 = vld [vmem:[%s2055_s15 + $0xa0] sm:$0xff]   ;;  %v1815_v44 = vld [vmem:[%s2055_s15 + $0xa8] sm:$0xff]  }
  0x37   : > { %1638 = vmatpush3.bf16.msra.mxu1 %v1799_v28  ;;  %1611 = vmatprep.subr.bf16.mxu0 %v1800_v29  ;;  %v1816_v45 = vld [vmem:[%s2055_s15 + $0x70] sm:$0xff]   ;;  %v1820_v49 = vld [vmem:[%s2055_s15 + $0x78] sm:$0xff]   ;;  %v1830_v57 = vld [vmem:[%s2055_s15 + $0x140] sm:$0xff]  }
  0x38   : > { %1639 = vmatprep.subr.bf16.mxu1 %v1801_v30  ;;  %v1817_v46 = vld [vmem:[%s2055_s15 + $0xf0] sm:$0xff]   ;;  %v1821_v50 = vld [vmem:[%s2055_s15 + $0xf8] sm:$0xff]   ;;  %v1831_v58 = vld [vmem:[%s2055_s15 + $0x100] sm:$0xff]  }
  0x39   : > { %v1818_v47 = vld [vmem:[%s2055_s15 + $0x30] sm:$0xff]   ;;  %v1822_v51 = vld [vmem:[%s2055_s15 + $0x38] sm:$0xff]   ;;  %v1832_v59 = vld [vmem:[%s2055_s15 + $0x1c0] sm:$0xff]  }
  0x3a   : > { %1612 = vmatpush3.bf16.msra.mxu0 %v1802_v31  ;;  %v1819_v48 = vld [vmem:[%s2055_s15 + $0xb0] sm:$0xff]   ;;  %v1823_v52 = vld [vmem:[%s2055_s15 + $0xb8] sm:$0xff]   ;;  %v1833_v60 = vld [vmem:[%s2055_s15 + $0x180] sm:$0xff]  }
  0x3b   : > { %1640 = vmatpush3.bf16.msra.mxu1 %v1803_v32  ;;  %1613 = vmatprep.subr.bf16.mxu0 %v1804_v33  ;;  %v1824_v53 = vld [vmem:[%s2057_s16] ss:$36 sps:$4 sm:$0xff]   ;;  %v1827_v55 = vld [vmem:[%s2057_s16 + $0x8] ss:$36 sps:$4 sm:$0xff]   ;;  %v1853_v15 = vld [vmem:[%s2057_s16 + $0x54] ss:$36 sps:$4 sm:$0xff]  }
  0x3c   : > { %1641 = vmatprep.subr.bf16.mxu1 %v1805_v34  ;;  %v1826_v54 = vld [vmem:[%s2057_s16 + $0x4] ss:$36 sps:$4 sm:$0xff]   ;;  %v1829_v56 = vld [vmem:[%s2057_s16 + $0xc] ss:$36 sps:$4 sm:$0xff]   ;;  %v1869_v29 = vld [vmem:[%s2057_s16 + $0x14] ss:$36 sps:$4 sm:$0xff]  }
  0x3d   : > { %1103 = vmatprep.mubr.bf16.mxu0 %v1826_v54  ;;  %1152 = vmatprep.mubr.bf16.mxu1 %v1829_v56  ;;  %v1834_v61 = vld [vmem:[%s2055_s15 + $0x148] sm:$0xff]   ;;  %v1838_v1 = vld [vmem:[%s2055_s15 + $0x150] sm:$0xff]   ;;  %v1842_v5 = vld [vmem:[%s2055_s15 + $0x158] sm:$0xff]  }
  0x3e   : > { %1614 = vmatpush3.bf16.msra.mxu0 %v1806_v35  ;;  %v1835_v62 = vld [vmem:[%s2055_s15 + $0x108] sm:$0xff]   ;;  %v1839_v2 = vld [vmem:[%s2055_s15 + $0x110] sm:$0xff]   ;;  %v1843_v6 = vld [vmem:[%s2055_s15 + $0x118] sm:$0xff]  }
  0x3f   : > { %1642 = vmatpush3.bf16.msra.mxu1 %v1807_v36  ;;  %1615 = vmatprep.subr.bf16.mxu0 %v1808_v37  ;;  %v1836_v63 = vld [vmem:[%s2055_s15 + $0x1c8] sm:$0xff]   ;;  %v1840_v3 = vld [vmem:[%s2055_s15 + $0x1d0] sm:$0xff]   ;;  %v1844_v7 = vld [vmem:[%s2055_s15 + $0x1d8] sm:$0xff]  }
  0x40   : > { %1643 = vmatprep.subr.bf16.mxu1 %v1809_v38  ;;  %v1837_v0 = vld [vmem:[%s2055_s15 + $0x188] sm:$0xff]   ;;  %v1841_v4 = vld [vmem:[%s2055_s15 + $0x190] sm:$0xff]   ;;  %v1845_v8 = vld [vmem:[%s2055_s15 + $0x198] sm:$0xff]  }
  0x41   : > { %v1846_v9 = vld [vmem:[%s2055_s15 + $0x160] sm:$0xff]   ;;  %v1850_v13 = vld [vmem:[%s2055_s15 + $0x168] sm:$0xff]   ;;  %v1860_v21 = vld [vmem:[%s2055_s15 + $0x170] sm:$0xff]  }
  0x42   : > { %1616 = vmatpush3.bf16.msra.mxu0 %v1810_v39  ;;  %v1847_v10 = vld [vmem:[%s2055_s15 + $0x120] sm:$0xff]   ;;  %v1855_v16 = vld [vmem:[%s2055_s15 + $0x128] sm:$0xff]   ;;  %v1861_v22 = vld [vmem:[%s2055_s15 + $0x130] sm:$0xff]  }
  0x43   : > { %1644 = vmatpush3.bf16.msra.mxu1 %v1811_v40  ;;  %1617 = vmatprep.subr.bf16.mxu0 %v1812_v41  ;;  %v1848_v11 = vld [vmem:[%s2055_s15 + $0x1e0] sm:$0xff]   ;;  %v1856_v17 = vld [vmem:[%s2057_s16 + $0x48] ss:$36 sps:$4 sm:$0xff]   ;;  %v1862_v23 = vld [vmem:[%s2055_s15 + $0x1f0] sm:$0xff]  }
  0x44   : > { %1645 = vmatprep.subr.bf16.mxu1 %v1813_v42  ;;  %v1849_v12 = vld [vmem:[%s2055_s15 + $0x1a0] sm:$0xff]   ;;  %v1858_v19 = vld [vmem:[%s2055_s15 + $0x1e8] sm:$0xff]   ;;  %v1863_v24 = vld [vmem:[%s2055_s15 + $0x1b0] sm:$0xff]  }
  0x45   : > { %v1851_v14 = vld [vmem:[%s2057_s16 + $0x4c] ss:$36 sps:$4 sm:$0xff]   ;;  %v1872_v32 = vld [vmem:[%s2057_s16 + $0x18] ss:$36 sps:$4 sm:$0xff]   ;;  %v1880_v38 = vld [vmem:[%s2057_s16 + $0x64] ss:$36 sps:$4 sm:$0xff]  }
  0x46   : > { %1618 = vmatpush3.bf16.msra.mxu0 %v1814_v43  ;;  %v1857_v18 = vld [vmem:[%s2057_s16 + $0x50] ss:$36 sps:$4 sm:$0xff]   ;;  %v1859_v20 = vld [vmem:[%s2055_s15 + $0x1a8] sm:$0xff]   ;;  %v1864_v25 = vld [vmem:[%s2055_s15 + $0x178] sm:$0xff]  }
  0x47   : > { %1646 = vmatpush3.bf16.msra.mxu1 %v1815_v44  ;;  %1619 = vmatprep.subr.bf16.mxu0 %v1816_v45  ;;  %v1865_v26 = vld [vmem:[%s2055_s15 + $0x138] sm:$0xff]   ;;  %v1867_v28 = vld [vmem:[%s2057_s16 + $0x10] ss:$36 sps:$4 sm:$0xff]   ;;  %v1875_v34 = vld [vmem:[%s2055_s15 + $0x208] sm:$0xff]  }
  0x48   : > { %1647 = vmatprep.subr.bf16.mxu1 %v1817_v46  ;;  %v1866_v27 = vld [vmem:[%s2055_s15 + $0x1f8] sm:$0xff]   ;;  %v1871_v31 = vld [vmem:[%s2055_s15 + $0x200] sm:$0xff]   ;;  %v1879_v37 = vld [vmem:[%s2055_s15 + $0x210] sm:$0xff]  }
  0x49   : > { %v1870_v30 = vld [vmem:[%s2055_s15 + $0x1b8] sm:$0xff]   ;;  %v1882_v39 = vld [vmem:[%s2057_s16 + $0x60] ss:$36 sps:$4 sm:$0xff]   ;;  %v1885_v43 = vld [vmem:[%s2055_s15 + $0x228] sm:$0xff]  }
  0x4a   : > { %1620 = vmatpush3.bf16.msra.mxu0 %v1818_v47  ;;  %v1874_v33 = vld [vmem:[%s2057_s16 + $0x1c] ss:$36 sps:$4 sm:$0xff]   ;;  %v1889_v46 = vld [vmem:[%s2057_s16 + $0x68] ss:$36 sps:$4 sm:$0xff]  }
  0x4b   : > { %1648 = vmatpush3.bf16.msra.mxu1 %v1819_v48  ;;  %1621 = vmatprep.subr.bf16.mxu0 %v1820_v49  ;;  %v1876_v35 = vld [vmem:[%s2057_s16 + $0x5c] ss:$36 sps:$4 sm:$0xff]  }
  0x4c   : > { %1649 = vmatprep.subr.bf16.mxu1 %v1821_v50  ;;  %v1878_v36 = vld [vmem:[%s2057_s16 + $0x58] ss:$36 sps:$4 sm:$0xff]   ;;  %v1884_v41 = vld [vmem:[%s2055_s15 + $0x220] sm:$0xff]   ;;  %v1886_v44 = vld [vmem:[%s2055_s15 + $0x230] sm:$0xff]  }
  0x4d   : > { %v1883_v40 = vld [vmem:[%s2055_s15 + $0x218] sm:$0xff]   ;;  %v1888_v42 = vld [vmem:[%s2057_s16 + $0x20] ss:$36 sps:$4 sm:$0xff]  }
  0x4e   : > { %1622 = vmatpush3.bf16.msra.mxu0 %v1822_v51  ;;  %v1887_v45 = vld [vmem:[%s2055_s15 + $0x238] sm:$0xff]  }
  0x4f   : > { %1650 = vmatpush3.bf16.msra.mxu1 %v1823_v52  ;;  %1663 = vmatprep.subr.bf16.mxu0 %v1830_v57 }
  0x50   : > { %1691 = vmatprep.subr.bf16.mxu1 %v1832_v59 }
  0x51   : > { %1104 = vmatmul.mubr.bf16.vlgmr.msra.gmra.mrb[0].mxu0 %v1824_v53 }
  0x52   : > { %1153 = vmatmul.mubr.bf16.vlgmr.msra.gmra.mrb[0].mxu1 %v1827_v55  ;;  %1664 = vmatpush3.bf16.msra.mxu0 %v1831_v58 }
  0x53   : > { %1692 = vmatpush3.bf16.msra.mxu1 %v1833_v60  ;;  %1665 = vmatprep.subr.bf16.mxu0 %v1834_v61 }
  0x54   : > { %1693 = vmatprep.subr.bf16.mxu1 %v1836_v63  ;;  %1111 = vmatprep.mubr.bf16.mxu0 %v1851_v14 }
  0x55   : > { %1160 = vmatprep.mubr.bf16.mxu1 %v1853_v15 }
  0x56   : > { %1666 = vmatpush3.bf16.msra.mxu0 %v1835_v62 }
  0x57   : > { %1694 = vmatpush3.bf16.msra.mxu1 %v1837_v0  ;;  %1667 = vmatprep.subr.bf16.mxu0 %v1838_v1 }
  0x58   : > { %1695 = vmatprep.subr.bf16.mxu1 %v1840_v3 }
  0x59   : > { %1112 = vmatmul.mubr.bf16.gmra.mrb[4].mxu0 %v1856_v17 }
  0x5a   : > { %1668 = vmatpush3.bf16.msra.mxu0 %v1839_v2  ;;  %1161 = vmatmul.mubr.bf16.gmra.mrb[4].mxu1 %v1857_v18 }
  0x5b   : > { %1696 = vmatpush3.bf16.msra.mxu1 %v1841_v4  ;;  %1669 = vmatprep.subr.bf16.mxu0 %v1842_v5 }
  0x5c   : > { %1697 = vmatprep.subr.bf16.mxu1 %v1844_v7  ;;  %1201 = vmatprep.mubr.bf16.mxu0 %v1869_v29 }
  0x5d   : > { %1250 = vmatprep.mubr.bf16.mxu1 %v1874_v33 }
  0x5e   : > { %1670 = vmatpush3.bf16.msra.mxu0 %v1843_v6 }
  0x5f   : > { %1698 = vmatpush3.bf16.msra.mxu1 %v1845_v8  ;;  %1671 = vmatprep.subr.bf16.mxu0 %v1846_v9 }
  0x60   : > { %1699 = vmatprep.subr.bf16.mxu1 %v1848_v11 }
  0x62   : > { %1672 = vmatpush3.bf16.msra.mxu0 %v1847_v10 }
  0x63   : > { %1700 = vmatpush3.bf16.msra.mxu1 %v1849_v12  ;;  %1673 = vmatprep.subr.bf16.mxu0 %v1850_v13 }
  0x64   : > { %1701 = vmatprep.subr.bf16.mxu1 %v1858_v19 }
  0x66   : > { %1674 = vmatpush3.bf16.msra.mxu0 %v1855_v16 }
  0x67   : > { %1702 = vmatpush3.bf16.msra.mxu1 %v1859_v20  ;;  %1675 = vmatprep.subr.bf16.mxu0 %v1860_v21 }
  0x68   : > { %1703 = vmatprep.subr.bf16.mxu1 %v1862_v23 }
  0x6a   : > { %1676 = vmatpush3.bf16.msra.mxu0 %v1861_v22 }
  0x6b   : > { %1704 = vmatpush3.bf16.msra.mxu1 %v1863_v24  ;;  %1677 = vmatprep.subr.bf16.mxu0 %v1864_v25 }
  0x6c   : > { %1705 = vmatprep.subr.bf16.mxu1 %v1866_v27 }
  0x6e   : > { %1678 = vmatpush3.bf16.msra.mxu0 %v1865_v26 }
  0x6f   : > { %1706 = vmatpush3.bf16.msra.mxu1 %v1870_v30  ;;  %1729 = vmatprep.subr.bf16.mxu0 %v1871_v31 }
  0x71   : > { %1202 = vmatmul.mubr.bf16.vlgmr.msra.gmra.mrb[8].mxu0 %v1867_v28 }
  0x72   : > { %1730 = vmatpush3.bf16.msra.mxu0 %v1871_v31  ;;  %1251 = vmatmul.mubr.bf16.vlgmr.msra.gmra.mrb[8].mxu1 %v1872_v32 }
  0x73   : > { %1731 = vmatprep.subr.bf16.mxu0 %v1875_v34  ;;  %1209 = vmatprep.mubr.bf16.mxu0 %v1876_v35 }
  0x74   : > { %1258 = vmatprep.mubr.bf16.mxu1 %v1880_v38 }
  0x76   : > { %1732 = vmatpush3.bf16.msra.mxu0 %v1875_v34 }
  0x77   : > { %1733 = vmatprep.subr.bf16.mxu0 %v1879_v37 }
  0x79   : > { %1210 = vmatmul.mubr.bf16.gmra.mrb[12].mxu0 %v1878_v36 }
  0x7a   : > { %1734 = vmatpush3.bf16.msra.mxu0 %v1879_v37  ;;  %1259 = vmatmul.mubr.bf16.gmra.mrb[12].mxu1 %v1882_v39 }
  0x7b   : > { %1735 = vmatprep.subr.bf16.mxu0 %v1883_v40  ;;  %1745 = vmatprep.mubr.bf16.mxu0 %v1888_v42 }
  0x7e   : > { %1736 = vmatpush3.bf16.msra.mxu0 %v1883_v40 }
  0x7f   : > { %1737 = vmatprep.subr.bf16.mxu0 %v1884_v41 }
  0x82   : > { %1738 = vmatpush3.bf16.msra.mxu0 %v1884_v41 }
  0x83   : > { %1739 = vmatprep.subr.bf16.mxu0 %v1885_v43 }
  0x86   : > { %1740 = vmatpush3.bf16.msra.mxu0 %v1885_v43  ;;  %v381_v43 = vld [vmem:[%s2257_s4 + $0x10] sm:$0xff] }
  0x87   : > { %1741 = vmatprep.subr.bf16.mxu0 %v1886_v44 }
  0x8a   : > { %1742 = vmatpush3.bf16.msra.mxu0 %v1886_v44 }
  0x8b   : > { %1743 = vmatprep.subr.bf16.mxu0 %v1887_v45 }
  0x8e   : > { %1744 = vmatpush3.bf16.msra.mxu0 %v1887_v45 }
  0x91   : > { %1746 = vmatmul.mubr.bf16.vlgmr.msra.gmra.mrb[16].mxu0 %v1889_v46  ;;  %v379_v46 = vld [vmem:[%s2257_s4] sm:$0xff] }
 0x124   : > { %v1623_v47 = vpop.f32.mrb[0].mxu0 }
 0x125   : > { %v1651_v48 = vpop.f32.mrb[0].mxu1  ;;  %v1624_v49 = vpop.f32.mrb[1].mxu0 }
 0x126   : > { %v1625_v50 = vadd.f32 %v1624_v49, %v1623_v47  ;;  %v1652_v51 = vpop.f32.mrb[1].mxu1  ;;  %v1626_v52 = vpop.f32.mrb[2].mxu0  ;;  %v382_v49 = vld [vmem:[%s2257_s4 + $0x18] sm:$0xff] }
 0x127   : > { %v1653_v53 = vadd.f32 %v1652_v51, %v1651_v48  ;;  %v1654_v54 = vpop.f32.mrb[2].mxu1  ;;  %v1627_v55 = vpop.f32.mrb[3].mxu0 }
 0x128   : > { %v1628_v56 = vadd.f32 %v1627_v55, %v1626_v52  ;;  %v1655_v57 = vpop.f32.mrb[3].mxu1 }
 0x129   : > { %v1155_v58 = vadd.f32 %v1653_v53, %v1625_v50  ;;  %v1656_v59 = vadd.f32 %v1655_v57, %v1654_v54  ;;  %v380_v53 = vld [vmem:[%s2257_s4 + $0x8] sm:$0xff] }
 0x12b   : > { %v1158_v60 = vadd.f32 %v1656_v59, %v1628_v56 }
 0x12c   : > { %v1629_v61 = vpop.f32.mrb[4].mxu0 }
 0x12d   : > { %v1657_v62 = vpop.f32.mrb[4].mxu1  ;;  %v1630_v63 = vpop.f32.mrb[5].mxu0 }
 0x12e   : > { %v1658_v0 = vpop.f32.mrb[5].mxu1  ;;  %v1631_v1 = vadd.f32 %v1630_v63, %v1629_v61  ;;  %v1632_v3 = vpop.f32.mrb[6].mxu0 }
 0x12f   : > { %v1659_v2 = vadd.f32 %v1658_v0, %v1657_v62  ;;  %v1660_v4 = vpop.f32.mrb[6].mxu1  ;;  %v1633_v5 = vpop.f32.mrb[7].mxu0 }
 0x130   : > { %v1661_v6 = vpop.f32.mrb[7].mxu1  ;;  %v1634_v8 = vadd.f32 %v1633_v5, %v1632_v3  ;;  %v1348_v5 = vld [vmem:[%s2256_s3 + $0x8] sm:$0xff] (!%p1598_p11) }
 0x131   : > { %v1163_v7 = vadd.f32 %v1659_v2, %v1631_v1  ;;  %v1662_v9 = vadd.f32 %v1661_v6, %v1660_v4  ;;  %v1347_v2 = vld [vmem:[%s2256_s3] sm:$0xff] (!%p1598_p11)  ;;  %v1349_v6 = vld [vmem:[%s2256_s3 + $0x10] sm:$0xff] (!%p1598_p11) }
 0x133   : > { %v1166_v10 = vadd.f32 %v1662_v9, %v1634_v8 }
 0x144   : > { %v1679_v11 = vpop.f32.mrb[8].mxu0 }
 0x145   : > { %v1680_v12 = vpop.f32.mrb[9].mxu0  ;;  %v1707_v15 = vpop.f32.mrb[8].mxu1 }
 0x146   : > { %v1681_v13 = vadd.f32 %v1680_v12, %v1679_v11  ;;  %v1682_v14 = vpop.f32.mrb[10].mxu0  ;;  %v1708_v19 = vpop.f32.mrb[9].mxu1 }
 0x147   : > { %v1683_v16 = vpop.f32.mrb[11].mxu0  ;;  %v1709_v20 = vadd.f32 %v1708_v19, %v1707_v15  ;;  %v1710_v21 = vpop.f32.mrb[10].mxu1 }
 0x148   : > { %v1204_v17 = vadd.f32 %v1681_v13, %v1155_v58  ;;  %v1684_v18 = vadd.f32 %v1683_v16, %v1682_v14  ;;  %v1711_v23 = vpop.f32.mrb[11].mxu1 }
 0x149   : > { %v1712_v24 = vadd.f32 %v1711_v23, %v1710_v21 }
 0x14a   : > { %v1207_v22 = vadd.f32 %v1684_v18, %v1158_v60  ;;  %v1253_v25 = vadd.f32 %v1709_v20, %v1204_v17  ;;  %v1599_v60 = vld [vmem:[%s2255_s2] ss:$0 sm:$0xff] (!%p1598_p11) }
 0x14c   : > { %v1685_v26 = vpop.f32.mrb[12].mxu0  ;;  %v1256_v28 = vadd.f32 %v1712_v24, %v1207_v22 }
 0x14d   : > { %v1686_v27 = vpop.f32.mrb[13].mxu0  ;;  %v1713_v31 = vpop.f32.mrb[12].mxu1 }
 0x14e   : > { %v1687_v29 = vadd.f32 %v1686_v27, %v1685_v26  ;;  %v1688_v30 = vpop.f32.mrb[14].mxu0  ;;  %v1714_v35 = vpop.f32.mrb[13].mxu1 }
 0x14f   : > { %v1689_v32 = vpop.f32.mrb[15].mxu0  ;;  %v1715_v36 = vadd.f32 %v1714_v35, %v1713_v31  ;;  %v1716_v37 = vpop.f32.mrb[14].mxu1 }
 0x150   : > { %v1212_v33 = vadd.f32 %v1687_v29, %v1163_v7  ;;  %v1690_v34 = vadd.f32 %v1689_v32, %v1688_v30  ;;  %v1717_v39 = vpop.f32.mrb[15].mxu1  ;;  %v1350_v7 = vld [vmem:[%s2256_s3 + $0x18] sm:$0xff] (!%p1598_p11) }
 0x151   : > { %v1718_v40 = vadd.f32 %v1717_v39, %v1716_v37 }
 0x152   : > { %v1215_v38 = vadd.f32 %v1690_v34, %v1166_v10  ;;  %v1261_v41 = vadd.f32 %v1715_v36, %v1212_v33 }
 0x154   : > { %v1264_v42 = vadd.f32 %v1718_v40, %v1215_v38 }
 0x164   : > { %v1747_v44 = vpop.f32.mrb[16].mxu0 }
 0x165   : > { %v1310_v45 = vadd.f32 %v1747_v44, %v1261_v41  ;;  %v1301_v47 = vpop.f32.mrb[17].mxu0 }
 0x166   : > { %v1302_v48 = vadd.f32 %v1301_v47, %v1253_v25  ;;  %v1748_v50 = vpop.f32.mrb[18].mxu0  ;;  %1327 = sbr.rel (%p1598_p11) target bundleno = 377 (0x179), region = 70 }
 0x167   : > { %v1318_v51 = vadd.f32 %v1310_v45, %v381_v43  ;;  %v1313_v52 = vadd.f32 %v1748_v50, %v1264_v42  ;;  %v1304_v54 = vpop.f32.mrb[19].mxu0 }
 0x168   : > { %v1316_v55 = vadd.f32 %v1302_v48, %v379_v46  ;;  %v1305_v56 = vadd.f32 %v1304_v54, %v1256_v28 }
 0x169   : > { %1322 = vst [vmem:[%s2257_s4 + $0x10] sm:$0xff] %v1318_v51  ;;  %v1319_v57 = vadd.f32 %v1313_v52, %v382_v49 }
 0x16a   : > { %1320 = vst [vmem:[%s2257_s4] sm:$0xff] %v1316_v55  ;;  %v1317_v58 = vadd.f32 %v1305_v56, %v380_v53 }
 0x16b   : > { %1323 = vst [vmem:[%s2257_s4 + $0x18] sm:$0xff] %v1319_v57 }
 0x16c   : > { %1321 = vst [vmem:[%s2257_s4 + $0x8] sm:$0xff] %v1317_v58 }
 0x170   : > { %v1330_v0 = vld [vmem:[%s2257_s4 + $0x10] sm:$0xff] }
 0x171   : > { %v1328_v59 = vld [vmem:[%s2257_s4] sm:$0xff]  ;;  %v1341_v3 = vadd.f32 %v1599_v60, %v1330_v0 }
 0x172   : > { %v1339_v62 = vadd.f32 %v1599_v60, %v1328_v59  ;;  %v1331_v1 = vld [vmem:[%s2257_s4 + $0x18] sm:$0xff] }
 0x173   : > { %v1329_v61 = vld [vmem:[%s2257_s4 + $0x8] sm:$0xff]  ;;  %v1342_v4 = vadd.f32 %v1599_v60, %v1331_v1  ;;  %1345 = vst [vmem:[%s2257_s4 + $0x10] sm:$0xff] %v1341_v3  ;;  %v1353_v10 = vadd.f32 %v1349_v6, %v1341_v3 }
 0x174   : > { %v1340_v63 = vadd.f32 %v1599_v60, %v1329_v61  ;;  %1343 = vst [vmem:[%s2257_s4] sm:$0xff] %v1339_v62  ;;  %v1351_v8 = vadd.f32 %v1347_v2, %v1339_v62 }
 0x175   : > { %1346 = vst [vmem:[%s2257_s4 + $0x18] sm:$0xff] %v1342_v4  ;;  %v1354_v11 = vadd.f32 %v1350_v7, %v1342_v4  ;;  %1357 = vst [vmem:[%s2258_s5 + $0x10] sm:$0xff] %v1353_v10 }
 0x176   : > { %1344 = vst [vmem:[%s2257_s4 + $0x8] sm:$0xff] %v1340_v63  ;;  %v1352_v9 = vadd.f32 %v1348_v5, %v1340_v63  ;;  %1355 = vst [vmem:[%s2258_s5] sm:$0xff] %v1351_v8 }
 0x177   : > { %1358 = vst [vmem:[%s2258_s5 + $0x18] sm:$0xff] %v1354_v11 }
 0x178   : > { %1356 = vst [vmem:[%s2258_s5 + $0x8] sm:$0xff] %v1352_v9 }
 0x179 PF: > { %s16_s22 = sadd.s32 1, %s1928_s22   ;;  %s2259_s18 = smov %s1916_s19 }
 0x17a   : > { %p13_p12 = scmp.ge.s32.totalorder %s16_s22, 6   ;;  %s2260_s19 = smov %s1996_s26 }
 0x17b   : > { %s2261_s20 = smov %s1924_s21  ;;  %s2262_s21 = smov %s2264_s23 }
 0x17c   :  { %15 = sbr.rel (!%p13_p12) target bundleno = 3 (0x3), region = 129 }

// kernel: autoregressive_block.16
= control target key start
LH: loop header
LB: loop body
LE: loop exit
PB: predicated region body
PF: predicated region fallthrough
CT: control target
= control target key end

     0   :  { %s3949_s15 = smov 0   ;;  %s3951_s16 = smov 0   ;;  %s4661_s0 = inlined_call_operand.vmem [shape: bf16[32,9216], index: 0, kind: input, shape index: {}]   ;;  %s4662_s1 = inlined_call_operand.vmem [shape: bf16[9216,512], index: 1, kind: input, shape index: {}]   ;;  %s4663_s2 = inlined_call_operand.vmem [shape: f32[1,512], index: 2, kind: input, shape index: {}]   ;;  %s4664_s3 = inlined_call_operand.vmem [shape: f32[32,512], index: 3, kind: input, shape index: {}]   ;;  %s4665_s4 = inlined_call_operand.vmem [shape: f32[32,512], index: 4, kind: output, shape index: {}]  }
   0x1   :  { %s3953_s17 = smov 0   ;;  %s3955_s18 = smov 0  }
   0x2   :  { %s3957_s19 = smov 0  }
   0x3 LB: > { %s23_s20 = sadd.s32 1, %s3916_s18  ;;  %p42_p1 = scmp.ne.s32.totalorder %s3908_s16, %s3904_s15  ;;  %s3920_s19 = sphi %s3957_s19, %s14_s19   ;;  %s3916_s18 = sphi %s3955_s18, %s4669_s18   ;;  %s3912_s17 = sphi %s3953_s17, %s4668_s17   ;;  %s3908_s16 = sphi %s3951_s16, %s4667_s16   ;;  %s3904_s15 = sphi %s3949_s15, %s4666_s15  }
   0x4   : > { %p24_p0 = scmp.ge.s32.totalorder %s23_s20, 8  ;;  %p43_p2 = scmp.eq.s32.totalorder %s3920_s19, 0 }
   0x5   : > { %s35_s22 = sadd.s32 1, %s3908_s16  ;;  %p2989_p5 = scmp.ge.s32.totalorder %s3920_s19, 8 }
   0x6   : > { %s4671_s20 = smov (%p24_p0, %s23_s20), 0  ;;  %p44_p3 = por %p43_p2, %p42_p1 }
   0x7   : > { %s31_s21 = ssub.s32 %s3916_s18, %s4671_s20  ;;  %180 = sbr.rel (%p2989_p5) target bundleno = 30 (0x1e), region = 24 }
   0x8   : > { %p33_p4 = scmp.eq.s32.totalorder %s31_s21, 0 }
   0xa   : > { %s3984_s23 = scalar_select %p33_p4, %s3908_s16, %s35_s22  }
   0xe   : > { %183 = sbr.rel (!%p44_p3) target bundleno = 30 (0x1e), region = 28  ;;  %s185_s24 = sand.u32 (%p44_p3), 1, %s3908_s16  }
   0xf   : > { %s3314_s25 = smul.u32 (%p44_p3), 36, %s3916_s18 }
  0x10   : > { %s3380_s26 = smul.u32 (%p44_p3), 144, %s185_s24 }
  0x11   : > { %s3992_s29 = scalar_lea.vmem (%p44_p3), %s4661_s0, %s3314_s25 }
  0x12   : > { %v208_v0 = vld [vmem:[%s3992_s29] sm:$0xff] (%p44_p3)  ;;  %v210_v1 = vld [vmem:[%s3992_s29 + $0x8] sm:$0xff] (%p44_p3)  ;;  %v212_v2 = vld [vmem:[%s3992_s29 + $0x10] sm:$0xff] (%p44_p3)  ;;  %s3997_s30 = scalar_lea.vmem (%p44_p3), [#allocation2], %s3380_s26 }
  0x13   : > { %209 = vst [vmem:[%s3997_s30] sm:$0xff] (%p44_p3), %v208_v0  ;;  %211 = vst [vmem:[%s3997_s30 + $0x8] sm:$0xff] (%p44_p3), %v210_v1  ;;  %v214_v3 = vld [vmem:[%s3992_s29 + $0x18] sm:$0xff] (%p44_p3)  ;;  %v216_v4 = vld [vmem:[%s3992_s29 + $0x120] sm:$0xff] (%p44_p3) }
  0x14   : > { %213 = vst [vmem:[%s3997_s30 + $0x10] sm:$0xff] (%p44_p3), %v212_v2  ;;  %v218_v5 = vld [vmem:[%s3992_s29 + $0x128] sm:$0xff] (%p44_p3)  ;;  %215 = vst [vmem:[%s3997_s30 + $0x18] sm:$0xff] (%p44_p3), %v214_v3  ;;  %v220_v6 = vld [vmem:[%s3992_s29 + $0x130] sm:$0xff] (%p44_p3) }
  0x15   : > { %217 = vst [vmem:[%s3997_s30 + $0x24] sm:$0xff] %v216_v4  ;;  %219 = vst [vmem:[%s3997_s30 + $0x2c] sm:$0xff] %v218_v5  ;;  %v222_v7 = vld [vmem:[%s3992_s29 + $0x138] sm:$0xff]  ;;  %v224_v8 = vld [vmem:[%s3992_s29 + $0x240] sm:$0xff] }
  0x16   : > { %221 = vst [vmem:[%s3997_s30 + $0x34] sm:$0xff] %v220_v6  ;;  %223 = vst [vmem:[%s3997_s30 + $0x3c] sm:$0xff] %v222_v7  ;;  %v226_v9 = vld [vmem:[%s3992_s29 + $0x248] sm:$0xff]  ;;  %v228_v10 = vld [vmem:[%s3992_s29 + $0x250] sm:$0xff] }
  0x17   : > { %225 = vst [vmem:[%s3997_s30 + $0x48] sm:$0xff] %v224_v8  ;;  %v230_v11 = vld [vmem:[%s3992_s29 + $0x258] sm:$0xff]  ;;  %227 = vst [vmem:[%s3997_s30 + $0x50] sm:$0xff] %v226_v9  ;;  %v232_v12 = vld [vmem:[%s3992_s29 + $0x360] sm:$0xff] }
  0x18   : > { %229 = vst [vmem:[%s3997_s30 + $0x58] sm:$0xff] %v228_v10  ;;  %231 = vst [vmem:[%s3997_s30 + $0x60] sm:$0xff] %v230_v11  ;;  %v234_v13 = vld [vmem:[%s3992_s29 + $0x368] sm:$0xff]  ;;  %v236_v14 = vld [vmem:[%s3992_s29 + $0x370] sm:$0xff] }
  0x19   : > { %233 = vst [vmem:[%s3997_s30 + $0x6c] sm:$0xff] %v232_v12  ;;  %235 = vst [vmem:[%s3997_s30 + $0x74] sm:$0xff] %v234_v13  ;;  %v238_v15 = vld [vmem:[%s3992_s29 + $0x378] sm:$0xff]  ;;  %v2991_v16 = vld [vmem:[%s3992_s29 + $0x20] sm:$0xf] }
  0x1a   : > { %237 = vst [vmem:[%s3997_s30 + $0x7c] sm:$0xff] %v236_v14  ;;  %v2993_v17 = vld [vmem:[%s3992_s29 + $0x140] sm:$0xf]  ;;  %239 = vst [vmem:[%s3997_s30 + $0x84] sm:$0xff] %v238_v15 }
  0x1b   : > { %2992 = vst [vmem:[%s3997_s30 + $0x20] sm:$0xf] %v2991_v16  ;;  %2994 = vst [vmem:[%s3997_s30 + $0x44] sm:$0xf] %v2993_v17  ;;  %v2995_v18 = vld [vmem:[%s3992_s29 + $0x260] sm:$0xf] }
  0x1c   : > { %v2997_v19 = vld [vmem:[%s3992_s29 + $0x380] sm:$0xf]  ;;  %2996 = vst [vmem:[%s3997_s30 + $0x68] sm:$0xf] %v2995_v18 }
  0x1d   : > { %2998 = vst [vmem:[%s3997_s30 + $0x8c] sm:$0xf] %v2997_v19 }
  0x1e PF: > { %p2999_p6 = scmp.ge.s32.totalorder %s3920_s19, 1  ;;  %p269_p7 = scmp.lt.s32.totalorder %s3920_s19, 9 }
  0x20   : > { %p270_p8 = pnand %p2999_p6, %p269_p7 }
  0x21   : > { %s276_s5 = sand.u32 (!%p270_p8), 1, %s3904_s15   ;;  %s316_s6 = smul.u32 (!%p270_p8), 144, %s3912_s17 }
  0x22   : > { %273 = sbr.rel (%p270_p8) target bundleno = 578 (0x242), region = 58  ;;  %p3002_p10 = scmp.ne.s32.totalorder (!%p270_p8), %s3912_s17, 0 }
  0x23   : > { %s3381_s7 = smul.u32 (!%p270_p8), 144, %s276_s5  ;;  %p317_p9 = scmp.lt.s32.totalorder (!%p270_p8), %s316_s6, 1151 }
  0x25   : > { %s4045_s12 = scalar_lea.vmem (!%p270_p8), [#allocation2], %s3381_s7 }
  0x29   : > { %s4673_s6 = smov (!%p317_p9, %s316_s6), 1151  ;;  %341 = sbr.rel (%p3002_p10) target bundleno = 51 (0x33), region = 66 }
  0x2a   : > { %s3315_s8 = sshll.u32 %s4673_s6, 4  ;;  %v3922_v20 = vmov (!%p3002_p10), 0.0  }
  0x2b   : > { %s4043_s11 = scalar_lea.vmem %s4662_s1, %s3315_s8  ;;  %342 = vst [vmem:[%s4665_s4] sm:$0xff] (!%p3002_p10), %v3922_v20  ;;  %343 = vst [vmem:[%s4665_s4 + $0x8] sm:$0xff] (!%p3002_p10), %v3922_v20 }
  0x2c   : > { %344 = vst [vmem:[%s4665_s4 + $0x10] sm:$0xff] (!%p3002_p10), %v3922_v20  ;;  %345 = vst [vmem:[%s4665_s4 + $0x18] sm:$0xff] (!%p3002_p10), %v3922_v20 }
  0x2d   : > { %346 = vst [vmem:[%s4665_s4 + $0x20] sm:$0xff] (!%p3002_p10), %v3922_v20  ;;  %347 = vst [vmem:[%s4665_s4 + $0x28] sm:$0xff] (!%p3002_p10), %v3922_v20 }
  0x2e   : > { %348 = vst [vmem:[%s4665_s4 + $0x30] sm:$0xff] (!%p3002_p10), %v3922_v20  ;;  %349 = vst [vmem:[%s4665_s4 + $0x38] sm:$0xff] (!%p3002_p10), %v3922_v20 }
  0x2f   : > { %350 = vst [vmem:[%s4665_s4 + $0x40] sm:$0xff] (!%p3002_p10), %v3922_v20  ;;  %351 = vst [vmem:[%s4665_s4 + $0x48] sm:$0xff] (!%p3002_p10), %v3922_v20 }
  0x30   : > { %352 = vst [vmem:[%s4665_s4 + $0x50] sm:$0xff] %v3922_v20  ;;  %353 = vst [vmem:[%s4665_s4 + $0x58] sm:$0xff] %v3922_v20 }
  0x31   : > { %354 = vst [vmem:[%s4665_s4 + $0x60] sm:$0xff] %v3922_v20  ;;  %355 = vst [vmem:[%s4665_s4 + $0x68] sm:$0xff] %v3922_v20 }
  0x32   : > { %356 = vst [vmem:[%s4665_s4 + $0x70] sm:$0xff] %v3922_v20  ;;  %357 = vst [vmem:[%s4665_s4 + $0x78] sm:$0xff] %v3922_v20 }
  0x33 PF: > { %v3424_v21 = vld [vmem:[%s4043_s11 + $0x4] ss:$16 sps:$4 sm:$0xff]   ;;  %v3426_v22 = vld [vmem:[%s4043_s11 + $0xc] ss:$16 sps:$4 sm:$0xff]   ;;  %v3428_v23 = vld [vmem:[%s4043_s11] ss:$16 sps:$4 sm:$0xff]  }
  0x34   : > { %2214 = vmatprep.subr.bf16.mxu0 %v3424_v21  ;;  %v3429_v24 = vld [vmem:[%s4043_s11 + $0x8] ss:$16 sps:$4 sm:$0xff]   ;;  %2479 = vmatprep.subr.bf16.mxu1 %v3426_v22  ;;  %v3430_v25 = vld [vmem:[%s4043_s11 + $0x24] ss:$16 sps:$4 sm:$0xff]   ;;  %v3432_v26 = vld [vmem:[%s4043_s11 + $0x2c] ss:$16 sps:$4 sm:$0xff]  }
  0x35   : > { %2215 = vmatpush1.bf16.msra.mxu0 %v3428_v23  ;;  %2480 = vmatpush1.bf16.msra.mxu1 %v3429_v24  ;;  %v3434_v27 = vld [vmem:[%s4043_s11 + $0x20] ss:$16 sps:$4 sm:$0xff]   ;;  %v3435_v28 = vld [vmem:[%s4043_s11 + $0x28] ss:$16 sps:$4 sm:$0xff]   ;;  %v3436_v29 = vld [vmem:[%s4043_s11 + $0x44] ss:$16 sps:$4 sm:$0xff]  }
  0x36   : > { %2216 = vmatprep.subr.bf16.mxu0 %v3430_v25  ;;  %2481 = vmatprep.subr.bf16.mxu1 %v3432_v26  ;;  %v3438_v30 = vld [vmem:[%s4043_s11 + $0x4c] ss:$16 sps:$4 sm:$0xff]   ;;  %v3440_v31 = vld [vmem:[%s4043_s11 + $0x40] ss:$16 sps:$4 sm:$0xff]   ;;  %v3441_v32 = vld [vmem:[%s4043_s11 + $0x48] ss:$16 sps:$4 sm:$0xff]  }
  0x37   : > { %v3442_v33 = vld [vmem:[%s4043_s11 + $0x64] ss:$16 sps:$4 sm:$0xff]   ;;  %v3444_v34 = vld [vmem:[%s4043_s11 + $0x6c] ss:$16 sps:$4 sm:$0xff]   ;;  %v3446_v35 = vld [vmem:[%s4043_s11 + $0x60] ss:$16 sps:$4 sm:$0xff]  }
  0x38   : > { %v3447_v36 = vld [vmem:[%s4043_s11 + $0x68] ss:$16 sps:$4 sm:$0xff]   ;;  %v3448_v37 = vld [vmem:[%s4043_s11 + $0x84] ss:$16 sps:$4 sm:$0xff]   ;;  %v3450_v38 = vld [vmem:[%s4043_s11 + $0x8c] ss:$16 sps:$4 sm:$0xff]  }
  0x39   : > { %2217 = vmatpush1.bf16.msra.mxu0 %v3434_v27  ;;  %2482 = vmatpush1.bf16.msra.mxu1 %v3435_v28  ;;  %v3452_v39 = vld [vmem:[%s4043_s11 + $0x80] ss:$16 sps:$4 sm:$0xff]   ;;  %v3453_v40 = vld [vmem:[%s4043_s11 + $0x88] ss:$16 sps:$4 sm:$0xff]   ;;  %v3454_v41 = vld [vmem:[%s4043_s11 + $0xa4] ss:$16 sps:$4 sm:$0xff]  }
  0x3a   : > { %2218 = vmatprep.subr.bf16.mxu0 %v3436_v29  ;;  %2483 = vmatprep.subr.bf16.mxu1 %v3438_v30  ;;  %v3456_v42 = vld [vmem:[%s4043_s11 + $0xac] ss:$16 sps:$4 sm:$0xff]   ;;  %v3458_v43 = vld [vmem:[%s4043_s11 + $0xa0] ss:$16 sps:$4 sm:$0xff]   ;;  %v3459_v44 = vld [vmem:[%s4043_s11 + $0xa8] ss:$16 sps:$4 sm:$0xff]  }
  0x3b   : > { %v3460_v45 = vld [vmem:[%s4043_s11 + $0xc4] ss:$16 sps:$4 sm:$0xff]   ;;  %v3462_v46 = vld [vmem:[%s4043_s11 + $0xcc] ss:$16 sps:$4 sm:$0xff]   ;;  %v3464_v47 = vld [vmem:[%s4043_s11 + $0xc0] ss:$16 sps:$4 sm:$0xff]  }
  0x3c   : > { %v3465_v48 = vld [vmem:[%s4043_s11 + $0xc8] ss:$16 sps:$4 sm:$0xff]   ;;  %v3466_v49 = vld [vmem:[%s4043_s11 + $0xe4] ss:$16 sps:$4 sm:$0xff]   ;;  %v3468_v50 = vld [vmem:[%s4043_s11 + $0xec] ss:$16 sps:$4 sm:$0xff]  }
  0x3d   : > { %2219 = vmatpush1.bf16.msra.mxu0 %v3440_v31  ;;  %2484 = vmatpush1.bf16.msra.mxu1 %v3441_v32  ;;  %v3470_v51 = vld [vmem:[%s4043_s11 + $0xe0] ss:$16 sps:$4 sm:$0xff]   ;;  %v3471_v52 = vld [vmem:[%s4043_s11 + $0xe8] ss:$16 sps:$4 sm:$0xff]   ;;  %v3472_v53 = vld [vmem:[%s4043_s11 + $0x104] ss:$16 sps:$4 sm:$0xff]  }
  0x3e   : > { %2220 = vmatprep.subr.bf16.mxu0 %v3442_v33  ;;  %2485 = vmatprep.subr.bf16.mxu1 %v3444_v34  ;;  %v3474_v54 = vld [vmem:[%s4043_s11 + $0x10c] ss:$16 sps:$4 sm:$0xff]   ;;  %v3476_v55 = vld [vmem:[%s4043_s11 + $0x100] ss:$16 sps:$4 sm:$0xff]   ;;  %v3477_v56 = vld [vmem:[%s4043_s11 + $0x108] ss:$16 sps:$4 sm:$0xff]  }
  0x3f   : > { %v3478_v57 = vld [vmem:[%s4043_s11 + $0x124] ss:$16 sps:$4 sm:$0xff]   ;;  %v3480_v58 = vld [vmem:[%s4043_s11 + $0x12c] ss:$16 sps:$4 sm:$0xff]   ;;  %v3482_v59 = vld [vmem:[%s4043_s11 + $0x120] ss:$16 sps:$4 sm:$0xff]  }
  0x40   : > { %v3483_v60 = vld [vmem:[%s4043_s11 + $0x128] ss:$16 sps:$4 sm:$0xff]   ;;  %v3484_v61 = vld [vmem:[%s4043_s11 + $0x144] ss:$16 sps:$4 sm:$0xff]   ;;  %v3486_v62 = vld [vmem:[%s4043_s11 + $0x14c] ss:$16 sps:$4 sm:$0xff]  }
  0x41   : > { %2221 = vmatpush1.bf16.msra.mxu0 %v3446_v35  ;;  %2486 = vmatpush1.bf16.msra.mxu1 %v3447_v36  ;;  %v3488_v63 = vld [vmem:[%s4043_s11 + $0x140] ss:$16 sps:$4 sm:$0xff]   ;;  %v3489_v0 = vld [vmem:[%s4043_s11 + $0x148] ss:$16 sps:$4 sm:$0xff]   ;;  %v3490_v1 = vld [vmem:[%s4043_s11 + $0x164] ss:$16 sps:$4 sm:$0xff]  }
  0x42   : > { %2222 = vmatprep.subr.bf16.mxu0 %v3448_v37  ;;  %2487 = vmatprep.subr.bf16.mxu1 %v3450_v38  ;;  %v3492_v2 = vld [vmem:[%s4043_s11 + $0x16c] ss:$16 sps:$4 sm:$0xff]   ;;  %v3494_v3 = vld [vmem:[%s4043_s11 + $0x160] ss:$16 sps:$4 sm:$0xff]   ;;  %v3495_v4 = vld [vmem:[%s4043_s11 + $0x168] ss:$16 sps:$4 sm:$0xff]  }
  0x43   : > { %v3522_v5 = vld [vmem:[%s4045_s12 + $0x4] ss:$36 sps:$4 sm:$0xff]   ;;  %v3498_v7 = vld [vmem:[%s4043_s11 + $0x18c] ss:$16 sps:$4 sm:$0xff]   ;;  %v3500_v8 = vld [vmem:[%s4043_s11 + $0x180] ss:$16 sps:$4 sm:$0xff]  }
  0x44   : > { %v3496_v6 = vld [vmem:[%s4043_s11 + $0x184] ss:$16 sps:$4 sm:$0xff]   ;;  %2246 = vmatprep.mubr.bf16.mxu0 %v3522_v5  ;;  %2511 = vmatprep.mubr.bf16.mxu1 %v3522_v5  ;;  %v3501_v9 = vld [vmem:[%s4043_s11 + $0x188] ss:$16 sps:$4 sm:$0xff]   ;;  %v3504_v11 = vld [vmem:[%s4043_s11 + $0x1ac] ss:$16 sps:$4 sm:$0xff]  }
  0x45   : > { %2223 = vmatpush1.bf16.msra.mxu0 %v3452_v39  ;;  %2488 = vmatpush1.bf16.msra.mxu1 %v3453_v40  ;;  %v3502_v10 = vld [vmem:[%s4043_s11 + $0x1a4] ss:$16 sps:$4 sm:$0xff]   ;;  %v3506_v12 = vld [vmem:[%s4043_s11 + $0x1a0] ss:$16 sps:$4 sm:$0xff]   ;;  %v3507_v13 = vld [vmem:[%s4043_s11 + $0x1a8] ss:$16 sps:$4 sm:$0xff]  }
  0x46   : > { %2224 = vmatprep.subr.bf16.mxu0 %v3454_v41  ;;  %2489 = vmatprep.subr.bf16.mxu1 %v3456_v42  ;;  %v3508_v14 = vld [vmem:[%s4043_s11 + $0x1c4] ss:$16 sps:$4 sm:$0xff]   ;;  %v3510_v15 = vld [vmem:[%s4043_s11 + $0x1cc] ss:$16 sps:$4 sm:$0xff]   ;;  %v3512_v16 = vld [vmem:[%s4043_s11 + $0x1c0] ss:$16 sps:$4 sm:$0xff]  }
  0x47   : > { %v3513_v17 = vld [vmem:[%s4043_s11 + $0x1c8] ss:$16 sps:$4 sm:$0xff]   ;;  %v3514_v18 = vld [vmem:[%s4043_s11 + $0x1e4] ss:$16 sps:$4 sm:$0xff]   ;;  %v3516_v19 = vld [vmem:[%s4043_s11 + $0x1ec] ss:$16 sps:$4 sm:$0xff]  }
  0x48   : > { %v3518_v20 = vld [vmem:[%s4043_s11 + $0x1e0] ss:$16 sps:$4 sm:$0xff]   ;;  %v3519_v21 = vld [vmem:[%s4043_s11 + $0x1e8] ss:$16 sps:$4 sm:$0xff]   ;;  %v3525_v22 = vld [vmem:[%s4043_s11 + $0x204] ss:$16 sps:$4 sm:$0xff]  }
  0x49   : > { %2225 = vmatpush1.bf16.msra.mxu0 %v3458_v43  ;;  %2490 = vmatpush1.bf16.msra.mxu1 %v3459_v44  ;;  %v3528_v23 = vld [vmem:[%s4043_s11 + $0x20c] ss:$16 sps:$4 sm:$0xff]   ;;  %v3520_v24 = vld [vmem:[%s4045_s12] ss:$36 sps:$4 sm:$0xff]   ;;  %v3526_v26 = vld [vmem:[%s4043_s11 + $0x208] ss:$16 sps:$4 sm:$0xff]  }
  0x4a   : > { %2226 = vmatprep.subr.bf16.mxu0 %v3460_v45  ;;  %2491 = vmatprep.subr.bf16.mxu1 %v3462_v46  ;;  %v3523_v25 = vld [vmem:[%s4043_s11 + $0x200] ss:$16 sps:$4 sm:$0xff]   ;;  %v3531_v27 = vld [vmem:[%s4043_s11 + $0x224] ss:$16 sps:$4 sm:$0xff]   ;;  %v3534_v28 = vld [vmem:[%s4043_s11 + $0x22c] ss:$16 sps:$4 sm:$0xff]  }
  0x4b   : > { %v3529_v29 = vld [vmem:[%s4043_s11 + $0x220] ss:$16 sps:$4 sm:$0xff]   ;;  %v3532_v30 = vld [vmem:[%s4043_s11 + $0x228] ss:$16 sps:$4 sm:$0xff]   ;;  %v3537_v31 = vld [vmem:[%s4043_s11 + $0x244] ss:$16 sps:$4 sm:$0xff]  }
  0x4c   : > { %v3540_v32 = vld [vmem:[%s4043_s11 + $0x24c] ss:$16 sps:$4 sm:$0xff]   ;;  %v3535_v33 = vld [vmem:[%s4043_s11 + $0x240] ss:$16 sps:$4 sm:$0xff]   ;;  %v3538_v34 = vld [vmem:[%s4043_s11 + $0x248] ss:$16 sps:$4 sm:$0xff]  }
  0x4d   : > { %2227 = vmatpush1.bf16.msra.mxu0 %v3464_v47  ;;  %2492 = vmatpush1.bf16.msra.mxu1 %v3465_v48  ;;  %v3543_v35 = vld [vmem:[%s4043_s11 + $0x264] ss:$16 sps:$4 sm:$0xff]   ;;  %v3546_v36 = vld [vmem:[%s4043_s11 + $0x26c] ss:$16 sps:$4 sm:$0xff]   ;;  %v3541_v37 = vld [vmem:[%s4043_s11 + $0x260] ss:$16 sps:$4 sm:$0xff]  }
  0x4e   : > { %2228 = vmatprep.subr.bf16.mxu0 %v3466_v49  ;;  %2493 = vmatprep.subr.bf16.mxu1 %v3468_v50  ;;  %v3544_v38 = vld [vmem:[%s4043_s11 + $0x268] ss:$16 sps:$4 sm:$0xff]   ;;  %v3549_v39 = vld [vmem:[%s4043_s11 + $0x284] ss:$16 sps:$4 sm:$0xff]   ;;  %v3552_v40 = vld [vmem:[%s4043_s11 + $0x28c] ss:$16 sps:$4 sm:$0xff]  }
  0x4f   : > { %v3547_v41 = vld [vmem:[%s4043_s11 + $0x280] ss:$16 sps:$4 sm:$0xff]   ;;  %v3550_v42 = vld [vmem:[%s4043_s11 + $0x288] ss:$16 sps:$4 sm:$0xff]   ;;  %v3555_v43 = vld [vmem:[%s4043_s11 + $0x2a4] ss:$16 sps:$4 sm:$0xff]  }
  0x50   : > { %v3558_v44 = vld [vmem:[%s4043_s11 + $0x2ac] ss:$16 sps:$4 sm:$0xff]   ;;  %v3553_v46 = vld [vmem:[%s4043_s11 + $0x2a0] ss:$16 sps:$4 sm:$0xff]   ;;  %v3556_v47 = vld [vmem:[%s4043_s11 + $0x2a8] ss:$16 sps:$4 sm:$0xff]  }
  0x51   : > { %2229 = vmatpush1.bf16.msra.mxu0 %v3470_v51  ;;  %2494 = vmatpush1.bf16.msra.mxu1 %v3471_v52  ;;  %v3607_v45 = vld [vmem:[%s4045_s12 + $0x4c] ss:$36 sps:$4 sm:$0xff]   ;;  %v3561_v48 = vld [vmem:[%s4043_s11 + $0x2c4] ss:$16 sps:$4 sm:$0xff]   ;;  %v3562_v52 = vld [vmem:[%s4043_s11 + $0x2c8] ss:$16 sps:$4 sm:$0xff]  }
  0x52   : > { %2230 = vmatprep.subr.bf16.mxu0 %v3472_v53  ;;  %2495 = vmatprep.subr.bf16.mxu1 %v3474_v54  ;;  %v3564_v49 = vld [vmem:[%s4043_s11 + $0x2cc] ss:$16 sps:$4 sm:$0xff]   ;;  %v3559_v51 = vld [vmem:[%s4043_s11 + $0x2c0] ss:$16 sps:$4 sm:$0xff]   ;;  %v3567_v53 = vld [vmem:[%s4043_s11 + $0x2e4] ss:$16 sps:$4 sm:$0xff]  }
  0x53   : > { %v3615_v50 = vld [vmem:[%s4045_s12 + $0x48] ss:$36 sps:$4 sm:$0xff]   ;;  %p3309_p11 = scmp.ne.s32.totalorder %s3912_s17, 7 }
  0x54   : > { %v3570_v54 = vld [vmem:[%s4043_s11 + $0x2ec] ss:$16 sps:$4 sm:$0xff]   ;;  %v3586_v5 = vld [vmem:[%s4043_s11 + $0x348] ss:$16 sps:$4 sm:$0xff]  }
  0x55   : > { %2231 = vmatpush1.bf16.msra.mxu0 %v3476_v55  ;;  %2496 = vmatpush1.bf16.msra.mxu1 %v3477_v56  ;;  %v3624_v55 = vld [vmem:[%s4045_s12 + $0xc] ss:$36 sps:$4 sm:$0xff]  }
  0x56   : > { %2232 = vmatprep.subr.bf16.mxu0 %v3478_v57  ;;  %2497 = vmatprep.subr.bf16.mxu1 %v3480_v58  ;;  %v3565_v56 = vld [vmem:[%s4043_s11 + $0x2e0] ss:$16 sps:$4 sm:$0xff]   ;;  %v3568_v57 = vld [vmem:[%s4043_s11 + $0x2e8] ss:$16 sps:$4 sm:$0xff]   ;;  %v3573_v58 = vld [vmem:[%s4043_s11 + $0x304] ss:$16 sps:$4 sm:$0xff]  }
  0x59   : > { %2233 = vmatpush1.bf16.msra.mxu0 %v3482_v59  ;;  %2498 = vmatpush1.bf16.msra.mxu1 %v3483_v60  ;;  %v3576_v59 = vld [vmem:[%s4043_s11 + $0x30c] ss:$16 sps:$4 sm:$0xff]   ;;  %v3571_v60 = vld [vmem:[%s4043_s11 + $0x300] ss:$16 sps:$4 sm:$0xff]  }
  0x5a   : > { %2234 = vmatprep.subr.bf16.mxu0 %v3484_v61  ;;  %2499 = vmatprep.subr.bf16.mxu1 %v3486_v62  ;;  %v3574_v61 = vld [vmem:[%s4043_s11 + $0x308] ss:$16 sps:$4 sm:$0xff]   ;;  %v3579_v62 = vld [vmem:[%s4043_s11 + $0x324] ss:$16 sps:$4 sm:$0xff]  }
  0x5d   : > { %2235 = vmatpush1.bf16.msra.mxu0 %v3488_v63  ;;  %2500 = vmatpush1.bf16.msra.mxu1 %v3489_v0  ;;  %v3582_v63 = vld [vmem:[%s4043_s11 + $0x32c] ss:$16 sps:$4 sm:$0xff]   ;;  %v3577_v0 = vld [vmem:[%s4043_s11 + $0x320] ss:$16 sps:$4 sm:$0xff]  }
  0x5e   : > { %2236 = vmatprep.subr.bf16.mxu0 %v3490_v1  ;;  %2501 = vmatprep.subr.bf16.mxu1 %v3492_v2  ;;  %v3580_v1 = vld [vmem:[%s4043_s11 + $0x328] ss:$16 sps:$4 sm:$0xff]   ;;  %v3585_v2 = vld [vmem:[%s4043_s11 + $0x344] ss:$16 sps:$4 sm:$0xff]  }
  0x61   : > { %2237 = vmatpush1.bf16.msra.mxu0 %v3494_v3  ;;  %2502 = vmatpush1.bf16.msra.mxu1 %v3495_v4  ;;  %v3588_v3 = vld [vmem:[%s4043_s11 + $0x34c] ss:$16 sps:$4 sm:$0xff]   ;;  %v3583_v4 = vld [vmem:[%s4043_s11 + $0x340] ss:$16 sps:$4 sm:$0xff]  }
  0x62   : > { %2238 = vmatprep.subr.bf16.mxu0 %v3496_v6  ;;  %2503 = vmatprep.subr.bf16.mxu1 %v3498_v7  ;;  %v3591_v6 = vld [vmem:[%s4043_s11 + $0x364] ss:$16 sps:$4 sm:$0xff]   ;;  %v3594_v7 = vld [vmem:[%s4043_s11 + $0x36c] ss:$16 sps:$4 sm:$0xff]  }
  0x65   : > { %2239 = vmatpush1.bf16.msra.mxu0 %v3500_v8  ;;  %2504 = vmatpush1.bf16.msra.mxu1 %v3501_v9  ;;  %v3589_v8 = vld [vmem:[%s4043_s11 + $0x360] ss:$16 sps:$4 sm:$0xff]   ;;  %v3592_v9 = vld [vmem:[%s4043_s11 + $0x368] ss:$16 sps:$4 sm:$0xff]  }
  0x66   : > { %2240 = vmatprep.subr.bf16.mxu0 %v3502_v10  ;;  %2505 = vmatprep.subr.bf16.mxu1 %v3504_v11  ;;  %v3597_v10 = vld [vmem:[%s4043_s11 + $0x384] ss:$16 sps:$4 sm:$0xff]   ;;  %v3600_v11 = vld [vmem:[%s4043_s11 + $0x38c] ss:$16 sps:$4 sm:$0xff]  }
  0x69   : > { %2241 = vmatpush1.bf16.msra.mxu0 %v3506_v12  ;;  %2506 = vmatpush1.bf16.msra.mxu1 %v3507_v13  ;;  %v3595_v12 = vld [vmem:[%s4043_s11 + $0x380] ss:$16 sps:$4 sm:$0xff]   ;;  %v3598_v13 = vld [vmem:[%s4043_s11 + $0x388] ss:$16 sps:$4 sm:$0xff]  }
  0x6a   : > { %2242 = vmatprep.subr.bf16.mxu0 %v3508_v14  ;;  %2507 = vmatprep.subr.bf16.mxu1 %v3510_v15  ;;  %v3603_v14 = vld [vmem:[%s4043_s11 + $0x3a4] ss:$16 sps:$4 sm:$0xff]   ;;  %v3606_v15 = vld [vmem:[%s4043_s11 + $0x3ac] ss:$16 sps:$4 sm:$0xff]  }
  0x6d   : > { %2243 = vmatpush1.bf16.msra.mxu0 %v3512_v16  ;;  %2508 = vmatpush1.bf16.msra.mxu1 %v3513_v17  ;;  %v3601_v16 = vld [vmem:[%s4043_s11 + $0x3a0] ss:$16 sps:$4 sm:$0xff]   ;;  %v3604_v17 = vld [vmem:[%s4043_s11 + $0x3a8] ss:$16 sps:$4 sm:$0xff]  }
  0x6e   : > { %2244 = vmatprep.subr.bf16.mxu0 %v3514_v18  ;;  %2509 = vmatprep.subr.bf16.mxu1 %v3516_v19  ;;  %v3611_v18 = vld [vmem:[%s4043_s11 + $0x3c4] ss:$16 sps:$4 sm:$0xff]   ;;  %v3614_v19 = vld [vmem:[%s4043_s11 + $0x3cc] ss:$16 sps:$4 sm:$0xff]  }
  0x71   : > { %2245 = vmatpush1.bf16.msra.mxu0 %v3518_v20  ;;  %2510 = vmatpush1.bf16.msra.mxu1 %v3519_v21  ;;  %v3609_v20 = vld [vmem:[%s4043_s11 + $0x3c0] ss:$16 sps:$4 sm:$0xff]   ;;  %v3612_v21 = vld [vmem:[%s4043_s11 + $0x3c8] ss:$16 sps:$4 sm:$0xff]  }
  0x72   : > { %2267 = vmatprep.subr.bf16.mxu0 %v3525_v22  ;;  %2532 = vmatprep.subr.bf16.mxu1 %v3528_v23  ;;  %v3618_v22 = vld [vmem:[%s4043_s11 + $0x3e4] ss:$16 sps:$4 sm:$0xff]   ;;  %v3621_v23 = vld [vmem:[%s4043_s11 + $0x3ec] ss:$16 sps:$4 sm:$0xff]  }
  0x74   : > { %2247 = vmatmul.mubr.bf16.vlgmr.msra.gmra.mrb[0].mxu0 %v3520_v24  ;;  %2512 = vmatmul.mubr.bf16.vlgmr.msra.gmra.mrb[0].mxu1 %v3520_v24  ;;  %v3616_v24 = vld [vmem:[%s4043_s11 + $0x3e0] ss:$16 sps:$4 sm:$0xff]  }
  0x75   : > { %2268 = vmatpush1.bf16.msra.mxu0 %v3523_v25  ;;  %2533 = vmatpush1.bf16.msra.mxu1 %v3526_v26  ;;  %v3619_v25 = vld [vmem:[%s4043_s11 + $0x3e8] ss:$16 sps:$4 sm:$0xff]   ;;  %v3627_v26 = vld [vmem:[%s4043_s11 + $0x404] ss:$16 sps:$4 sm:$0xff]  }
  0x76   : > { %2269 = vmatprep.subr.bf16.mxu0 %v3531_v27  ;;  %2534 = vmatprep.subr.bf16.mxu1 %v3534_v28  ;;  %v3630_v27 = vld [vmem:[%s4043_s11 + $0x40c] ss:$16 sps:$4 sm:$0xff]  }
  0x77   : > { %2256 = vmatprep.mubr.bf16.mxu0 %v3607_v45  ;;  %2521 = vmatprep.mubr.bf16.mxu1 %v3607_v45  ;;  %v3622_v28 = vld [vmem:[%s4045_s12 + $0x8] ss:$36 sps:$4 sm:$0xff]  }
  0x78   : > { %v3646_v45 = vld [vmem:[%s4043_s11 + $0x468] ss:$16 sps:$4 sm:$0xff]  }
  0x79   : > { %2270 = vmatpush1.bf16.msra.mxu0 %v3529_v29  ;;  %2535 = vmatpush1.bf16.msra.mxu1 %v3532_v30  ;;  %v3625_v29 = vld [vmem:[%s4043_s11 + $0x400] ss:$16 sps:$4 sm:$0xff]   ;;  %v3628_v30 = vld [vmem:[%s4043_s11 + $0x408] ss:$16 sps:$4 sm:$0xff]  }
  0x7a   : > { %2271 = vmatprep.subr.bf16.mxu0 %v3537_v31  ;;  %2536 = vmatprep.subr.bf16.mxu1 %v3540_v32  ;;  %v3633_v31 = vld [vmem:[%s4043_s11 + $0x424] ss:$16 sps:$4 sm:$0xff]   ;;  %v3636_v32 = vld [vmem:[%s4043_s11 + $0x42c] ss:$16 sps:$4 sm:$0xff]  }
  0x7c   : > { %2257 = vmatmul.mubr.bf16.gmra.mrb[4].mxu0 %v3615_v50  ;;  %2522 = vmatmul.mubr.bf16.gmra.mrb[4].mxu1 %v3615_v50  ;;  %v3657_v50 = vld [vmem:[%s4043_s11 + $0x4a4] ss:$16 sps:$4 sm:$0xff]  }
  0x7d   : > { %2272 = vmatpush1.bf16.msra.mxu0 %v3535_v33  ;;  %2537 = vmatpush1.bf16.msra.mxu1 %v3538_v34  ;;  %v3709_v33 = vld [vmem:[%s4045_s12 + $0x54] ss:$36 sps:$4 sm:$0xff]   ;;  %v3631_v34 = vld [vmem:[%s4043_s11 + $0x420] ss:$16 sps:$4 sm:$0xff]  }
  0x7e   : > { %2273 = vmatprep.subr.bf16.mxu0 %v3543_v35  ;;  %2538 = vmatprep.subr.bf16.mxu1 %v3546_v36  ;;  %v3634_v35 = vld [vmem:[%s4043_s11 + $0x428] ss:$16 sps:$4 sm:$0xff]   ;;  %v3639_v36 = vld [vmem:[%s4043_s11 + $0x444] ss:$16 sps:$4 sm:$0xff]  }
  0x7f   : > { %2299 = vmatprep.mubr.bf16.mxu0 %v3624_v55  ;;  %2564 = vmatprep.mubr.bf16.mxu1 %v3624_v55  ;;  %v3666_v55 = vld [vmem:[%s4043_s11 + $0x4cc] ss:$16 sps:$4 sm:$0xff]  }
  0x81   : > { %2274 = vmatpush1.bf16.msra.mxu0 %v3541_v37  ;;  %2539 = vmatpush1.bf16.msra.mxu1 %v3544_v38  ;;  %v3642_v37 = vld [vmem:[%s4043_s11 + $0x44c] ss:$16 sps:$4 sm:$0xff]   ;;  %v3637_v38 = vld [vmem:[%s4043_s11 + $0x440] ss:$16 sps:$4 sm:$0xff]  }
  0x82   : > { %2275 = vmatprep.subr.bf16.mxu0 %v3549_v39  ;;  %2540 = vmatprep.subr.bf16.mxu1 %v3552_v40  ;;  %v3640_v39 = vld [vmem:[%s4043_s11 + $0x448] ss:$16 sps:$4 sm:$0xff]   ;;  %v3717_v40 = vld [vmem:[%s4045_s12 + $0x50] ss:$36 sps:$4 sm:$0xff]  }
  0x85   : > { %2276 = vmatpush1.bf16.msra.mxu0 %v3547_v41  ;;  %2541 = vmatpush1.bf16.msra.mxu1 %v3550_v42  ;;  %v3645_v41 = vld [vmem:[%s4043_s11 + $0x464] ss:$16 sps:$4 sm:$0xff]   ;;  %v3648_v42 = vld [vmem:[%s4043_s11 + $0x46c] ss:$16 sps:$4 sm:$0xff]  }
  0x86   : > { %2277 = vmatprep.subr.bf16.mxu0 %v3555_v43  ;;  %2542 = vmatprep.subr.bf16.mxu1 %v3558_v44  ;;  %v3726_v43 = vld [vmem:[%s4045_s12 + $0x14] ss:$36 sps:$4 sm:$0xff]   ;;  %v3643_v44 = vld [vmem:[%s4043_s11 + $0x460] ss:$16 sps:$4 sm:$0xff]  }
  0x89   : > { %2278 = vmatpush1.bf16.msra.mxu0 %v3553_v46  ;;  %2543 = vmatpush1.bf16.msra.mxu1 %v3556_v47  ;;  %v3651_v46 = vld [vmem:[%s4043_s11 + $0x484] ss:$16 sps:$4 sm:$0xff]   ;;  %v3654_v47 = vld [vmem:[%s4043_s11 + $0x48c] ss:$16 sps:$4 sm:$0xff]  }
  0x8a   : > { %2279 = vmatprep.subr.bf16.mxu0 %v3561_v48  ;;  %2544 = vmatprep.subr.bf16.mxu1 %v3564_v49  ;;  %v3649_v48 = vld [vmem:[%s4043_s11 + $0x480] ss:$16 sps:$4 sm:$0xff]   ;;  %v3652_v49 = vld [vmem:[%s4043_s11 + $0x488] ss:$16 sps:$4 sm:$0xff]  }
  0x8d   : > { %2280 = vmatpush1.bf16.msra.mxu0 %v3559_v51  ;;  %2545 = vmatpush1.bf16.msra.mxu1 %v3562_v52  ;;  %v3660_v51 = vld [vmem:[%s4043_s11 + $0x4ac] ss:$16 sps:$4 sm:$0xff]   ;;  %v3655_v52 = vld [vmem:[%s4043_s11 + $0x4a0] ss:$16 sps:$4 sm:$0xff]  }
  0x8e   : > { %2281 = vmatprep.subr.bf16.mxu0 %v3567_v53  ;;  %2546 = vmatprep.subr.bf16.mxu1 %v3570_v54  ;;  %v3658_v53 = vld [vmem:[%s4043_s11 + $0x4a8] ss:$16 sps:$4 sm:$0xff]   ;;  %v3663_v54 = vld [vmem:[%s4043_s11 + $0x4c4] ss:$16 sps:$4 sm:$0xff]  }
  0x91   : > { %2282 = vmatpush1.bf16.msra.mxu0 %v3565_v56  ;;  %2547 = vmatpush1.bf16.msra.mxu1 %v3568_v57  ;;  %v3661_v56 = vld [vmem:[%s4043_s11 + $0x4c0] ss:$16 sps:$4 sm:$0xff]   ;;  %v3664_v57 = vld [vmem:[%s4043_s11 + $0x4c8] ss:$16 sps:$4 sm:$0xff]  }
  0x92   : > { %2283 = vmatprep.subr.bf16.mxu0 %v3573_v58  ;;  %2548 = vmatprep.subr.bf16.mxu1 %v3576_v59  ;;  %v3669_v58 = vld [vmem:[%s4043_s11 + $0x4e4] ss:$16 sps:$4 sm:$0xff]   ;;  %v3672_v59 = vld [vmem:[%s4043_s11 + $0x4ec] ss:$16 sps:$4 sm:$0xff]  }
  0x95   : > { %2284 = vmatpush1.bf16.msra.mxu0 %v3571_v60  ;;  %2549 = vmatpush1.bf16.msra.mxu1 %v3574_v61  ;;  %v3667_v60 = vld [vmem:[%s4043_s11 + $0x4e0] ss:$16 sps:$4 sm:$0xff]   ;;  %v3670_v61 = vld [vmem:[%s4043_s11 + $0x4e8] ss:$16 sps:$4 sm:$0xff]  }
  0x96   : > { %2285 = vmatprep.subr.bf16.mxu0 %v3579_v62  ;;  %2550 = vmatprep.subr.bf16.mxu1 %v3582_v63  ;;  %v3675_v62 = vld [vmem:[%s4043_s11 + $0x504] ss:$16 sps:$4 sm:$0xff]   ;;  %v3678_v63 = vld [vmem:[%s4043_s11 + $0x50c] ss:$16 sps:$4 sm:$0xff]  }
  0x99   : > { %2286 = vmatpush1.bf16.msra.mxu0 %v3577_v0  ;;  %2551 = vmatpush1.bf16.msra.mxu1 %v3580_v1  ;;  %v3673_v0 = vld [vmem:[%s4043_s11 + $0x500] ss:$16 sps:$4 sm:$0xff]   ;;  %v3676_v1 = vld [vmem:[%s4043_s11 + $0x508] ss:$16 sps:$4 sm:$0xff]  }
  0x9a   : > { %2287 = vmatprep.subr.bf16.mxu0 %v3585_v2  ;;  %2552 = vmatprep.subr.bf16.mxu1 %v3588_v3  ;;  %v3681_v2 = vld [vmem:[%s4043_s11 + $0x524] ss:$16 sps:$4 sm:$0xff]   ;;  %v3684_v3 = vld [vmem:[%s4043_s11 + $0x52c] ss:$16 sps:$4 sm:$0xff]  }
  0x9d   : > { %2288 = vmatpush1.bf16.msra.mxu0 %v3583_v4  ;;  %2553 = vmatpush1.bf16.msra.mxu1 %v3586_v5  ;;  %v3679_v4 = vld [vmem:[%s4043_s11 + $0x520] ss:$16 sps:$4 sm:$0xff]   ;;  %v3682_v5 = vld [vmem:[%s4043_s11 + $0x528] ss:$16 sps:$4 sm:$0xff]  }
  0x9e   : > { %2289 = vmatprep.subr.bf16.mxu0 %v3591_v6  ;;  %2554 = vmatprep.subr.bf16.mxu1 %v3594_v7  ;;  %v3687_v6 = vld [vmem:[%s4043_s11 + $0x544] ss:$16 sps:$4 sm:$0xff]   ;;  %v3690_v7 = vld [vmem:[%s4043_s11 + $0x54c] ss:$16 sps:$4 sm:$0xff]  }
  0xa1   : > { %2290 = vmatpush1.bf16.msra.mxu0 %v3589_v8  ;;  %2555 = vmatpush1.bf16.msra.mxu1 %v3592_v9  ;;  %v3685_v8 = vld [vmem:[%s4043_s11 + $0x540] ss:$16 sps:$4 sm:$0xff]   ;;  %v3688_v9 = vld [vmem:[%s4043_s11 + $0x548] ss:$16 sps:$4 sm:$0xff]  }
  0xa2   : > { %2291 = vmatprep.subr.bf16.mxu0 %v3597_v10  ;;  %2556 = vmatprep.subr.bf16.mxu1 %v3600_v11  ;;  %v3693_v10 = vld [vmem:[%s4043_s11 + $0x564] ss:$16 sps:$4 sm:$0xff]   ;;  %v3696_v11 = vld [vmem:[%s4043_s11 + $0x56c] ss:$16 sps:$4 sm:$0xff]  }
  0xa5   : > { %2292 = vmatpush1.bf16.msra.mxu0 %v3595_v12  ;;  %2557 = vmatpush1.bf16.msra.mxu1 %v3598_v13  ;;  %v3691_v12 = vld [vmem:[%s4043_s11 + $0x560] ss:$16 sps:$4 sm:$0xff]   ;;  %v3694_v13 = vld [vmem:[%s4043_s11 + $0x568] ss:$16 sps:$4 sm:$0xff]  }
  0xa6   : > { %2293 = vmatprep.subr.bf16.mxu0 %v3603_v14  ;;  %2558 = vmatprep.subr.bf16.mxu1 %v3606_v15  ;;  %v3699_v14 = vld [vmem:[%s4043_s11 + $0x584] ss:$16 sps:$4 sm:$0xff]   ;;  %v3702_v15 = vld [vmem:[%s4043_s11 + $0x58c] ss:$16 sps:$4 sm:$0xff]  }
  0xa9   : > { %2294 = vmatpush1.bf16.msra.mxu0 %v3601_v16  ;;  %2559 = vmatpush1.bf16.msra.mxu1 %v3604_v17  ;;  %v3697_v16 = vld [vmem:[%s4043_s11 + $0x580] ss:$16 sps:$4 sm:$0xff]   ;;  %v3700_v17 = vld [vmem:[%s4043_s11 + $0x588] ss:$16 sps:$4 sm:$0xff]  }
  0xaa   : > { %2295 = vmatprep.subr.bf16.mxu0 %v3611_v18  ;;  %2560 = vmatprep.subr.bf16.mxu1 %v3614_v19  ;;  %v3705_v18 = vld [vmem:[%s4043_s11 + $0x5a4] ss:$16 sps:$4 sm:$0xff]   ;;  %v3708_v19 = vld [vmem:[%s4043_s11 + $0x5ac] ss:$16 sps:$4 sm:$0xff]  }
  0xad   : > { %2296 = vmatpush1.bf16.msra.mxu0 %v3609_v20  ;;  %2561 = vmatpush1.bf16.msra.mxu1 %v3612_v21  ;;  %v3703_v20 = vld [vmem:[%s4043_s11 + $0x5a0] ss:$16 sps:$4 sm:$0xff]   ;;  %v3706_v21 = vld [vmem:[%s4043_s11 + $0x5a8] ss:$16 sps:$4 sm:$0xff]  }
  0xae   : > { %2297 = vmatprep.subr.bf16.mxu0 %v3618_v22  ;;  %2562 = vmatprep.subr.bf16.mxu1 %v3621_v23  ;;  %v3713_v22 = vld [vmem:[%s4043_s11 + $0x5c4] ss:$16 sps:$4 sm:$0xff]   ;;  %v3716_v23 = vld [vmem:[%s4043_s11 + $0x5cc] ss:$16 sps:$4 sm:$0xff]  }
  0xb1   : > { %2298 = vmatpush1.bf16.msra.mxu0 %v3616_v24  ;;  %2563 = vmatpush1.bf16.msra.mxu1 %v3619_v25  ;;  %v3711_v24 = vld [vmem:[%s4043_s11 + $0x5c0] ss:$16 sps:$4 sm:$0xff]   ;;  %v3714_v25 = vld [vmem:[%s4043_s11 + $0x5c8] ss:$16 sps:$4 sm:$0xff]  }
  0xb2   : > { %2320 = vmatprep.subr.bf16.mxu0 %v3627_v26  ;;  %2585 = vmatprep.subr.bf16.mxu1 %v3630_v27  ;;  %v3720_v26 = vld [vmem:[%s4043_s11 + $0x5e4] ss:$16 sps:$4 sm:$0xff]   ;;  %v3723_v27 = vld [vmem:[%s4043_s11 + $0x5ec] ss:$16 sps:$4 sm:$0xff]  }
  0xb4   : > { %2300 = vmatmul.mubr.bf16.vlgmr.msra.gmra.mrb[0].mxu0 %v3622_v28  ;;  %2565 = vmatmul.mubr.bf16.vlgmr.msra.gmra.mrb[0].mxu1 %v3622_v28  ;;  %v3718_v28 = vld [vmem:[%s4043_s11 + $0x5e0] ss:$16 sps:$4 sm:$0xff]  }
  0xb5   : > { %2321 = vmatpush1.bf16.msra.mxu0 %v3625_v29  ;;  %2586 = vmatpush1.bf16.msra.mxu1 %v3628_v30  ;;  %v3721_v29 = vld [vmem:[%s4043_s11 + $0x5e8] ss:$16 sps:$4 sm:$0xff]   ;;  %v3729_v30 = vld [vmem:[%s4043_s11 + $0x604] ss:$16 sps:$4 sm:$0xff]  }
  0xb6   : > { %2322 = vmatprep.subr.bf16.mxu0 %v3633_v31  ;;  %2587 = vmatprep.subr.bf16.mxu1 %v3636_v32  ;;  %v3732_v31 = vld [vmem:[%s4043_s11 + $0x60c] ss:$16 sps:$4 sm:$0xff]   ;;  %v3724_v32 = vld [vmem:[%s4045_s12 + $0x10] ss:$36 sps:$4 sm:$0xff]  }
  0xb7   : > { %2309 = vmatprep.mubr.bf16.mxu0 %v3709_v33  ;;  %2574 = vmatprep.mubr.bf16.mxu1 %v3709_v33  ;;  %v3727_v33 = vld [vmem:[%s4043_s11 + $0x600] ss:$16 sps:$4 sm:$0xff]  }
  0xb9   : > { %2323 = vmatpush1.bf16.msra.mxu0 %v3631_v34  ;;  %2588 = vmatpush1.bf16.msra.mxu1 %v3634_v35  ;;  %v3730_v34 = vld [vmem:[%s4043_s11 + $0x608] ss:$16 sps:$4 sm:$0xff]   ;;  %v3735_v35 = vld [vmem:[%s4043_s11 + $0x624] ss:$16 sps:$4 sm:$0xff]  }
  0xba   : > { %2324 = vmatprep.subr.bf16.mxu0 %v3639_v36  ;;  %2589 = vmatprep.subr.bf16.mxu1 %v3642_v37  ;;  %v3738_v36 = vld [vmem:[%s4043_s11 + $0x62c] ss:$16 sps:$4 sm:$0xff]  }
  0xbb   : > { %v3811_v37 = vld [vmem:[%s4045_s12 + $0x5c] ss:$36 sps:$4 sm:$0xff]  }
  0xbc   : > { %2310 = vmatmul.mubr.bf16.gmra.mrb[4].mxu0 %v3717_v40  ;;  %2575 = vmatmul.mubr.bf16.gmra.mrb[4].mxu1 %v3717_v40  ;;  %v3741_v40 = vld [vmem:[%s4043_s11 + $0x644] ss:$16 sps:$4 sm:$0xff]  }
  0xbd   : > { %2325 = vmatpush1.bf16.msra.mxu0 %v3637_v38  ;;  %2590 = vmatpush1.bf16.msra.mxu1 %v3640_v39  ;;  %v3733_v38 = vld [vmem:[%s4043_s11 + $0x620] ss:$16 sps:$4 sm:$0xff]   ;;  %v3736_v39 = vld [vmem:[%s4043_s11 + $0x628] ss:$16 sps:$4 sm:$0xff]  }
  0xbe   : > { %2326 = vmatprep.subr.bf16.mxu0 %v3645_v41  ;;  %2591 = vmatprep.subr.bf16.mxu1 %v3648_v42  ;;  %v3744_v41 = vld [vmem:[%s4043_s11 + $0x64c] ss:$16 sps:$4 sm:$0xff]   ;;  %v3739_v42 = vld [vmem:[%s4043_s11 + $0x640] ss:$16 sps:$4 sm:$0xff]  }
  0xbf   : > { %2352 = vmatprep.mubr.bf16.mxu0 %v3726_v43  ;;  %2617 = vmatprep.mubr.bf16.mxu1 %v3726_v43  ;;  %v3742_v43 = vld [vmem:[%s4043_s11 + $0x648] ss:$16 sps:$4 sm:$0xff]  }
  0xc1   : > { %2327 = vmatpush1.bf16.msra.mxu0 %v3643_v44  ;;  %2592 = vmatpush1.bf16.msra.mxu1 %v3646_v45  ;;  %v3819_v44 = vld [vmem:[%s4045_s12 + $0x58] ss:$36 sps:$4 sm:$0xff]   ;;  %v3747_v45 = vld [vmem:[%s4043_s11 + $0x664] ss:$16 sps:$4 sm:$0xff]  }
  0xc2   : > { %2328 = vmatprep.subr.bf16.mxu0 %v3651_v46  ;;  %2593 = vmatprep.subr.bf16.mxu1 %v3654_v47  ;;  %v3750_v46 = vld [vmem:[%s4043_s11 + $0x66c] ss:$16 sps:$4 sm:$0xff]  }
  0xc3   : > { %v3828_v47 = vld [vmem:[%s4045_s12 + $0x1c] ss:$36 sps:$4 sm:$0xff]  }
  0xc5   : > { %2329 = vmatpush1.bf16.msra.mxu0 %v3649_v48  ;;  %2594 = vmatpush1.bf16.msra.mxu1 %v3652_v49  ;;  %v3745_v48 = vld [vmem:[%s4043_s11 + $0x660] ss:$16 sps:$4 sm:$0xff]   ;;  %v3748_v49 = vld [vmem:[%s4043_s11 + $0x668] ss:$16 sps:$4 sm:$0xff]  }
  0xc6   : > { %2330 = vmatprep.subr.bf16.mxu0 %v3657_v50  ;;  %2595 = vmatprep.subr.bf16.mxu1 %v3660_v51  ;;  %v3753_v50 = vld [vmem:[%s4043_s11 + $0x684] ss:$16 sps:$4 sm:$0xff]   ;;  %v3756_v51 = vld [vmem:[%s4043_s11 + $0x68c] ss:$16 sps:$4 sm:$0xff]  }
  0xc9   : > { %2331 = vmatpush1.bf16.msra.mxu0 %v3655_v52  ;;  %2596 = vmatpush1.bf16.msra.mxu1 %v3658_v53  ;;  %v3751_v52 = vld [vmem:[%s4043_s11 + $0x680] ss:$16 sps:$4 sm:$0xff]   ;;  %v3754_v53 = vld [vmem:[%s4043_s11 + $0x688] ss:$16 sps:$4 sm:$0xff]  }
  0xca   : > { %2332 = vmatprep.subr.bf16.mxu0 %v3663_v54  ;;  %2597 = vmatprep.subr.bf16.mxu1 %v3666_v55  ;;  %v3759_v54 = vld [vmem:[%s4043_s11 + $0x6a4] ss:$16 sps:$4 sm:$0xff]   ;;  %v3762_v55 = vld [vmem:[%s4043_s11 + $0x6ac] ss:$16 sps:$4 sm:$0xff]  }
  0xcd   : > { %2333 = vmatpush1.bf16.msra.mxu0 %v3661_v56  ;;  %2598 = vmatpush1.bf16.msra.mxu1 %v3664_v57  ;;  %v3757_v56 = vld [vmem:[%s4043_s11 + $0x6a0] ss:$16 sps:$4 sm:$0xff]   ;;  %v3760_v57 = vld [vmem:[%s4043_s11 + $0x6a8] ss:$16 sps:$4 sm:$0xff]  }
  0xce   : > { %2334 = vmatprep.subr.bf16.mxu0 %v3669_v58  ;;  %2599 = vmatprep.subr.bf16.mxu1 %v3672_v59  ;;  %v3765_v58 = vld [vmem:[%s4043_s11 + $0x6c4] ss:$16 sps:$4 sm:$0xff]   ;;  %v3768_v59 = vld [vmem:[%s4043_s11 + $0x6cc] ss:$16 sps:$4 sm:$0xff]  }
  0xd1   : > { %2335 = vmatpush1.bf16.msra.mxu0 %v3667_v60  ;;  %2600 = vmatpush1.bf16.msra.mxu1 %v3670_v61  ;;  %v3763_v60 = vld [vmem:[%s4043_s11 + $0x6c0] ss:$16 sps:$4 sm:$0xff]   ;;  %v3766_v61 = vld [vmem:[%s4043_s11 + $0x6c8] ss:$16 sps:$4 sm:$0xff]  }
  0xd2   : > { %2336 = vmatprep.subr.bf16.mxu0 %v3675_v62  ;;  %2601 = vmatprep.subr.bf16.mxu1 %v3678_v63  ;;  %v3771_v62 = vld [vmem:[%s4043_s11 + $0x6e4] ss:$16 sps:$4 sm:$0xff]   ;;  %v3774_v63 = vld [vmem:[%s4043_s11 + $0x6ec] ss:$16 sps:$4 sm:$0xff]  }
  0xd5   : > { %2337 = vmatpush1.bf16.msra.mxu0 %v3673_v0  ;;  %2602 = vmatpush1.bf16.msra.mxu1 %v3676_v1  ;;  %v3769_v0 = vld [vmem:[%s4043_s11 + $0x6e0] ss:$16 sps:$4 sm:$0xff]   ;;  %v3772_v1 = vld [vmem:[%s4043_s11 + $0x6e8] ss:$16 sps:$4 sm:$0xff]  }
  0xd6   : > { %2338 = vmatprep.subr.bf16.mxu0 %v3681_v2  ;;  %2603 = vmatprep.subr.bf16.mxu1 %v3684_v3  ;;  %v3777_v2 = vld [vmem:[%s4043_s11 + $0x704] ss:$16 sps:$4 sm:$0xff]   ;;  %v3780_v3 = vld [vmem:[%s4043_s11 + $0x70c] ss:$16 sps:$4 sm:$0xff]  }
  0xd9   : > { %2339 = vmatpush1.bf16.msra.mxu0 %v3679_v4  ;;  %2604 = vmatpush1.bf16.msra.mxu1 %v3682_v5  ;;  %v3775_v4 = vld [vmem:[%s4043_s11 + $0x700] ss:$16 sps:$4 sm:$0xff]   ;;  %v3778_v5 = vld [vmem:[%s4043_s11 + $0x708] ss:$16 sps:$4 sm:$0xff]  }
  0xda   : > { %2340 = vmatprep.subr.bf16.mxu0 %v3687_v6  ;;  %2605 = vmatprep.subr.bf16.mxu1 %v3690_v7  ;;  %v3783_v6 = vld [vmem:[%s4043_s11 + $0x724] ss:$16 sps:$4 sm:$0xff]   ;;  %v3786_v7 = vld [vmem:[%s4043_s11 + $0x72c] ss:$16 sps:$4 sm:$0xff]  }
  0xdd   : > { %2341 = vmatpush1.bf16.msra.mxu0 %v3685_v8  ;;  %2606 = vmatpush1.bf16.msra.mxu1 %v3688_v9  ;;  %v3781_v8 = vld [vmem:[%s4043_s11 + $0x720] ss:$16 sps:$4 sm:$0xff]   ;;  %v3784_v9 = vld [vmem:[%s4043_s11 + $0x728] ss:$16 sps:$4 sm:$0xff]  }
  0xde   : > { %2342 = vmatprep.subr.bf16.mxu0 %v3693_v10  ;;  %2607 = vmatprep.subr.bf16.mxu1 %v3696_v11  ;;  %v3789_v10 = vld [vmem:[%s4043_s11 + $0x744] ss:$16 sps:$4 sm:$0xff]   ;;  %v3792_v11 = vld [vmem:[%s4043_s11 + $0x74c] ss:$16 sps:$4 sm:$0xff]  }
  0xe1   : > { %2343 = vmatpush1.bf16.msra.mxu0 %v3691_v12  ;;  %2608 = vmatpush1.bf16.msra.mxu1 %v3694_v13  ;;  %v3787_v12 = vld [vmem:[%s4043_s11 + $0x740] ss:$16 sps:$4 sm:$0xff]   ;;  %v3790_v13 = vld [vmem:[%s4043_s11 + $0x748] ss:$16 sps:$4 sm:$0xff]  }
  0xe2   : > { %2344 = vmatprep.subr.bf16.mxu0 %v3699_v14  ;;  %2609 = vmatprep.subr.bf16.mxu1 %v3702_v15  ;;  %v3795_v14 = vld [vmem:[%s4043_s11 + $0x764] ss:$16 sps:$4 sm:$0xff]   ;;  %v3798_v15 = vld [vmem:[%s4043_s11 + $0x76c] ss:$16 sps:$4 sm:$0xff]  }
  0xe5   : > { %2345 = vmatpush1.bf16.msra.mxu0 %v3697_v16  ;;  %2610 = vmatpush1.bf16.msra.mxu1 %v3700_v17  ;;  %v3793_v16 = vld [vmem:[%s4043_s11 + $0x760] ss:$16 sps:$4 sm:$0xff]   ;;  %v3796_v17 = vld [vmem:[%s4043_s11 + $0x768] ss:$16 sps:$4 sm:$0xff]  }
  0xe6   : > { %2346 = vmatprep.subr.bf16.mxu0 %v3705_v18  ;;  %2611 = vmatprep.subr.bf16.mxu1 %v3708_v19  ;;  %v3801_v18 = vld [vmem:[%s4043_s11 + $0x784] ss:$16 sps:$4 sm:$0xff]   ;;  %v3804_v19 = vld [vmem:[%s4043_s11 + $0x78c] ss:$16 sps:$4 sm:$0xff]  }
  0xe9   : > { %2347 = vmatpush1.bf16.msra.mxu0 %v3703_v20  ;;  %2612 = vmatpush1.bf16.msra.mxu1 %v3706_v21  ;;  %v3799_v20 = vld [vmem:[%s4043_s11 + $0x780] ss:$16 sps:$4 sm:$0xff]   ;;  %v3802_v21 = vld [vmem:[%s4043_s11 + $0x788] ss:$16 sps:$4 sm:$0xff]  }
  0xea   : > { %2348 = vmatprep.subr.bf16.mxu0 %v3713_v22  ;;  %2613 = vmatprep.subr.bf16.mxu1 %v3716_v23  ;;  %v3807_v22 = vld [vmem:[%s4043_s11 + $0x7a4] ss:$16 sps:$4 sm:$0xff]   ;;  %v3810_v23 = vld [vmem:[%s4043_s11 + $0x7ac] ss:$16 sps:$4 sm:$0xff]  }
  0xed   : > { %2349 = vmatpush1.bf16.msra.mxu0 %v3711_v24  ;;  %2614 = vmatpush1.bf16.msra.mxu1 %v3714_v25  ;;  %v3805_v24 = vld [vmem:[%s4043_s11 + $0x7a0] ss:$16 sps:$4 sm:$0xff]   ;;  %v3808_v25 = vld [vmem:[%s4043_s11 + $0x7a8] ss:$16 sps:$4 sm:$0xff]  }
  0xee   : > { %2350 = vmatprep.subr.bf16.mxu0 %v3720_v26  ;;  %2615 = vmatprep.subr.bf16.mxu1 %v3723_v27  ;;  %v3815_v26 = vld [vmem:[%s4043_s11 + $0x7c4] ss:$16 sps:$4 sm:$0xff]   ;;  %v3818_v27 = vld [vmem:[%s4043_s11 + $0x7cc] ss:$16 sps:$4 sm:$0xff]  }
  0xf1   : > { %2351 = vmatpush1.bf16.msra.mxu0 %v3718_v28  ;;  %2616 = vmatpush1.bf16.msra.mxu1 %v3721_v29  ;;  %v3813_v28 = vld [vmem:[%s4043_s11 + $0x7c0] ss:$16 sps:$4 sm:$0xff]   ;;  %v3816_v29 = vld [vmem:[%s4043_s11 + $0x7c8] ss:$16 sps:$4 sm:$0xff]  }
  0xf2   : > { %2373 = vmatprep.subr.bf16.mxu0 %v3729_v30  ;;  %2638 = vmatprep.subr.bf16.mxu1 %v3732_v31  ;;  %v3822_v30 = vld [vmem:[%s4043_s11 + $0x7e4] ss:$16 sps:$4 sm:$0xff]   ;;  %v3825_v31 = vld [vmem:[%s4043_s11 + $0x7ec] ss:$16 sps:$4 sm:$0xff]  }
  0xf4   : > { %2353 = vmatmul.mubr.bf16.vlgmr.msra.gmra.mrb[0].mxu0 %v3724_v32  ;;  %2618 = vmatmul.mubr.bf16.vlgmr.msra.gmra.mrb[0].mxu1 %v3724_v32  ;;  %v3820_v32 = vld [vmem:[%s4043_s11 + $0x7e0] ss:$16 sps:$4 sm:$0xff]  }
  0xf5   : > { %2374 = vmatpush1.bf16.msra.mxu0 %v3727_v33  ;;  %2639 = vmatpush1.bf16.msra.mxu1 %v3730_v34  ;;  %v3823_v33 = vld [vmem:[%s4043_s11 + $0x7e8] ss:$16 sps:$4 sm:$0xff]   ;;  %v3831_v34 = vld [vmem:[%s4043_s11 + $0x804] ss:$16 sps:$4 sm:$0xff]  }
  0xf6   : > { %2375 = vmatprep.subr.bf16.mxu0 %v3735_v35  ;;  %2640 = vmatprep.subr.bf16.mxu1 %v3738_v36  ;;  %v3834_v35 = vld [vmem:[%s4043_s11 + $0x80c] ss:$16 sps:$4 sm:$0xff]  }
  0xf7   : > { %2362 = vmatprep.mubr.bf16.mxu0 %v3811_v37  ;;  %2627 = vmatprep.mubr.bf16.mxu1 %v3811_v37  ;;  %v3826_v36 = vld [vmem:[%s4045_s12 + $0x18] ss:$36 sps:$4 sm:$0xff]   ;;  %v3829_v37 = vld [vmem:[%s4043_s11 + $0x800] ss:$16 sps:$4 sm:$0xff]  }
  0xf9   : > { %2376 = vmatpush1.bf16.msra.mxu0 %v3733_v38  ;;  %2641 = vmatpush1.bf16.msra.mxu1 %v3736_v39  ;;  %v3832_v38 = vld [vmem:[%s4043_s11 + $0x808] ss:$16 sps:$4 sm:$0xff]   ;;  %v3837_v39 = vld [vmem:[%s4043_s11 + $0x824] ss:$16 sps:$4 sm:$0xff]  }
  0xfa   : > { %2377 = vmatprep.subr.bf16.mxu0 %v3741_v40  ;;  %2642 = vmatprep.subr.bf16.mxu1 %v3744_v41  ;;  %v3840_v40 = vld [vmem:[%s4043_s11 + $0x82c] ss:$16 sps:$4 sm:$0xff]   ;;  %v3865_v41 = vld [vmem:[%s4045_s12 + $0x64] ss:$36 sps:$4 sm:$0xff]  }
  0xfc   : > { %2363 = vmatmul.mubr.bf16.gmra.mrb[4].mxu0 %v3819_v44  ;;  %2628 = vmatmul.mubr.bf16.gmra.mrb[4].mxu1 %v3819_v44  ;;  %v3843_v44 = vld [vmem:[%s4043_s11 + $0x844] ss:$16 sps:$4 sm:$0xff]  }
  0xfd   : > { %2378 = vmatpush1.bf16.msra.mxu0 %v3739_v42  ;;  %2643 = vmatpush1.bf16.msra.mxu1 %v3742_v43  ;;  %v3835_v42 = vld [vmem:[%s4043_s11 + $0x820] ss:$16 sps:$4 sm:$0xff]   ;;  %v3838_v43 = vld [vmem:[%s4043_s11 + $0x828] ss:$16 sps:$4 sm:$0xff]  }
  0xfe   : > { %2379 = vmatprep.subr.bf16.mxu0 %v3747_v45  ;;  %2644 = vmatprep.subr.bf16.mxu1 %v3750_v46  ;;  %v3846_v45 = vld [vmem:[%s4043_s11 + $0x84c] ss:$16 sps:$4 sm:$0xff]   ;;  %v3867_v46 = vld [vmem:[%s4045_s12 + $0x60] ss:$36 sps:$4 sm:$0xff]  }
  0xff   : > { %2405 = vmatprep.mubr.bf16.mxu0 %v3828_v47  ;;  %2670 = vmatprep.mubr.bf16.mxu1 %v3828_v47  ;;  %v3841_v47 = vld [vmem:[%s4043_s11 + $0x840] ss:$16 sps:$4 sm:$0xff]  }
 0x101   : > { %2380 = vmatpush1.bf16.msra.mxu0 %v3745_v48  ;;  %2645 = vmatpush1.bf16.msra.mxu1 %v3748_v49  ;;  %v3844_v48 = vld [vmem:[%s4043_s11 + $0x848] ss:$16 sps:$4 sm:$0xff]   ;;  %v3849_v49 = vld [vmem:[%s4043_s11 + $0x864] ss:$16 sps:$4 sm:$0xff]  }
 0x102   : > { %2381 = vmatprep.subr.bf16.mxu0 %v3753_v50  ;;  %2646 = vmatprep.subr.bf16.mxu1 %v3756_v51  ;;  %v3852_v50 = vld [vmem:[%s4043_s11 + $0x86c] ss:$16 sps:$4 sm:$0xff]   ;;  %v3847_v51 = vld [vmem:[%s4043_s11 + $0x860] ss:$16 sps:$4 sm:$0xff]  }
 0x105   : > { %2382 = vmatpush1.bf16.msra.mxu0 %v3751_v52  ;;  %2647 = vmatpush1.bf16.msra.mxu1 %v3754_v53  ;;  %v3850_v52 = vld [vmem:[%s4043_s11 + $0x868] ss:$16 sps:$4 sm:$0xff]   ;;  %v3855_v53 = vld [vmem:[%s4043_s11 + $0x884] ss:$16 sps:$4 sm:$0xff]  }
 0x106   : > { %2383 = vmatprep.subr.bf16.mxu0 %v3759_v54  ;;  %2648 = vmatprep.subr.bf16.mxu1 %v3762_v55  ;;  %v3858_v54 = vld [vmem:[%s4043_s11 + $0x88c] ss:$16 sps:$4 sm:$0xff]   ;;  %v3923_v55 = vmov 0  }
 0x109   : > { %2384 = vmatpush1.bf16.msra.mxu0 %v3757_v56  ;;  %2649 = vmatpush1.bf16.msra.mxu1 %v3760_v57  ;;  %v3853_v56 = vld [vmem:[%s4043_s11 + $0x880] ss:$16 sps:$4 sm:$0xff]   ;;  %v3856_v57 = vld [vmem:[%s4043_s11 + $0x888] ss:$16 sps:$4 sm:$0xff]  }
 0x10a   : > { %2385 = vmatprep.subr.bf16.mxu0 %v3765_v58  ;;  %2650 = vmatprep.subr.bf16.mxu1 %v3768_v59  ;;  %v3861_v58 = vld [vmem:[%s4043_s11 + $0x8a4] ss:$16 sps:$4 sm:$0xff]   ;;  %v3864_v59 = vld [vmem:[%s4043_s11 + $0x8ac] ss:$16 sps:$4 sm:$0xff]  }
 0x10d   : > { %2386 = vmatpush1.bf16.msra.mxu0 %v3763_v60  ;;  %2651 = vmatpush1.bf16.msra.mxu1 %v3766_v61  ;;  %v3859_v60 = vld [vmem:[%s4043_s11 + $0x8a0] ss:$16 sps:$4 sm:$0xff]   ;;  %v3862_v61 = vld [vmem:[%s4043_s11 + $0x8a8] ss:$16 sps:$4 sm:$0xff]  }
 0x10e   : > { %2387 = vmatprep.subr.bf16.mxu0 %v3771_v62  ;;  %2652 = vmatprep.subr.bf16.mxu1 %v3774_v63  ;;  %v3870_v62 = vld [vmem:[%s4043_s11 + $0x8c4] ss:$16 sps:$4 sm:$0xff]   ;;  %v3873_v63 = vld [vmem:[%s4043_s11 + $0x8cc] ss:$16 sps:$4 sm:$0xff]  }
 0x111   : > { %2388 = vmatpush1.bf16.msra.mxu0 %v3769_v0  ;;  %2653 = vmatpush1.bf16.msra.mxu1 %v3772_v1  ;;  %v3868_v0 = vld [vmem:[%s4043_s11 + $0x8c0] ss:$16 sps:$4 sm:$0xff]   ;;  %v3871_v1 = vld [vmem:[%s4043_s11 + $0x8c8] ss:$16 sps:$4 sm:$0xff]  }
 0x112   : > { %2389 = vmatprep.subr.bf16.mxu0 %v3777_v2  ;;  %2654 = vmatprep.subr.bf16.mxu1 %v3780_v3  ;;  %v3876_v2 = vld [vmem:[%s4043_s11 + $0x8e4] ss:$16 sps:$4 sm:$0xff]   ;;  %v3879_v3 = vld [vmem:[%s4043_s11 + $0x8ec] ss:$16 sps:$4 sm:$0xff]  }
 0x115   : > { %2390 = vmatpush1.bf16.msra.mxu0 %v3775_v4  ;;  %2655 = vmatpush1.bf16.msra.mxu1 %v3778_v5  ;;  %v3874_v4 = vld [vmem:[%s4043_s11 + $0x8e0] ss:$16 sps:$4 sm:$0xff]   ;;  %v3877_v5 = vld [vmem:[%s4043_s11 + $0x8e8] ss:$16 sps:$4 sm:$0xff]  }
 0x116   : > { %2391 = vmatprep.subr.bf16.mxu0 %v3783_v6  ;;  %2656 = vmatprep.subr.bf16.mxu1 %v3786_v7  ;;  %v3880_v6 = vld [vmem:[%s4045_s12 + $0x20] ss:$36 sps:$4 sm:$0xff]   ;;  %v3881_v7 = vld [vmem:[%s4045_s12 + $0x68] ss:$36 sps:$4 sm:$0xff]  }
 0x119   : > { %2392 = vmatpush1.bf16.msra.mxu0 %v3781_v8  ;;  %2657 = vmatpush1.bf16.msra.mxu1 %v3784_v9  ;;  %v358_v8 = vld [vmem:[%s4665_s4] sm:$0xff]  ;;  %v360_v9 = vld [vmem:[%s4665_s4 + $0x10] sm:$0xff] }
 0x11a   : > { %2393 = vmatprep.subr.bf16.mxu0 %v3789_v10  ;;  %2658 = vmatprep.subr.bf16.mxu1 %v3792_v11  ;;  %v359_v10 = vld [vmem:[%s4665_s4 + $0x8] sm:$0xff]  ;;  %v361_v11 = vld [vmem:[%s4665_s4 + $0x18] sm:$0xff] }
 0x11d   : > { %2394 = vmatpush1.bf16.msra.mxu0 %v3787_v12  ;;  %2659 = vmatpush1.bf16.msra.mxu1 %v3790_v13 }
 0x11e   : > { %2395 = vmatprep.subr.bf16.mxu0 %v3795_v14  ;;  %2660 = vmatprep.subr.bf16.mxu1 %v3798_v15  ;;  %v362_v14 = vld [vmem:[%s4665_s4 + $0x20] sm:$0xff]  ;;  %v364_v15 = vld [vmem:[%s4665_s4 + $0x30] sm:$0xff] }
 0x121   : > { %2396 = vmatpush1.bf16.msra.mxu0 %v3793_v16  ;;  %2661 = vmatpush1.bf16.msra.mxu1 %v3796_v17 }
 0x122   : > { %2397 = vmatprep.subr.bf16.mxu0 %v3801_v18  ;;  %2662 = vmatprep.subr.bf16.mxu1 %v3804_v19 }
 0x125   : > { %2398 = vmatpush1.bf16.msra.mxu0 %v3799_v20  ;;  %2663 = vmatpush1.bf16.msra.mxu1 %v3802_v21  ;;  %v363_v20 = vld [vmem:[%s4665_s4 + $0x28] sm:$0xff]  ;;  %v365_v21 = vld [vmem:[%s4665_s4 + $0x38] sm:$0xff] }
 0x126   : > { %2399 = vmatprep.subr.bf16.mxu0 %v3807_v22  ;;  %2664 = vmatprep.subr.bf16.mxu1 %v3810_v23 }
 0x129   : > { %2400 = vmatpush1.bf16.msra.mxu0 %v3805_v24  ;;  %2665 = vmatpush1.bf16.msra.mxu1 %v3808_v25 }
 0x12a   : > { %2401 = vmatprep.subr.bf16.mxu0 %v3815_v26  ;;  %2666 = vmatprep.subr.bf16.mxu1 %v3818_v27 }
 0x12d   : > { %2402 = vmatpush1.bf16.msra.mxu0 %v3813_v28  ;;  %2667 = vmatpush1.bf16.msra.mxu1 %v3816_v29 }
 0x12e   : > { %2403 = vmatprep.subr.bf16.mxu0 %v3822_v30  ;;  %2668 = vmatprep.subr.bf16.mxu1 %v3825_v31 }
 0x131   : > { %2404 = vmatpush1.bf16.msra.mxu0 %v3820_v32  ;;  %2669 = vmatpush1.bf16.msra.mxu1 %v3823_v33  ;;  %v366_v32 = vld [vmem:[%s4665_s4 + $0x40] sm:$0xff]  ;;  %v368_v33 = vld [vmem:[%s4665_s4 + $0x50] sm:$0xff] }
 0x132   : > { %2426 = vmatprep.subr.bf16.mxu0 %v3831_v34  ;;  %2691 = vmatprep.subr.bf16.mxu1 %v3834_v35  ;;  %v367_v34 = vld [vmem:[%s4665_s4 + $0x48] sm:$0xff]  ;;  %v369_v35 = vld [vmem:[%s4665_s4 + $0x58] sm:$0xff] }
 0x134   : > { %2406 = vmatmul.mubr.bf16.vlgmr.msra.gmra.mrb[0].mxu0 %v3826_v36  ;;  %2671 = vmatmul.mubr.bf16.vlgmr.msra.gmra.mrb[0].mxu1 %v3826_v36 }
 0x135   : > { %2427 = vmatpush1.bf16.msra.mxu0 %v3829_v37  ;;  %2692 = vmatpush1.bf16.msra.mxu1 %v3832_v38  ;;  %v370_v38 = vld [vmem:[%s4665_s4 + $0x60] sm:$0xff] }
 0x136   : > { %2428 = vmatprep.subr.bf16.mxu0 %v3837_v39  ;;  %2693 = vmatprep.subr.bf16.mxu1 %v3840_v40  ;;  %v372_v39 = vld [vmem:[%s4665_s4 + $0x70] sm:$0xff] }
 0x137   : > { %2415 = vmatprep.mubr.bf16.mxu0 %v3865_v41  ;;  %2680 = vmatprep.mubr.bf16.mxu1 %v3865_v41 }
 0x139   : > { %2429 = vmatpush1.bf16.msra.mxu0 %v3835_v42  ;;  %2694 = vmatpush1.bf16.msra.mxu1 %v3838_v43 }
 0x13a   : > { %2430 = vmatprep.subr.bf16.mxu0 %v3843_v44  ;;  %2695 = vmatprep.subr.bf16.mxu1 %v3846_v45  ;;  %v371_v44 = vld [vmem:[%s4665_s4 + $0x68] sm:$0xff]  ;;  %v373_v45 = vld [vmem:[%s4665_s4 + $0x78] sm:$0xff] }
 0x13c   : > { %2416 = vmatmul.mubr.bf16.gmra.mrb[4].mxu0 %v3867_v46  ;;  %2681 = vmatmul.mubr.bf16.gmra.mrb[4].mxu1 %v3867_v46 }
 0x13d   : > { %2431 = vmatpush1.bf16.msra.mxu0 %v3841_v47  ;;  %2696 = vmatpush1.bf16.msra.mxu1 %v3844_v48 }
 0x13e   : > { %2432 = vmatprep.subr.bf16.mxu0 %v3849_v49  ;;  %2697 = vmatprep.subr.bf16.mxu1 %v3852_v50 }
 0x13f   : > { %2458 = vmatprep.mubr.bf16.mxu0 %v3923_v55  ;;  %2723 = vmatprep.mubr.bf16.mxu1 %v3923_v55 }
 0x141   : > { %2433 = vmatpush1.bf16.msra.mxu0 %v3847_v51  ;;  %2698 = vmatpush1.bf16.msra.mxu1 %v3850_v52 }
 0x142   : > { %2434 = vmatprep.subr.bf16.mxu0 %v3855_v53  ;;  %2699 = vmatprep.subr.bf16.mxu1 %v3858_v54 }
 0x145   : > { %2435 = vmatpush1.bf16.msra.mxu0 %v3853_v56  ;;  %2700 = vmatpush1.bf16.msra.mxu1 %v3856_v57  ;;  %v2798_v56 = vlaneseq (!%p3309_p11) }
 0x146   : > { %2436 = vmatprep.subr.bf16.mxu0 %v3861_v58  ;;  %2701 = vmatprep.subr.bf16.mxu1 %v3864_v59  ;;  %v2796_v59 = vld [vmem:[%s4663_s2] sm:$0xf] (!%p3309_p11) }
 0x147   : > { %v2799_v57 = vshrl.u32 (!%p3309_p11), %v2798_v56, 7 }
 0x149   : > { %2437 = vmatpush1.bf16.msra.mxu0 %v3859_v60  ;;  %2702 = vmatpush1.bf16.msra.mxu1 %v3862_v61  ;;  %v2800_v60 = vsub.s32 (!%p3309_p11), 0, %v2799_v57 }
 0x14a   : > { %2438 = vmatprep.subr.bf16.mxu0 %v3870_v62  ;;  %2703 = vmatprep.subr.bf16.mxu1 %v3873_v63  ;;  %v2804_v62 = vsub.s32 (!%p3309_p11), 1, %v2799_v57 }
 0x14d   : > { %2439 = vmatpush1.bf16.msra.mxu0 %v3868_v0  ;;  %2704 = vmatpush1.bf16.msra.mxu1 %v3871_v1  ;;  %v2808_v0 = vsub.s32 (!%p3309_p11), 2, %v2799_v57  ;;  %v2812_v1 = vsub.s32 (!%p3309_p11), 3, %v2799_v57 }
 0x14e   : > { %2440 = vmatprep.subr.bf16.mxu0 %v3876_v2  ;;  %2705 = vmatprep.subr.bf16.mxu1 %v3879_v3  ;;  %v2834_v2 = vld [vmem:[%s4664_s3] sm:$0xff] (!%p3309_p11)  ;;  %v2835_v3 = vld [vmem:[%s4664_s3 + $0x8] sm:$0xff] (!%p3309_p11) }
 0x151   : > { %2441 = vmatpush1.bf16.msra.mxu0 %v3874_v4  ;;  %2706 = vmatpush1.bf16.msra.mxu1 %v3877_v5  ;;  %v2836_v4 = vld [vmem:[%s4664_s3 + $0x10] sm:$0xff] (!%p3309_p11) }
 0x154   : > { %2459 = vmatmul.mubr.bf16.vlgmr.msra.gmra.mrb[0].mxu0 %v3880_v6  ;;  %2724 = vmatmul.mubr.bf16.vlgmr.msra.gmra.mrb[0].mxu1 %v3880_v6  ;;  %v2837_v6 = vld [vmem:[%s4664_s3 + $0x18] sm:$0xff] (!%p3309_p11) }
 0x155   : > { %2468 = vmatprep.mubr.bf16.mxu0 %v3923_v55  ;;  %2733 = vmatprep.mubr.bf16.mxu1 %v3923_v55 }
 0x15c   : > { %2469 = vmatmul.mubr.bf16.gmra.mrb[4].mxu0 %v3881_v7  ;;  %2734 = vmatmul.mubr.bf16.gmra.mrb[4].mxu1 %v3881_v7 }
 0x227   : > { %v2460_v12 = vpop.f32.mrb[0].mxu0  ;;  %v2725_v13 = vpop.f32.mrb[0].mxu1 }
 0x228   : > { %v2744_v16 = vadd.f32 %v2460_v12, %v358_v8  ;;  %v2746_v17 = vadd.f32 %v2725_v13, %v360_v9  ;;  %v2462_v18 = vpop.f32.mrb[1].mxu0  ;;  %v2727_v19 = vpop.f32.mrb[1].mxu1  ;;  %v2801_v8 = vrot.slane (!%p3309_p11), %v2796_v59, %v2800_v60  ;;  %v2805_v9 = vrot.slane (!%p3309_p11), %v2796_v59, %v2804_v62 }
 0x229   : > { %v2745_v22 = vadd.f32 %v2462_v18, %v359_v10  ;;  %v2747_v23 = vadd.f32 %v2727_v19, %v361_v11  ;;  %v2464_v24 = vpop.f32.mrb[2].mxu0  ;;  %v2729_v25 = vpop.f32.mrb[2].mxu1  ;;  %v2809_v10 = vrot.slane (!%p3309_p11), %v2796_v59, %v2808_v0  ;;  %v2813_v11 = vrot.slane (!%p3309_p11), %v2796_v59, %v2812_v1 }
 0x22a   : > { %2760 = vst [vmem:[%s4665_s4] sm:$0xff] %v2744_v16  ;;  %2762 = vst [vmem:[%s4665_s4 + $0x10] sm:$0xff] %v2746_v17  ;;  %v2748_v26 = vadd.f32 %v2464_v24, %v362_v14  ;;  %v2750_v27 = vadd.f32 %v2729_v25, %v364_v15  ;;  %v2466_v28 = vpop.f32.mrb[3].mxu0  ;;  %v2731_v29 = vpop.f32.mrb[3].mxu1  ;;  %v2838_v15 = vld [vmem:[%s4664_s3 + $0x20] sm:$0xff] (!%p3309_p11)  ;;  %v2839_v16 = vld [vmem:[%s4664_s3 + $0x28] sm:$0xff] (!%p3309_p11) }
 0x22b   : > { %2761 = vst [vmem:[%s4665_s4 + $0x8] sm:$0xff] %v2745_v22  ;;  %2763 = vst [vmem:[%s4665_s4 + $0x18] sm:$0xff] %v2747_v23  ;;  %v2749_v30 = vadd.f32 %v2466_v28, %v363_v20  ;;  %v2751_v31 = vadd.f32 %v2731_v29, %v365_v21  ;;  %v2840_v17 = vld [vmem:[%s4664_s3 + $0x30] sm:$0xff] (!%p3309_p11)  ;;  %v2841_v22 = vld [vmem:[%s4664_s3 + $0x38] sm:$0xff] (!%p3309_p11) }
 0x22c   : > { %2764 = vst [vmem:[%s4665_s4 + $0x20] sm:$0xff] %v2748_v26  ;;  %2766 = vst [vmem:[%s4665_s4 + $0x30] sm:$0xff] %v2750_v27  ;;  %v2842_v29 = vld [vmem:[%s4664_s3 + $0x40] sm:$0xff] (!%p3309_p11) }
 0x22d   : > { %2765 = vst [vmem:[%s4665_s4 + $0x28] sm:$0xff] %v2749_v30  ;;  %2767 = vst [vmem:[%s4665_s4 + $0x38] sm:$0xff] %v2751_v31  ;;  %v2843_v30 = vld [vmem:[%s4664_s3 + $0x48] sm:$0xff] (!%p3309_p11) }
 0x22f   : > { %v2470_v36 = vpop.f32.mrb[4].mxu0  ;;  %v2735_v37 = vpop.f32.mrb[4].mxu1  ;;  %2779 = sbr.rel (%p3309_p11) target bundleno = 578 (0x242), region = 70 }
 0x230   : > { %v2752_v40 = vadd.f32 %v2470_v36, %v366_v32  ;;  %v2754_v41 = vadd.f32 %v2735_v37, %v368_v33  ;;  %v2472_v42 = vpop.f32.mrb[5].mxu0  ;;  %v2737_v43 = vpop.f32.mrb[5].mxu1 }
 0x231   : > { %v2753_v46 = vadd.f32 %v2472_v42, %v367_v34  ;;  %v2755_v47 = vadd.f32 %v2737_v43, %v369_v35  ;;  %v2474_v48 = vpop.f32.mrb[6].mxu0  ;;  %v2739_v49 = vpop.f32.mrb[6].mxu1  ;;  %v2780_v58 = vld [vmem:[%s4665_s4] sm:$0xff] (!%p3309_p11)  ;;  %v2782_v63 = vld [vmem:[%s4665_s4 + $0x10] sm:$0xff] (!%p3309_p11) }
 0x232   : > { %2768 = vst [vmem:[%s4665_s4 + $0x40] sm:$0xff] %v2752_v40  ;;  %2770 = vst [vmem:[%s4665_s4 + $0x50] sm:$0xff] %v2754_v41  ;;  %v2756_v50 = vadd.f32 %v2474_v48, %v370_v38  ;;  %v2758_v51 = vadd.f32 %v2739_v49, %v372_v39  ;;  %v2476_v52 = vpop.f32.mrb[7].mxu0  ;;  %v2741_v53 = vpop.f32.mrb[7].mxu1  ;;  %v2781_v61 = vld [vmem:[%s4665_s4 + $0x8] sm:$0xff] (!%p3309_p11)  ;;  %v2783_v5 = vld [vmem:[%s4665_s4 + $0x18] sm:$0xff] (!%p3309_p11)  ;;  %v2818_v18 = vadd.f32 (!%p3309_p11), %v2801_v8, %v2780_v58 }
 0x233   : > { %2769 = vst [vmem:[%s4665_s4 + $0x48] sm:$0xff] %v2753_v46  ;;  %2771 = vst [vmem:[%s4665_s4 + $0x58] sm:$0xff] %v2755_v47  ;;  %v2757_v54 = vadd.f32 %v2476_v52, %v371_v44  ;;  %v2759_v55 = vadd.f32 %v2741_v53, %v373_v45  ;;  %v2784_v7 = vld [vmem:[%s4665_s4 + $0x20] sm:$0xff] (!%p3309_p11)  ;;  %v2786_v13 = vld [vmem:[%s4665_s4 + $0x30] sm:$0xff] (!%p3309_p11)  ;;  %v2819_v19 = vadd.f32 (!%p3309_p11), %v2805_v9, %v2781_v61 }
 0x234   : > { %2772 = vst [vmem:[%s4665_s4 + $0x60] sm:$0xff] %v2756_v50  ;;  %2774 = vst [vmem:[%s4665_s4 + $0x70] sm:$0xff] %v2758_v51  ;;  %v2785_v12 = vld [vmem:[%s4665_s4 + $0x28] sm:$0xff] (!%p3309_p11)  ;;  %v2787_v14 = vld [vmem:[%s4665_s4 + $0x38] sm:$0xff] (!%p3309_p11)  ;;  %v2820_v20 = vadd.f32 (!%p3309_p11), %v2809_v10, %v2782_v63  ;;  %v2821_v21 = vadd.f32 (!%p3309_p11), %v2813_v11, %v2783_v5  ;;  %v2822_v25 = vadd.f32 (!%p3309_p11), %v2801_v8, %v2784_v7 }
 0x235   : > { %2773 = vst [vmem:[%s4665_s4 + $0x68] sm:$0xff] %v2757_v54  ;;  %2775 = vst [vmem:[%s4665_s4 + $0x78] sm:$0xff] %v2759_v55  ;;  %v2823_v26 = vadd.f32 (!%p3309_p11), %v2805_v9, %v2785_v12  ;;  %v2824_v27 = vadd.f32 (!%p3309_p11), %v2809_v10, %v2786_v13  ;;  %v2825_v28 = vadd.f32 (!%p3309_p11), %v2813_v11, %v2787_v14  ;;  %v2844_v45 = vld [vmem:[%s4664_s3 + $0x50] sm:$0xff] (!%p3309_p11)  ;;  %v2845_v46 = vld [vmem:[%s4664_s3 + $0x58] sm:$0xff] (!%p3309_p11) }
 0x236   : > { %v2850_v34 = vadd.f32 %v2834_v2, %v2818_v18  ;;  %v2851_v35 = vadd.f32 %v2835_v3, %v2819_v19  ;;  %v2852_v36 = vadd.f32 %v2836_v4, %v2820_v20  ;;  %v2853_v37 = vadd.f32 %v2837_v6, %v2821_v21  ;;  %v2846_v47 = vld [vmem:[%s4664_s3 + $0x60] sm:$0xff]  ;;  %v2847_v52 = vld [vmem:[%s4664_s3 + $0x68] sm:$0xff]  ;;  %v2848_v53 = vld [vmem:[%s4664_s3 + $0x70] sm:$0xff] }
 0x237   : > { %v2854_v41 = vadd.f32 %v2838_v15, %v2822_v25  ;;  %v2855_v42 = vadd.f32 %v2839_v16, %v2823_v26  ;;  %v2856_v43 = vadd.f32 %v2840_v17, %v2824_v27  ;;  %v2857_v44 = vadd.f32 %v2841_v22, %v2825_v28  ;;  %v2849_v54 = vld [vmem:[%s4664_s3 + $0x78] sm:$0xff] }
 0x238   : > { %2866 = vst [vmem:[%s4665_s4] sm:$0xff] %v2850_v34  ;;  %2867 = vst [vmem:[%s4665_s4 + $0x8] sm:$0xff] %v2851_v35 }
 0x239   : > { %v2788_v23 = vld [vmem:[%s4665_s4 + $0x40] sm:$0xff]  ;;  %v2790_v31 = vld [vmem:[%s4665_s4 + $0x50] sm:$0xff]  ;;  %2868 = vst [vmem:[%s4665_s4 + $0x10] sm:$0xff] %v2852_v36  ;;  %2869 = vst [vmem:[%s4665_s4 + $0x18] sm:$0xff] %v2853_v37 }
 0x23a   : > { %v2789_v24 = vld [vmem:[%s4665_s4 + $0x48] sm:$0xff]  ;;  %v2791_v32 = vld [vmem:[%s4665_s4 + $0x58] sm:$0xff]  ;;  %v2826_v48 = vadd.f32 %v2801_v8, %v2788_v23  ;;  %v2828_v50 = vadd.f32 %v2809_v10, %v2790_v31  ;;  %2870 = vst [vmem:[%s4665_s4 + $0x20] sm:$0xff] %v2854_v41  ;;  %2871 = vst [vmem:[%s4665_s4 + $0x28] sm:$0xff] %v2855_v42 }
 0x23b   : > { %v2792_v33 = vld [vmem:[%s4665_s4 + $0x60] sm:$0xff]  ;;  %v2794_v39 = vld [vmem:[%s4665_s4 + $0x70] sm:$0xff]  ;;  %v2827_v49 = vadd.f32 %v2805_v9, %v2789_v24  ;;  %v2829_v51 = vadd.f32 %v2813_v11, %v2791_v32  ;;  %2872 = vst [vmem:[%s4665_s4 + $0x30] sm:$0xff] %v2856_v43  ;;  %2873 = vst [vmem:[%s4665_s4 + $0x38] sm:$0xff] %v2857_v44 }
 0x23c   : > { %v2793_v38 = vld [vmem:[%s4665_s4 + $0x68] sm:$0xff]  ;;  %v2795_v40 = vld [vmem:[%s4665_s4 + $0x78] sm:$0xff]  ;;  %v2830_v55 = vadd.f32 %v2801_v8, %v2792_v33  ;;  %v2832_v57 = vadd.f32 %v2809_v10, %v2794_v39  ;;  %v2858_v59 = vadd.f32 %v2842_v29, %v2826_v48  ;;  %v2860_v61 = vadd.f32 %v2844_v45, %v2828_v50 }
 0x23d   : > { %v2831_v56 = vadd.f32 %v2805_v9, %v2793_v38  ;;  %v2833_v58 = vadd.f32 %v2813_v11, %v2795_v40  ;;  %v2859_v60 = vadd.f32 %v2843_v30, %v2827_v49  ;;  %v2861_v62 = vadd.f32 %v2845_v46, %v2829_v51 }
 0x23e   : > { %v2862_v63 = vadd.f32 %v2846_v47, %v2830_v55  ;;  %v2864_v1 = vadd.f32 %v2848_v53, %v2832_v57  ;;  %2874 = vst [vmem:[%s4665_s4 + $0x40] sm:$0xff] %v2858_v59  ;;  %2876 = vst [vmem:[%s4665_s4 + $0x50] sm:$0xff] %v2860_v61 }
 0x23f   : > { %v2863_v0 = vadd.f32 %v2847_v52, %v2831_v56  ;;  %v2865_v2 = vadd.f32 %v2849_v54, %v2833_v58  ;;  %2875 = vst [vmem:[%s4665_s4 + $0x48] sm:$0xff] %v2859_v60  ;;  %2877 = vst [vmem:[%s4665_s4 + $0x58] sm:$0xff] %v2861_v62 }
 0x240   : > { %2878 = vst [vmem:[%s4665_s4 + $0x60] sm:$0xff] %v2862_v63  ;;  %2880 = vst [vmem:[%s4665_s4 + $0x70] sm:$0xff] %v2864_v1 }
 0x241   : > { %2879 = vst [vmem:[%s4665_s4 + $0x68] sm:$0xff] %v2863_v0  ;;  %2881 = vst [vmem:[%s4665_s4 + $0x78] sm:$0xff] %v2865_v2 }
 0x242 PF: > { %s14_s19 = sadd.s32 1, %s3920_s19   ;;  %s4666_s15 = smov %s3908_s16 }
 0x243   : > { %p11_p12 = scmp.ge.s32.totalorder %s14_s19, 10   ;;  %s4667_s16 = smov %s3984_s23 }
 0x244   : > { %s4668_s17 = smov %s3916_s18  ;;  %s4669_s18 = smov %s4671_s20 }
 0x245   :  { %13 = sbr.rel (!%p11_p12) target bundleno = 3 (0x3), region = 117 }

</bundles_post_ra>
